<compile_context>
chip_gen: v5e
topology: v5e:2x2
jax: 0.10.0
libtpu: 0.0.40
codegen_flags: <defaults>
</compile_context>

<pallas_src>
import math

import jax
import jax.numpy as jnp
from jax import lax
from jax.experimental import pallas as pl
from jax.experimental.pallas import tpu as pltpu

# ----------------------------- configuration -----------------------------
B = 2                    # batch
C_IN = 3                 # image channels
IMG = 32                 # image spatial size
PATCH = 16               # ViT patch size
NUM_PATCH = (IMG // PATCH) ** 2          # 4 patches
S = NUM_PATCH + 1                        # +CLS token -> ViT sequence length (5)
D = 128                  # d_model (768 in the real module)
LATENT = 32              # latent_dim
NHEAD = 8
DH = D // NHEAD          # 16
FFN = 4 * D
VOCAB = 512              # 30522 in the real module
VIT_LAYERS = 2           # 12 in the real module
DEC_LAYERS = 2           # 6 in the real module

M_VALID = B * S          # 10 valid token rows
MP = 16                  # padded row count (multiple of 8 sublanes)
NEG_INF = -1e30          # finite "minus infinity" keeps padded rows NaN-free


# ----------------------------- in-kernel helpers -----------------------------
def _ln(x, g, b, eps=1e-5):
    """LayerNorm over the last axis (f32 math)."""
    mu = jnp.mean(x, axis=-1, keepdims=True)
    xc = x - mu
    var = jnp.mean(xc * xc, axis=-1, keepdims=True)
    return xc * lax.rsqrt(var + eps) * g + b


def _gelu(x):
    # TODO(synk): HF ViT uses exact (erf) GELU; tanh approximation used here.
    return 0.5 * x * (1.0 + jnp.tanh(0.7978845608028654 * (x + 0.044715 * x * x * x)))


# ----------------------------- fused kernels -----------------------------
def _make_attn_block_kernel(*, norm_first, self_attn, num_heads, head_dim, scale):
    d_model = num_heads * head_dim

    def kernel(xq_ref, xkv_ref, mask_ref, wqkv_ref, bqkv_ref, wo_ref, bo_ref,
               g_ref, b_ref, o_ref):
        xq = xq_ref[...]                                  # (Mq, D) f32
        g = g_ref[...]
        beta = b_ref[...]

        hq = _ln(xq, g, beta) if norm_first else xq

        if self_attn:
            # single fused QKV matmul (bf16 operands, f32 accumulation)
            qkv = jnp.dot(hq.astype(jnp.bfloat16), wqkv_ref[...],
                          preferred_element_type=jnp.float32) + bqkv_ref[...]
            q = qkv[:, :d_model]
            k = qkv[:, d_model:2 * d_model]
            v = qkv[:, 2 * d_model:]
        else:
            hk = xkv_ref[...]                             # decoder memory (not normed)
            q = jnp.dot(hq.astype(jnp.bfloat16), wqkv_ref[:, :d_model],
                        preferred_element_type=jnp.float32) + bqkv_ref[:, :d_model]
            kv = jnp.dot(hk.astype(jnp.bfloat16), wqkv_ref[:, d_model:],
                         preferred_element_type=jnp.float32) + bqkv_ref[:, d_model:]
            k = kv[:, :d_model]
            v = kv[:, d_model:]

        mask = mask_ref[...] != 0                         # (Mq, Mk) block-diagonal groups

        heads = []
        for h in range(num_heads):                        # static unroll, all in one call
            sl = slice(h * head_dim, (h + 1) * head_dim)
            qh = q[:, sl].astype(jnp.bfloat16)
            kh = k[:, sl].astype(jnp.bfloat16)
            vh = v[:, sl].astype(jnp.bfloat16)
            # scores: contract the head dim of q and k  -> (Mq, Mk), f32
            s = lax.dot_general(qh, kh, (((1,), (1,)), ((), ())),
                                preferred_element_type=jnp.float32) * scale
            s = jnp.where(mask, s, NEG_INF)
            m = jnp.max(s, axis=-1, keepdims=True)
            p = jnp.exp(s - m)
            l = jnp.sum(p, axis=-1, keepdims=True)
            ctx = jnp.dot(p.astype(jnp.bfloat16), vh,
                          preferred_element_type=jnp.float32)
            heads.append(ctx * pl.reciprocal(l, approx=True))
        attn = jnp.concatenate(heads, axis=-1)            # (Mq, D)

        out = jnp.dot(attn.astype(jnp.bfloat16), wo_ref[...],
                      preferred_element_type=jnp.float32) + bo_ref[...]
        y = xq + out
        if not norm_first:
            y = _ln(y, g, beta)
        o_ref[...] = y

    return kernel


def _make_ffn_block_kernel(*, norm_first, activation):
    def kernel(x_ref, w1_ref, b1_ref, w2_ref, b2_ref, g_ref, b_ref, o_ref):
        x = x_ref[...]
        g = g_ref[...]
        beta = b_ref[...]
        h = _ln(x, g, beta) if norm_first else x
        h = jnp.dot(h.astype(jnp.bfloat16), w1_ref[...],
                    preferred_element_type=jnp.float32) + b1_ref[...]
        if activation == "relu":
            h = jnp.maximum(h, 0.0)
        else:
            h = _gelu(h)
        h = jnp.dot(h.astype(jnp.bfloat16), w2_ref[...],
                    preferred_element_type=jnp.float32) + b2_ref[...]
        y = x + h
        if not norm_first:
            y = _ln(y, g, beta)
        o_ref[...] = y

    return kernel


def _linear_kernel(x_ref, w_ref, b_ref, o_ref):
    o_ref[...] = jnp.dot(x_ref[...].astype(jnp.bfloat16), w_ref[...],
                         preferred_element_type=jnp.float32) + b_ref[...]


def _layernorm_kernel(x_ref, g_ref, b_ref, o_ref):
    o_ref[...] = _ln(x_ref[...], g_ref[...], b_ref[...])


# ----------------------------- pallas_call wrappers -----------------------------
def attn_block(x, kv, mask, p, *, norm_first, self_attn):
    Mq, Dm = x.shape
    Mk = kv.shape[0]
    kernel = _make_attn_block_kernel(
        norm_first=norm_first, self_attn=self_attn,
        num_heads=NHEAD, head_dim=DH, scale=1.0 / math.sqrt(DH))
    return pl.pallas_call(
        kernel,
        out_shape=jax.ShapeDtypeStruct((Mq, Dm), jnp.float32),
        in_specs=[
            pl.BlockSpec((Mq, Dm), lambda: (0, 0)),
            pl.BlockSpec((Mk, Dm), lambda: (0, 0)),
            pl.BlockSpec((Mq, Mk), lambda: (0, 0)),
            pl.BlockSpec((Dm, 3 * Dm), lambda: (0, 0)),
            pl.BlockSpec((1, 3 * Dm), lambda: (0, 0)),
            pl.BlockSpec((Dm, Dm), lambda: (0, 0)),
            pl.BlockSpec((1, Dm), lambda: (0, 0)),
            pl.BlockSpec((1, Dm), lambda: (0, 0)),
            pl.BlockSpec((1, Dm), lambda: (0, 0)),
        ],
        out_specs=pl.BlockSpec((Mq, Dm), lambda: (0, 0)),
    )(x, kv, mask, p["wqkv"], p["bqkv"].reshape(1, -1), p["wo"],
      p["bo"].reshape(1, -1), p["ln_g"].reshape(1, -1), p["ln_b"].reshape(1, -1))


def ffn_block(x, p, *, norm_first, activation):
    Mq, Dm = x.shape
    F = p["w1"].shape[1]
    return pl.pallas_call(
        _make_ffn_block_kernel(norm_first=norm_first, activation=activation),
        out_shape=jax.ShapeDtypeStruct((Mq, Dm), jnp.float32),
        in_specs=[
            pl.BlockSpec((Mq, Dm), lambda: (0, 0)),
            pl.BlockSpec((Dm, F), lambda: (0, 0)),
            pl.BlockSpec((1, F), lambda: (0, 0)),
            pl.BlockSpec((F, Dm), lambda: (0, 0)),
            pl.BlockSpec((1, Dm), lambda: (0, 0)),
            pl.BlockSpec((1, Dm), lambda: (0, 0)),
            pl.BlockSpec((1, Dm), lambda: (0, 0)),
        ],
        out_specs=pl.BlockSpec((Mq, Dm), lambda: (0, 0)),
    )(x, p["w1"], p["b1"].reshape(1, -1), p["w2"], p["b2"].reshape(1, -1),
      p["ln_g"].reshape(1, -1), p["ln_b"].reshape(1, -1))


def linear(x, w, b):
    M, K = x.shape
    N = w.shape[1]
    return pl.pallas_call(
        _linear_kernel,
        out_shape=jax.ShapeDtypeStruct((M, N), jnp.float32),
        in_specs=[pl.BlockSpec((M, K), lambda: (0, 0)),
                  pl.BlockSpec((K, N), lambda: (0, 0)),
                  pl.BlockSpec((1, N), lambda: (0, 0))],
        out_specs=pl.BlockSpec((M, N), lambda: (0, 0)),
    )(x, w, b.reshape(1, N))


def output_projection(x, w, b, *, tn=256):
    """Vocab-tiled linear; N tiles are independent -> 'parallel' (uses 2nd TC on v7x)."""
    M, K = x.shape
    N = w.shape[1]
    return pl.pallas_call(
        _linear_kernel,
        out_shape=jax.ShapeDtypeStruct((M, N), jnp.float32),
        grid=(N // tn,),
        in_specs=[pl.BlockSpec((M, K), lambda j: (0, 0)),
                  pl.BlockSpec((K, tn), lambda j: (0, j)),
                  pl.BlockSpec((1, tn), lambda j: (0, j))],
        out_specs=pl.BlockSpec((M, tn), lambda j: (0, j)),
        compiler_params=pltpu.CompilerParams(dimension_semantics=("parallel",)),
    )(x, w, b.reshape(1, N))


def layernorm(x, g, b):
    M, Dm = x.shape
    return pl.pallas_call(
        _layernorm_kernel,
        out_shape=jax.ShapeDtypeStruct((M, Dm), jnp.float32),
        in_specs=[pl.BlockSpec((M, Dm), lambda: (0, 0)),
                  pl.BlockSpec((1, Dm), lambda: (0, 0)),
                  pl.BlockSpec((1, Dm), lambda: (0, 0))],
        out_specs=pl.BlockSpec((M, Dm), lambda: (0, 0)),
    )(x, g.reshape(1, Dm), b.reshape(1, Dm))


# ----------------------------- forward pass -----------------------------
def _attention_masks():
    """Block-diagonal group masks over the flattened padded row axis (row = b*S + s)."""
    rows = jnp.arange(MP)
    key_valid = rows < M_VALID
    g_vit = rows // S          # ViT: attend within a batch element, over S positions
    g_dec = rows % S           # decoder fed (B,S,E) batch_first=False: S is batch, B is length
    mask_vit = ((g_vit[:, None] == g_vit[None, :]) & key_valid[None, :]).astype(jnp.int32)
    mask_dec = ((g_dec[:, None] == g_dec[None, :]) & key_valid[None, :]).astype(jnp.int32)
    return mask_vit, mask_dec


def generator_forward(z, images, params):
    Bn = images.shape[0]
    mask_vit, mask_dec = _attention_masks()

    # ---- ViT patch embedding (patchify is a pure layout op, done in XLA) ----
    x = images.reshape(Bn, C_IN, IMG // PATCH, PATCH, IMG // PATCH, PATCH)
    x = x.transpose(0, 2, 4, 1, 3, 5).reshape(Bn * NUM_PATCH, C_IN * PATCH * PATCH)
    patches = linear(x, params["vit"]["patch_w"], params["vit"]["patch_b"])   # (B*4, D)
    patches = patches.reshape(Bn, NUM_PATCH, D)
    cls = jnp.broadcast_to(params["vit"]["cls"], (Bn, 1, D))
    h = jnp.concatenate([cls, patches], axis=1) + params["vit"]["pos"]        # (B, S, D)
    h = h.reshape(Bn * S, D)
    h = jnp.pad(h, ((0, MP - Bn * S), (0, 0)))                                # (MP, D)

    # ---- ViT encoder (pre-norm) ----
    for lp in params["vit"]["layers"]:
        h = attn_block(h, h, mask_vit, lp["attn"], norm_first=True, self_attn=True)
        h = ffn_block(h, lp["ffn"], norm_first=True, activation="gelu")
    feats = layernorm(h, params["vit"]["lnf_g"], params["vit"]["lnf_b"])      # last_hidden_state

    # ---- combine latent + features, project to d_model ----
    z_exp = jnp.broadcast_to(z[:, None, :], (Bn, S, LATENT)).reshape(Bn * S, LATENT)
    z_exp = jnp.pad(z_exp, ((0, MP - Bn * S), (0, 0)))
    combined = jnp.concatenate([z_exp, feats], axis=-1)                       # (MP, LATENT+D)
    x = linear(combined, params["fc_w"], params["fc_b"])                      # (MP, D)

    # ---- transformer decoder (post-norm, relu), attention over the B axis per mask_dec ----
    for lp in params["dec"]:
        x = attn_block(x, x, mask_dec, lp["self_attn"], norm_first=False, self_attn=True)
        x = attn_block(x, feats, mask_dec, lp["cross_attn"], norm_first=False, self_attn=False)
        x = ffn_block(x, lp["ffn"], norm_first=False, activation="relu")

    # ---- output projection (vocab-tiled) ----
    logits = output_projection(x, params["out_w"], params["out_b"])           # (MP, VOCAB)
    return logits[:Bn * S].reshape(Bn, S, VOCAB)


# ----------------------------- deterministic parameter init -----------------------------
def _dense(key, fan_in, fan_out):
    w = (jax.random.normal(key, (fan_in, fan_out), jnp.float32) * 0.02).astype(jnp.bfloat16)
    b = jnp.zeros((fan_out,), jnp.float32)
    return w, b


def _attn_params(key):
    ks = jax.random.split(key, 4)
    wq, _ = _dense(ks[0], D, D)
    wk, _ = _dense(ks[1], D, D)
    wv, _ = _dense(ks[2], D, D)
    wo, bo = _dense(ks[3], D, D)
    return {
        "wqkv": jnp.concatenate([wq, wk, wv], axis=1),      # fused (D, 3D)
        "bqkv": jnp.zeros((3 * D,), jnp.float32),
        "wo": wo, "bo": bo,
        "ln_g": jnp.ones((D,), jnp.float32),
        "ln_b": jnp.zeros((D,), jnp.float32),
    }


def _ffn_params(key):
    k1, k2 = jax.random.split(key)
    w1, b1 = _dense(k1, D, FFN)
    w2, b2 = _dense(k2, FFN, D)
    return {"w1": w1, "b1": b1, "w2": w2, "b2": b2,
            "ln_g": jnp.ones((D,), jnp.float32), "ln_b": jnp.zeros((D,), jnp.float32)}


def init_params(key):
    keys = iter(jax.random.split(key, 256))
    nxt = lambda: next(keys)

    # TODO(synk): pretrained google/vit-base-patch16-224 weights cannot be loaded here;
    # a deterministically-initialized, scaled-down ViT encoder is used instead.
    vit = {}
    vit["patch_w"], vit["patch_b"] = _dense(nxt(), C_IN * PATCH * PATCH, D)
    vit["cls"] = jax.random.normal(nxt(), (1, 1, D), jnp.float32) * 0.02
    vit["pos"] = jax.random.normal(nxt(), (1, S, D), jnp.float32) * 0.02
    vit["layers"] = [{"attn": _attn_params(nxt()), "ffn": _ffn_params(nxt())}
                     for _ in range(VIT_LAYERS)]
    vit["lnf_g"] = jnp.ones((D,), jnp.float32)
    vit["lnf_b"] = jnp.zeros((D,), jnp.float32)

    dec = [{"self_attn": _attn_params(nxt()),
            "cross_attn": _attn_params(nxt()),
            "ffn": _ffn_params(nxt())}
           for _ in range(DEC_LAYERS)]

    params = {"vit": vit, "dec": dec}
    params["fc_w"], params["fc_b"] = _dense(nxt(), LATENT + D, D)
    params["out_w"], params["out_b"] = _dense(nxt(), D, VOCAB)
    return params


# ----------------------------- main -----------------------------
if __name__ == "__main__":
    kz, kimg = jax.random.split(jax.random.PRNGKey(0))
    z = jax.random.normal(kz, (B, LATENT), dtype=jnp.float32)
    images = jax.random.normal(kimg, (B, C_IN, IMG, IMG), dtype=jnp.float32)  # NCHW like PyTorch
    params = init_params(jax.random.PRNGKey(42))

    logits = jax.jit(generator_forward)(z, images, params)
    jax.block_until_ready(logits)

    assert logits.shape == (B, S, VOCAB), logits.shape
    assert logits.dtype == jnp.float32
    assert bool(jnp.all(jnp.isfinite(logits)))
    print("KERNEL_OK")
</pallas_src>

<mosaic_0001>
module attributes {stable_mosaic.version = 11 : i64} {
  func.func @_linear_kernel(%arg0: memref<8x768xf32, #tpu.memory_space<vmem>>, %arg1: memref<768x128xbf16, #tpu.memory_space<vmem>>, %arg2: memref<1x128xf32, #tpu.memory_space<vmem>>, %arg3: memref<8x128xf32, #tpu.memory_space<vmem>>) attributes {dimension_semantics = [], scalar_prefetch = 0 : i64, scratch_operands = 0 : i64, tpu.core_type = #tpu.core_type<tc>} {
    %c0 = arith.constant 0 : index
    %c0_0 = arith.constant 0 : index
    %0 = vector.load %arg0[%c0, %c0_0] : memref<8x768xf32, #tpu.memory_space<vmem>>, vector<8x768xf32>
    %1 = arith.truncf %0 : vector<8x768xf32> to vector<8x768xbf16>
    %c0_1 = arith.constant 0 : index
    %c0_2 = arith.constant 0 : index
    %2 = vector.load %arg1[%c0_1, %c0_2] : memref<768x128xbf16, #tpu.memory_space<vmem>>, vector<768x128xbf16>
    %cst = arith.constant dense<0.000000e+00> : vector<8x128xf32>
    %3 = tpu.matmul %1, %2, %cst {dimension_numbers = #tpu.dot_dimension_numbers<[1], [0], [0], [1], [0, 0, 1, 1], [], []>} : vector<8x768xbf16>, vector<768x128xbf16>, vector<8x128xf32> -> vector<8x128xf32>
    %c0_3 = arith.constant 0 : index
    %c0_4 = arith.constant 0 : index
    %4 = vector.load %arg2[%c0_3, %c0_4] : memref<1x128xf32, #tpu.memory_space<vmem>>, vector<1x128xf32>
    %5 = vector.broadcast %4 : vector<1x128xf32> to vector<8x128xf32>
    %6 = arith.addf %3, %5 : vector<8x128xf32>
    %c0_5 = arith.constant 0 : index
    %c0_6 = arith.constant 0 : index
    %7 = vector.load %arg3[%c0_5, %c0_6] : memref<8x128xf32, #tpu.memory_space<vmem>>, vector<8x128xf32>
    tpu.vector_store %arg3[%c0_5, %c0_6], %6 {strides = array<i32>} : memref<8x128xf32, #tpu.memory_space<vmem>>, vector<8x128xf32>,
    return
  }
}

module attributes {stable_mosaic.version = 11 : i64} {
  func.func @kernel(%arg0: memref<16x128xf32, #tpu.memory_space<vmem>>, %arg1: memref<16x128xf32, #tpu.memory_space<vmem>>, %arg2: memref<16x16xi32, #tpu.memory_space<vmem>>, %arg3: memref<128x384xbf16, #tpu.memory_space<vmem>>, %arg4: memref<1x384xf32, #tpu.memory_space<vmem>>, %arg5: memref<128x128xbf16, #tpu.memory_space<vmem>>, %arg6: memref<1x128xf32, #tpu.memory_space<vmem>>, %arg7: memref<1x128xf32, #tpu.memory_space<vmem>>, %arg8: memref<1x128xf32, #tpu.memory_space<vmem>>, %arg9: memref<16x128xf32, #tpu.memory_space<vmem>>) attributes {dimension_semantics = [], scalar_prefetch = 0 : i64, scratch_operands = 0 : i64, tpu.core_type = #tpu.core_type<tc>} {
    %c0 = arith.constant 0 : index
    %c0_0 = arith.constant 0 : index
    %0 = vector.load %arg0[%c0, %c0_0] : memref<16x128xf32, #tpu.memory_space<vmem>>, vector<16x128xf32>
    %c0_1 = arith.constant 0 : index
    %c0_2 = arith.constant 0 : index
    %1 = vector.load %arg7[%c0_1, %c0_2] : memref<1x128xf32, #tpu.memory_space<vmem>>, vector<1x128xf32>
    %c0_3 = arith.constant 0 : index
    %c0_4 = arith.constant 0 : index
    %2 = vector.load %arg8[%c0_3, %c0_4] : memref<1x128xf32, #tpu.memory_space<vmem>>, vector<1x128xf32>
    %cst = arith.constant dense<0.000000e+00> : vector<16xf32>
    %3 = vector.multi_reduction <add>, %0, %cst [1] : vector<16x128xf32> to vector<16xf32>
    %4 = vector.shape_cast %3 : vector<16xf32> to vector<16x1xf32>
    %cst_5 = arith.constant 1.280000e+02 : f32
    %5 = vector.broadcast %cst_5 : f32 to vector<16x1xf32>
    %6 = arith.divf %4, %5 : vector<16x1xf32>
    %7 = vector.broadcast %6 : vector<16x1xf32> to vector<16x128xf32>
    %8 = arith.subf %0, %7 : vector<16x128xf32>
    %9 = arith.mulf %8, %8 : vector<16x128xf32>
    %cst_6 = arith.constant dense<0.000000e+00> : vector<16xf32>
    %10 = vector.multi_reduction <add>, %9, %cst_6 [1] : vector<16x128xf32> to vector<16xf32>
    %11 = vector.shape_cast %10 : vector<16xf32> to vector<16x1xf32>
    %cst_7 = arith.constant 1.280000e+02 : f32
    %12 = vector.broadcast %cst_7 : f32 to vector<16x1xf32>
    %13 = arith.divf %11, %12 : vector<16x1xf32>
    %cst_8 = arith.constant 9.99999974E-6 : f32
    %14 = vector.broadcast %cst_8 : f32 to vector<16x1xf32>
    %15 = arith.addf %13, %14 : vector<16x1xf32>
    %16 = math.rsqrt %15 : vector<16x1xf32>
    %17 = vector.broadcast %16 : vector<16x1xf32> to vector<16x128xf32>
    %18 = arith.mulf %8, %17 : vector<16x128xf32>
    %19 = vector.broadcast %1 : vector<1x128xf32> to vector<16x128xf32>
    %20 = arith.mulf %18, %19 : vector<16x128xf32>
    %21 = vector.broadcast %2 : vector<1x128xf32> to vector<16x128xf32>
    %22 = arith.addf %20, %21 : vector<16x128xf32>
    %23 = arith.truncf %22 : vector<16x128xf32> to vector<16x128xbf16>
    %c0_9 = arith.constant 0 : index
    %c0_10 = arith.constant 0 : index
    %24 = vector.load %arg3[%c0_9, %c0_10] : memref<128x384xbf16, #tpu.memory_space<vmem>>, vector<128x384xbf16>
    %cst_11 = arith.constant dense<0.000000e+00> : vector<16x384xf32>
    %25 = tpu.matmul %23, %24, %cst_11 {dimension_numbers = #tpu.dot_dimension_numbers<[1], [0], [0], [1], [0, 0, 1, 1], [], []>} : vector<16x128xbf16>, vector<128x384xbf16>, vector<16x384xf32> -> vector<16x384xf32>
    %c0_12 = arith.constant 0 : index
    %c0_13 = arith.constant 0 : index
    %26 = vector.load %arg4[%c0_12, %c0_13] : memref<1x384xf32, #tpu.memory_space<vmem>>, vector<1x384xf32>
    %27 = vector.broadcast %26 : vector<1x384xf32> to vector<16x384xf32>
    %28 = arith.addf %25, %27 : vector<16x384xf32>
    %29 = vector.extract_strided_slice %28 {offsets = [0, 0], sizes = [16, 128], strides = [1, 1]} : vector<16x384xf32> to vector<16x128xf32>
    %30 = vector.extract_strided_slice %28 {offsets = [0, 128], sizes = [16, 128], strides = [1, 1]} : vector<16x384xf32> to vector<16x128xf32>
    %31 = vector.extract_strided_slice %28 {offsets = [0, 256], sizes = [16, 128], strides = [1, 1]} : vector<16x384xf32> to vector<16x128xf32>
    %c0_14 = arith.constant 0 : index
    %c0_15 = arith.constant 0 : index
    %32 = vector.load %arg2[%c0_14, %c0_15] : memref<16x16xi32, #tpu.memory_space<vmem>>, vector<16x16xi32>
    %c0_i32 = arith.constant 0 : i32
    %33 = vector.broadcast %c0_i32 : i32 to vector<16x16xi32>
    %34 = arith.cmpi ne, %32, %33 : vector<16x16xi32>
    %35 = vector.extract_strided_slice %29 {offsets = [0, 0], sizes = [16, 16], strides = [1, 1]} : vector<16x128xf32> to vector<16x16xf32>
    %36 = arith.truncf %35 : vector<16x16xf32> to vector<16x16xbf16>
    %37 = vector.extract_strided_slice %30 {offsets = [0, 0], sizes = [16, 16], strides = [1, 1]} : vector<16x128xf32> to vector<16x16xf32>
    %38 = arith.truncf %37 : vector<16x16xf32> to vector<16x16xbf16>
    %39 = vector.extract_strided_slice %31 {offsets = [0, 0], sizes = [16, 16], strides = [1, 1]} : vector<16x128xf32> to vector<16x16xf32>
    %40 = arith.truncf %39 : vector<16x16xf32> to vector<16x16xbf16>
    %cst_16 = arith.constant dense<0.000000e+00> : vector<16x16xf32>
    %41 = tpu.matmul %36, %38, %cst_16 {dimension_numbers = #tpu.dot_dimension_numbers<[1], [1], [0], [0], [0, 0, 1, 0], [], []>} : vector<16x16xbf16>, vector<16x16xbf16>, vector<16x16xf32> -> vector<16x16xf32>
    %cst_17 = arith.constant 2.500000e-01 : f32
    %42 = vector.broadcast %cst_17 : f32 to vector<16x16xf32>
    %43 = arith.mulf %41, %42 : vector<16x16xf32>
    %cst_18 = arith.constant -1.000000e+30 : f32
    %44 = vector.broadcast %cst_18 : f32 to vector<16x16xf32>
    %45 = arith.select %34, %43, %44 : vector<16x16xi1>, vector<16x16xf32>
    %cst_19 = arith.constant dense<0xFF800000> : vector<16xf32>
    %46 = vector.multi_reduction <maximumf>, %45, %cst_19 [1] : vector<16x16xf32> to vector<16xf32>
    %47 = vector.shape_cast %46 : vector<16xf32> to vector<16x1xf32>
    %48 = vector.broadcast %47 : vector<16x1xf32> to vector<16x16xf32>
    %49 = arith.subf %45, %48 : vector<16x16xf32>
    %50 = math.exp %49 : vector<16x16xf32>
    %cst_20 = arith.constant dense<0.000000e+00> : vector<16xf32>
    %51 = vector.multi_reduction <add>, %50, %cst_20 [1] : vector<16x16xf32> to vector<16xf32>
    %52 = vector.shape_cast %51 : vector<16xf32> to vector<16x1xf32>
    %53 = arith.truncf %50 : vector<16x16xf32> to vector<16x16xbf16>
    %cst_21 = arith.constant dense<0.000000e+00> : vector<16x16xf32>
    %54 = tpu.matmul %53, %40, %cst_21 {dimension_numbers = #tpu.dot_dimension_numbers<[1], [0], [0], [1], [0, 0, 1, 1], [], []>} : vector<16x16xbf16>, vector<16x16xbf16>, vector<16x16xf32> -> vector<16x16xf32>
    %55 = tpu.reciprocal %52 {approx = true} : vector<16x1xf32> -> vector<16x1xf32>
    %56 = vector.broadcast %55 : vector<16x1xf32> to vector<16x16xf32>
    %57 = arith.mulf %54, %56 : vector<16x16xf32>
    %58 = vector.extract_strided_slice %29 {offsets = [0, 16], sizes = [16, 16], strides = [1, 1]} : vector<16x128xf32> to vector<16x16xf32>
    %59 = arith.truncf %58 : vector<16x16xf32> to vector<16x16xbf16>
    %60 = vector.extract_strided_slice %30 {offsets = [0, 16], sizes = [16, 16], strides = [1, 1]} : vector<16x128xf32> to vector<16x16xf32>
    %61 = arith.truncf %60 : vector<16x16xf32> to vector<16x16xbf16>
    %62 = vector.extract_strided_slice %31 {offsets = [0, 16], sizes = [16, 16], strides = [1, 1]} : vector<16x128xf32> to vector<16x16xf32>
    %63 = arith.truncf %62 : vector<16x16xf32> to vector<16x16xbf16>
    %cst_22 = arith.constant dense<0.000000e+00> : vector<16x16xf32>
    %64 = tpu.matmul %59, %61, %cst_22 {dimension_numbers = #tpu.dot_dimension_numbers<[1], [1], [0], [0], [0, 0, 1, 0], [], []>} : vector<16x16xbf16>, vector<16x16xbf16>, vector<16x16xf32> -> vector<16x16xf32>
    %cst_23 = arith.constant 2.500000e-01 : f32
    %65 = vector.broadcast %cst_23 : f32 to vector<16x16xf32>
    %66 = arith.mulf %64, %65 : vector<16x16xf32>
    %cst_24 = arith.constant -1.000000e+30 : f32
    %67 = vector.broadcast %cst_24 : f32 to vector<16x16xf32>
    %68 = arith.select %34, %66, %67 : vector<16x16xi1>, vector<16x16xf32>
    %cst_25 = arith.constant dense<0xFF800000> : vector<16xf32>
    %69 = vector.multi_reduction <maximumf>, %68, %cst_25 [1] : vector<16x16xf32> to vector<16xf32>
    %70 = vector.shape_cast %69 : vector<16xf32> to vector<16x1xf32>
    %71 = vector.broadcast %70 : vector<16x1xf32> to vector<16x16xf32>
    %72 = arith.subf %68, %71 : vector<16x16xf32>
    %73 = math.exp %72 : vector<16x16xf32>
    %cst_26 = arith.constant dense<0.000000e+00> : vector<16xf32>
    %74 = vector.multi_reduction <add>, %73, %cst_26 [1] : vector<16x16xf32> to vector<16xf32>
    %75 = vector.shape_cast %74 : vector<16xf32> to vector<16x1xf32>
    %76 = arith.truncf %73 : vector<16x16xf32> to vector<16x16xbf16>
    %cst_27 = arith.constant dense<0.000000e+00> : vector<16x16xf32>
    %77 = tpu.matmul %76, %63, %cst_27 {dimension_numbers = #tpu.dot_dimension_numbers<[1], [0], [0], [1], [0, 0, 1, 1], [], []>} : vector<16x16xbf16>, vector<16x16xbf16>, vector<16x16xf32> -> vector<16x16xf32>
    %78 = tpu.reciprocal %75 {approx = true} : vector<16x1xf32> -> vector<16x1xf32>
    %79 = vector.broadcast %78 : vector<16x1xf32> to vector<16x16xf32>
    %80 = arith.mulf %77, %79 : vector<16x16xf32>
    %81 = vector.extract_strided_slice %29 {offsets = [0, 32], sizes = [16, 16], strides = [1, 1]} : vector<16x128xf32> to vector<16x16xf32>
    %82 = arith.truncf %81 : vector<16x16xf32> to vector<16x16xbf16>
    %83 = vector.extract_strided_slice %30 {offsets = [0, 32], sizes = [16, 16], strides = [1, 1]} : vector<16x128xf32> to vector<16x16xf32>
    %84 = arith.truncf %83 : vector<16x16xf32> to vector<16x16xbf16>
    %85 = vector.extract_strided_slice %31 {offsets = [0, 32], sizes = [16, 16], strides = [1, 1]} : vector<16x128xf32> to vector<16x16xf32>
    %86 = arith.truncf %85 : vector<16x16xf32> to vector<16x16xbf16>
    %cst_28 = arith.constant dense<0.000000e+00> : vector<16x16xf32>
    %87 = tpu.matmul %82, %84, %cst_28 {dimension_numbers = #tpu.dot_dimension_numbers<[1], [1], [0], [0], [0, 0, 1, 0], [], []>} : vector<16x16xbf16>, vector<16x16xbf16>, vector<16x16xf32> -> vector<16x16xf32>
    %cst_29 = arith.constant 2.500000e-01 : f32
    %88 = vector.broadcast %cst_29 : f32 to vector<16x16xf32>
    %89 = arith.mulf %87, %88 : vector<16x16xf32>
    %cst_30 = arith.constant -1.000000e+30 : f32
    %90 = vector.broadcast %cst_30 : f32 to vector<16x16xf32>
    %91 = arith.select %34, %89, %90 : vector<16x16xi1>, vector<16x16xf32>
    %cst_31 = arith.constant dense<0xFF800000> : vector<16xf32>
    %92 = vector.multi_reduction <maximumf>, %91, %cst_31 [1] : vector<16x16xf32> to vector<16xf32>
    %93 = vector.shape_cast %92 : vector<16xf32> to vector<16x1xf32>
    %94 = vector.broadcast %93 : vector<16x1xf32> to vector<16x16xf32>
    %95 = arith.subf %91, %94 : vector<16x16xf32>
    %96 = math.exp %95 : vector<16x16xf32>
    %cst_32 = arith.constant dense<0.000000e+00> : vector<16xf32>
    %97 = vector.multi_reduction <add>, %96, %cst_32 [1] : vector<16x16xf32> to vector<16xf32>
    %98 = vector.shape_cast %97 : vector<16xf32> to vector<16x1xf32>
    %99 = arith.truncf %96 : vector<16x16xf32> to vector<16x16xbf16>
    %cst_33 = arith.constant dense<0.000000e+00> : vector<16x16xf32>
    %100 = tpu.matmul %99, %86, %cst_33 {dimension_numbers = #tpu.dot_dimension_numbers<[1], [0], [0], [1], [0, 0, 1, 1], [], []>} : vector<16x16xbf16>, vector<16x16xbf16>, vector<16x16xf32> -> vector<16x16xf32>
    %101 = tpu.reciprocal %98 {approx = true} : vector<16x1xf32> -> vector<16x1xf32>
    %102 = vector.broadcast %101 : vector<16x1xf32> to vector<16x16xf32>
    %103 = arith.mulf %100, %102 : vector<16x16xf32>
    %104 = vector.extract_strided_slice %29 {offsets = [0, 48], sizes = [16, 16], strides = [1, 1]} : vector<16x128xf32> to vector<16x16xf32>
    %105 = arith.truncf %104 : vector<16x16xf32> to vector<16x16xbf16>
    %106 = vector.extract_strided_slice %30 {offsets = [0, 48], sizes = [16, 16], strides = [1, 1]} : vector<16x128xf32> to vector<16x16xf32>
    %107 = arith.truncf %106 : vector<16x16xf32> to vector<16x16xbf16>
    %108 = vector.extract_strided_slice %31 {offsets = [0, 48], sizes = [16, 16], strides = [1, 1]} : vector<16x128xf32> to vector<16x16xf32>
    %109 = arith.truncf %108 : vector<16x16xf32> to vector<16x16xbf16>
    %cst_34 = arith.constant dense<0.000000e+00> : vector<16x16xf32>
    %110 = tpu.matmul %105, %107, %cst_34 {dimension_numbers = #tpu.dot_dimension_numbers<[1], [1], [0], [0], [0, 0, 1, 0], [], []>} : vector<16x16xbf16>, vector<16x16xbf16>, vector<16x16xf32> -> vector<16x16xf32>
    %cst_35 = arith.constant 2.500000e-01 : f32
    %111 = vector.broadcast %cst_35 : f32 to vector<16x16xf32>
    %112 = arith.mulf %110, %111 : vector<16x16xf32>
    %cst_36 = arith.constant -1.000000e+30 : f32
    %113 = vector.broadcast %cst_36 : f32 to vector<16x16xf32>
    %114 = arith.select %34, %112, %113 : vector<16x16xi1>, vector<16x16xf32>
    %cst_37 = arith.constant dense<0xFF800000> : vector<16xf32>
    %115 = vector.multi_reduction <maximumf>, %114, %cst_37 [1] : vector<16x16xf32> to vector<16xf32>
    %116 = vector.shape_cast %115 : vector<16xf32> to vector<16x1xf32>
    %117 = vector.broadcast %116 : vector<16x1xf32> to vector<16x16xf32>
    %118 = arith.subf %114, %117 : vector<16x16xf32>
    %119 = math.exp %118 : vector<16x16xf32>
    %cst_38 = arith.constant dense<0.000000e+00> : vector<16xf32>
    %120 = vector.multi_reduction <add>, %119, %cst_38 [1] : vector<16x16xf32> to vector<16xf32>
    %121 = vector.shape_cast %120 : vector<16xf32> to vector<16x1xf32>
    %122 = arith.truncf %119 : vector<16x16xf32> to vector<16x16xbf16>
    %cst_39 = arith.constant dense<0.000000e+00> : vector<16x16xf32>
    %123 = tpu.matmul %122, %109, %cst_39 {dimension_numbers = #tpu.dot_dimension_numbers<[1], [0], [0], [1], [0, 0, 1, 1], [], []>} : vector<16x16xbf16>, vector<16x16xbf16>, vector<16x16xf32> -> vector<16x16xf32>
    %124 = tpu.reciprocal %121 {approx = true} : vector<16x1xf32> -> vector<16x1xf32>
    %125 = vector.broadcast %124 : vector<16x1xf32> to vector<16x16xf32>
    %126 = arith.mulf %123, %125 : vector<16x16xf32>
    %127 = vector.extract_strided_slice %29 {offsets = [0, 64], sizes = [16, 16], strides = [1, 1]} : vector<16x128xf32> to vector<16x16xf32>
    %128 = arith.truncf %127 : vector<16x16xf32> to vector<16x16xbf16>
    %129 = vector.extract_strided_slice %30 {offsets = [0, 64], sizes = [16, 16], strides = [1, 1]} : vector<16x128xf32> to vector<16x16xf32>
    %130 = arith.truncf %129 : vector<16x16xf32> to vector<16x16xbf16>
    %131 = vector.extract_strided_slice %31 {offsets = [0, 64], sizes = [16, 16], strides = [1, 1]} : vector<16x128xf32> to vector<16x16xf32>
    %132 = arith.truncf %131 : vector<16x16xf32> to vector<16x16xbf16>
    %cst_40 = arith.constant dense<0.000000e+00> : vector<16x16xf32>
    %133 = tpu.matmul %128, %130, %cst_40 {dimension_numbers = #tpu.dot_dimension_numbers<[1], [1], [0], [0], [0, 0, 1, 0], [], []>} : vector<16x16xbf16>, vector<16x16xbf16>, vector<16x16xf32> -> vector<16x16xf32>
    %cst_41 = arith.constant 2.500000e-01 : f32
    %134 = vector.broadcast %cst_41 : f32 to vector<16x16xf32>
    %135 = arith.mulf %133, %134 : vector<16x16xf32>
    %cst_42 = arith.constant -1.000000e+30 : f32
    %136 = vector.broadcast %cst_42 : f32 to vector<16x16xf32>
    %137 = arith.select %34, %135, %136 : vector<16x16xi1>, vector<16x16xf32>
    %cst_43 = arith.constant dense<0xFF800000> : vector<16xf32>
    %138 = vector.multi_reduction <maximumf>, %137, %cst_43 [1] : vector<16x16xf32> to vector<16xf32>
    %139 = vector.shape_cast %138 : vector<16xf32> to vector<16x1xf32>
    %140 = vector.broadcast %139 : vector<16x1xf32> to vector<16x16xf32>
    %141 = arith.subf %137, %140 : vector<16x16xf32>
    %142 = math.exp %141 : vector<16x16xf32>
    %cst_44 = arith.constant dense<0.000000e+00> : vector<16xf32>
    %143 = vector.multi_reduction <add>, %142, %cst_44 [1] : vector<16x16xf32> to vector<16xf32>
    %144 = vector.shape_cast %143 : vector<16xf32> to vector<16x1xf32>
    %145 = arith.truncf %142 : vector<16x16xf32> to vector<16x16xbf16>
    %cst_45 = arith.constant dense<0.000000e+00> : vector<16x16xf32>
    %146 = tpu.matmul %145, %132, %cst_45 {dimension_numbers = #tpu.dot_dimension_numbers<[1], [0], [0], [1], [0, 0, 1, 1], [], []>} : vector<16x16xbf16>, vector<16x16xbf16>, vector<16x16xf32> -> vector<16x16xf32>
    %147 = tpu.reciprocal %144 {approx = true} : vector<16x1xf32> -> vector<16x1xf32>
    %148 = vector.broadcast %147 : vector<16x1xf32> to vector<16x16xf32>
    %149 = arith.mulf %146, %148 : vector<16x16xf32>
    %150 = vector.extract_strided_slice %29 {offsets = [0, 80], sizes = [16, 16], strides = [1, 1]} : vector<16x128xf32> to vector<16x16xf32>
    %151 = arith.truncf %150 : vector<16x16xf32> to vector<16x16xbf16>
    %152 = vector.extract_strided_slice %30 {offsets = [0, 80], sizes = [16, 16], strides = [1, 1]} : vector<16x128xf32> to vector<16x16xf32>
    %153 = arith.truncf %152 : vector<16x16xf32> to vector<16x16xbf16>
    %154 = vector.extract_strided_slice %31 {offsets = [0, 80], sizes = [16, 16], strides = [1, 1]} : vector<16x128xf32> to vector<16x16xf32>
    %155 = arith.truncf %154 : vector<16x16xf32> to vector<16x16xbf16>
    %cst_46 = arith.constant dense<0.000000e+00> : vector<16x16xf32>
    %156 = tpu.matmul %151, %153, %cst_46 {dimension_numbers = #tpu.dot_dimension_numbers<[1], [1], [0], [0], [0, 0, 1, 0], [], []>} : vector<16x16xbf16>, vector<16x16xbf16>, vector<16x16xf32> -> vector<16x16xf32>
    %cst_47 = arith.constant 2.500000e-01 : f32
    %157 = vector.broadcast %cst_47 : f32 to vector<16x16xf32>
    %158 = arith.mulf %156, %157 : vector<16x16xf32>
    %cst_48 = arith.constant -1.000000e+30 : f32
    %159 = vector.broadcast %cst_48 : f32 to vector<16x16xf32>
    %160 = arith.select %34, %158, %159 : vector<16x16xi1>, vector<16x16xf32>
    %cst_49 = arith.constant dense<0xFF800000> : vector<16xf32>
    %161 = vector.multi_reduction <maximumf>, %160, %cst_49 [1] : vector<16x16xf32> to vector<16xf32>
    %162 = vector.shape_cast %161 : vector<16xf32> to vector<16x1xf32>
    %163 = vector.broadcast %162 : vector<16x1xf32> to vector<16x16xf32>
    %164 = arith.subf %160, %163 : vector<16x16xf32>
    %165 = math.exp %164 : vector<16x16xf32>
    %cst_50 = arith.constant dense<0.000000e+00> : vector<16xf32>
    %166 = vector.multi_reduction <add>, %165, %cst_50 [1] : vector<16x16xf32> to vector<16xf32>
    %167 = vector.shape_cast %166 : vector<16xf32> to vector<16x1xf32>
    %168 = arith.truncf %165 : vector<16x16xf32> to vector<16x16xbf16>
    %cst_51 = arith.constant dense<0.000000e+00> : vector<16x16xf32>
    %169 = tpu.matmul %168, %155, %cst_51 {dimension_numbers = #tpu.dot_dimension_numbers<[1], [0], [0], [1], [0, 0, 1, 1], [], []>} : vector<16x16xbf16>, vector<16x16xbf16>, vector<16x16xf32> -> vector<16x16xf32>
    %170 = tpu.reciprocal %167 {approx = true} : vector<16x1xf32> -> vector<16x1xf32>
    %171 = vector.broadcast %170 : vector<16x1xf32> to vector<16x16xf32>
    %172 = arith.mulf %169, %171 : vector<16x16xf32>
    %173 = vector.extract_strided_slice %29 {offsets = [0, 96], sizes = [16, 16], strides = [1, 1]} : vector<16x128xf32> to vector<16x16xf32>
    %174 = arith.truncf %173 : vector<16x16xf32> to vector<16x16xbf16>
    %175 = vector.extract_strided_slice %30 {offsets = [0, 96], sizes = [16, 16], strides = [1, 1]} : vector<16x128xf32> to vector<16x16xf32>
    %176 = arith.truncf %175 : vector<16x16xf32> to vector<16x16xbf16>
    %177 = vector.extract_strided_slice %31 {offsets = [0, 96], sizes = [16, 16], strides = [1, 1]} : vector<16x128xf32> to vector<16x16xf32>
    %178 = arith.truncf %177 : vector<16x16xf32> to vector<16x16xbf16>
    %cst_52 = arith.constant dense<0.000000e+00> : vector<16x16xf32>
    %179 = tpu.matmul %174, %176, %cst_52 {dimension_numbers = #tpu.dot_dimension_numbers<[1], [1], [0], [0], [0, 0, 1, 0], [], []>} : vector<16x16xbf16>, vector<16x16xbf16>, vector<16x16xf32> -> vector<16x16xf32>
    %cst_53 = arith.constant 2.500000e-01 : f32
    %180 = vector.broadcast %cst_53 : f32 to vector<16x16xf32>
    %181 = arith.mulf %179, %180 : vector<16x16xf32>
    %cst_54 = arith.constant -1.000000e+30 : f32
    %182 = vector.broadcast %cst_54 : f32 to vector<16x16xf32>
    %183 = arith.select %34, %181, %182 : vector<16x16xi1>, vector<16x16xf32>
    %cst_55 = arith.constant dense<0xFF800000> : vector<16xf32>
    %184 = vector.multi_reduction <maximumf>, %183, %cst_55 [1] : vector<16x16xf32> to vector<16xf32>
    %185 = vector.shape_cast %184 : vector<16xf32> to vector<16x1xf32>
    %186 = vector.broadcast %185 : vector<16x1xf32> to vector<16x16xf32>
    %187 = arith.subf %183, %186 : vector<16x16xf32>
    %188 = math.exp %187 : vector<16x16xf32>
    %cst_56 = arith.constant dense<0.000000e+00> : vector<16xf32>
    %189 = vector.multi_reduction <add>, %188, %cst_56 [1] : vector<16x16xf32> to vector<16xf32>
    %190 = vector.shape_cast %189 : vector<16xf32> to vector<16x1xf32>
    %191 = arith.truncf %188 : vector<16x16xf32> to vector<16x16xbf16>
    %cst_57 = arith.constant dense<0.000000e+00> : vector<16x16xf32>
    %192 = tpu.matmul %191, %178, %cst_57 {dimension_numbers = #tpu.dot_dimension_numbers<[1], [0], [0], [1], [0, 0, 1, 1], [], []>} : vector<16x16xbf16>, vector<16x16xbf16>, vector<16x16xf32> -> vector<16x16xf32>
    %193 = tpu.reciprocal %190 {approx = true} : vector<16x1xf32> -> vector<16x1xf32>
    %194 = vector.broadcast %193 : vector<16x1xf32> to vector<16x16xf32>
    %195 = arith.mulf %192, %194 : vector<16x16xf32>
    %196 = vector.extract_strided_slice %29 {offsets = [0, 112], sizes = [16, 16], strides = [1, 1]} : vector<16x128xf32> to vector<16x16xf32>
    %197 = arith.truncf %196 : vector<16x16xf32> to vector<16x16xbf16>
    %198 = vector.extract_strided_slice %30 {offsets = [0, 112], sizes = [16, 16], strides = [1, 1]} : vector<16x128xf32> to vector<16x16xf32>
    %199 = arith.truncf %198 : vector<16x16xf32> to vector<16x16xbf16>
    %200 = vector.extract_strided_slice %31 {offsets = [0, 112], sizes = [16, 16], strides = [1, 1]} : vector<16x128xf32> to vector<16x16xf32>
    %201 = arith.truncf %200 : vector<16x16xf32> to vector<16x16xbf16>
    %cst_58 = arith.constant dense<0.000000e+00> : vector<16x16xf32>
    %202 = tpu.matmul %197, %199, %cst_58 {dimension_numbers = #tpu.dot_dimension_numbers<[1], [1], [0], [0], [0, 0, 1, 0], [], []>} : vector<16x16xbf16>, vector<16x16xbf16>, vector<16x16xf32> -> vector<16x16xf32>
    %cst_59 = arith.constant 2.500000e-01 : f32
    %203 = vector.broadcast %cst_59 : f32 to vector<16x16xf32>
    %204 = arith.mulf %202, %203 : vector<16x16xf32>
    %cst_60 = arith.constant -1.000000e+30 : f32
    %205 = vector.broadcast %cst_60 : f32 to vector<16x16xf32>
    %206 = arith.select %34, %204, %205 : vector<16x16xi1>, vector<16x16xf32>
    %cst_61 = arith.constant dense<0xFF800000> : vector<16xf32>
    %207 = vector.multi_reduction <maximumf>, %206, %cst_61 [1] : vector<16x16xf32> to vector<16xf32>
    %208 = vector.shape_cast %207 : vector<16xf32> to vector<16x1xf32>
    %209 = vector.broadcast %208 : vector<16x1xf32> to vector<16x16xf32>
    %210 = arith.subf %206, %209 : vector<16x16xf32>
    %211 = math.exp %210 : vector<16x16xf32>
    %cst_62 = arith.constant dense<0.000000e+00> : vector<16xf32>
    %212 = vector.multi_reduction <add>, %211, %cst_62 [1] : vector<16x16xf32> to vector<16xf32>
    %213 = vector.shape_cast %212 : vector<16xf32> to vector<16x1xf32>
    %214 = arith.truncf %211 : vector<16x16xf32> to vector<16x16xbf16>
    %cst_63 = arith.constant dense<0.000000e+00> : vector<16x16xf32>
    %215 = tpu.matmul %214, %201, %cst_63 {dimension_numbers = #tpu.dot_dimension_numbers<[1], [0], [0], [1], [0, 0, 1, 1], [], []>} : vector<16x16xbf16>, vector<16x16xbf16>, vector<16x16xf32> -> vector<16x16xf32>
    %216 = tpu.reciprocal %213 {approx = true} : vector<16x1xf32> -> vector<16x1xf32>
    %217 = vector.broadcast %216 : vector<16x1xf32> to vector<16x16xf32>
    %218 = arith.mulf %215, %217 : vector<16x16xf32>
    %219 = tpu.concatenate %57, %80, %103, %126, %149, %172, %195, %218 in 1 : vector<16x16xf32>, vector<16x16xf32>, vector<16x16xf32>, vector<16x16xf32>, vector<16x16xf32>, vector<16x16xf32>, vector<16x16xf32>, vector<16x16xf32> -> vector<16x128xf32>
    %220 = arith.truncf %219 : vector<16x128xf32> to vector<16x128xbf16>
    %c0_64 = arith.constant 0 : index
    %c0_65 = arith.constant 0 : index
    %221 = vector.load %arg5[%c0_64, %c0_65] : memref<128x128xbf16, #tpu.memory_space<vmem>>, vector<128x128xbf16>
    %cst_66 = arith.constant dense<0.000000e+00> : vector<16x128xf32>
    %222 = tpu.matmul %220, %221, %cst_66 {dimension_numbers = #tpu.dot_dimension_numbers<[1], [0], [0], [1], [0, 0, 1, 1], [], []>} : vector<16x128xbf16>, vector<128x128xbf16>, vector<16x128xf32> -> vector<16x128xf32>
    %c0_67 = arith.constant 0 : index
    %c0_68 = arith.constant 0 : index
    %223 = vector.load %arg6[%c0_67, %c0_68] : memref<1x128xf32, #tpu.memory_space<vmem>>, vector<1x128xf32>
    %224 = vector.broadcast %223 : vector<1x128xf32> to vector<16x128xf32>
    %225 = arith.addf %222, %224 : vector<16x128xf32>
    %226 = arith.addf %0, %225 : vector<16x128xf32>
    %c0_69 = arith.constant 0 : index
    %c0_70 = arith.constant 0 : index
    %227 = vector.load %arg9[%c0_69, %c0_70] : memref<16x128xf32, #tpu.memory_space<vmem>>, vector<16x128xf32>
    tpu.vector_store %arg9[%c0_69, %c0_70], %226 {strides = array<i32>} : memref<16x128xf32, #tpu.memory_space<vmem>>, vector<16x128xf32>,
    return
  }
}

module attributes {stable_mosaic.version = 11 : i64} {
  func.func @kernel(%arg0: memref<16x128xf32, #tpu.memory_space<vmem>>, %arg1: memref<128x512xbf16, #tpu.memory_space<vmem>>, %arg2: memref<1x512xf32, #tpu.memory_space<vmem>>, %arg3: memref<512x128xbf16, #tpu.memory_space<vmem>>, %arg4: memref<1x128xf32, #tpu.memory_space<vmem>>, %arg5: memref<1x128xf32, #tpu.memory_space<vmem>>, %arg6: memref<1x128xf32, #tpu.memory_space<vmem>>, %arg7: memref<16x128xf32, #tpu.memory_space<vmem>>) attributes {dimension_semantics = [], scalar_prefetch = 0 : i64, scratch_operands = 0 : i64, tpu.core_type = #tpu.core_type<tc>} {
    %c0 = arith.constant 0 : index
    %c0_0 = arith.constant 0 : index
    %0 = vector.load %arg0[%c0, %c0_0] : memref<16x128xf32, #tpu.memory_space<vmem>>, vector<16x128xf32>
    %c0_1 = arith.constant 0 : index
    %c0_2 = arith.constant 0 : index
    %1 = vector.load %arg5[%c0_1, %c0_2] : memref<1x128xf32, #tpu.memory_space<vmem>>, vector<1x128xf32>
    %c0_3 = arith.constant 0 : index
    %c0_4 = arith.constant 0 : index
    %2 = vector.load %arg6[%c0_3, %c0_4] : memref<1x128xf32, #tpu.memory_space<vmem>>, vector<1x128xf32>
    %cst = arith.constant dense<0.000000e+00> : vector<16xf32>
    %3 = vector.multi_reduction <add>, %0, %cst [1] : vector<16x128xf32> to vector<16xf32>
    %4 = vector.shape_cast %3 : vector<16xf32> to vector<16x1xf32>
    %cst_5 = arith.constant 1.280000e+02 : f32
    %5 = vector.broadcast %cst_5 : f32 to vector<16x1xf32>
    %6 = arith.divf %4, %5 : vector<16x1xf32>
    %7 = vector.broadcast %6 : vector<16x1xf32> to vector<16x128xf32>
    %8 = arith.subf %0, %7 : vector<16x128xf32>
    %9 = arith.mulf %8, %8 : vector<16x128xf32>
    %cst_6 = arith.constant dense<0.000000e+00> : vector<16xf32>
    %10 = vector.multi_reduction <add>, %9, %cst_6 [1] : vector<16x128xf32> to vector<16xf32>
    %11 = vector.shape_cast %10 : vector<16xf32> to vector<16x1xf32>
    %cst_7 = arith.constant 1.280000e+02 : f32
    %12 = vector.broadcast %cst_7 : f32 to vector<16x1xf32>
    %13 = arith.divf %11, %12 : vector<16x1xf32>
    %cst_8 = arith.constant 9.99999974E-6 : f32
    %14 = vector.broadcast %cst_8 : f32 to vector<16x1xf32>
    %15 = arith.addf %13, %14 : vector<16x1xf32>
    %16 = math.rsqrt %15 : vector<16x1xf32>
    %17 = vector.broadcast %16 : vector<16x1xf32> to vector<16x128xf32>
    %18 = arith.mulf %8, %17 : vector<16x128xf32>
    %19 = vector.broadcast %1 : vector<1x128xf32> to vector<16x128xf32>
    %20 = arith.mulf %18, %19 : vector<16x128xf32>
    %21 = vector.broadcast %2 : vector<1x128xf32> to vector<16x128xf32>
    %22 = arith.addf %20, %21 : vector<16x128xf32>
    %23 = arith.truncf %22 : vector<16x128xf32> to vector<16x128xbf16>
    %c0_9 = arith.constant 0 : index
    %c0_10 = arith.constant 0 : index
    %24 = vector.load %arg1[%c0_9, %c0_10] : memref<128x512xbf16, #tpu.memory_space<vmem>>, vector<128x512xbf16>
    %cst_11 = arith.constant dense<0.000000e+00> : vector<16x512xf32>
    %25 = tpu.matmul %23, %24, %cst_11 {dimension_numbers = #tpu.dot_dimension_numbers<[1], [0], [0], [1], [0, 0, 1, 1], [], []>} : vector<16x128xbf16>, vector<128x512xbf16>, vector<16x512xf32> -> vector<16x512xf32>
    %c0_12 = arith.constant 0 : index
    %c0_13 = arith.constant 0 : index
    %26 = vector.load %arg2[%c0_12, %c0_13] : memref<1x512xf32, #tpu.memory_space<vmem>>, vector<1x512xf32>
    %27 = vector.broadcast %26 : vector<1x512xf32> to vector<16x512xf32>
    %28 = arith.addf %25, %27 : vector<16x512xf32>
    %cst_14 = arith.constant 5.000000e-01 : f32
    %29 = vector.broadcast %cst_14 : f32 to vector<16x512xf32>
    %30 = arith.mulf %29, %28 : vector<16x512xf32>
    %cst_15 = arith.constant 4.471500e-02 : f32
    %31 = vector.broadcast %cst_15 : f32 to vector<16x512xf32>
    %32 = arith.mulf %31, %28 : vector<16x512xf32>
    %33 = arith.mulf %32, %28 : vector<16x512xf32>
    %34 = arith.mulf %33, %28 : vector<16x512xf32>
    %35 = arith.addf %28, %34 : vector<16x512xf32>
    %cst_16 = arith.constant 0.797884583 : f32
    %36 = vector.broadcast %cst_16 : f32 to vector<16x512xf32>
    %37 = arith.mulf %36, %35 : vector<16x512xf32>
    %38 = math.tanh %37 : vector<16x512xf32>
    %cst_17 = arith.constant 1.000000e+00 : f32
    %39 = vector.broadcast %cst_17 : f32 to vector<16x512xf32>
    %40 = arith.addf %39, %38 : vector<16x512xf32>
    %41 = arith.mulf %30, %40 : vector<16x512xf32>
    %42 = arith.truncf %41 : vector<16x512xf32> to vector<16x512xbf16>
    %c0_18 = arith.constant 0 : index
    %c0_19 = arith.constant 0 : index
    %43 = vector.load %arg3[%c0_18, %c0_19] : memref<512x128xbf16, #tpu.memory_space<vmem>>, vector<512x128xbf16>
    %cst_20 = arith.constant dense<0.000000e+00> : vector<16x128xf32>
    %44 = tpu.matmul %42, %43, %cst_20 {dimension_numbers = #tpu.dot_dimension_numbers<[1], [0], [0], [1], [0, 0, 1, 1], [], []>} : vector<16x512xbf16>, vector<512x128xbf16>, vector<16x128xf32> -> vector<16x128xf32>
    %c0_21 = arith.constant 0 : index
    %c0_22 = arith.constant 0 : index
    %45 = vector.load %arg4[%c0_21, %c0_22] : memref<1x128xf32, #tpu.memory_space<vmem>>, vector<1x128xf32>
    %46 = vector.broadcast %45 : vector<1x128xf32> to vector<16x128xf32>
    %47 = arith.addf %44, %46 : vector<16x128xf32>
    %48 = arith.addf %0, %47 : vector<16x128xf32>
    %c0_23 = arith.constant 0 : index
    %c0_24 = arith.constant 0 : index
    %49 = vector.load %arg7[%c0_23, %c0_24] : memref<16x128xf32, #tpu.memory_space<vmem>>, vector<16x128xf32>
    tpu.vector_store %arg7[%c0_23, %c0_24], %48 {strides = array<i32>} : memref<16x128xf32, #tpu.memory_space<vmem>>, vector<16x128xf32>,
    return
  }
}

module attributes {stable_mosaic.version = 11 : i64} {
  func.func @_layernorm_kernel(%arg0: memref<16x128xf32, #tpu.memory_space<vmem>>, %arg1: memref<1x128xf32, #tpu.memory_space<vmem>>, %arg2: memref<1x128xf32, #tpu.memory_space<vmem>>, %arg3: memref<16x128xf32, #tpu.memory_space<vmem>>) attributes {dimension_semantics = [], scalar_prefetch = 0 : i64, scratch_operands = 0 : i64, tpu.core_type = #tpu.core_type<tc>} {
    %c0 = arith.constant 0 : index
    %c0_0 = arith.constant 0 : index
    %0 = vector.load %arg0[%c0, %c0_0] : memref<16x128xf32, #tpu.memory_space<vmem>>, vector<16x128xf32>
    %c0_1 = arith.constant 0 : index
    %c0_2 = arith.constant 0 : index
    %1 = vector.load %arg1[%c0_1, %c0_2] : memref<1x128xf32, #tpu.memory_space<vmem>>, vector<1x128xf32>
    %c0_3 = arith.constant 0 : index
    %c0_4 = arith.constant 0 : index
    %2 = vector.load %arg2[%c0_3, %c0_4] : memref<1x128xf32, #tpu.memory_space<vmem>>, vector<1x128xf32>
    %cst = arith.constant dense<0.000000e+00> : vector<16xf32>
    %3 = vector.multi_reduction <add>, %0, %cst [1] : vector<16x128xf32> to vector<16xf32>
    %4 = vector.shape_cast %3 : vector<16xf32> to vector<16x1xf32>
    %cst_5 = arith.constant 1.280000e+02 : f32
    %5 = vector.broadcast %cst_5 : f32 to vector<16x1xf32>
    %6 = arith.divf %4, %5 : vector<16x1xf32>
    %7 = vector.broadcast %6 : vector<16x1xf32> to vector<16x128xf32>
    %8 = arith.subf %0, %7 : vector<16x128xf32>
    %9 = arith.mulf %8, %8 : vector<16x128xf32>
    %cst_6 = arith.constant dense<0.000000e+00> : vector<16xf32>
    %10 = vector.multi_reduction <add>, %9, %cst_6 [1] : vector<16x128xf32> to vector<16xf32>
    %11 = vector.shape_cast %10 : vector<16xf32> to vector<16x1xf32>
    %cst_7 = arith.constant 1.280000e+02 : f32
    %12 = vector.broadcast %cst_7 : f32 to vector<16x1xf32>
    %13 = arith.divf %11, %12 : vector<16x1xf32>
    %cst_8 = arith.constant 9.99999974E-6 : f32
    %14 = vector.broadcast %cst_8 : f32 to vector<16x1xf32>
    %15 = arith.addf %13, %14 : vector<16x1xf32>
    %16 = math.rsqrt %15 : vector<16x1xf32>
    %17 = vector.broadcast %16 : vector<16x1xf32> to vector<16x128xf32>
    %18 = arith.mulf %8, %17 : vector<16x128xf32>
    %19 = vector.broadcast %1 : vector<1x128xf32> to vector<16x128xf32>
    %20 = arith.mulf %18, %19 : vector<16x128xf32>
    %21 = vector.broadcast %2 : vector<1x128xf32> to vector<16x128xf32>
    %22 = arith.addf %20, %21 : vector<16x128xf32>
    %c0_9 = arith.constant 0 : index
    %c0_10 = arith.constant 0 : index
    %23 = vector.load %arg3[%c0_9, %c0_10] : memref<16x128xf32, #tpu.memory_space<vmem>>, vector<16x128xf32>
    tpu.vector_store %arg3[%c0_9, %c0_10], %22 {strides = array<i32>} : memref<16x128xf32, #tpu.memory_space<vmem>>, vector<16x128xf32>,
    return
  }
}

module attributes {stable_mosaic.version = 11 : i64} {
  func.func @_linear_kernel(%arg0: memref<16x160xf32, #tpu.memory_space<vmem>>, %arg1: memref<160x128xbf16, #tpu.memory_space<vmem>>, %arg2: memref<1x128xf32, #tpu.memory_space<vmem>>, %arg3: memref<16x128xf32, #tpu.memory_space<vmem>>) attributes {dimension_semantics = [], scalar_prefetch = 0 : i64, scratch_operands = 0 : i64, tpu.core_type = #tpu.core_type<tc>} {
    %c0 = arith.constant 0 : index
    %c0_0 = arith.constant 0 : index
    %0 = vector.load %arg0[%c0, %c0_0] : memref<16x160xf32, #tpu.memory_space<vmem>>, vector<16x160xf32>
    %1 = arith.truncf %0 : vector<16x160xf32> to vector<16x160xbf16>
    %c0_1 = arith.constant 0 : index
    %c0_2 = arith.constant 0 : index
    %2 = vector.load %arg1[%c0_1, %c0_2] : memref<160x128xbf16, #tpu.memory_space<vmem>>, vector<160x128xbf16>
    %cst = arith.constant dense<0.000000e+00> : vector<16x128xf32>
    %3 = tpu.matmul %1, %2, %cst {dimension_numbers = #tpu.dot_dimension_numbers<[1], [0], [0], [1], [0, 0, 1, 1], [], []>} : vector<16x160xbf16>, vector<160x128xbf16>, vector<16x128xf32> -> vector<16x128xf32>
    %c0_3 = arith.constant 0 : index
    %c0_4 = arith.constant 0 : index
    %4 = vector.load %arg2[%c0_3, %c0_4] : memref<1x128xf32, #tpu.memory_space<vmem>>, vector<1x128xf32>
    %5 = vector.broadcast %4 : vector<1x128xf32> to vector<16x128xf32>
    %6 = arith.addf %3, %5 : vector<16x128xf32>
    %c0_5 = arith.constant 0 : index
    %c0_6 = arith.constant 0 : index
    %7 = vector.load %arg3[%c0_5, %c0_6] : memref<16x128xf32, #tpu.memory_space<vmem>>, vector<16x128xf32>
    tpu.vector_store %arg3[%c0_5, %c0_6], %6 {strides = array<i32>} : memref<16x128xf32, #tpu.memory_space<vmem>>, vector<16x128xf32>,
    return
  }
}

module attributes {stable_mosaic.version = 11 : i64} {
  func.func @kernel(%arg0: memref<16x128xf32, #tpu.memory_space<vmem>>, %arg1: memref<16x128xf32, #tpu.memory_space<vmem>>, %arg2: memref<16x16xi32, #tpu.memory_space<vmem>>, %arg3: memref<128x384xbf16, #tpu.memory_space<vmem>>, %arg4: memref<1x384xf32, #tpu.memory_space<vmem>>, %arg5: memref<128x128xbf16, #tpu.memory_space<vmem>>, %arg6: memref<1x128xf32, #tpu.memory_space<vmem>>, %arg7: memref<1x128xf32, #tpu.memory_space<vmem>>, %arg8: memref<1x128xf32, #tpu.memory_space<vmem>>, %arg9: memref<16x128xf32, #tpu.memory_space<vmem>>) attributes {dimension_semantics = [], scalar_prefetch = 0 : i64, scratch_operands = 0 : i64, tpu.core_type = #tpu.core_type<tc>} {
    %c0 = arith.constant 0 : index
    %c0_0 = arith.constant 0 : index
    %0 = vector.load %arg0[%c0, %c0_0] : memref<16x128xf32, #tpu.memory_space<vmem>>, vector<16x128xf32>
    %c0_1 = arith.constant 0 : index
    %c0_2 = arith.constant 0 : index
    %1 = vector.load %arg7[%c0_1, %c0_2] : memref<1x128xf32, #tpu.memory_space<vmem>>, vector<1x128xf32>
    %c0_3 = arith.constant 0 : index
    %c0_4 = arith.constant 0 : index
    %2 = vector.load %arg8[%c0_3, %c0_4] : memref<1x128xf32, #tpu.memory_space<vmem>>, vector<1x128xf32>
    %3 = arith.truncf %0 : vector<16x128xf32> to vector<16x128xbf16>
    %c0_5 = arith.constant 0 : index
    %c0_6 = arith.constant 0 : index
    %4 = vector.load %arg3[%c0_5, %c0_6] : memref<128x384xbf16, #tpu.memory_space<vmem>>, vector<128x384xbf16>
    %cst = arith.constant dense<0.000000e+00> : vector<16x384xf32>
    %5 = tpu.matmul %3, %4, %cst {dimension_numbers = #tpu.dot_dimension_numbers<[1], [0], [0], [1], [0, 0, 1, 1], [], []>} : vector<16x128xbf16>, vector<128x384xbf16>, vector<16x384xf32> -> vector<16x384xf32>
    %c0_7 = arith.constant 0 : index
    %c0_8 = arith.constant 0 : index
    %6 = vector.load %arg4[%c0_7, %c0_8] : memref<1x384xf32, #tpu.memory_space<vmem>>, vector<1x384xf32>
    %7 = vector.broadcast %6 : vector<1x384xf32> to vector<16x384xf32>
    %8 = arith.addf %5, %7 : vector<16x384xf32>
    %9 = vector.extract_strided_slice %8 {offsets = [0, 0], sizes = [16, 128], strides = [1, 1]} : vector<16x384xf32> to vector<16x128xf32>
    %10 = vector.extract_strided_slice %8 {offsets = [0, 128], sizes = [16, 128], strides = [1, 1]} : vector<16x384xf32> to vector<16x128xf32>
    %11 = vector.extract_strided_slice %8 {offsets = [0, 256], sizes = [16, 128], strides = [1, 1]} : vector<16x384xf32> to vector<16x128xf32>
    %c0_9 = arith.constant 0 : index
    %c0_10 = arith.constant 0 : index
    %12 = vector.load %arg2[%c0_9, %c0_10] : memref<16x16xi32, #tpu.memory_space<vmem>>, vector<16x16xi32>
    %c0_i32 = arith.constant 0 : i32
    %13 = vector.broadcast %c0_i32 : i32 to vector<16x16xi32>
    %14 = arith.cmpi ne, %12, %13 : vector<16x16xi32>
    %15 = vector.extract_strided_slice %9 {offsets = [0, 0], sizes = [16, 16], strides = [1, 1]} : vector<16x128xf32> to vector<16x16xf32>
    %16 = arith.truncf %15 : vector<16x16xf32> to vector<16x16xbf16>
    %17 = vector.extract_strided_slice %10 {offsets = [0, 0], sizes = [16, 16], strides = [1, 1]} : vector<16x128xf32> to vector<16x16xf32>
    %18 = arith.truncf %17 : vector<16x16xf32> to vector<16x16xbf16>
    %19 = vector.extract_strided_slice %11 {offsets = [0, 0], sizes = [16, 16], strides = [1, 1]} : vector<16x128xf32> to vector<16x16xf32>
    %20 = arith.truncf %19 : vector<16x16xf32> to vector<16x16xbf16>
    %cst_11 = arith.constant dense<0.000000e+00> : vector<16x16xf32>
    %21 = tpu.matmul %16, %18, %cst_11 {dimension_numbers = #tpu.dot_dimension_numbers<[1], [1], [0], [0], [0, 0, 1, 0], [], []>} : vector<16x16xbf16>, vector<16x16xbf16>, vector<16x16xf32> -> vector<16x16xf32>
    %cst_12 = arith.constant 2.500000e-01 : f32
    %22 = vector.broadcast %cst_12 : f32 to vector<16x16xf32>
    %23 = arith.mulf %21, %22 : vector<16x16xf32>
    %cst_13 = arith.constant -1.000000e+30 : f32
    %24 = vector.broadcast %cst_13 : f32 to vector<16x16xf32>
    %25 = arith.select %14, %23, %24 : vector<16x16xi1>, vector<16x16xf32>
    %cst_14 = arith.constant dense<0xFF800000> : vector<16xf32>
    %26 = vector.multi_reduction <maximumf>, %25, %cst_14 [1] : vector<16x16xf32> to vector<16xf32>
    %27 = vector.shape_cast %26 : vector<16xf32> to vector<16x1xf32>
    %28 = vector.broadcast %27 : vector<16x1xf32> to vector<16x16xf32>
    %29 = arith.subf %25, %28 : vector<16x16xf32>
    %30 = math.exp %29 : vector<16x16xf32>
    %cst_15 = arith.constant dense<0.000000e+00> : vector<16xf32>
    %31 = vector.multi_reduction <add>, %30, %cst_15 [1] : vector<16x16xf32> to vector<16xf32>
    %32 = vector.shape_cast %31 : vector<16xf32> to vector<16x1xf32>
    %33 = arith.truncf %30 : vector<16x16xf32> to vector<16x16xbf16>
    %cst_16 = arith.constant dense<0.000000e+00> : vector<16x16xf32>
    %34 = tpu.matmul %33, %20, %cst_16 {dimension_numbers = #tpu.dot_dimension_numbers<[1], [0], [0], [1], [0, 0, 1, 1], [], []>} : vector<16x16xbf16>, vector<16x16xbf16>, vector<16x16xf32> -> vector<16x16xf32>
    %35 = tpu.reciprocal %32 {approx = true} : vector<16x1xf32> -> vector<16x1xf32>
    %36 = vector.broadcast %35 : vector<16x1xf32> to vector<16x16xf32>
    %37 = arith.mulf %34, %36 : vector<16x16xf32>
    %38 = vector.extract_strided_slice %9 {offsets = [0, 16], sizes = [16, 16], strides = [1, 1]} : vector<16x128xf32> to vector<16x16xf32>
    %39 = arith.truncf %38 : vector<16x16xf32> to vector<16x16xbf16>
    %40 = vector.extract_strided_slice %10 {offsets = [0, 16], sizes = [16, 16], strides = [1, 1]} : vector<16x128xf32> to vector<16x16xf32>
    %41 = arith.truncf %40 : vector<16x16xf32> to vector<16x16xbf16>
    %42 = vector.extract_strided_slice %11 {offsets = [0, 16], sizes = [16, 16], strides = [1, 1]} : vector<16x128xf32> to vector<16x16xf32>
    %43 = arith.truncf %42 : vector<16x16xf32> to vector<16x16xbf16>
    %cst_17 = arith.constant dense<0.000000e+00> : vector<16x16xf32>
    %44 = tpu.matmul %39, %41, %cst_17 {dimension_numbers = #tpu.dot_dimension_numbers<[1], [1], [0], [0], [0, 0, 1, 0], [], []>} : vector<16x16xbf16>, vector<16x16xbf16>, vector<16x16xf32> -> vector<16x16xf32>
    %cst_18 = arith.constant 2.500000e-01 : f32
    %45 = vector.broadcast %cst_18 : f32 to vector<16x16xf32>
    %46 = arith.mulf %44, %45 : vector<16x16xf32>
    %cst_19 = arith.constant -1.000000e+30 : f32
    %47 = vector.broadcast %cst_19 : f32 to vector<16x16xf32>
    %48 = arith.select %14, %46, %47 : vector<16x16xi1>, vector<16x16xf32>
    %cst_20 = arith.constant dense<0xFF800000> : vector<16xf32>
    %49 = vector.multi_reduction <maximumf>, %48, %cst_20 [1] : vector<16x16xf32> to vector<16xf32>
    %50 = vector.shape_cast %49 : vector<16xf32> to vector<16x1xf32>
    %51 = vector.broadcast %50 : vector<16x1xf32> to vector<16x16xf32>
    %52 = arith.subf %48, %51 : vector<16x16xf32>
    %53 = math.exp %52 : vector<16x16xf32>
    %cst_21 = arith.constant dense<0.000000e+00> : vector<16xf32>
    %54 = vector.multi_reduction <add>, %53, %cst_21 [1] : vector<16x16xf32> to vector<16xf32>
    %55 = vector.shape_cast %54 : vector<16xf32> to vector<16x1xf32>
    %56 = arith.truncf %53 : vector<16x16xf32> to vector<16x16xbf16>
    %cst_22 = arith.constant dense<0.000000e+00> : vector<16x16xf32>
    %57 = tpu.matmul %56, %43, %cst_22 {dimension_numbers = #tpu.dot_dimension_numbers<[1], [0], [0], [1], [0, 0, 1, 1], [], []>} : vector<16x16xbf16>, vector<16x16xbf16>, vector<16x16xf32> -> vector<16x16xf32>
    %58 = tpu.reciprocal %55 {approx = true} : vector<16x1xf32> -> vector<16x1xf32>
    %59 = vector.broadcast %58 : vector<16x1xf32> to vector<16x16xf32>
    %60 = arith.mulf %57, %59 : vector<16x16xf32>
    %61 = vector.extract_strided_slice %9 {offsets = [0, 32], sizes = [16, 16], strides = [1, 1]} : vector<16x128xf32> to vector<16x16xf32>
    %62 = arith.truncf %61 : vector<16x16xf32> to vector<16x16xbf16>
    %63 = vector.extract_strided_slice %10 {offsets = [0, 32], sizes = [16, 16], strides = [1, 1]} : vector<16x128xf32> to vector<16x16xf32>
    %64 = arith.truncf %63 : vector<16x16xf32> to vector<16x16xbf16>
    %65 = vector.extract_strided_slice %11 {offsets = [0, 32], sizes = [16, 16], strides = [1, 1]} : vector<16x128xf32> to vector<16x16xf32>
    %66 = arith.truncf %65 : vector<16x16xf32> to vector<16x16xbf16>
    %cst_23 = arith.constant dense<0.000000e+00> : vector<16x16xf32>
    %67 = tpu.matmul %62, %64, %cst_23 {dimension_numbers = #tpu.dot_dimension_numbers<[1], [1], [0], [0], [0, 0, 1, 0], [], []>} : vector<16x16xbf16>, vector<16x16xbf16>, vector<16x16xf32> -> vector<16x16xf32>
    %cst_24 = arith.constant 2.500000e-01 : f32
    %68 = vector.broadcast %cst_24 : f32 to vector<16x16xf32>
    %69 = arith.mulf %67, %68 : vector<16x16xf32>
    %cst_25 = arith.constant -1.000000e+30 : f32
    %70 = vector.broadcast %cst_25 : f32 to vector<16x16xf32>
    %71 = arith.select %14, %69, %70 : vector<16x16xi1>, vector<16x16xf32>
    %cst_26 = arith.constant dense<0xFF800000> : vector<16xf32>
    %72 = vector.multi_reduction <maximumf>, %71, %cst_26 [1] : vector<16x16xf32> to vector<16xf32>
    %73 = vector.shape_cast %72 : vector<16xf32> to vector<16x1xf32>
    %74 = vector.broadcast %73 : vector<16x1xf32> to vector<16x16xf32>
    %75 = arith.subf %71, %74 : vector<16x16xf32>
    %76 = math.exp %75 : vector<16x16xf32>
    %cst_27 = arith.constant dense<0.000000e+00> : vector<16xf32>
    %77 = vector.multi_reduction <add>, %76, %cst_27 [1] : vector<16x16xf32> to vector<16xf32>
    %78 = vector.shape_cast %77 : vector<16xf32> to vector<16x1xf32>
    %79 = arith.truncf %76 : vector<16x16xf32> to vector<16x16xbf16>
    %cst_28 = arith.constant dense<0.000000e+00> : vector<16x16xf32>
    %80 = tpu.matmul %79, %66, %cst_28 {dimension_numbers = #tpu.dot_dimension_numbers<[1], [0], [0], [1], [0, 0, 1, 1], [], []>} : vector<16x16xbf16>, vector<16x16xbf16>, vector<16x16xf32> -> vector<16x16xf32>
    %81 = tpu.reciprocal %78 {approx = true} : vector<16x1xf32> -> vector<16x1xf32>
    %82 = vector.broadcast %81 : vector<16x1xf32> to vector<16x16xf32>
    %83 = arith.mulf %80, %82 : vector<16x16xf32>
    %84 = vector.extract_strided_slice %9 {offsets = [0, 48], sizes = [16, 16], strides = [1, 1]} : vector<16x128xf32> to vector<16x16xf32>
    %85 = arith.truncf %84 : vector<16x16xf32> to vector<16x16xbf16>
    %86 = vector.extract_strided_slice %10 {offsets = [0, 48], sizes = [16, 16], strides = [1, 1]} : vector<16x128xf32> to vector<16x16xf32>
    %87 = arith.truncf %86 : vector<16x16xf32> to vector<16x16xbf16>
    %88 = vector.extract_strided_slice %11 {offsets = [0, 48], sizes = [16, 16], strides = [1, 1]} : vector<16x128xf32> to vector<16x16xf32>
    %89 = arith.truncf %88 : vector<16x16xf32> to vector<16x16xbf16>
    %cst_29 = arith.constant dense<0.000000e+00> : vector<16x16xf32>
    %90 = tpu.matmul %85, %87, %cst_29 {dimension_numbers = #tpu.dot_dimension_numbers<[1], [1], [0], [0], [0, 0, 1, 0], [], []>} : vector<16x16xbf16>, vector<16x16xbf16>, vector<16x16xf32> -> vector<16x16xf32>
    %cst_30 = arith.constant 2.500000e-01 : f32
    %91 = vector.broadcast %cst_30 : f32 to vector<16x16xf32>
    %92 = arith.mulf %90, %91 : vector<16x16xf32>
    %cst_31 = arith.constant -1.000000e+30 : f32
    %93 = vector.broadcast %cst_31 : f32 to vector<16x16xf32>
    %94 = arith.select %14, %92, %93 : vector<16x16xi1>, vector<16x16xf32>
    %cst_32 = arith.constant dense<0xFF800000> : vector<16xf32>
    %95 = vector.multi_reduction <maximumf>, %94, %cst_32 [1] : vector<16x16xf32> to vector<16xf32>
    %96 = vector.shape_cast %95 : vector<16xf32> to vector<16x1xf32>
    %97 = vector.broadcast %96 : vector<16x1xf32> to vector<16x16xf32>
    %98 = arith.subf %94, %97 : vector<16x16xf32>
    %99 = math.exp %98 : vector<16x16xf32>
    %cst_33 = arith.constant dense<0.000000e+00> : vector<16xf32>
    %100 = vector.multi_reduction <add>, %99, %cst_33 [1] : vector<16x16xf32> to vector<16xf32>
    %101 = vector.shape_cast %100 : vector<16xf32> to vector<16x1xf32>
    %102 = arith.truncf %99 : vector<16x16xf32> to vector<16x16xbf16>
    %cst_34 = arith.constant dense<0.000000e+00> : vector<16x16xf32>
    %103 = tpu.matmul %102, %89, %cst_34 {dimension_numbers = #tpu.dot_dimension_numbers<[1], [0], [0], [1], [0, 0, 1, 1], [], []>} : vector<16x16xbf16>, vector<16x16xbf16>, vector<16x16xf32> -> vector<16x16xf32>
    %104 = tpu.reciprocal %101 {approx = true} : vector<16x1xf32> -> vector<16x1xf32>
    %105 = vector.broadcast %104 : vector<16x1xf32> to vector<16x16xf32>
    %106 = arith.mulf %103, %105 : vector<16x16xf32>
    %107 = vector.extract_strided_slice %9 {offsets = [0, 64], sizes = [16, 16], strides = [1, 1]} : vector<16x128xf32> to vector<16x16xf32>
    %108 = arith.truncf %107 : vector<16x16xf32> to vector<16x16xbf16>
    %109 = vector.extract_strided_slice %10 {offsets = [0, 64], sizes = [16, 16], strides = [1, 1]} : vector<16x128xf32> to vector<16x16xf32>
    %110 = arith.truncf %109 : vector<16x16xf32> to vector<16x16xbf16>
    %111 = vector.extract_strided_slice %11 {offsets = [0, 64], sizes = [16, 16], strides = [1, 1]} : vector<16x128xf32> to vector<16x16xf32>
    %112 = arith.truncf %111 : vector<16x16xf32> to vector<16x16xbf16>
    %cst_35 = arith.constant dense<0.000000e+00> : vector<16x16xf32>
    %113 = tpu.matmul %108, %110, %cst_35 {dimension_numbers = #tpu.dot_dimension_numbers<[1], [1], [0], [0], [0, 0, 1, 0], [], []>} : vector<16x16xbf16>, vector<16x16xbf16>, vector<16x16xf32> -> vector<16x16xf32>
    %cst_36 = arith.constant 2.500000e-01 : f32
    %114 = vector.broadcast %cst_36 : f32 to vector<16x16xf32>
    %115 = arith.mulf %113, %114 : vector<16x16xf32>
    %cst_37 = arith.constant -1.000000e+30 : f32
    %116 = vector.broadcast %cst_37 : f32 to vector<16x16xf32>
    %117 = arith.select %14, %115, %116 : vector<16x16xi1>, vector<16x16xf32>
    %cst_38 = arith.constant dense<0xFF800000> : vector<16xf32>
    %118 = vector.multi_reduction <maximumf>, %117, %cst_38 [1] : vector<16x16xf32> to vector<16xf32>
    %119 = vector.shape_cast %118 : vector<16xf32> to vector<16x1xf32>
    %120 = vector.broadcast %119 : vector<16x1xf32> to vector<16x16xf32>
    %121 = arith.subf %117, %120 : vector<16x16xf32>
    %122 = math.exp %121 : vector<16x16xf32>
    %cst_39 = arith.constant dense<0.000000e+00> : vector<16xf32>
    %123 = vector.multi_reduction <add>, %122, %cst_39 [1] : vector<16x16xf32> to vector<16xf32>
    %124 = vector.shape_cast %123 : vector<16xf32> to vector<16x1xf32>
    %125 = arith.truncf %122 : vector<16x16xf32> to vector<16x16xbf16>
    %cst_40 = arith.constant dense<0.000000e+00> : vector<16x16xf32>
    %126 = tpu.matmul %125, %112, %cst_40 {dimension_numbers = #tpu.dot_dimension_numbers<[1], [0], [0], [1], [0, 0, 1, 1], [], []>} : vector<16x16xbf16>, vector<16x16xbf16>, vector<16x16xf32> -> vector<16x16xf32>
    %127 = tpu.reciprocal %124 {approx = true} : vector<16x1xf32> -> vector<16x1xf32>
    %128 = vector.broadcast %127 : vector<16x1xf32> to vector<16x16xf32>
    %129 = arith.mulf %126, %128 : vector<16x16xf32>
    %130 = vector.extract_strided_slice %9 {offsets = [0, 80], sizes = [16, 16], strides = [1, 1]} : vector<16x128xf32> to vector<16x16xf32>
    %131 = arith.truncf %130 : vector<16x16xf32> to vector<16x16xbf16>
    %132 = vector.extract_strided_slice %10 {offsets = [0, 80], sizes = [16, 16], strides = [1, 1]} : vector<16x128xf32> to vector<16x16xf32>
    %133 = arith.truncf %132 : vector<16x16xf32> to vector<16x16xbf16>
    %134 = vector.extract_strided_slice %11 {offsets = [0, 80], sizes = [16, 16], strides = [1, 1]} : vector<16x128xf32> to vector<16x16xf32>
    %135 = arith.truncf %134 : vector<16x16xf32> to vector<16x16xbf16>
    %cst_41 = arith.constant dense<0.000000e+00> : vector<16x16xf32>
    %136 = tpu.matmul %131, %133, %cst_41 {dimension_numbers = #tpu.dot_dimension_numbers<[1], [1], [0], [0], [0, 0, 1, 0], [], []>} : vector<16x16xbf16>, vector<16x16xbf16>, vector<16x16xf32> -> vector<16x16xf32>
    %cst_42 = arith.constant 2.500000e-01 : f32
    %137 = vector.broadcast %cst_42 : f32 to vector<16x16xf32>
    %138 = arith.mulf %136, %137 : vector<16x16xf32>
    %cst_43 = arith.constant -1.000000e+30 : f32
    %139 = vector.broadcast %cst_43 : f32 to vector<16x16xf32>
    %140 = arith.select %14, %138, %139 : vector<16x16xi1>, vector<16x16xf32>
    %cst_44 = arith.constant dense<0xFF800000> : vector<16xf32>
    %141 = vector.multi_reduction <maximumf>, %140, %cst_44 [1] : vector<16x16xf32> to vector<16xf32>
    %142 = vector.shape_cast %141 : vector<16xf32> to vector<16x1xf32>
    %143 = vector.broadcast %142 : vector<16x1xf32> to vector<16x16xf32>
    %144 = arith.subf %140, %143 : vector<16x16xf32>
    %145 = math.exp %144 : vector<16x16xf32>
    %cst_45 = arith.constant dense<0.000000e+00> : vector<16xf32>
    %146 = vector.multi_reduction <add>, %145, %cst_45 [1] : vector<16x16xf32> to vector<16xf32>
    %147 = vector.shape_cast %146 : vector<16xf32> to vector<16x1xf32>
    %148 = arith.truncf %145 : vector<16x16xf32> to vector<16x16xbf16>
    %cst_46 = arith.constant dense<0.000000e+00> : vector<16x16xf32>
    %149 = tpu.matmul %148, %135, %cst_46 {dimension_numbers = #tpu.dot_dimension_numbers<[1], [0], [0], [1], [0, 0, 1, 1], [], []>} : vector<16x16xbf16>, vector<16x16xbf16>, vector<16x16xf32> -> vector<16x16xf32>
    %150 = tpu.reciprocal %147 {approx = true} : vector<16x1xf32> -> vector<16x1xf32>
    %151 = vector.broadcast %150 : vector<16x1xf32> to vector<16x16xf32>
    %152 = arith.mulf %149, %151 : vector<16x16xf32>
    %153 = vector.extract_strided_slice %9 {offsets = [0, 96], sizes = [16, 16], strides = [1, 1]} : vector<16x128xf32> to vector<16x16xf32>
    %154 = arith.truncf %153 : vector<16x16xf32> to vector<16x16xbf16>
    %155 = vector.extract_strided_slice %10 {offsets = [0, 96], sizes = [16, 16], strides = [1, 1]} : vector<16x128xf32> to vector<16x16xf32>
    %156 = arith.truncf %155 : vector<16x16xf32> to vector<16x16xbf16>
    %157 = vector.extract_strided_slice %11 {offsets = [0, 96], sizes = [16, 16], strides = [1, 1]} : vector<16x128xf32> to vector<16x16xf32>
    %158 = arith.truncf %157 : vector<16x16xf32> to vector<16x16xbf16>
    %cst_47 = arith.constant dense<0.000000e+00> : vector<16x16xf32>
    %159 = tpu.matmul %154, %156, %cst_47 {dimension_numbers = #tpu.dot_dimension_numbers<[1], [1], [0], [0], [0, 0, 1, 0], [], []>} : vector<16x16xbf16>, vector<16x16xbf16>, vector<16x16xf32> -> vector<16x16xf32>
    %cst_48 = arith.constant 2.500000e-01 : f32
    %160 = vector.broadcast %cst_48 : f32 to vector<16x16xf32>
    %161 = arith.mulf %159, %160 : vector<16x16xf32>
    %cst_49 = arith.constant -1.000000e+30 : f32
    %162 = vector.broadcast %cst_49 : f32 to vector<16x16xf32>
    %163 = arith.select %14, %161, %162 : vector<16x16xi1>, vector<16x16xf32>
    %cst_50 = arith.constant dense<0xFF800000> : vector<16xf32>
    %164 = vector.multi_reduction <maximumf>, %163, %cst_50 [1] : vector<16x16xf32> to vector<16xf32>
    %165 = vector.shape_cast %164 : vector<16xf32> to vector<16x1xf32>
    %166 = vector.broadcast %165 : vector<16x1xf32> to vector<16x16xf32>
    %167 = arith.subf %163, %166 : vector<16x16xf32>
    %168 = math.exp %167 : vector<16x16xf32>
    %cst_51 = arith.constant dense<0.000000e+00> : vector<16xf32>
    %169 = vector.multi_reduction <add>, %168, %cst_51 [1] : vector<16x16xf32> to vector<16xf32>
    %170 = vector.shape_cast %169 : vector<16xf32> to vector<16x1xf32>
    %171 = arith.truncf %168 : vector<16x16xf32> to vector<16x16xbf16>
    %cst_52 = arith.constant dense<0.000000e+00> : vector<16x16xf32>
    %172 = tpu.matmul %171, %158, %cst_52 {dimension_numbers = #tpu.dot_dimension_numbers<[1], [0], [0], [1], [0, 0, 1, 1], [], []>} : vector<16x16xbf16>, vector<16x16xbf16>, vector<16x16xf32> -> vector<16x16xf32>
    %173 = tpu.reciprocal %170 {approx = true} : vector<16x1xf32> -> vector<16x1xf32>
    %174 = vector.broadcast %173 : vector<16x1xf32> to vector<16x16xf32>
    %175 = arith.mulf %172, %174 : vector<16x16xf32>
    %176 = vector.extract_strided_slice %9 {offsets = [0, 112], sizes = [16, 16], strides = [1, 1]} : vector<16x128xf32> to vector<16x16xf32>
    %177 = arith.truncf %176 : vector<16x16xf32> to vector<16x16xbf16>
    %178 = vector.extract_strided_slice %10 {offsets = [0, 112], sizes = [16, 16], strides = [1, 1]} : vector<16x128xf32> to vector<16x16xf32>
    %179 = arith.truncf %178 : vector<16x16xf32> to vector<16x16xbf16>
    %180 = vector.extract_strided_slice %11 {offsets = [0, 112], sizes = [16, 16], strides = [1, 1]} : vector<16x128xf32> to vector<16x16xf32>
    %181 = arith.truncf %180 : vector<16x16xf32> to vector<16x16xbf16>
    %cst_53 = arith.constant dense<0.000000e+00> : vector<16x16xf32>
    %182 = tpu.matmul %177, %179, %cst_53 {dimension_numbers = #tpu.dot_dimension_numbers<[1], [1], [0], [0], [0, 0, 1, 0], [], []>} : vector<16x16xbf16>, vector<16x16xbf16>, vector<16x16xf32> -> vector<16x16xf32>
    %cst_54 = arith.constant 2.500000e-01 : f32
    %183 = vector.broadcast %cst_54 : f32 to vector<16x16xf32>
    %184 = arith.mulf %182, %183 : vector<16x16xf32>
    %cst_55 = arith.constant -1.000000e+30 : f32
    %185 = vector.broadcast %cst_55 : f32 to vector<16x16xf32>
    %186 = arith.select %14, %184, %185 : vector<16x16xi1>, vector<16x16xf32>
    %cst_56 = arith.constant dense<0xFF800000> : vector<16xf32>
    %187 = vector.multi_reduction <maximumf>, %186, %cst_56 [1] : vector<16x16xf32> to vector<16xf32>
    %188 = vector.shape_cast %187 : vector<16xf32> to vector<16x1xf32>
    %189 = vector.broadcast %188 : vector<16x1xf32> to vector<16x16xf32>
    %190 = arith.subf %186, %189 : vector<16x16xf32>
    %191 = math.exp %190 : vector<16x16xf32>
    %cst_57 = arith.constant dense<0.000000e+00> : vector<16xf32>
    %192 = vector.multi_reduction <add>, %191, %cst_57 [1] : vector<16x16xf32> to vector<16xf32>
    %193 = vector.shape_cast %192 : vector<16xf32> to vector<16x1xf32>
    %194 = arith.truncf %191 : vector<16x16xf32> to vector<16x16xbf16>
    %cst_58 = arith.constant dense<0.000000e+00> : vector<16x16xf32>
    %195 = tpu.matmul %194, %181, %cst_58 {dimension_numbers = #tpu.dot_dimension_numbers<[1], [0], [0], [1], [0, 0, 1, 1], [], []>} : vector<16x16xbf16>, vector<16x16xbf16>, vector<16x16xf32> -> vector<16x16xf32>
    %196 = tpu.reciprocal %193 {approx = true} : vector<16x1xf32> -> vector<16x1xf32>
    %197 = vector.broadcast %196 : vector<16x1xf32> to vector<16x16xf32>
    %198 = arith.mulf %195, %197 : vector<16x16xf32>
    %199 = tpu.concatenate %37, %60, %83, %106, %129, %152, %175, %198 in 1 : vector<16x16xf32>, vector<16x16xf32>, vector<16x16xf32>, vector<16x16xf32>, vector<16x16xf32>, vector<16x16xf32>, vector<16x16xf32>, vector<16x16xf32> -> vector<16x128xf32>
    %200 = arith.truncf %199 : vector<16x128xf32> to vector<16x128xbf16>
    %c0_59 = arith.constant 0 : index
    %c0_60 = arith.constant 0 : index
    %201 = vector.load %arg5[%c0_59, %c0_60] : memref<128x128xbf16, #tpu.memory_space<vmem>>, vector<128x128xbf16>
    %cst_61 = arith.constant dense<0.000000e+00> : vector<16x128xf32>
    %202 = tpu.matmul %200, %201, %cst_61 {dimension_numbers = #tpu.dot_dimension_numbers<[1], [0], [0], [1], [0, 0, 1, 1], [], []>} : vector<16x128xbf16>, vector<128x128xbf16>, vector<16x128xf32> -> vector<16x128xf32>
    %c0_62 = arith.constant 0 : index
    %c0_63 = arith.constant 0 : index
    %203 = vector.load %arg6[%c0_62, %c0_63] : memref<1x128xf32, #tpu.memory_space<vmem>>, vector<1x128xf32>
    %204 = vector.broadcast %203 : vector<1x128xf32> to vector<16x128xf32>
    %205 = arith.addf %202, %204 : vector<16x128xf32>
    %206 = arith.addf %0, %205 : vector<16x128xf32>
    %cst_64 = arith.constant dense<0.000000e+00> : vector<16xf32>
    %207 = vector.multi_reduction <add>, %206, %cst_64 [1] : vector<16x128xf32> to vector<16xf32>
    %208 = vector.shape_cast %207 : vector<16xf32> to vector<16x1xf32>
    %cst_65 = arith.constant 1.280000e+02 : f32
    %209 = vector.broadcast %cst_65 : f32 to vector<16x1xf32>
    %210 = arith.divf %208, %209 : vector<16x1xf32>
    %211 = vector.broadcast %210 : vector<16x1xf32> to vector<16x128xf32>
    %212 = arith.subf %206, %211 : vector<16x128xf32>
    %213 = arith.mulf %212, %212 : vector<16x128xf32>
    %cst_66 = arith.constant dense<0.000000e+00> : vector<16xf32>
    %214 = vector.multi_reduction <add>, %213, %cst_66 [1] : vector<16x128xf32> to vector<16xf32>
    %215 = vector.shape_cast %214 : vector<16xf32> to vector<16x1xf32>
    %cst_67 = arith.constant 1.280000e+02 : f32
    %216 = vector.broadcast %cst_67 : f32 to vector<16x1xf32>
    %217 = arith.divf %215, %216 : vector<16x1xf32>
    %cst_68 = arith.constant 9.99999974E-6 : f32
    %218 = vector.broadcast %cst_68 : f32 to vector<16x1xf32>
    %219 = arith.addf %217, %218 : vector<16x1xf32>
    %220 = math.rsqrt %219 : vector<16x1xf32>
    %221 = vector.broadcast %220 : vector<16x1xf32> to vector<16x128xf32>
    %222 = arith.mulf %212, %221 : vector<16x128xf32>
    %223 = vector.broadcast %1 : vector<1x128xf32> to vector<16x128xf32>
    %224 = arith.mulf %222, %223 : vector<16x128xf32>
    %225 = vector.broadcast %2 : vector<1x128xf32> to vector<16x128xf32>
    %226 = arith.addf %224, %225 : vector<16x128xf32>
    %c0_69 = arith.constant 0 : index
    %c0_70 = arith.constant 0 : index
    %227 = vector.load %arg9[%c0_69, %c0_70] : memref<16x128xf32, #tpu.memory_space<vmem>>, vector<16x128xf32>
    tpu.vector_store %arg9[%c0_69, %c0_70], %226 {strides = array<i32>} : memref<16x128xf32, #tpu.memory_space<vmem>>, vector<16x128xf32>,
    return
  }
}

module attributes {stable_mosaic.version = 11 : i64} {
  func.func @kernel(%arg0: memref<16x128xf32, #tpu.memory_space<vmem>>, %arg1: memref<128x512xbf16, #tpu.memory_space<vmem>>, %arg2: memref<1x512xf32, #tpu.memory_space<vmem>>, %arg3: memref<512x128xbf16, #tpu.memory_space<vmem>>, %arg4: memref<1x128xf32, #tpu.memory_space<vmem>>, %arg5: memref<1x128xf32, #tpu.memory_space<vmem>>, %arg6: memref<1x128xf32, #tpu.memory_space<vmem>>, %arg7: memref<16x128xf32, #tpu.memory_space<vmem>>) attributes {dimension_semantics = [], scalar_prefetch = 0 : i64, scratch_operands = 0 : i64, tpu.core_type = #tpu.core_type<tc>} {
    %c0 = arith.constant 0 : index
    %c0_0 = arith.constant 0 : index
    %0 = vector.load %arg0[%c0, %c0_0] : memref<16x128xf32, #tpu.memory_space<vmem>>, vector<16x128xf32>
    %c0_1 = arith.constant 0 : index
    %c0_2 = arith.constant 0 : index
    %1 = vector.load %arg5[%c0_1, %c0_2] : memref<1x128xf32, #tpu.memory_space<vmem>>, vector<1x128xf32>
    %c0_3 = arith.constant 0 : index
    %c0_4 = arith.constant 0 : index
    %2 = vector.load %arg6[%c0_3, %c0_4] : memref<1x128xf32, #tpu.memory_space<vmem>>, vector<1x128xf32>
    %3 = arith.truncf %0 : vector<16x128xf32> to vector<16x128xbf16>
    %c0_5 = arith.constant 0 : index
    %c0_6 = arith.constant 0 : index
    %4 = vector.load %arg1[%c0_5, %c0_6] : memref<128x512xbf16, #tpu.memory_space<vmem>>, vector<128x512xbf16>
    %cst = arith.constant dense<0.000000e+00> : vector<16x512xf32>
    %5 = tpu.matmul %3, %4, %cst {dimension_numbers = #tpu.dot_dimension_numbers<[1], [0], [0], [1], [0, 0, 1, 1], [], []>} : vector<16x128xbf16>, vector<128x512xbf16>, vector<16x512xf32> -> vector<16x512xf32>
    %c0_7 = arith.constant 0 : index
    %c0_8 = arith.constant 0 : index
    %6 = vector.load %arg2[%c0_7, %c0_8] : memref<1x512xf32, #tpu.memory_space<vmem>>, vector<1x512xf32>
    %7 = vector.broadcast %6 : vector<1x512xf32> to vector<16x512xf32>
    %8 = arith.addf %5, %7 : vector<16x512xf32>
    %cst_9 = arith.constant 0.000000e+00 : f32
    %9 = vector.broadcast %cst_9 : f32 to vector<16x512xf32>
    %10 = arith.maximumf %8, %9 : vector<16x512xf32>
    %11 = arith.truncf %10 : vector<16x512xf32> to vector<16x512xbf16>
    %c0_10 = arith.constant 0 : index
    %c0_11 = arith.constant 0 : index
    %12 = vector.load %arg3[%c0_10, %c0_11] : memref<512x128xbf16, #tpu.memory_space<vmem>>, vector<512x128xbf16>
    %cst_12 = arith.constant dense<0.000000e+00> : vector<16x128xf32>
    %13 = tpu.matmul %11, %12, %cst_12 {dimension_numbers = #tpu.dot_dimension_numbers<[1], [0], [0], [1], [0, 0, 1, 1], [], []>} : vector<16x512xbf16>, vector<512x128xbf16>, vector<16x128xf32> -> vector<16x128xf32>
    %c0_13 = arith.constant 0 : index
    %c0_14 = arith.constant 0 : index
    %14 = vector.load %arg4[%c0_13, %c0_14] : memref<1x128xf32, #tpu.memory_space<vmem>>, vector<1x128xf32>
    %15 = vector.broadcast %14 : vector<1x128xf32> to vector<16x128xf32>
    %16 = arith.addf %13, %15 : vector<16x128xf32>
    %17 = arith.addf %0, %16 : vector<16x128xf32>
    %cst_15 = arith.constant dense<0.000000e+00> : vector<16xf32>
    %18 = vector.multi_reduction <add>, %17, %cst_15 [1] : vector<16x128xf32> to vector<16xf32>
    %19 = vector.shape_cast %18 : vector<16xf32> to vector<16x1xf32>
    %cst_16 = arith.constant 1.280000e+02 : f32
    %20 = vector.broadcast %cst_16 : f32 to vector<16x1xf32>
    %21 = arith.divf %19, %20 : vector<16x1xf32>
    %22 = vector.broadcast %21 : vector<16x1xf32> to vector<16x128xf32>
    %23 = arith.subf %17, %22 : vector<16x128xf32>
    %24 = arith.mulf %23, %23 : vector<16x128xf32>
    %cst_17 = arith.constant dense<0.000000e+00> : vector<16xf32>
    %25 = vector.multi_reduction <add>, %24, %cst_17 [1] : vector<16x128xf32> to vector<16xf32>
    %26 = vector.shape_cast %25 : vector<16xf32> to vector<16x1xf32>
    %cst_18 = arith.constant 1.280000e+02 : f32
    %27 = vector.broadcast %cst_18 : f32 to vector<16x1xf32>
    %28 = arith.divf %26, %27 : vector<16x1xf32>
    %cst_19 = arith.constant 9.99999974E-6 : f32
    %29 = vector.broadcast %cst_19 : f32 to vector<16x1xf32>
    %30 = arith.addf %28, %29 : vector<16x1xf32>
    %31 = math.rsqrt %30 : vector<16x1xf32>
    %32 = vector.broadcast %31 : vector<16x1xf32> to vector<16x128xf32>
    %33 = arith.mulf %23, %32 : vector<16x128xf32>
    %34 = vector.broadcast %1 : vector<1x128xf32> to vector<16x128xf32>
    %35 = arith.mulf %33, %34 : vector<16x128xf32>
    %36 = vector.broadcast %2 : vector<1x128xf32> to vector<16x128xf32>
    %37 = arith.addf %35, %36 : vector<16x128xf32>
    %c0_20 = arith.constant 0 : index
    %c0_21 = arith.constant 0 : index
    %38 = vector.load %arg7[%c0_20, %c0_21] : memref<16x128xf32, #tpu.memory_space<vmem>>, vector<16x128xf32>
    tpu.vector_store %arg7[%c0_20, %c0_21], %37 {strides = array<i32>} : memref<16x128xf32, #tpu.memory_space<vmem>>, vector<16x128xf32>,
    return
  }
}

module attributes {stable_mosaic.version = 11 : i64} {
  func.func @kernel(%arg0: memref<16x128xf32, #tpu.memory_space<vmem>>, %arg1: memref<16x128xf32, #tpu.memory_space<vmem>>, %arg2: memref<16x16xi32, #tpu.memory_space<vmem>>, %arg3: memref<128x384xbf16, #tpu.memory_space<vmem>>, %arg4: memref<1x384xf32, #tpu.memory_space<vmem>>, %arg5: memref<128x128xbf16, #tpu.memory_space<vmem>>, %arg6: memref<1x128xf32, #tpu.memory_space<vmem>>, %arg7: memref<1x128xf32, #tpu.memory_space<vmem>>, %arg8: memref<1x128xf32, #tpu.memory_space<vmem>>, %arg9: memref<16x128xf32, #tpu.memory_space<vmem>>) attributes {dimension_semantics = [], scalar_prefetch = 0 : i64, scratch_operands = 0 : i64, tpu.core_type = #tpu.core_type<tc>} {
    %c0 = arith.constant 0 : index
    %c0_0 = arith.constant 0 : index
    %0 = vector.load %arg0[%c0, %c0_0] : memref<16x128xf32, #tpu.memory_space<vmem>>, vector<16x128xf32>
    %c0_1 = arith.constant 0 : index
    %c0_2 = arith.constant 0 : index
    %1 = vector.load %arg7[%c0_1, %c0_2] : memref<1x128xf32, #tpu.memory_space<vmem>>, vector<1x128xf32>
    %c0_3 = arith.constant 0 : index
    %c0_4 = arith.constant 0 : index
    %2 = vector.load %arg8[%c0_3, %c0_4] : memref<1x128xf32, #tpu.memory_space<vmem>>, vector<1x128xf32>
    %c0_5 = arith.constant 0 : index
    %c0_6 = arith.constant 0 : index
    %3 = vector.load %arg1[%c0_5, %c0_6] : memref<16x128xf32, #tpu.memory_space<vmem>>, vector<16x128xf32>
    %4 = arith.truncf %0 : vector<16x128xf32> to vector<16x128xbf16>
    %c0_7 = arith.constant 0 : index
    %c0_8 = arith.constant 0 : index
    %5 = vector.load %arg3[%c0_7, %c0_8] : memref<128x384xbf16, #tpu.memory_space<vmem>>, vector<128x128xbf16>
    %cst = arith.constant dense<0.000000e+00> : vector<16x128xf32>
    %6 = tpu.matmul %4, %5, %cst {dimension_numbers = #tpu.dot_dimension_numbers<[1], [0], [0], [1], [0, 0, 1, 1], [], []>} : vector<16x128xbf16>, vector<128x128xbf16>, vector<16x128xf32> -> vector<16x128xf32>
    %c0_9 = arith.constant 0 : index
    %c0_10 = arith.constant 0 : index
    %7 = vector.load %arg4[%c0_9, %c0_10] : memref<1x384xf32, #tpu.memory_space<vmem>>, vector<1x128xf32>
    %8 = vector.broadcast %7 : vector<1x128xf32> to vector<16x128xf32>
    %9 = arith.addf %6, %8 : vector<16x128xf32>
    %10 = arith.truncf %3 : vector<16x128xf32> to vector<16x128xbf16>
    %c0_11 = arith.constant 0 : index
    %c128 = arith.constant 128 : index
    %11 = vector.load %arg3[%c0_11, %c128] : memref<128x384xbf16, #tpu.memory_space<vmem>>, vector<128x256xbf16>
    %cst_12 = arith.constant dense<0.000000e+00> : vector<16x256xf32>
    %12 = tpu.matmul %10, %11, %cst_12 {dimension_numbers = #tpu.dot_dimension_numbers<[1], [0], [0], [1], [0, 0, 1, 1], [], []>} : vector<16x128xbf16>, vector<128x256xbf16>, vector<16x256xf32> -> vector<16x256xf32>
    %c0_13 = arith.constant 0 : index
    %c128_14 = arith.constant 128 : index
    %13 = vector.load %arg4[%c0_13, %c128_14] : memref<1x384xf32, #tpu.memory_space<vmem>>, vector<1x256xf32>
    %14 = vector.broadcast %13 : vector<1x256xf32> to vector<16x256xf32>
    %15 = arith.addf %12, %14 : vector<16x256xf32>
    %16 = vector.extract_strided_slice %15 {offsets = [0, 0], sizes = [16, 128], strides = [1, 1]} : vector<16x256xf32> to vector<16x128xf32>
    %17 = vector.extract_strided_slice %15 {offsets = [0, 128], sizes = [16, 128], strides = [1, 1]} : vector<16x256xf32> to vector<16x128xf32>
    %c0_15 = arith.constant 0 : index
    %c0_16 = arith.constant 0 : index
    %18 = vector.load %arg2[%c0_15, %c0_16] : memref<16x16xi32, #tpu.memory_space<vmem>>, vector<16x16xi32>
    %c0_i32 = arith.constant 0 : i32
    %19 = vector.broadcast %c0_i32 : i32 to vector<16x16xi32>
    %20 = arith.cmpi ne, %18, %19 : vector<16x16xi32>
    %21 = vector.extract_strided_slice %9 {offsets = [0, 0], sizes = [16, 16], strides = [1, 1]} : vector<16x128xf32> to vector<16x16xf32>
    %22 = arith.truncf %21 : vector<16x16xf32> to vector<16x16xbf16>
    %23 = vector.extract_strided_slice %16 {offsets = [0, 0], sizes = [16, 16], strides = [1, 1]} : vector<16x128xf32> to vector<16x16xf32>
    %24 = arith.truncf %23 : vector<16x16xf32> to vector<16x16xbf16>
    %25 = vector.extract_strided_slice %17 {offsets = [0, 0], sizes = [16, 16], strides = [1, 1]} : vector<16x128xf32> to vector<16x16xf32>
    %26 = arith.truncf %25 : vector<16x16xf32> to vector<16x16xbf16>
    %cst_17 = arith.constant dense<0.000000e+00> : vector<16x16xf32>
    %27 = tpu.matmul %22, %24, %cst_17 {dimension_numbers = #tpu.dot_dimension_numbers<[1], [1], [0], [0], [0, 0, 1, 0], [], []>} : vector<16x16xbf16>, vector<16x16xbf16>, vector<16x16xf32> -> vector<16x16xf32>
    %cst_18 = arith.constant 2.500000e-01 : f32
    %28 = vector.broadcast %cst_18 : f32 to vector<16x16xf32>
    %29 = arith.mulf %27, %28 : vector<16x16xf32>
    %cst_19 = arith.constant -1.000000e+30 : f32
    %30 = vector.broadcast %cst_19 : f32 to vector<16x16xf32>
    %31 = arith.select %20, %29, %30 : vector<16x16xi1>, vector<16x16xf32>
    %cst_20 = arith.constant dense<0xFF800000> : vector<16xf32>
    %32 = vector.multi_reduction <maximumf>, %31, %cst_20 [1] : vector<16x16xf32> to vector<16xf32>
    %33 = vector.shape_cast %32 : vector<16xf32> to vector<16x1xf32>
    %34 = vector.broadcast %33 : vector<16x1xf32> to vector<16x16xf32>
    %35 = arith.subf %31, %34 : vector<16x16xf32>
    %36 = math.exp %35 : vector<16x16xf32>
    %cst_21 = arith.constant dense<0.000000e+00> : vector<16xf32>
    %37 = vector.multi_reduction <add>, %36, %cst_21 [1] : vector<16x16xf32> to vector<16xf32>
    %38 = vector.shape_cast %37 : vector<16xf32> to vector<16x1xf32>
    %39 = arith.truncf %36 : vector<16x16xf32> to vector<16x16xbf16>
    %cst_22 = arith.constant dense<0.000000e+00> : vector<16x16xf32>
    %40 = tpu.matmul %39, %26, %cst_22 {dimension_numbers = #tpu.dot_dimension_numbers<[1], [0], [0], [1], [0, 0, 1, 1], [], []>} : vector<16x16xbf16>, vector<16x16xbf16>, vector<16x16xf32> -> vector<16x16xf32>
    %41 = tpu.reciprocal %38 {approx = true} : vector<16x1xf32> -> vector<16x1xf32>
    %42 = vector.broadcast %41 : vector<16x1xf32> to vector<16x16xf32>
    %43 = arith.mulf %40, %42 : vector<16x16xf32>
    %44 = vector.extract_strided_slice %9 {offsets = [0, 16], sizes = [16, 16], strides = [1, 1]} : vector<16x128xf32> to vector<16x16xf32>
    %45 = arith.truncf %44 : vector<16x16xf32> to vector<16x16xbf16>
    %46 = vector.extract_strided_slice %16 {offsets = [0, 16], sizes = [16, 16], strides = [1, 1]} : vector<16x128xf32> to vector<16x16xf32>
    %47 = arith.truncf %46 : vector<16x16xf32> to vector<16x16xbf16>
    %48 = vector.extract_strided_slice %17 {offsets = [0, 16], sizes = [16, 16], strides = [1, 1]} : vector<16x128xf32> to vector<16x16xf32>
    %49 = arith.truncf %48 : vector<16x16xf32> to vector<16x16xbf16>
    %cst_23 = arith.constant dense<0.000000e+00> : vector<16x16xf32>
    %50 = tpu.matmul %45, %47, %cst_23 {dimension_numbers = #tpu.dot_dimension_numbers<[1], [1], [0], [0], [0, 0, 1, 0], [], []>} : vector<16x16xbf16>, vector<16x16xbf16>, vector<16x16xf32> -> vector<16x16xf32>
    %cst_24 = arith.constant 2.500000e-01 : f32
    %51 = vector.broadcast %cst_24 : f32 to vector<16x16xf32>
    %52 = arith.mulf %50, %51 : vector<16x16xf32>
    %cst_25 = arith.constant -1.000000e+30 : f32
    %53 = vector.broadcast %cst_25 : f32 to vector<16x16xf32>
    %54 = arith.select %20, %52, %53 : vector<16x16xi1>, vector<16x16xf32>
    %cst_26 = arith.constant dense<0xFF800000> : vector<16xf32>
    %55 = vector.multi_reduction <maximumf>, %54, %cst_26 [1] : vector<16x16xf32> to vector<16xf32>
    %56 = vector.shape_cast %55 : vector<16xf32> to vector<16x1xf32>
    %57 = vector.broadcast %56 : vector<16x1xf32> to vector<16x16xf32>
    %58 = arith.subf %54, %57 : vector<16x16xf32>
    %59 = math.exp %58 : vector<16x16xf32>
    %cst_27 = arith.constant dense<0.000000e+00> : vector<16xf32>
    %60 = vector.multi_reduction <add>, %59, %cst_27 [1] : vector<16x16xf32> to vector<16xf32>
    %61 = vector.shape_cast %60 : vector<16xf32> to vector<16x1xf32>
    %62 = arith.truncf %59 : vector<16x16xf32> to vector<16x16xbf16>
    %cst_28 = arith.constant dense<0.000000e+00> : vector<16x16xf32>
    %63 = tpu.matmul %62, %49, %cst_28 {dimension_numbers = #tpu.dot_dimension_numbers<[1], [0], [0], [1], [0, 0, 1, 1], [], []>} : vector<16x16xbf16>, vector<16x16xbf16>, vector<16x16xf32> -> vector<16x16xf32>
    %64 = tpu.reciprocal %61 {approx = true} : vector<16x1xf32> -> vector<16x1xf32>
    %65 = vector.broadcast %64 : vector<16x1xf32> to vector<16x16xf32>
    %66 = arith.mulf %63, %65 : vector<16x16xf32>
    %67 = vector.extract_strided_slice %9 {offsets = [0, 32], sizes = [16, 16], strides = [1, 1]} : vector<16x128xf32> to vector<16x16xf32>
    %68 = arith.truncf %67 : vector<16x16xf32> to vector<16x16xbf16>
    %69 = vector.extract_strided_slice %16 {offsets = [0, 32], sizes = [16, 16], strides = [1, 1]} : vector<16x128xf32> to vector<16x16xf32>
    %70 = arith.truncf %69 : vector<16x16xf32> to vector<16x16xbf16>
    %71 = vector.extract_strided_slice %17 {offsets = [0, 32], sizes = [16, 16], strides = [1, 1]} : vector<16x128xf32> to vector<16x16xf32>
    %72 = arith.truncf %71 : vector<16x16xf32> to vector<16x16xbf16>
    %cst_29 = arith.constant dense<0.000000e+00> : vector<16x16xf32>
    %73 = tpu.matmul %68, %70, %cst_29 {dimension_numbers = #tpu.dot_dimension_numbers<[1], [1], [0], [0], [0, 0, 1, 0], [], []>} : vector<16x16xbf16>, vector<16x16xbf16>, vector<16x16xf32> -> vector<16x16xf32>
    %cst_30 = arith.constant 2.500000e-01 : f32
    %74 = vector.broadcast %cst_30 : f32 to vector<16x16xf32>
    %75 = arith.mulf %73, %74 : vector<16x16xf32>
    %cst_31 = arith.constant -1.000000e+30 : f32
    %76 = vector.broadcast %cst_31 : f32 to vector<16x16xf32>
    %77 = arith.select %20, %75, %76 : vector<16x16xi1>, vector<16x16xf32>
    %cst_32 = arith.constant dense<0xFF800000> : vector<16xf32>
    %78 = vector.multi_reduction <maximumf>, %77, %cst_32 [1] : vector<16x16xf32> to vector<16xf32>
    %79 = vector.shape_cast %78 : vector<16xf32> to vector<16x1xf32>
    %80 = vector.broadcast %79 : vector<16x1xf32> to vector<16x16xf32>
    %81 = arith.subf %77, %80 : vector<16x16xf32>
    %82 = math.exp %81 : vector<16x16xf32>
    %cst_33 = arith.constant dense<0.000000e+00> : vector<16xf32>
    %83 = vector.multi_reduction <add>, %82, %cst_33 [1] : vector<16x16xf32> to vector<16xf32>
    %84 = vector.shape_cast %83 : vector<16xf32> to vector<16x1xf32>
    %85 = arith.truncf %82 : vector<16x16xf32> to vector<16x16xbf16>
    %cst_34 = arith.constant dense<0.000000e+00> : vector<16x16xf32>
    %86 = tpu.matmul %85, %72, %cst_34 {dimension_numbers = #tpu.dot_dimension_numbers<[1], [0], [0], [1], [0, 0, 1, 1], [], []>} : vector<16x16xbf16>, vector<16x16xbf16>, vector<16x16xf32> -> vector<16x16xf32>
    %87 = tpu.reciprocal %84 {approx = true} : vector<16x1xf32> -> vector<16x1xf32>
    %88 = vector.broadcast %87 : vector<16x1xf32> to vector<16x16xf32>
    %89 = arith.mulf %86, %88 : vector<16x16xf32>
    %90 = vector.extract_strided_slice %9 {offsets = [0, 48], sizes = [16, 16], strides = [1, 1]} : vector<16x128xf32> to vector<16x16xf32>
    %91 = arith.truncf %90 : vector<16x16xf32> to vector<16x16xbf16>
    %92 = vector.extract_strided_slice %16 {offsets = [0, 48], sizes = [16, 16], strides = [1, 1]} : vector<16x128xf32> to vector<16x16xf32>
    %93 = arith.truncf %92 : vector<16x16xf32> to vector<16x16xbf16>
    %94 = vector.extract_strided_slice %17 {offsets = [0, 48], sizes = [16, 16], strides = [1, 1]} : vector<16x128xf32> to vector<16x16xf32>
    %95 = arith.truncf %94 : vector<16x16xf32> to vector<16x16xbf16>
    %cst_35 = arith.constant dense<0.000000e+00> : vector<16x16xf32>
    %96 = tpu.matmul %91, %93, %cst_35 {dimension_numbers = #tpu.dot_dimension_numbers<[1], [1], [0], [0], [0, 0, 1, 0], [], []>} : vector<16x16xbf16>, vector<16x16xbf16>, vector<16x16xf32> -> vector<16x16xf32>
    %cst_36 = arith.constant 2.500000e-01 : f32
    %97 = vector.broadcast %cst_36 : f32 to vector<16x16xf32>
    %98 = arith.mulf %96, %97 : vector<16x16xf32>
    %cst_37 = arith.constant -1.000000e+30 : f32
    %99 = vector.broadcast %cst_37 : f32 to vector<16x16xf32>
    %100 = arith.select %20, %98, %99 : vector<16x16xi1>, vector<16x16xf32>
    %cst_38 = arith.constant dense<0xFF800000> : vector<16xf32>
    %101 = vector.multi_reduction <maximumf>, %100, %cst_38 [1] : vector<16x16xf32> to vector<16xf32>
    %102 = vector.shape_cast %101 : vector<16xf32> to vector<16x1xf32>
    %103 = vector.broadcast %102 : vector<16x1xf32> to vector<16x16xf32>
    %104 = arith.subf %100, %103 : vector<16x16xf32>
    %105 = math.exp %104 : vector<16x16xf32>
    %cst_39 = arith.constant dense<0.000000e+00> : vector<16xf32>
    %106 = vector.multi_reduction <add>, %105, %cst_39 [1] : vector<16x16xf32> to vector<16xf32>
    %107 = vector.shape_cast %106 : vector<16xf32> to vector<16x1xf32>
    %108 = arith.truncf %105 : vector<16x16xf32> to vector<16x16xbf16>
    %cst_40 = arith.constant dense<0.000000e+00> : vector<16x16xf32>
    %109 = tpu.matmul %108, %95, %cst_40 {dimension_numbers = #tpu.dot_dimension_numbers<[1], [0], [0], [1], [0, 0, 1, 1], [], []>} : vector<16x16xbf16>, vector<16x16xbf16>, vector<16x16xf32> -> vector<16x16xf32>
    %110 = tpu.reciprocal %107 {approx = true} : vector<16x1xf32> -> vector<16x1xf32>
    %111 = vector.broadcast %110 : vector<16x1xf32> to vector<16x16xf32>
    %112 = arith.mulf %109, %111 : vector<16x16xf32>
    %113 = vector.extract_strided_slice %9 {offsets = [0, 64], sizes = [16, 16], strides = [1, 1]} : vector<16x128xf32> to vector<16x16xf32>
    %114 = arith.truncf %113 : vector<16x16xf32> to vector<16x16xbf16>
    %115 = vector.extract_strided_slice %16 {offsets = [0, 64], sizes = [16, 16], strides = [1, 1]} : vector<16x128xf32> to vector<16x16xf32>
    %116 = arith.truncf %115 : vector<16x16xf32> to vector<16x16xbf16>
    %117 = vector.extract_strided_slice %17 {offsets = [0, 64], sizes = [16, 16], strides = [1, 1]} : vector<16x128xf32> to vector<16x16xf32>
    %118 = arith.truncf %117 : vector<16x16xf32> to vector<16x16xbf16>
    %cst_41 = arith.constant dense<0.000000e+00> : vector<16x16xf32>
    %119 = tpu.matmul %114, %116, %cst_41 {dimension_numbers = #tpu.dot_dimension_numbers<[1], [1], [0], [0], [0, 0, 1, 0], [], []>} : vector<16x16xbf16>, vector<16x16xbf16>, vector<16x16xf32> -> vector<16x16xf32>
    %cst_42 = arith.constant 2.500000e-01 : f32
    %120 = vector.broadcast %cst_42 : f32 to vector<16x16xf32>
    %121 = arith.mulf %119, %120 : vector<16x16xf32>
    %cst_43 = arith.constant -1.000000e+30 : f32
    %122 = vector.broadcast %cst_43 : f32 to vector<16x16xf32>
    %123 = arith.select %20, %121, %122 : vector<16x16xi1>, vector<16x16xf32>
    %cst_44 = arith.constant dense<0xFF800000> : vector<16xf32>
    %124 = vector.multi_reduction <maximumf>, %123, %cst_44 [1] : vector<16x16xf32> to vector<16xf32>
    %125 = vector.shape_cast %124 : vector<16xf32> to vector<16x1xf32>
    %126 = vector.broadcast %125 : vector<16x1xf32> to vector<16x16xf32>
    %127 = arith.subf %123, %126 : vector<16x16xf32>
    %128 = math.exp %127 : vector<16x16xf32>
    %cst_45 = arith.constant dense<0.000000e+00> : vector<16xf32>
    %129 = vector.multi_reduction <add>, %128, %cst_45 [1] : vector<16x16xf32> to vector<16xf32>
    %130 = vector.shape_cast %129 : vector<16xf32> to vector<16x1xf32>
    %131 = arith.truncf %128 : vector<16x16xf32> to vector<16x16xbf16>
    %cst_46 = arith.constant dense<0.000000e+00> : vector<16x16xf32>
    %132 = tpu.matmul %131, %118, %cst_46 {dimension_numbers = #tpu.dot_dimension_numbers<[1], [0], [0], [1], [0, 0, 1, 1], [], []>} : vector<16x16xbf16>, vector<16x16xbf16>, vector<16x16xf32> -> vector<16x16xf32>
    %133 = tpu.reciprocal %130 {approx = true} : vector<16x1xf32> -> vector<16x1xf32>
    %134 = vector.broadcast %133 : vector<16x1xf32> to vector<16x16xf32>
    %135 = arith.mulf %132, %134 : vector<16x16xf32>
    %136 = vector.extract_strided_slice %9 {offsets = [0, 80], sizes = [16, 16], strides = [1, 1]} : vector<16x128xf32> to vector<16x16xf32>
    %137 = arith.truncf %136 : vector<16x16xf32> to vector<16x16xbf16>
    %138 = vector.extract_strided_slice %16 {offsets = [0, 80], sizes = [16, 16], strides = [1, 1]} : vector<16x128xf32> to vector<16x16xf32>
    %139 = arith.truncf %138 : vector<16x16xf32> to vector<16x16xbf16>
    %140 = vector.extract_strided_slice %17 {offsets = [0, 80], sizes = [16, 16], strides = [1, 1]} : vector<16x128xf32> to vector<16x16xf32>
    %141 = arith.truncf %140 : vector<16x16xf32> to vector<16x16xbf16>
    %cst_47 = arith.constant dense<0.000000e+00> : vector<16x16xf32>
    %142 = tpu.matmul %137, %139, %cst_47 {dimension_numbers = #tpu.dot_dimension_numbers<[1], [1], [0], [0], [0, 0, 1, 0], [], []>} : vector<16x16xbf16>, vector<16x16xbf16>, vector<16x16xf32> -> vector<16x16xf32>
    %cst_48 = arith.constant 2.500000e-01 : f32
    %143 = vector.broadcast %cst_48 : f32 to vector<16x16xf32>
    %144 = arith.mulf %142, %143 : vector<16x16xf32>
    %cst_49 = arith.constant -1.000000e+30 : f32
    %145 = vector.broadcast %cst_49 : f32 to vector<16x16xf32>
    %146 = arith.select %20, %144, %145 : vector<16x16xi1>, vector<16x16xf32>
    %cst_50 = arith.constant dense<0xFF800000> : vector<16xf32>
    %147 = vector.multi_reduction <maximumf>, %146, %cst_50 [1] : vector<16x16xf32> to vector<16xf32>
    %148 = vector.shape_cast %147 : vector<16xf32> to vector<16x1xf32>
    %149 = vector.broadcast %148 : vector<16x1xf32> to vector<16x16xf32>
    %150 = arith.subf %146, %149 : vector<16x16xf32>
    %151 = math.exp %150 : vector<16x16xf32>
    %cst_51 = arith.constant dense<0.000000e+00> : vector<16xf32>
    %152 = vector.multi_reduction <add>, %151, %cst_51 [1] : vector<16x16xf32> to vector<16xf32>
    %153 = vector.shape_cast %152 : vector<16xf32> to vector<16x1xf32>
    %154 = arith.truncf %151 : vector<16x16xf32> to vector<16x16xbf16>
    %cst_52 = arith.constant dense<0.000000e+00> : vector<16x16xf32>
    %155 = tpu.matmul %154, %141, %cst_52 {dimension_numbers = #tpu.dot_dimension_numbers<[1], [0], [0], [1], [0, 0, 1, 1], [], []>} : vector<16x16xbf16>, vector<16x16xbf16>, vector<16x16xf32> -> vector<16x16xf32>
    %156 = tpu.reciprocal %153 {approx = true} : vector<16x1xf32> -> vector<16x1xf32>
    %157 = vector.broadcast %156 : vector<16x1xf32> to vector<16x16xf32>
    %158 = arith.mulf %155, %157 : vector<16x16xf32>
    %159 = vector.extract_strided_slice %9 {offsets = [0, 96], sizes = [16, 16], strides = [1, 1]} : vector<16x128xf32> to vector<16x16xf32>
    %160 = arith.truncf %159 : vector<16x16xf32> to vector<16x16xbf16>
    %161 = vector.extract_strided_slice %16 {offsets = [0, 96], sizes = [16, 16], strides = [1, 1]} : vector<16x128xf32> to vector<16x16xf32>
    %162 = arith.truncf %161 : vector<16x16xf32> to vector<16x16xbf16>
    %163 = vector.extract_strided_slice %17 {offsets = [0, 96], sizes = [16, 16], strides = [1, 1]} : vector<16x128xf32> to vector<16x16xf32>
    %164 = arith.truncf %163 : vector<16x16xf32> to vector<16x16xbf16>
    %cst_53 = arith.constant dense<0.000000e+00> : vector<16x16xf32>
    %165 = tpu.matmul %160, %162, %cst_53 {dimension_numbers = #tpu.dot_dimension_numbers<[1], [1], [0], [0], [0, 0, 1, 0], [], []>} : vector<16x16xbf16>, vector<16x16xbf16>, vector<16x16xf32> -> vector<16x16xf32>
    %cst_54 = arith.constant 2.500000e-01 : f32
    %166 = vector.broadcast %cst_54 : f32 to vector<16x16xf32>
    %167 = arith.mulf %165, %166 : vector<16x16xf32>
    %cst_55 = arith.constant -1.000000e+30 : f32
    %168 = vector.broadcast %cst_55 : f32 to vector<16x16xf32>
    %169 = arith.select %20, %167, %168 : vector<16x16xi1>, vector<16x16xf32>
    %cst_56 = arith.constant dense<0xFF800000> : vector<16xf32>
    %170 = vector.multi_reduction <maximumf>, %169, %cst_56 [1] : vector<16x16xf32> to vector<16xf32>
    %171 = vector.shape_cast %170 : vector<16xf32> to vector<16x1xf32>
    %172 = vector.broadcast %171 : vector<16x1xf32> to vector<16x16xf32>
    %173 = arith.subf %169, %172 : vector<16x16xf32>
    %174 = math.exp %173 : vector<16x16xf32>
    %cst_57 = arith.constant dense<0.000000e+00> : vector<16xf32>
    %175 = vector.multi_reduction <add>, %174, %cst_57 [1] : vector<16x16xf32> to vector<16xf32>
    %176 = vector.shape_cast %175 : vector<16xf32> to vector<16x1xf32>
    %177 = arith.truncf %174 : vector<16x16xf32> to vector<16x16xbf16>
    %cst_58 = arith.constant dense<0.000000e+00> : vector<16x16xf32>
    %178 = tpu.matmul %177, %164, %cst_58 {dimension_numbers = #tpu.dot_dimension_numbers<[1], [0], [0], [1], [0, 0, 1, 1], [], []>} : vector<16x16xbf16>, vector<16x16xbf16>, vector<16x16xf32> -> vector<16x16xf32>
    %179 = tpu.reciprocal %176 {approx = true} : vector<16x1xf32> -> vector<16x1xf32>
    %180 = vector.broadcast %179 : vector<16x1xf32> to vector<16x16xf32>
    %181 = arith.mulf %178, %180 : vector<16x16xf32>
    %182 = vector.extract_strided_slice %9 {offsets = [0, 112], sizes = [16, 16], strides = [1, 1]} : vector<16x128xf32> to vector<16x16xf32>
    %183 = arith.truncf %182 : vector<16x16xf32> to vector<16x16xbf16>
    %184 = vector.extract_strided_slice %16 {offsets = [0, 112], sizes = [16, 16], strides = [1, 1]} : vector<16x128xf32> to vector<16x16xf32>
    %185 = arith.truncf %184 : vector<16x16xf32> to vector<16x16xbf16>
    %186 = vector.extract_strided_slice %17 {offsets = [0, 112], sizes = [16, 16], strides = [1, 1]} : vector<16x128xf32> to vector<16x16xf32>
    %187 = arith.truncf %186 : vector<16x16xf32> to vector<16x16xbf16>
    %cst_59 = arith.constant dense<0.000000e+00> : vector<16x16xf32>
    %188 = tpu.matmul %183, %185, %cst_59 {dimension_numbers = #tpu.dot_dimension_numbers<[1], [1], [0], [0], [0, 0, 1, 0], [], []>} : vector<16x16xbf16>, vector<16x16xbf16>, vector<16x16xf32> -> vector<16x16xf32>
    %cst_60 = arith.constant 2.500000e-01 : f32
    %189 = vector.broadcast %cst_60 : f32 to vector<16x16xf32>
    %190 = arith.mulf %188, %189 : vector<16x16xf32>
    %cst_61 = arith.constant -1.000000e+30 : f32
    %191 = vector.broadcast %cst_61 : f32 to vector<16x16xf32>
    %192 = arith.select %20, %190, %191 : vector<16x16xi1>, vector<16x16xf32>
    %cst_62 = arith.constant dense<0xFF800000> : vector<16xf32>
    %193 = vector.multi_reduction <maximumf>, %192, %cst_62 [1] : vector<16x16xf32> to vector<16xf32>
    %194 = vector.shape_cast %193 : vector<16xf32> to vector<16x1xf32>
    %195 = vector.broadcast %194 : vector<16x1xf32> to vector<16x16xf32>
    %196 = arith.subf %192, %195 : vector<16x16xf32>
    %197 = math.exp %196 : vector<16x16xf32>
    %cst_63 = arith.constant dense<0.000000e+00> : vector<16xf32>
    %198 = vector.multi_reduction <add>, %197, %cst_63 [1] : vector<16x16xf32> to vector<16xf32>
    %199 = vector.shape_cast %198 : vector<16xf32> to vector<16x1xf32>
    %200 = arith.truncf %197 : vector<16x16xf32> to vector<16x16xbf16>
    %cst_64 = arith.constant dense<0.000000e+00> : vector<16x16xf32>
    %201 = tpu.matmul %200, %187, %cst_64 {dimension_numbers = #tpu.dot_dimension_numbers<[1], [0], [0], [1], [0, 0, 1, 1], [], []>} : vector<16x16xbf16>, vector<16x16xbf16>, vector<16x16xf32> -> vector<16x16xf32>
    %202 = tpu.reciprocal %199 {approx = true} : vector<16x1xf32> -> vector<16x1xf32>
    %203 = vector.broadcast %202 : vector<16x1xf32> to vector<16x16xf32>
    %204 = arith.mulf %201, %203 : vector<16x16xf32>
    %205 = tpu.concatenate %43, %66, %89, %112, %135, %158, %181, %204 in 1 : vector<16x16xf32>, vector<16x16xf32>, vector<16x16xf32>, vector<16x16xf32>, vector<16x16xf32>, vector<16x16xf32>, vector<16x16xf32>, vector<16x16xf32> -> vector<16x128xf32>
    %206 = arith.truncf %205 : vector<16x128xf32> to vector<16x128xbf16>
    %c0_65 = arith.constant 0 : index
    %c0_66 = arith.constant 0 : index
    %207 = vector.load %arg5[%c0_65, %c0_66] : memref<128x128xbf16, #tpu.memory_space<vmem>>, vector<128x128xbf16>
    %cst_67 = arith.constant dense<0.000000e+00> : vector<16x128xf32>
    %208 = tpu.matmul %206, %207, %cst_67 {dimension_numbers = #tpu.dot_dimension_numbers<[1], [0], [0], [1], [0, 0, 1, 1], [], []>} : vector<16x128xbf16>, vector<128x128xbf16>, vector<16x128xf32> -> vector<16x128xf32>
    %c0_68 = arith.constant 0 : index
    %c0_69 = arith.constant 0 : index
    %209 = vector.load %arg6[%c0_68, %c0_69] : memref<1x128xf32, #tpu.memory_space<vmem>>, vector<1x128xf32>
    %210 = vector.broadcast %209 : vector<1x128xf32> to vector<16x128xf32>
    %211 = arith.addf %208, %210 : vector<16x128xf32>
    %212 = arith.addf %0, %211 : vector<16x128xf32>
    %cst_70 = arith.constant dense<0.000000e+00> : vector<16xf32>
    %213 = vector.multi_reduction <add>, %212, %cst_70 [1] : vector<16x128xf32> to vector<16xf32>
    %214 = vector.shape_cast %213 : vector<16xf32> to vector<16x1xf32>
    %cst_71 = arith.constant 1.280000e+02 : f32
    %215 = vector.broadcast %cst_71 : f32 to vector<16x1xf32>
    %216 = arith.divf %214, %215 : vector<16x1xf32>
    %217 = vector.broadcast %216 : vector<16x1xf32> to vector<16x128xf32>
    %218 = arith.subf %212, %217 : vector<16x128xf32>
    %219 = arith.mulf %218, %218 : vector<16x128xf32>
    %cst_72 = arith.constant dense<0.000000e+00> : vector<16xf32>
    %220 = vector.multi_reduction <add>, %219, %cst_72 [1] : vector<16x128xf32> to vector<16xf32>
    %221 = vector.shape_cast %220 : vector<16xf32> to vector<16x1xf32>
    %cst_73 = arith.constant 1.280000e+02 : f32
    %222 = vector.broadcast %cst_73 : f32 to vector<16x1xf32>
    %223 = arith.divf %221, %222 : vector<16x1xf32>
    %cst_74 = arith.constant 9.99999974E-6 : f32
    %224 = vector.broadcast %cst_74 : f32 to vector<16x1xf32>
    %225 = arith.addf %223, %224 : vector<16x1xf32>
    %226 = math.rsqrt %225 : vector<16x1xf32>
    %227 = vector.broadcast %226 : vector<16x1xf32> to vector<16x128xf32>
    %228 = arith.mulf %218, %227 : vector<16x128xf32>
    %229 = vector.broadcast %1 : vector<1x128xf32> to vector<16x128xf32>
    %230 = arith.mulf %228, %229 : vector<16x128xf32>
    %231 = vector.broadcast %2 : vector<1x128xf32> to vector<16x128xf32>
    %232 = arith.addf %230, %231 : vector<16x128xf32>
    %c0_75 = arith.constant 0 : index
    %c0_76 = arith.constant 0 : index
    %233 = vector.load %arg9[%c0_75, %c0_76] : memref<16x128xf32, #tpu.memory_space<vmem>>, vector<16x128xf32>
    tpu.vector_store %arg9[%c0_75, %c0_76], %232 {strides = array<i32>} : memref<16x128xf32, #tpu.memory_space<vmem>>, vector<16x128xf32>,
    return
  }
}

module attributes {stable_mosaic.version = 11 : i64} {
  func.func @kernel(%arg0: memref<16x128xf32, #tpu.memory_space<vmem>>, %arg1: memref<16x128xf32, #tpu.memory_space<vmem>>, %arg2: memref<16x16xi32, #tpu.memory_space<vmem>>, %arg3: memref<128x384xbf16, #tpu.memory_space<vmem>>, %arg4: memref<1x384xf32, #tpu.memory_space<vmem>>, %arg5: memref<128x128xbf16, #tpu.memory_space<vmem>>, %arg6: memref<1x128xf32, #tpu.memory_space<vmem>>, %arg7: memref<1x128xf32, #tpu.memory_space<vmem>>, %arg8: memref<1x128xf32, #tpu.memory_space<vmem>>, %arg9: memref<16x128xf32, #tpu.memory_space<vmem>>) attributes {dimension_semantics = [], scalar_prefetch = 0 : i64, scratch_operands = 0 : i64, tpu.core_type = #tpu.core_type<tc>} {
    %c0 = arith.constant 0 : index
    %c0_0 = arith.constant 0 : index
    %0 = vector.load %arg0[%c0, %c0_0] : memref<16x128xf32, #tpu.memory_space<vmem>>, vector<16x128xf32>
    %c0_1 = arith.constant 0 : index
    %c0_2 = arith.constant 0 : index
    %1 = vector.load %arg7[%c0_1, %c0_2] : memref<1x128xf32, #tpu.memory_space<vmem>>, vector<1x128xf32>
    %c0_3 = arith.constant 0 : index
    %c0_4 = arith.constant 0 : index
    %2 = vector.load %arg8[%c0_3, %c0_4] : memref<1x128xf32, #tpu.memory_space<vmem>>, vector<1x128xf32>
    %3 = arith.truncf %0 : vector<16x128xf32> to vector<16x128xbf16>
    %c0_5 = arith.constant 0 : index
    %c0_6 = arith.constant 0 : index
    %4 = vector.load %arg3[%c0_5, %c0_6] : memref<128x384xbf16, #tpu.memory_space<vmem>>, vector<128x384xbf16>
    %cst = arith.constant dense<0.000000e+00> : vector<16x384xf32>
    %5 = tpu.matmul %3, %4, %cst {dimension_numbers = #tpu.dot_dimension_numbers<[1], [0], [0], [1], [0, 0, 1, 1], [], []>} : vector<16x128xbf16>, vector<128x384xbf16>, vector<16x384xf32> -> vector<16x384xf32>
    %c0_7 = arith.constant 0 : index
    %c0_8 = arith.constant 0 : index
    %6 = vector.load %arg4[%c0_7, %c0_8] : memref<1x384xf32, #tpu.memory_space<vmem>>, vector<1x384xf32>
    %7 = vector.broadcast %6 : vector<1x384xf32> to vector<16x384xf32>
    %8 = arith.addf %5, %7 : vector<16x384xf32>
    %9 = vector.extract_strided_slice %8 {offsets = [0, 0], sizes = [16, 128], strides = [1, 1]} : vector<16x384xf32> to vector<16x128xf32>
    %10 = vector.extract_strided_slice %8 {offsets = [0, 128], sizes = [16, 128], strides = [1, 1]} : vector<16x384xf32> to vector<16x128xf32>
    %11 = vector.extract_strided_slice %8 {offsets = [0, 256], sizes = [16, 128], strides = [1, 1]} : vector<16x384xf32> to vector<16x128xf32>
    %c0_9 = arith.constant 0 : index
    %c0_10 = arith.constant 0 : index
    %12 = vector.load %arg2[%c0_9, %c0_10] : memref<16x16xi32, #tpu.memory_space<vmem>>, vector<16x16xi32>
    %c0_i32 = arith.constant 0 : i32
    %13 = vector.broadcast %c0_i32 : i32 to vector<16x16xi32>
    %14 = arith.cmpi ne, %12, %13 : vector<16x16xi32>
    %15 = vector.extract_strided_slice %9 {offsets = [0, 0], sizes = [16, 16], strides = [1, 1]} : vector<16x128xf32> to vector<16x16xf32>
    %16 = arith.truncf %15 : vector<16x16xf32> to vector<16x16xbf16>
    %17 = vector.extract_strided_slice %10 {offsets = [0, 0], sizes = [16, 16], strides = [1, 1]} : vector<16x128xf32> to vector<16x16xf32>
    %18 = arith.truncf %17 : vector<16x16xf32> to vector<16x16xbf16>
    %19 = vector.extract_strided_slice %11 {offsets = [0, 0], sizes = [16, 16], strides = [1, 1]} : vector<16x128xf32> to vector<16x16xf32>
    %20 = arith.truncf %19 : vector<16x16xf32> to vector<16x16xbf16>
    %cst_11 = arith.constant dense<0.000000e+00> : vector<16x16xf32>
    %21 = tpu.matmul %16, %18, %cst_11 {dimension_numbers = #tpu.dot_dimension_numbers<[1], [1], [0], [0], [0, 0, 1, 0], [], []>} : vector<16x16xbf16>, vector<16x16xbf16>, vector<16x16xf32> -> vector<16x16xf32>
    %cst_12 = arith.constant 2.500000e-01 : f32
    %22 = vector.broadcast %cst_12 : f32 to vector<16x16xf32>
    %23 = arith.mulf %21, %22 : vector<16x16xf32>
    %cst_13 = arith.constant -1.000000e+30 : f32
    %24 = vector.broadcast %cst_13 : f32 to vector<16x16xf32>
    %25 = arith.select %14, %23, %24 : vector<16x16xi1>, vector<16x16xf32>
    %cst_14 = arith.constant dense<0xFF800000> : vector<16xf32>
    %26 = vector.multi_reduction <maximumf>, %25, %cst_14 [1] : vector<16x16xf32> to vector<16xf32>
    %27 = vector.shape_cast %26 : vector<16xf32> to vector<16x1xf32>
    %28 = vector.broadcast %27 : vector<16x1xf32> to vector<16x16xf32>
    %29 = arith.subf %25, %28 : vector<16x16xf32>
    %30 = math.exp %29 : vector<16x16xf32>
    %cst_15 = arith.constant dense<0.000000e+00> : vector<16xf32>
    %31 = vector.multi_reduction <add>, %30, %cst_15 [1] : vector<16x16xf32> to vector<16xf32>
    %32 = vector.shape_cast %31 : vector<16xf32> to vector<16x1xf32>
    %33 = arith.truncf %30 : vector<16x16xf32> to vector<16x16xbf16>
    %cst_16 = arith.constant dense<0.000000e+00> : vector<16x16xf32>
    %34 = tpu.matmul %33, %20, %cst_16 {dimension_numbers = #tpu.dot_dimension_numbers<[1], [0], [0], [1], [0, 0, 1, 1], [], []>} : vector<16x16xbf16>, vector<16x16xbf16>, vector<16x16xf32> -> vector<16x16xf32>
    %35 = tpu.reciprocal %32 {approx = true} : vector<16x1xf32> -> vector<16x1xf32>
    %36 = vector.broadcast %35 : vector<16x1xf32> to vector<16x16xf32>
    %37 = arith.mulf %34, %36 : vector<16x16xf32>
    %38 = vector.extract_strided_slice %9 {offsets = [0, 16], sizes = [16, 16], strides = [1, 1]} : vector<16x128xf32> to vector<16x16xf32>
    %39 = arith.truncf %38 : vector<16x16xf32> to vector<16x16xbf16>
    %40 = vector.extract_strided_slice %10 {offsets = [0, 16], sizes = [16, 16], strides = [1, 1]} : vector<16x128xf32> to vector<16x16xf32>
    %41 = arith.truncf %40 : vector<16x16xf32> to vector<16x16xbf16>
    %42 = vector.extract_strided_slice %11 {offsets = [0, 16], sizes = [16, 16], strides = [1, 1]} : vector<16x128xf32> to vector<16x16xf32>
    %43 = arith.truncf %42 : vector<16x16xf32> to vector<16x16xbf16>
    %cst_17 = arith.constant dense<0.000000e+00> : vector<16x16xf32>
    %44 = tpu.matmul %39, %41, %cst_17 {dimension_numbers = #tpu.dot_dimension_numbers<[1], [1], [0], [0], [0, 0, 1, 0], [], []>} : vector<16x16xbf16>, vector<16x16xbf16>, vector<16x16xf32> -> vector<16x16xf32>
    %cst_18 = arith.constant 2.500000e-01 : f32
    %45 = vector.broadcast %cst_18 : f32 to vector<16x16xf32>
    %46 = arith.mulf %44, %45 : vector<16x16xf32>
    %cst_19 = arith.constant -1.000000e+30 : f32
    %47 = vector.broadcast %cst_19 : f32 to vector<16x16xf32>
    %48 = arith.select %14, %46, %47 : vector<16x16xi1>, vector<16x16xf32>
    %cst_20 = arith.constant dense<0xFF800000> : vector<16xf32>
    %49 = vector.multi_reduction <maximumf>, %48, %cst_20 [1] : vector<16x16xf32> to vector<16xf32>
    %50 = vector.shape_cast %49 : vector<16xf32> to vector<16x1xf32>
    %51 = vector.broadcast %50 : vector<16x1xf32> to vector<16x16xf32>
    %52 = arith.subf %48, %51 : vector<16x16xf32>
    %53 = math.exp %52 : vector<16x16xf32>
    %cst_21 = arith.constant dense<0.000000e+00> : vector<16xf32>
    %54 = vector.multi_reduction <add>, %53, %cst_21 [1] : vector<16x16xf32> to vector<16xf32>
    %55 = vector.shape_cast %54 : vector<16xf32> to vector<16x1xf32>
    %56 = arith.truncf %53 : vector<16x16xf32> to vector<16x16xbf16>
    %cst_22 = arith.constant dense<0.000000e+00> : vector<16x16xf32>
    %57 = tpu.matmul %56, %43, %cst_22 {dimension_numbers = #tpu.dot_dimension_numbers<[1], [0], [0], [1], [0, 0, 1, 1], [], []>} : vector<16x16xbf16>, vector<16x16xbf16>, vector<16x16xf32> -> vector<16x16xf32>
    %58 = tpu.reciprocal %55 {approx = true} : vector<16x1xf32> -> vector<16x1xf32>
    %59 = vector.broadcast %58 : vector<16x1xf32> to vector<16x16xf32>
    %60 = arith.mulf %57, %59 : vector<16x16xf32>
    %61 = vector.extract_strided_slice %9 {offsets = [0, 32], sizes = [16, 16], strides = [1, 1]} : vector<16x128xf32> to vector<16x16xf32>
    %62 = arith.truncf %61 : vector<16x16xf32> to vector<16x16xbf16>
    %63 = vector.extract_strided_slice %10 {offsets = [0, 32], sizes = [16, 16], strides = [1, 1]} : vector<16x128xf32> to vector<16x16xf32>
    %64 = arith.truncf %63 : vector<16x16xf32> to vector<16x16xbf16>
    %65 = vector.extract_strided_slice %11 {offsets = [0, 32], sizes = [16, 16], strides = [1, 1]} : vector<16x128xf32> to vector<16x16xf32>
    %66 = arith.truncf %65 : vector<16x16xf32> to vector<16x16xbf16>
    %cst_23 = arith.constant dense<0.000000e+00> : vector<16x16xf32>
    %67 = tpu.matmul %62, %64, %cst_23 {dimension_numbers = #tpu.dot_dimension_numbers<[1], [1], [0], [0], [0, 0, 1, 0], [], []>} : vector<16x16xbf16>, vector<16x16xbf16>, vector<16x16xf32> -> vector<16x16xf32>
    %cst_24 = arith.constant 2.500000e-01 : f32
    %68 = vector.broadcast %cst_24 : f32 to vector<16x16xf32>
    %69 = arith.mulf %67, %68 : vector<16x16xf32>
    %cst_25 = arith.constant -1.000000e+30 : f32
    %70 = vector.broadcast %cst_25 : f32 to vector<16x16xf32>
    %71 = arith.select %14, %69, %70 : vector<16x16xi1>, vector<16x16xf32>
    %cst_26 = arith.constant dense<0xFF800000> : vector<16xf32>
    %72 = vector.multi_reduction <maximumf>, %71, %cst_26 [1] : vector<16x16xf32> to vector<16xf32>
    %73 = vector.shape_cast %72 : vector<16xf32> to vector<16x1xf32>
    %74 = vector.broadcast %73 : vector<16x1xf32> to vector<16x16xf32>
    %75 = arith.subf %71, %74 : vector<16x16xf32>
    %76 = math.exp %75 : vector<16x16xf32>
    %cst_27 = arith.constant dense<0.000000e+00> : vector<16xf32>
    %77 = vector.multi_reduction <add>, %76, %cst_27 [1] : vector<16x16xf32> to vector<16xf32>
    %78 = vector.shape_cast %77 : vector<16xf32> to vector<16x1xf32>
    %79 = arith.truncf %76 : vector<16x16xf32> to vector<16x16xbf16>
    %cst_28 = arith.constant dense<0.000000e+00> : vector<16x16xf32>
    %80 = tpu.matmul %79, %66, %cst_28 {dimension_numbers = #tpu.dot_dimension_numbers<[1], [0], [0], [1], [0, 0, 1, 1], [], []>} : vector<16x16xbf16>, vector<16x16xbf16>, vector<16x16xf32> -> vector<16x16xf32>
    %81 = tpu.reciprocal %78 {approx = true} : vector<16x1xf32> -> vector<16x1xf32>
    %82 = vector.broadcast %81 : vector<16x1xf32> to vector<16x16xf32>
    %83 = arith.mulf %80, %82 : vector<16x16xf32>
    %84 = vector.extract_strided_slice %9 {offsets = [0, 48], sizes = [16, 16], strides = [1, 1]} : vector<16x128xf32> to vector<16x16xf32>
    %85 = arith.truncf %84 : vector<16x16xf32> to vector<16x16xbf16>
    %86 = vector.extract_strided_slice %10 {offsets = [0, 48], sizes = [16, 16], strides = [1, 1]} : vector<16x128xf32> to vector<16x16xf32>
    %87 = arith.truncf %86 : vector<16x16xf32> to vector<16x16xbf16>
    %88 = vector.extract_strided_slice %11 {offsets = [0, 48], sizes = [16, 16], strides = [1, 1]} : vector<16x128xf32> to vector<16x16xf32>
    %89 = arith.truncf %88 : vector<16x16xf32> to vector<16x16xbf16>
    %cst_29 = arith.constant dense<0.000000e+00> : vector<16x16xf32>
    %90 = tpu.matmul %85, %87, %cst_29 {dimension_numbers = #tpu.dot_dimension_numbers<[1], [1], [0], [0], [0, 0, 1, 0], [], []>} : vector<16x16xbf16>, vector<16x16xbf16>, vector<16x16xf32> -> vector<16x16xf32>
    %cst_30 = arith.constant 2.500000e-01 : f32
    %91 = vector.broadcast %cst_30 : f32 to vector<16x16xf32>
    %92 = arith.mulf %90, %91 : vector<16x16xf32>
    %cst_31 = arith.constant -1.000000e+30 : f32
    %93 = vector.broadcast %cst_31 : f32 to vector<16x16xf32>
    %94 = arith.select %14, %92, %93 : vector<16x16xi1>, vector<16x16xf32>
    %cst_32 = arith.constant dense<0xFF800000> : vector<16xf32>
    %95 = vector.multi_reduction <maximumf>, %94, %cst_32 [1] : vector<16x16xf32> to vector<16xf32>
    %96 = vector.shape_cast %95 : vector<16xf32> to vector<16x1xf32>
    %97 = vector.broadcast %96 : vector<16x1xf32> to vector<16x16xf32>
    %98 = arith.subf %94, %97 : vector<16x16xf32>
    %99 = math.exp %98 : vector<16x16xf32>
    %cst_33 = arith.constant dense<0.000000e+00> : vector<16xf32>
    %100 = vector.multi_reduction <add>, %99, %cst_33 [1] : vector<16x16xf32> to vector<16xf32>
    %101 = vector.shape_cast %100 : vector<16xf32> to vector<16x1xf32>
    %102 = arith.truncf %99 : vector<16x16xf32> to vector<16x16xbf16>
    %cst_34 = arith.constant dense<0.000000e+00> : vector<16x16xf32>
    %103 = tpu.matmul %102, %89, %cst_34 {dimension_numbers = #tpu.dot_dimension_numbers<[1], [0], [0], [1], [0, 0, 1, 1], [], []>} : vector<16x16xbf16>, vector<16x16xbf16>, vector<16x16xf32> -> vector<16x16xf32>
    %104 = tpu.reciprocal %101 {approx = true} : vector<16x1xf32> -> vector<16x1xf32>
    %105 = vector.broadcast %104 : vector<16x1xf32> to vector<16x16xf32>
    %106 = arith.mulf %103, %105 : vector<16x16xf32>
    %107 = vector.extract_strided_slice %9 {offsets = [0, 64], sizes = [16, 16], strides = [1, 1]} : vector<16x128xf32> to vector<16x16xf32>
    %108 = arith.truncf %107 : vector<16x16xf32> to vector<16x16xbf16>
    %109 = vector.extract_strided_slice %10 {offsets = [0, 64], sizes = [16, 16], strides = [1, 1]} : vector<16x128xf32> to vector<16x16xf32>
    %110 = arith.truncf %109 : vector<16x16xf32> to vector<16x16xbf16>
    %111 = vector.extract_strided_slice %11 {offsets = [0, 64], sizes = [16, 16], strides = [1, 1]} : vector<16x128xf32> to vector<16x16xf32>
    %112 = arith.truncf %111 : vector<16x16xf32> to vector<16x16xbf16>
    %cst_35 = arith.constant dense<0.000000e+00> : vector<16x16xf32>
    %113 = tpu.matmul %108, %110, %cst_35 {dimension_numbers = #tpu.dot_dimension_numbers<[1], [1], [0], [0], [0, 0, 1, 0], [], []>} : vector<16x16xbf16>, vector<16x16xbf16>, vector<16x16xf32> -> vector<16x16xf32>
    %cst_36 = arith.constant 2.500000e-01 : f32
    %114 = vector.broadcast %cst_36 : f32 to vector<16x16xf32>
    %115 = arith.mulf %113, %114 : vector<16x16xf32>
    %cst_37 = arith.constant -1.000000e+30 : f32
    %116 = vector.broadcast %cst_37 : f32 to vector<16x16xf32>
    %117 = arith.select %14, %115, %116 : vector<16x16xi1>, vector<16x16xf32>
    %cst_38 = arith.constant dense<0xFF800000> : vector<16xf32>
    %118 = vector.multi_reduction <maximumf>, %117, %cst_38 [1] : vector<16x16xf32> to vector<16xf32>
    %119 = vector.shape_cast %118 : vector<16xf32> to vector<16x1xf32>
    %120 = vector.broadcast %119 : vector<16x1xf32> to vector<16x16xf32>
    %121 = arith.subf %117, %120 : vector<16x16xf32>
    %122 = math.exp %121 : vector<16x16xf32>
    %cst_39 = arith.constant dense<0.000000e+00> : vector<16xf32>
    %123 = vector.multi_reduction <add>, %122, %cst_39 [1] : vector<16x16xf32> to vector<16xf32>
    %124 = vector.shape_cast %123 : vector<16xf32> to vector<16x1xf32>
    %125 = arith.truncf %122 : vector<16x16xf32> to vector<16x16xbf16>
    %cst_40 = arith.constant dense<0.000000e+00> : vector<16x16xf32>
    %126 = tpu.matmul %125, %112, %cst_40 {dimension_numbers = #tpu.dot_dimension_numbers<[1], [0], [0], [1], [0, 0, 1, 1], [], []>} : vector<16x16xbf16>, vector<16x16xbf16>, vector<16x16xf32> -> vector<16x16xf32>
    %127 = tpu.reciprocal %124 {approx = true} : vector<16x1xf32> -> vector<16x1xf32>
    %128 = vector.broadcast %127 : vector<16x1xf32> to vector<16x16xf32>
    %129 = arith.mulf %126, %128 : vector<16x16xf32>
    %130 = vector.extract_strided_slice %9 {offsets = [0, 80], sizes = [16, 16], strides = [1, 1]} : vector<16x128xf32> to vector<16x16xf32>
    %131 = arith.truncf %130 : vector<16x16xf32> to vector<16x16xbf16>
    %132 = vector.extract_strided_slice %10 {offsets = [0, 80], sizes = [16, 16], strides = [1, 1]} : vector<16x128xf32> to vector<16x16xf32>
    %133 = arith.truncf %132 : vector<16x16xf32> to vector<16x16xbf16>
    %134 = vector.extract_strided_slice %11 {offsets = [0, 80], sizes = [16, 16], strides = [1, 1]} : vector<16x128xf32> to vector<16x16xf32>
    %135 = arith.truncf %134 : vector<16x16xf32> to vector<16x16xbf16>
    %cst_41 = arith.constant dense<0.000000e+00> : vector<16x16xf32>
    %136 = tpu.matmul %131, %133, %cst_41 {dimension_numbers = #tpu.dot_dimension_numbers<[1], [1], [0], [0], [0, 0, 1, 0], [], []>} : vector<16x16xbf16>, vector<16x16xbf16>, vector<16x16xf32> -> vector<16x16xf32>
    %cst_42 = arith.constant 2.500000e-01 : f32
    %137 = vector.broadcast %cst_42 : f32 to vector<16x16xf32>
    %138 = arith.mulf %136, %137 : vector<16x16xf32>
    %cst_43 = arith.constant -1.000000e+30 : f32
    %139 = vector.broadcast %cst_43 : f32 to vector<16x16xf32>
    %140 = arith.select %14, %138, %139 : vector<16x16xi1>, vector<16x16xf32>
    %cst_44 = arith.constant dense<0xFF800000> : vector<16xf32>
    %141 = vector.multi_reduction <maximumf>, %140, %cst_44 [1] : vector<16x16xf32> to vector<16xf32>
    %142 = vector.shape_cast %141 : vector<16xf32> to vector<16x1xf32>
    %143 = vector.broadcast %142 : vector<16x1xf32> to vector<16x16xf32>
    %144 = arith.subf %140, %143 : vector<16x16xf32>
    %145 = math.exp %144 : vector<16x16xf32>
    %cst_45 = arith.constant dense<0.000000e+00> : vector<16xf32>
    %146 = vector.multi_reduction <add>, %145, %cst_45 [1] : vector<16x16xf32> to vector<16xf32>
    %147 = vector.shape_cast %146 : vector<16xf32> to vector<16x1xf32>
    %148 = arith.truncf %145 : vector<16x16xf32> to vector<16x16xbf16>
    %cst_46 = arith.constant dense<0.000000e+00> : vector<16x16xf32>
    %149 = tpu.matmul %148, %135, %cst_46 {dimension_numbers = #tpu.dot_dimension_numbers<[1], [0], [0], [1], [0, 0, 1, 1], [], []>} : vector<16x16xbf16>, vector<16x16xbf16>, vector<16x16xf32> -> vector<16x16xf32>
    %150 = tpu.reciprocal %147 {approx = true} : vector<16x1xf32> -> vector<16x1xf32>
    %151 = vector.broadcast %150 : vector<16x1xf32> to vector<16x16xf32>
    %152 = arith.mulf %149, %151 : vector<16x16xf32>
    %153 = vector.extract_strided_slice %9 {offsets = [0, 96], sizes = [16, 16], strides = [1, 1]} : vector<16x128xf32> to vector<16x16xf32>
    %154 = arith.truncf %153 : vector<16x16xf32> to vector<16x16xbf16>
    %155 = vector.extract_strided_slice %10 {offsets = [0, 96], sizes = [16, 16], strides = [1, 1]} : vector<16x128xf32> to vector<16x16xf32>
    %156 = arith.truncf %155 : vector<16x16xf32> to vector<16x16xbf16>
    %157 = vector.extract_strided_slice %11 {offsets = [0, 96], sizes = [16, 16], strides = [1, 1]} : vector<16x128xf32> to vector<16x16xf32>
    %158 = arith.truncf %157 : vector<16x16xf32> to vector<16x16xbf16>
    %cst_47 = arith.constant dense<0.000000e+00> : vector<16x16xf32>
    %159 = tpu.matmul %154, %156, %cst_47 {dimension_numbers = #tpu.dot_dimension_numbers<[1], [1], [0], [0], [0, 0, 1, 0], [], []>} : vector<16x16xbf16>, vector<16x16xbf16>, vector<16x16xf32> -> vector<16x16xf32>
    %cst_48 = arith.constant 2.500000e-01 : f32
    %160 = vector.broadcast %cst_48 : f32 to vector<16x16xf32>
    %161 = arith.mulf %159, %160 : vector<16x16xf32>
    %cst_49 = arith.constant -1.000000e+30 : f32
    %162 = vector.broadcast %cst_49 : f32 to vector<16x16xf32>
    %163 = arith.select %14, %161, %162 : vector<16x16xi1>, vector<16x16xf32>
    %cst_50 = arith.constant dense<0xFF800000> : vector<16xf32>
    %164 = vector.multi_reduction <maximumf>, %163, %cst_50 [1] : vector<16x16xf32> to vector<16xf32>
    %165 = vector.shape_cast %164 : vector<16xf32> to vector<16x1xf32>
    %166 = vector.broadcast %165 : vector<16x1xf32> to vector<16x16xf32>
    %167 = arith.subf %163, %166 : vector<16x16xf32>
    %168 = math.exp %167 : vector<16x16xf32>
    %cst_51 = arith.constant dense<0.000000e+00> : vector<16xf32>
    %169 = vector.multi_reduction <add>, %168, %cst_51 [1] : vector<16x16xf32> to vector<16xf32>
    %170 = vector.shape_cast %169 : vector<16xf32> to vector<16x1xf32>
    %171 = arith.truncf %168 : vector<16x16xf32> to vector<16x16xbf16>
    %cst_52 = arith.constant dense<0.000000e+00> : vector<16x16xf32>
    %172 = tpu.matmul %171, %158, %cst_52 {dimension_numbers = #tpu.dot_dimension_numbers<[1], [0], [0], [1], [0, 0, 1, 1], [], []>} : vector<16x16xbf16>, vector<16x16xbf16>, vector<16x16xf32> -> vector<16x16xf32>
    %173 = tpu.reciprocal %170 {approx = true} : vector<16x1xf32> -> vector<16x1xf32>
    %174 = vector.broadcast %173 : vector<16x1xf32> to vector<16x16xf32>
    %175 = arith.mulf %172, %174 : vector<16x16xf32>
    %176 = vector.extract_strided_slice %9 {offsets = [0, 112], sizes = [16, 16], strides = [1, 1]} : vector<16x128xf32> to vector<16x16xf32>
    %177 = arith.truncf %176 : vector<16x16xf32> to vector<16x16xbf16>
    %178 = vector.extract_strided_slice %10 {offsets = [0, 112], sizes = [16, 16], strides = [1, 1]} : vector<16x128xf32> to vector<16x16xf32>
    %179 = arith.truncf %178 : vector<16x16xf32> to vector<16x16xbf16>
    %180 = vector.extract_strided_slice %11 {offsets = [0, 112], sizes = [16, 16], strides = [1, 1]} : vector<16x128xf32> to vector<16x16xf32>
    %181 = arith.truncf %180 : vector<16x16xf32> to vector<16x16xbf16>
    %cst_53 = arith.constant dense<0.000000e+00> : vector<16x16xf32>
    %182 = tpu.matmul %177, %179, %cst_53 {dimension_numbers = #tpu.dot_dimension_numbers<[1], [1], [0], [0], [0, 0, 1, 0], [], []>} : vector<16x16xbf16>, vector<16x16xbf16>, vector<16x16xf32> -> vector<16x16xf32>
    %cst_54 = arith.constant 2.500000e-01 : f32
    %183 = vector.broadcast %cst_54 : f32 to vector<16x16xf32>
    %184 = arith.mulf %182, %183 : vector<16x16xf32>
    %cst_55 = arith.constant -1.000000e+30 : f32
    %185 = vector.broadcast %cst_55 : f32 to vector<16x16xf32>
    %186 = arith.select %14, %184, %185 : vector<16x16xi1>, vector<16x16xf32>
    %cst_56 = arith.constant dense<0xFF800000> : vector<16xf32>
    %187 = vector.multi_reduction <maximumf>, %186, %cst_56 [1] : vector<16x16xf32> to vector<16xf32>
    %188 = vector.shape_cast %187 : vector<16xf32> to vector<16x1xf32>
    %189 = vector.broadcast %188 : vector<16x1xf32> to vector<16x16xf32>
    %190 = arith.subf %186, %189 : vector<16x16xf32>
    %191 = math.exp %190 : vector<16x16xf32>
    %cst_57 = arith.constant dense<0.000000e+00> : vector<16xf32>
    %192 = vector.multi_reduction <add>, %191, %cst_57 [1] : vector<16x16xf32> to vector<16xf32>
    %193 = vector.shape_cast %192 : vector<16xf32> to vector<16x1xf32>
    %194 = arith.truncf %191 : vector<16x16xf32> to vector<16x16xbf16>
    %cst_58 = arith.constant dense<0.000000e+00> : vector<16x16xf32>
    %195 = tpu.matmul %194, %181, %cst_58 {dimension_numbers = #tpu.dot_dimension_numbers<[1], [0], [0], [1], [0, 0, 1, 1], [], []>} : vector<16x16xbf16>, vector<16x16xbf16>, vector<16x16xf32> -> vector<16x16xf32>
    %196 = tpu.reciprocal %193 {approx = true} : vector<16x1xf32> -> vector<16x1xf32>
    %197 = vector.broadcast %196 : vector<16x1xf32> to vector<16x16xf32>
    %198 = arith.mulf %195, %197 : vector<16x16xf32>
    %199 = tpu.concatenate %37, %60, %83, %106, %129, %152, %175, %198 in 1 : vector<16x16xf32>, vector<16x16xf32>, vector<16x16xf32>, vector<16x16xf32>, vector<16x16xf32>, vector<16x16xf32>, vector<16x16xf32>, vector<16x16xf32> -> vector<16x128xf32>
    %200 = arith.truncf %199 : vector<16x128xf32> to vector<16x128xbf16>
    %c0_59 = arith.constant 0 : index
    %c0_60 = arith.constant 0 : index
    %201 = vector.load %arg5[%c0_59, %c0_60] : memref<128x128xbf16, #tpu.memory_space<vmem>>, vector<128x128xbf16>
    %cst_61 = arith.constant dense<0.000000e+00> : vector<16x128xf32>
    %202 = tpu.matmul %200, %201, %cst_61 {dimension_numbers = #tpu.dot_dimension_numbers<[1], [0], [0], [1], [0, 0, 1, 1], [], []>} : vector<16x128xbf16>, vector<128x128xbf16>, vector<16x128xf32> -> vector<16x128xf32>
    %c0_62 = arith.constant 0 : index
    %c0_63 = arith.constant 0 : index
    %203 = vector.load %arg6[%c0_62, %c0_63] : memref<1x128xf32, #tpu.memory_space<vmem>>, vector<1x128xf32>
    %204 = vector.broadcast %203 : vector<1x128xf32> to vector<16x128xf32>
    %205 = arith.addf %202, %204 : vector<16x128xf32>
    %206 = arith.addf %0, %205 : vector<16x128xf32>
    %cst_64 = arith.constant dense<0.000000e+00> : vector<16xf32>
    %207 = vector.multi_reduction <add>, %206, %cst_64 [1] : vector<16x128xf32> to vector<16xf32>
    %208 = vector.shape_cast %207 : vector<16xf32> to vector<16x1xf32>
    %cst_65 = arith.constant 1.280000e+02 : f32
    %209 = vector.broadcast %cst_65 : f32 to vector<16x1xf32>
    %210 = arith.divf %208, %209 : vector<16x1xf32>
    %211 = vector.broadcast %210 : vector<16x1xf32> to vector<16x128xf32>
    %212 = arith.subf %206, %211 : vector<16x128xf32>
    %213 = arith.mulf %212, %212 : vector<16x128xf32>
    %cst_66 = arith.constant dense<0.000000e+00> : vector<16xf32>
    %214 = vector.multi_reduction <add>, %213, %cst_66 [1] : vector<16x128xf32> to vector<16xf32>
    %215 = vector.shape_cast %214 : vector<16xf32> to vector<16x1xf32>
    %cst_67 = arith.constant 1.280000e+02 : f32
    %216 = vector.broadcast %cst_67 : f32 to vector<16x1xf32>
    %217 = arith.divf %215, %216 : vector<16x1xf32>
    %cst_68 = arith.constant 9.99999974E-6 : f32
    %218 = vector.broadcast %cst_68 : f32 to vector<16x1xf32>
    %219 = arith.addf %217, %218 : vector<16x1xf32>
    %220 = math.rsqrt %219 : vector<16x1xf32>
    %221 = vector.broadcast %220 : vector<16x1xf32> to vector<16x128xf32>
    %222 = arith.mulf %212, %221 : vector<16x128xf32>
    %223 = vector.broadcast %1 : vector<1x128xf32> to vector<16x128xf32>
    %224 = arith.mulf %222, %223 : vector<16x128xf32>
    %225 = vector.broadcast %2 : vector<1x128xf32> to vector<16x128xf32>
    %226 = arith.addf %224, %225 : vector<16x128xf32>
    %c0_69 = arith.constant 0 : index
    %c0_70 = arith.constant 0 : index
    %227 = vector.load %arg9[%c0_69, %c0_70] : memref<16x128xf32, #tpu.memory_space<vmem>>, vector<16x128xf32>
    tpu.vector_store %arg9[%c0_69, %c0_70], %226 {strides = array<i32>} : memref<16x128xf32, #tpu.memory_space<vmem>>, vector<16x128xf32>,
    return
  }
}

module attributes {stable_mosaic.version = 11 : i64} {
  func.func @kernel(%arg0: memref<16x128xf32, #tpu.memory_space<vmem>>, %arg1: memref<16x128xf32, #tpu.memory_space<vmem>>, %arg2: memref<16x16xi32, #tpu.memory_space<vmem>>, %arg3: memref<128x384xbf16, #tpu.memory_space<vmem>>, %arg4: memref<1x384xf32, #tpu.memory_space<vmem>>, %arg5: memref<128x128xbf16, #tpu.memory_space<vmem>>, %arg6: memref<1x128xf32, #tpu.memory_space<vmem>>, %arg7: memref<1x128xf32, #tpu.memory_space<vmem>>, %arg8: memref<1x128xf32, #tpu.memory_space<vmem>>, %arg9: memref<16x128xf32, #tpu.memory_space<vmem>>) attributes {dimension_semantics = [], scalar_prefetch = 0 : i64, scratch_operands = 0 : i64, tpu.core_type = #tpu.core_type<tc>} {
    %c0 = arith.constant 0 : index
    %c0_0 = arith.constant 0 : index
    %0 = vector.load %arg0[%c0, %c0_0] : memref<16x128xf32, #tpu.memory_space<vmem>>, vector<16x128xf32>
    %c0_1 = arith.constant 0 : index
    %c0_2 = arith.constant 0 : index
    %1 = vector.load %arg7[%c0_1, %c0_2] : memref<1x128xf32, #tpu.memory_space<vmem>>, vector<1x128xf32>
    %c0_3 = arith.constant 0 : index
    %c0_4 = arith.constant 0 : index
    %2 = vector.load %arg8[%c0_3, %c0_4] : memref<1x128xf32, #tpu.memory_space<vmem>>, vector<1x128xf32>
    %c0_5 = arith.constant 0 : index
    %c0_6 = arith.constant 0 : index
    %3 = vector.load %arg1[%c0_5, %c0_6] : memref<16x128xf32, #tpu.memory_space<vmem>>, vector<16x128xf32>
    %4 = arith.truncf %0 : vector<16x128xf32> to vector<16x128xbf16>
    %c0_7 = arith.constant 0 : index
    %c0_8 = arith.constant 0 : index
    %5 = vector.load %arg3[%c0_7, %c0_8] : memref<128x384xbf16, #tpu.memory_space<vmem>>, vector<128x128xbf16>
    %cst = arith.constant dense<0.000000e+00> : vector<16x128xf32>
    %6 = tpu.matmul %4, %5, %cst {dimension_numbers = #tpu.dot_dimension_numbers<[1], [0], [0], [1], [0, 0, 1, 1], [], []>} : vector<16x128xbf16>, vector<128x128xbf16>, vector<16x128xf32> -> vector<16x128xf32>
    %c0_9 = arith.constant 0 : index
    %c0_10 = arith.constant 0 : index
    %7 = vector.load %arg4[%c0_9, %c0_10] : memref<1x384xf32, #tpu.memory_space<vmem>>, vector<1x128xf32>
    %8 = vector.broadcast %7 : vector<1x128xf32> to vector<16x128xf32>
    %9 = arith.addf %6, %8 : vector<16x128xf32>
    %10 = arith.truncf %3 : vector<16x128xf32> to vector<16x128xbf16>
    %c0_11 = arith.constant 0 : index
    %c128 = arith.constant 128 : index
    %11 = vector.load %arg3[%c0_11, %c128] : memref<128x384xbf16, #tpu.memory_space<vmem>>, vector<128x256xbf16>
    %cst_12 = arith.constant dense<0.000000e+00> : vector<16x256xf32>
    %12 = tpu.matmul %10, %11, %cst_12 {dimension_numbers = #tpu.dot_dimension_numbers<[1], [0], [0], [1], [0, 0, 1, 1], [], []>} : vector<16x128xbf16>, vector<128x256xbf16>, vector<16x256xf32> -> vector<16x256xf32>
    %c0_13 = arith.constant 0 : index
    %c128_14 = arith.constant 128 : index
    %13 = vector.load %arg4[%c0_13, %c128_14] : memref<1x384xf32, #tpu.memory_space<vmem>>, vector<1x256xf32>
    %14 = vector.broadcast %13 : vector<1x256xf32> to vector<16x256xf32>
    %15 = arith.addf %12, %14 : vector<16x256xf32>
    %16 = vector.extract_strided_slice %15 {offsets = [0, 0], sizes = [16, 128], strides = [1, 1]} : vector<16x256xf32> to vector<16x128xf32>
    %17 = vector.extract_strided_slice %15 {offsets = [0, 128], sizes = [16, 128], strides = [1, 1]} : vector<16x256xf32> to vector<16x128xf32>
    %c0_15 = arith.constant 0 : index
    %c0_16 = arith.constant 0 : index
    %18 = vector.load %arg2[%c0_15, %c0_16] : memref<16x16xi32, #tpu.memory_space<vmem>>, vector<16x16xi32>
    %c0_i32 = arith.constant 0 : i32
    %19 = vector.broadcast %c0_i32 : i32 to vector<16x16xi32>
    %20 = arith.cmpi ne, %18, %19 : vector<16x16xi32>
    %21 = vector.extract_strided_slice %9 {offsets = [0, 0], sizes = [16, 16], strides = [1, 1]} : vector<16x128xf32> to vector<16x16xf32>
    %22 = arith.truncf %21 : vector<16x16xf32> to vector<16x16xbf16>
    %23 = vector.extract_strided_slice %16 {offsets = [0, 0], sizes = [16, 16], strides = [1, 1]} : vector<16x128xf32> to vector<16x16xf32>
    %24 = arith.truncf %23 : vector<16x16xf32> to vector<16x16xbf16>
    %25 = vector.extract_strided_slice %17 {offsets = [0, 0], sizes = [16, 16], strides = [1, 1]} : vector<16x128xf32> to vector<16x16xf32>
    %26 = arith.truncf %25 : vector<16x16xf32> to vector<16x16xbf16>
    %cst_17 = arith.constant dense<0.000000e+00> : vector<16x16xf32>
    %27 = tpu.matmul %22, %24, %cst_17 {dimension_numbers = #tpu.dot_dimension_numbers<[1], [1], [0], [0], [0, 0, 1, 0], [], []>} : vector<16x16xbf16>, vector<16x16xbf16>, vector<16x16xf32> -> vector<16x16xf32>
    %cst_18 = arith.constant 2.500000e-01 : f32
    %28 = vector.broadcast %cst_18 : f32 to vector<16x16xf32>
    %29 = arith.mulf %27, %28 : vector<16x16xf32>
    %cst_19 = arith.constant -1.000000e+30 : f32
    %30 = vector.broadcast %cst_19 : f32 to vector<16x16xf32>
    %31 = arith.select %20, %29, %30 : vector<16x16xi1>, vector<16x16xf32>
    %cst_20 = arith.constant dense<0xFF800000> : vector<16xf32>
    %32 = vector.multi_reduction <maximumf>, %31, %cst_20 [1] : vector<16x16xf32> to vector<16xf32>
    %33 = vector.shape_cast %32 : vector<16xf32> to vector<16x1xf32>
    %34 = vector.broadcast %33 : vector<16x1xf32> to vector<16x16xf32>
    %35 = arith.subf %31, %34 : vector<16x16xf32>
    %36 = math.exp %35 : vector<16x16xf32>
    %cst_21 = arith.constant dense<0.000000e+00> : vector<16xf32>
    %37 = vector.multi_reduction <add>, %36, %cst_21 [1] : vector<16x16xf32> to vector<16xf32>
    %38 = vector.shape_cast %37 : vector<16xf32> to vector<16x1xf32>
    %39 = arith.truncf %36 : vector<16x16xf32> to vector<16x16xbf16>
    %cst_22 = arith.constant dense<0.000000e+00> : vector<16x16xf32>
    %40 = tpu.matmul %39, %26, %cst_22 {dimension_numbers = #tpu.dot_dimension_numbers<[1], [0], [0], [1], [0, 0, 1, 1], [], []>} : vector<16x16xbf16>, vector<16x16xbf16>, vector<16x16xf32> -> vector<16x16xf32>
    %41 = tpu.reciprocal %38 {approx = true} : vector<16x1xf32> -> vector<16x1xf32>
    %42 = vector.broadcast %41 : vector<16x1xf32> to vector<16x16xf32>
    %43 = arith.mulf %40, %42 : vector<16x16xf32>
    %44 = vector.extract_strided_slice %9 {offsets = [0, 16], sizes = [16, 16], strides = [1, 1]} : vector<16x128xf32> to vector<16x16xf32>
    %45 = arith.truncf %44 : vector<16x16xf32> to vector<16x16xbf16>
    %46 = vector.extract_strided_slice %16 {offsets = [0, 16], sizes = [16, 16], strides = [1, 1]} : vector<16x128xf32> to vector<16x16xf32>
    %47 = arith.truncf %46 : vector<16x16xf32> to vector<16x16xbf16>
    %48 = vector.extract_strided_slice %17 {offsets = [0, 16], sizes = [16, 16], strides = [1, 1]} : vector<16x128xf32> to vector<16x16xf32>
    %49 = arith.truncf %48 : vector<16x16xf32> to vector<16x16xbf16>
    %cst_23 = arith.constant dense<0.000000e+00> : vector<16x16xf32>
    %50 = tpu.matmul %45, %47, %cst_23 {dimension_numbers = #tpu.dot_dimension_numbers<[1], [1], [0], [0], [0, 0, 1, 0], [], []>} : vector<16x16xbf16>, vector<16x16xbf16>, vector<16x16xf32> -> vector<16x16xf32>
    %cst_24 = arith.constant 2.500000e-01 : f32
    %51 = vector.broadcast %cst_24 : f32 to vector<16x16xf32>
    %52 = arith.mulf %50, %51 : vector<16x16xf32>
    %cst_25 = arith.constant -1.000000e+30 : f32
    %53 = vector.broadcast %cst_25 : f32 to vector<16x16xf32>
    %54 = arith.select %20, %52, %53 : vector<16x16xi1>, vector<16x16xf32>
    %cst_26 = arith.constant dense<0xFF800000> : vector<16xf32>
    %55 = vector.multi_reduction <maximumf>, %54, %cst_26 [1] : vector<16x16xf32> to vector<16xf32>
    %56 = vector.shape_cast %55 : vector<16xf32> to vector<16x1xf32>
    %57 = vector.broadcast %56 : vector<16x1xf32> to vector<16x16xf32>
    %58 = arith.subf %54, %57 : vector<16x16xf32>
    %59 = math.exp %58 : vector<16x16xf32>
    %cst_27 = arith.constant dense<0.000000e+00> : vector<16xf32>
    %60 = vector.multi_reduction <add>, %59, %cst_27 [1] : vector<16x16xf32> to vector<16xf32>
    %61 = vector.shape_cast %60 : vector<16xf32> to vector<16x1xf32>
    %62 = arith.truncf %59 : vector<16x16xf32> to vector<16x16xbf16>
    %cst_28 = arith.constant dense<0.000000e+00> : vector<16x16xf32>
    %63 = tpu.matmul %62, %49, %cst_28 {dimension_numbers = #tpu.dot_dimension_numbers<[1], [0], [0], [1], [0, 0, 1, 1], [], []>} : vector<16x16xbf16>, vector<16x16xbf16>, vector<16x16xf32> -> vector<16x16xf32>
    %64 = tpu.reciprocal %61 {approx = true} : vector<16x1xf32> -> vector<16x1xf32>
    %65 = vector.broadcast %64 : vector<16x1xf32> to vector<16x16xf32>
    %66 = arith.mulf %63, %65 : vector<16x16xf32>
    %67 = vector.extract_strided_slice %9 {offsets = [0, 32], sizes = [16, 16], strides = [1, 1]} : vector<16x128xf32> to vector<16x16xf32>
    %68 = arith.truncf %67 : vector<16x16xf32> to vector<16x16xbf16>
    %69 = vector.extract_strided_slice %16 {offsets = [0, 32], sizes = [16, 16], strides = [1, 1]} : vector<16x128xf32> to vector<16x16xf32>
    %70 = arith.truncf %69 : vector<16x16xf32> to vector<16x16xbf16>
    %71 = vector.extract_strided_slice %17 {offsets = [0, 32], sizes = [16, 16], strides = [1, 1]} : vector<16x128xf32> to vector<16x16xf32>
    %72 = arith.truncf %71 : vector<16x16xf32> to vector<16x16xbf16>
    %cst_29 = arith.constant dense<0.000000e+00> : vector<16x16xf32>
    %73 = tpu.matmul %68, %70, %cst_29 {dimension_numbers = #tpu.dot_dimension_numbers<[1], [1], [0], [0], [0, 0, 1, 0], [], []>} : vector<16x16xbf16>, vector<16x16xbf16>, vector<16x16xf32> -> vector<16x16xf32>
    %cst_30 = arith.constant 2.500000e-01 : f32
    %74 = vector.broadcast %cst_30 : f32 to vector<16x16xf32>
    %75 = arith.mulf %73, %74 : vector<16x16xf32>
    %cst_31 = arith.constant -1.000000e+30 : f32
    %76 = vector.broadcast %cst_31 : f32 to vector<16x16xf32>
    %77 = arith.select %20, %75, %76 : vector<16x16xi1>, vector<16x16xf32>
    %cst_32 = arith.constant dense<0xFF800000> : vector<16xf32>
    %78 = vector.multi_reduction <maximumf>, %77, %cst_32 [1] : vector<16x16xf32> to vector<16xf32>
    %79 = vector.shape_cast %78 : vector<16xf32> to vector<16x1xf32>
    %80 = vector.broadcast %79 : vector<16x1xf32> to vector<16x16xf32>
    %81 = arith.subf %77, %80 : vector<16x16xf32>
    %82 = math.exp %81 : vector<16x16xf32>
    %cst_33 = arith.constant dense<0.000000e+00> : vector<16xf32>
    %83 = vector.multi_reduction <add>, %82, %cst_33 [1] : vector<16x16xf32> to vector<16xf32>
    %84 = vector.shape_cast %83 : vector<16xf32> to vector<16x1xf32>
    %85 = arith.truncf %82 : vector<16x16xf32> to vector<16x16xbf16>
    %cst_34 = arith.constant dense<0.000000e+00> : vector<16x16xf32>
    %86 = tpu.matmul %85, %72, %cst_34 {dimension_numbers = #tpu.dot_dimension_numbers<[1], [0], [0], [1], [0, 0, 1, 1], [], []>} : vector<16x16xbf16>, vector<16x16xbf16>, vector<16x16xf32> -> vector<16x16xf32>
    %87 = tpu.reciprocal %84 {approx = true} : vector<16x1xf32> -> vector<16x1xf32>
    %88 = vector.broadcast %87 : vector<16x1xf32> to vector<16x16xf32>
    %89 = arith.mulf %86, %88 : vector<16x16xf32>
    %90 = vector.extract_strided_slice %9 {offsets = [0, 48], sizes = [16, 16], strides = [1, 1]} : vector<16x128xf32> to vector<16x16xf32>
    %91 = arith.truncf %90 : vector<16x16xf32> to vector<16x16xbf16>
    %92 = vector.extract_strided_slice %16 {offsets = [0, 48], sizes = [16, 16], strides = [1, 1]} : vector<16x128xf32> to vector<16x16xf32>
    %93 = arith.truncf %92 : vector<16x16xf32> to vector<16x16xbf16>
    %94 = vector.extract_strided_slice %17 {offsets = [0, 48], sizes = [16, 16], strides = [1, 1]} : vector<16x128xf32> to vector<16x16xf32>
    %95 = arith.truncf %94 : vector<16x16xf32> to vector<16x16xbf16>
    %cst_35 = arith.constant dense<0.000000e+00> : vector<16x16xf32>
    %96 = tpu.matmul %91, %93, %cst_35 {dimension_numbers = #tpu.dot_dimension_numbers<[1], [1], [0], [0], [0, 0, 1, 0], [], []>} : vector<16x16xbf16>, vector<16x16xbf16>, vector<16x16xf32> -> vector<16x16xf32>
    %cst_36 = arith.constant 2.500000e-01 : f32
    %97 = vector.broadcast %cst_36 : f32 to vector<16x16xf32>
    %98 = arith.mulf %96, %97 : vector<16x16xf32>
    %cst_37 = arith.constant -1.000000e+30 : f32
    %99 = vector.broadcast %cst_37 : f32 to vector<16x16xf32>
    %100 = arith.select %20, %98, %99 : vector<16x16xi1>, vector<16x16xf32>
    %cst_38 = arith.constant dense<0xFF800000> : vector<16xf32>
    %101 = vector.multi_reduction <maximumf>, %100, %cst_38 [1] : vector<16x16xf32> to vector<16xf32>
    %102 = vector.shape_cast %101 : vector<16xf32> to vector<16x1xf32>
    %103 = vector.broadcast %102 : vector<16x1xf32> to vector<16x16xf32>
    %104 = arith.subf %100, %103 : vector<16x16xf32>
    %105 = math.exp %104 : vector<16x16xf32>
    %cst_39 = arith.constant dense<0.000000e+00> : vector<16xf32>
    %106 = vector.multi_reduction <add>, %105, %cst_39 [1] : vector<16x16xf32> to vector<16xf32>
    %107 = vector.shape_cast %106 : vector<16xf32> to vector<16x1xf32>
    %108 = arith.truncf %105 : vector<16x16xf32> to vector<16x16xbf16>
    %cst_40 = arith.constant dense<0.000000e+00> : vector<16x16xf32>
    %109 = tpu.matmul %108, %95, %cst_40 {dimension_numbers = #tpu.dot_dimension_numbers<[1], [0], [0], [1], [0, 0, 1, 1], [], []>} : vector<16x16xbf16>, vector<16x16xbf16>, vector<16x16xf32> -> vector<16x16xf32>
    %110 = tpu.reciprocal %107 {approx = true} : vector<16x1xf32> -> vector<16x1xf32>
    %111 = vector.broadcast %110 : vector<16x1xf32> to vector<16x16xf32>
    %112 = arith.mulf %109, %111 : vector<16x16xf32>
    %113 = vector.extract_strided_slice %9 {offsets = [0, 64], sizes = [16, 16], strides = [1, 1]} : vector<16x128xf32> to vector<16x16xf32>
    %114 = arith.truncf %113 : vector<16x16xf32> to vector<16x16xbf16>
    %115 = vector.extract_strided_slice %16 {offsets = [0, 64], sizes = [16, 16], strides = [1, 1]} : vector<16x128xf32> to vector<16x16xf32>
    %116 = arith.truncf %115 : vector<16x16xf32> to vector<16x16xbf16>
    %117 = vector.extract_strided_slice %17 {offsets = [0, 64], sizes = [16, 16], strides = [1, 1]} : vector<16x128xf32> to vector<16x16xf32>
    %118 = arith.truncf %117 : vector<16x16xf32> to vector<16x16xbf16>
    %cst_41 = arith.constant dense<0.000000e+00> : vector<16x16xf32>
    %119 = tpu.matmul %114, %116, %cst_41 {dimension_numbers = #tpu.dot_dimension_numbers<[1], [1], [0], [0], [0, 0, 1, 0], [], []>} : vector<16x16xbf16>, vector<16x16xbf16>, vector<16x16xf32> -> vector<16x16xf32>
    %cst_42 = arith.constant 2.500000e-01 : f32
    %120 = vector.broadcast %cst_42 : f32 to vector<16x16xf32>
    %121 = arith.mulf %119, %120 : vector<16x16xf32>
    %cst_43 = arith.constant -1.000000e+30 : f32
    %122 = vector.broadcast %cst_43 : f32 to vector<16x16xf32>
    %123 = arith.select %20, %121, %122 : vector<16x16xi1>, vector<16x16xf32>
    %cst_44 = arith.constant dense<0xFF800000> : vector<16xf32>
    %124 = vector.multi_reduction <maximumf>, %123, %cst_44 [1] : vector<16x16xf32> to vector<16xf32>
    %125 = vector.shape_cast %124 : vector<16xf32> to vector<16x1xf32>
    %126 = vector.broadcast %125 : vector<16x1xf32> to vector<16x16xf32>
    %127 = arith.subf %123, %126 : vector<16x16xf32>
    %128 = math.exp %127 : vector<16x16xf32>
    %cst_45 = arith.constant dense<0.000000e+00> : vector<16xf32>
    %129 = vector.multi_reduction <add>, %128, %cst_45 [1] : vector<16x16xf32> to vector<16xf32>
    %130 = vector.shape_cast %129 : vector<16xf32> to vector<16x1xf32>
    %131 = arith.truncf %128 : vector<16x16xf32> to vector<16x16xbf16>
    %cst_46 = arith.constant dense<0.000000e+00> : vector<16x16xf32>
    %132 = tpu.matmul %131, %118, %cst_46 {dimension_numbers = #tpu.dot_dimension_numbers<[1], [0], [0], [1], [0, 0, 1, 1], [], []>} : vector<16x16xbf16>, vector<16x16xbf16>, vector<16x16xf32> -> vector<16x16xf32>
    %133 = tpu.reciprocal %130 {approx = true} : vector<16x1xf32> -> vector<16x1xf32>
    %134 = vector.broadcast %133 : vector<16x1xf32> to vector<16x16xf32>
    %135 = arith.mulf %132, %134 : vector<16x16xf32>
    %136 = vector.extract_strided_slice %9 {offsets = [0, 80], sizes = [16, 16], strides = [1, 1]} : vector<16x128xf32> to vector<16x16xf32>
    %137 = arith.truncf %136 : vector<16x16xf32> to vector<16x16xbf16>
    %138 = vector.extract_strided_slice %16 {offsets = [0, 80], sizes = [16, 16], strides = [1, 1]} : vector<16x128xf32> to vector<16x16xf32>
    %139 = arith.truncf %138 : vector<16x16xf32> to vector<16x16xbf16>
    %140 = vector.extract_strided_slice %17 {offsets = [0, 80], sizes = [16, 16], strides = [1, 1]} : vector<16x128xf32> to vector<16x16xf32>
    %141 = arith.truncf %140 : vector<16x16xf32> to vector<16x16xbf16>
    %cst_47 = arith.constant dense<0.000000e+00> : vector<16x16xf32>
    %142 = tpu.matmul %137, %139, %cst_47 {dimension_numbers = #tpu.dot_dimension_numbers<[1], [1], [0], [0], [0, 0, 1, 0], [], []>} : vector<16x16xbf16>, vector<16x16xbf16>, vector<16x16xf32> -> vector<16x16xf32>
    %cst_48 = arith.constant 2.500000e-01 : f32
    %143 = vector.broadcast %cst_48 : f32 to vector<16x16xf32>
    %144 = arith.mulf %142, %143 : vector<16x16xf32>
    %cst_49 = arith.constant -1.000000e+30 : f32
    %145 = vector.broadcast %cst_49 : f32 to vector<16x16xf32>
    %146 = arith.select %20, %144, %145 : vector<16x16xi1>, vector<16x16xf32>
    %cst_50 = arith.constant dense<0xFF800000> : vector<16xf32>
    %147 = vector.multi_reduction <maximumf>, %146, %cst_50 [1] : vector<16x16xf32> to vector<16xf32>
    %148 = vector.shape_cast %147 : vector<16xf32> to vector<16x1xf32>
    %149 = vector.broadcast %148 : vector<16x1xf32> to vector<16x16xf32>
    %150 = arith.subf %146, %149 : vector<16x16xf32>
    %151 = math.exp %150 : vector<16x16xf32>
    %cst_51 = arith.constant dense<0.000000e+00> : vector<16xf32>
    %152 = vector.multi_reduction <add>, %151, %cst_51 [1] : vector<16x16xf32> to vector<16xf32>
    %153 = vector.shape_cast %152 : vector<16xf32> to vector<16x1xf32>
    %154 = arith.truncf %151 : vector<16x16xf32> to vector<16x16xbf16>
    %cst_52 = arith.constant dense<0.000000e+00> : vector<16x16xf32>
    %155 = tpu.matmul %154, %141, %cst_52 {dimension_numbers = #tpu.dot_dimension_numbers<[1], [0], [0], [1], [0, 0, 1, 1], [], []>} : vector<16x16xbf16>, vector<16x16xbf16>, vector<16x16xf32> -> vector<16x16xf32>
    %156 = tpu.reciprocal %153 {approx = true} : vector<16x1xf32> -> vector<16x1xf32>
    %157 = vector.broadcast %156 : vector<16x1xf32> to vector<16x16xf32>
    %158 = arith.mulf %155, %157 : vector<16x16xf32>
    %159 = vector.extract_strided_slice %9 {offsets = [0, 96], sizes = [16, 16], strides = [1, 1]} : vector<16x128xf32> to vector<16x16xf32>
    %160 = arith.truncf %159 : vector<16x16xf32> to vector<16x16xbf16>
    %161 = vector.extract_strided_slice %16 {offsets = [0, 96], sizes = [16, 16], strides = [1, 1]} : vector<16x128xf32> to vector<16x16xf32>
    %162 = arith.truncf %161 : vector<16x16xf32> to vector<16x16xbf16>
    %163 = vector.extract_strided_slice %17 {offsets = [0, 96], sizes = [16, 16], strides = [1, 1]} : vector<16x128xf32> to vector<16x16xf32>
    %164 = arith.truncf %163 : vector<16x16xf32> to vector<16x16xbf16>
    %cst_53 = arith.constant dense<0.000000e+00> : vector<16x16xf32>
    %165 = tpu.matmul %160, %162, %cst_53 {dimension_numbers = #tpu.dot_dimension_numbers<[1], [1], [0], [0], [0, 0, 1, 0], [], []>} : vector<16x16xbf16>, vector<16x16xbf16>, vector<16x16xf32> -> vector<16x16xf32>
    %cst_54 = arith.constant 2.500000e-01 : f32
    %166 = vector.broadcast %cst_54 : f32 to vector<16x16xf32>
    %167 = arith.mulf %165, %166 : vector<16x16xf32>
    %cst_55 = arith.constant -1.000000e+30 : f32
    %168 = vector.broadcast %cst_55 : f32 to vector<16x16xf32>
    %169 = arith.select %20, %167, %168 : vector<16x16xi1>, vector<16x16xf32>
    %cst_56 = arith.constant dense<0xFF800000> : vector<16xf32>
    %170 = vector.multi_reduction <maximumf>, %169, %cst_56 [1] : vector<16x16xf32> to vector<16xf32>
    %171 = vector.shape_cast %170 : vector<16xf32> to vector<16x1xf32>
    %172 = vector.broadcast %171 : vector<16x1xf32> to vector<16x16xf32>
    %173 = arith.subf %169, %172 : vector<16x16xf32>
    %174 = math.exp %173 : vector<16x16xf32>
    %cst_57 = arith.constant dense<0.000000e+00> : vector<16xf32>
    %175 = vector.multi_reduction <add>, %174, %cst_57 [1] : vector<16x16xf32> to vector<16xf32>
    %176 = vector.shape_cast %175 : vector<16xf32> to vector<16x1xf32>
    %177 = arith.truncf %174 : vector<16x16xf32> to vector<16x16xbf16>
    %cst_58 = arith.constant dense<0.000000e+00> : vector<16x16xf32>
    %178 = tpu.matmul %177, %164, %cst_58 {dimension_numbers = #tpu.dot_dimension_numbers<[1], [0], [0], [1], [0, 0, 1, 1], [], []>} : vector<16x16xbf16>, vector<16x16xbf16>, vector<16x16xf32> -> vector<16x16xf32>
    %179 = tpu.reciprocal %176 {approx = true} : vector<16x1xf32> -> vector<16x1xf32>
    %180 = vector.broadcast %179 : vector<16x1xf32> to vector<16x16xf32>
    %181 = arith.mulf %178, %180 : vector<16x16xf32>
    %182 = vector.extract_strided_slice %9 {offsets = [0, 112], sizes = [16, 16], strides = [1, 1]} : vector<16x128xf32> to vector<16x16xf32>
    %183 = arith.truncf %182 : vector<16x16xf32> to vector<16x16xbf16>
    %184 = vector.extract_strided_slice %16 {offsets = [0, 112], sizes = [16, 16], strides = [1, 1]} : vector<16x128xf32> to vector<16x16xf32>
    %185 = arith.truncf %184 : vector<16x16xf32> to vector<16x16xbf16>
    %186 = vector.extract_strided_slice %17 {offsets = [0, 112], sizes = [16, 16], strides = [1, 1]} : vector<16x128xf32> to vector<16x16xf32>
    %187 = arith.truncf %186 : vector<16x16xf32> to vector<16x16xbf16>
    %cst_59 = arith.constant dense<0.000000e+00> : vector<16x16xf32>
    %188 = tpu.matmul %183, %185, %cst_59 {dimension_numbers = #tpu.dot_dimension_numbers<[1], [1], [0], [0], [0, 0, 1, 0], [], []>} : vector<16x16xbf16>, vector<16x16xbf16>, vector<16x16xf32> -> vector<16x16xf32>
    %cst_60 = arith.constant 2.500000e-01 : f32
    %189 = vector.broadcast %cst_60 : f32 to vector<16x16xf32>
    %190 = arith.mulf %188, %189 : vector<16x16xf32>
    %cst_61 = arith.constant -1.000000e+30 : f32
    %191 = vector.broadcast %cst_61 : f32 to vector<16x16xf32>
    %192 = arith.select %20, %190, %191 : vector<16x16xi1>, vector<16x16xf32>
    %cst_62 = arith.constant dense<0xFF800000> : vector<16xf32>
    %193 = vector.multi_reduction <maximumf>, %192, %cst_62 [1] : vector<16x16xf32> to vector<16xf32>
    %194 = vector.shape_cast %193 : vector<16xf32> to vector<16x1xf32>
    %195 = vector.broadcast %194 : vector<16x1xf32> to vector<16x16xf32>
    %196 = arith.subf %192, %195 : vector<16x16xf32>
    %197 = math.exp %196 : vector<16x16xf32>
    %cst_63 = arith.constant dense<0.000000e+00> : vector<16xf32>
    %198 = vector.multi_reduction <add>, %197, %cst_63 [1] : vector<16x16xf32> to vector<16xf32>
    %199 = vector.shape_cast %198 : vector<16xf32> to vector<16x1xf32>
    %200 = arith.truncf %197 : vector<16x16xf32> to vector<16x16xbf16>
    %cst_64 = arith.constant dense<0.000000e+00> : vector<16x16xf32>
    %201 = tpu.matmul %200, %187, %cst_64 {dimension_numbers = #tpu.dot_dimension_numbers<[1], [0], [0], [1], [0, 0, 1, 1], [], []>} : vector<16x16xbf16>, vector<16x16xbf16>, vector<16x16xf32> -> vector<16x16xf32>
    %202 = tpu.reciprocal %199 {approx = true} : vector<16x1xf32> -> vector<16x1xf32>
    %203 = vector.broadcast %202 : vector<16x1xf32> to vector<16x16xf32>
    %204 = arith.mulf %201, %203 : vector<16x16xf32>
    %205 = tpu.concatenate %43, %66, %89, %112, %135, %158, %181, %204 in 1 : vector<16x16xf32>, vector<16x16xf32>, vector<16x16xf32>, vector<16x16xf32>, vector<16x16xf32>, vector<16x16xf32>, vector<16x16xf32>, vector<16x16xf32> -> vector<16x128xf32>
    %206 = arith.truncf %205 : vector<16x128xf32> to vector<16x128xbf16>
    %c0_65 = arith.constant 0 : index
    %c0_66 = arith.constant 0 : index
    %207 = vector.load %arg5[%c0_65, %c0_66] : memref<128x128xbf16, #tpu.memory_space<vmem>>, vector<128x128xbf16>
    %cst_67 = arith.constant dense<0.000000e+00> : vector<16x128xf32>
    %208 = tpu.matmul %206, %207, %cst_67 {dimension_numbers = #tpu.dot_dimension_numbers<[1], [0], [0], [1], [0, 0, 1, 1], [], []>} : vector<16x128xbf16>, vector<128x128xbf16>, vector<16x128xf32> -> vector<16x128xf32>
    %c0_68 = arith.constant 0 : index
    %c0_69 = arith.constant 0 : index
    %209 = vector.load %arg6[%c0_68, %c0_69] : memref<1x128xf32, #tpu.memory_space<vmem>>, vector<1x128xf32>
    %210 = vector.broadcast %209 : vector<1x128xf32> to vector<16x128xf32>
    %211 = arith.addf %208, %210 : vector<16x128xf32>
    %212 = arith.addf %0, %211 : vector<16x128xf32>
    %cst_70 = arith.constant dense<0.000000e+00> : vector<16xf32>
    %213 = vector.multi_reduction <add>, %212, %cst_70 [1] : vector<16x128xf32> to vector<16xf32>
    %214 = vector.shape_cast %213 : vector<16xf32> to vector<16x1xf32>
    %cst_71 = arith.constant 1.280000e+02 : f32
    %215 = vector.broadcast %cst_71 : f32 to vector<16x1xf32>
    %216 = arith.divf %214, %215 : vector<16x1xf32>
    %217 = vector.broadcast %216 : vector<16x1xf32> to vector<16x128xf32>
    %218 = arith.subf %212, %217 : vector<16x128xf32>
    %219 = arith.mulf %218, %218 : vector<16x128xf32>
    %cst_72 = arith.constant dense<0.000000e+00> : vector<16xf32>
    %220 = vector.multi_reduction <add>, %219, %cst_72 [1] : vector<16x128xf32> to vector<16xf32>
    %221 = vector.shape_cast %220 : vector<16xf32> to vector<16x1xf32>
    %cst_73 = arith.constant 1.280000e+02 : f32
    %222 = vector.broadcast %cst_73 : f32 to vector<16x1xf32>
    %223 = arith.divf %221, %222 : vector<16x1xf32>
    %cst_74 = arith.constant 9.99999974E-6 : f32
    %224 = vector.broadcast %cst_74 : f32 to vector<16x1xf32>
    %225 = arith.addf %223, %224 : vector<16x1xf32>
    %226 = math.rsqrt %225 : vector<16x1xf32>
    %227 = vector.broadcast %226 : vector<16x1xf32> to vector<16x128xf32>
    %228 = arith.mulf %218, %227 : vector<16x128xf32>
    %229 = vector.broadcast %1 : vector<1x128xf32> to vector<16x128xf32>
    %230 = arith.mulf %228, %229 : vector<16x128xf32>
    %231 = vector.broadcast %2 : vector<1x128xf32> to vector<16x128xf32>
    %232 = arith.addf %230, %231 : vector<16x128xf32>
    %c0_75 = arith.constant 0 : index
    %c0_76 = arith.constant 0 : index
    %233 = vector.load %arg9[%c0_75, %c0_76] : memref<16x128xf32, #tpu.memory_space<vmem>>, vector<16x128xf32>
    tpu.vector_store %arg9[%c0_75, %c0_76], %232 {strides = array<i32>} : memref<16x128xf32, #tpu.memory_space<vmem>>, vector<16x128xf32>,
    return
  }
}

module attributes {stable_mosaic.version = 11 : i64} {
  func.func @kernel(%arg0: memref<16x128xf32, #tpu.memory_space<vmem>>, %arg1: memref<128x512xbf16, #tpu.memory_space<vmem>>, %arg2: memref<1x512xf32, #tpu.memory_space<vmem>>, %arg3: memref<512x128xbf16, #tpu.memory_space<vmem>>, %arg4: memref<1x128xf32, #tpu.memory_space<vmem>>, %arg5: memref<1x128xf32, #tpu.memory_space<vmem>>, %arg6: memref<1x128xf32, #tpu.memory_space<vmem>>, %arg7: memref<16x128xf32, #tpu.memory_space<vmem>>) attributes {dimension_semantics = [], scalar_prefetch = 0 : i64, scratch_operands = 0 : i64, tpu.core_type = #tpu.core_type<tc>} {
    %c0 = arith.constant 0 : index
    %c0_0 = arith.constant 0 : index
    %0 = vector.load %arg0[%c0, %c0_0] : memref<16x128xf32, #tpu.memory_space<vmem>>, vector<16x128xf32>
    %c0_1 = arith.constant 0 : index
    %c0_2 = arith.constant 0 : index
    %1 = vector.load %arg5[%c0_1, %c0_2] : memref<1x128xf32, #tpu.memory_space<vmem>>, vector<1x128xf32>
    %c0_3 = arith.constant 0 : index
    %c0_4 = arith.constant 0 : index
    %2 = vector.load %arg6[%c0_3, %c0_4] : memref<1x128xf32, #tpu.memory_space<vmem>>, vector<1x128xf32>
    %3 = arith.truncf %0 : vector<16x128xf32> to vector<16x128xbf16>
    %c0_5 = arith.constant 0 : index
    %c0_6 = arith.constant 0 : index
    %4 = vector.load %arg1[%c0_5, %c0_6] : memref<128x512xbf16, #tpu.memory_space<vmem>>, vector<128x512xbf16>
    %cst = arith.constant dense<0.000000e+00> : vector<16x512xf32>
    %5 = tpu.matmul %3, %4, %cst {dimension_numbers = #tpu.dot_dimension_numbers<[1], [0], [0], [1], [0, 0, 1, 1], [], []>} : vector<16x128xbf16>, vector<128x512xbf16>, vector<16x512xf32> -> vector<16x512xf32>
    %c0_7 = arith.constant 0 : index
    %c0_8 = arith.constant 0 : index
    %6 = vector.load %arg2[%c0_7, %c0_8] : memref<1x512xf32, #tpu.memory_space<vmem>>, vector<1x512xf32>
    %7 = vector.broadcast %6 : vector<1x512xf32> to vector<16x512xf32>
    %8 = arith.addf %5, %7 : vector<16x512xf32>
    %cst_9 = arith.constant 0.000000e+00 : f32
    %9 = vector.broadcast %cst_9 : f32 to vector<16x512xf32>
    %10 = arith.maximumf %8, %9 : vector<16x512xf32>
    %11 = arith.truncf %10 : vector<16x512xf32> to vector<16x512xbf16>
    %c0_10 = arith.constant 0 : index
    %c0_11 = arith.constant 0 : index
    %12 = vector.load %arg3[%c0_10, %c0_11] : memref<512x128xbf16, #tpu.memory_space<vmem>>, vector<512x128xbf16>
    %cst_12 = arith.constant dense<0.000000e+00> : vector<16x128xf32>
    %13 = tpu.matmul %11, %12, %cst_12 {dimension_numbers = #tpu.dot_dimension_numbers<[1], [0], [0], [1], [0, 0, 1, 1], [], []>} : vector<16x512xbf16>, vector<512x128xbf16>, vector<16x128xf32> -> vector<16x128xf32>
    %c0_13 = arith.constant 0 : index
    %c0_14 = arith.constant 0 : index
    %14 = vector.load %arg4[%c0_13, %c0_14] : memref<1x128xf32, #tpu.memory_space<vmem>>, vector<1x128xf32>
    %15 = vector.broadcast %14 : vector<1x128xf32> to vector<16x128xf32>
    %16 = arith.addf %13, %15 : vector<16x128xf32>
    %17 = arith.addf %0, %16 : vector<16x128xf32>
    %cst_15 = arith.constant dense<0.000000e+00> : vector<16xf32>
    %18 = vector.multi_reduction <add>, %17, %cst_15 [1] : vector<16x128xf32> to vector<16xf32>
    %19 = vector.shape_cast %18 : vector<16xf32> to vector<16x1xf32>
    %cst_16 = arith.constant 1.280000e+02 : f32
    %20 = vector.broadcast %cst_16 : f32 to vector<16x1xf32>
    %21 = arith.divf %19, %20 : vector<16x1xf32>
    %22 = vector.broadcast %21 : vector<16x1xf32> to vector<16x128xf32>
    %23 = arith.subf %17, %22 : vector<16x128xf32>
    %24 = arith.mulf %23, %23 : vector<16x128xf32>
    %cst_17 = arith.constant dense<0.000000e+00> : vector<16xf32>
    %25 = vector.multi_reduction <add>, %24, %cst_17 [1] : vector<16x128xf32> to vector<16xf32>
    %26 = vector.shape_cast %25 : vector<16xf32> to vector<16x1xf32>
    %cst_18 = arith.constant 1.280000e+02 : f32
    %27 = vector.broadcast %cst_18 : f32 to vector<16x1xf32>
    %28 = arith.divf %26, %27 : vector<16x1xf32>
    %cst_19 = arith.constant 9.99999974E-6 : f32
    %29 = vector.broadcast %cst_19 : f32 to vector<16x1xf32>
    %30 = arith.addf %28, %29 : vector<16x1xf32>
    %31 = math.rsqrt %30 : vector<16x1xf32>
    %32 = vector.broadcast %31 : vector<16x1xf32> to vector<16x128xf32>
    %33 = arith.mulf %23, %32 : vector<16x128xf32>
    %34 = vector.broadcast %1 : vector<1x128xf32> to vector<16x128xf32>
    %35 = arith.mulf %33, %34 : vector<16x128xf32>
    %36 = vector.broadcast %2 : vector<1x128xf32> to vector<16x128xf32>
    %37 = arith.addf %35, %36 : vector<16x128xf32>
    %c0_20 = arith.constant 0 : index
    %c0_21 = arith.constant 0 : index
    %38 = vector.load %arg7[%c0_20, %c0_21] : memref<16x128xf32, #tpu.memory_space<vmem>>, vector<16x128xf32>
    tpu.vector_store %arg7[%c0_20, %c0_21], %37 {strides = array<i32>} : memref<16x128xf32, #tpu.memory_space<vmem>>, vector<16x128xf32>,
    return
  }
}

module attributes {stable_mosaic.version = 11 : i64} {
  func.func @_linear_kernel(%arg0: i32, %arg1: memref<16x128xf32, #tpu.memory_space<vmem>>, %arg2: memref<128x256xbf16, #tpu.memory_space<vmem>>, %arg3: memref<1x256xf32, #tpu.memory_space<vmem>>, %arg4: memref<16x256xf32, #tpu.memory_space<vmem>>) attributes {dimension_semantics = [#tpu.dimension_semantics<parallel>], iteration_bounds = array<i64: 2>, scalar_prefetch = 0 : i64, scratch_operands = 0 : i64, tpu.core_type = #tpu.core_type<tc>, window_params = [{pipeline_mode = #tpu.pipeline_mode<synchronous>, transform_indices = @transform_0, window_bounds = array<i64: 16, 128>}, {transform_indices = @transform_1, window_bounds = array<i64: 128, 256>}, {transform_indices = @transform_2, window_bounds = array<i64: 1, 256>}, {transform_indices = @transform_3, window_bounds = array<i64: 16, 256>}]} {
    %c0 = arith.constant 0 : index
    %c0_0 = arith.constant 0 : index
    %0 = vector.load %arg1[%c0, %c0_0] : memref<16x128xf32, #tpu.memory_space<vmem>>, vector<16x128xf32>
    %1 = arith.truncf %0 : vector<16x128xf32> to vector<16x128xbf16>
    %c0_1 = arith.constant 0 : index
    %c0_2 = arith.constant 0 : index
    %2 = vector.load %arg2[%c0_1, %c0_2] : memref<128x256xbf16, #tpu.memory_space<vmem>>, vector<128x256xbf16>
    %cst = arith.constant dense<0.000000e+00> : vector<16x256xf32>
    %3 = tpu.matmul %1, %2, %cst {dimension_numbers = #tpu.dot_dimension_numbers<[1], [0], [0], [1], [0, 0, 1, 1], [], []>} : vector<16x128xbf16>, vector<128x256xbf16>, vector<16x256xf32> -> vector<16x256xf32>
    %c0_3 = arith.constant 0 : index
    %c0_4 = arith.constant 0 : index
    %4 = vector.load %arg3[%c0_3, %c0_4] : memref<1x256xf32, #tpu.memory_space<vmem>>, vector<1x256xf32>
    %5 = vector.broadcast %4 : vector<1x256xf32> to vector<16x256xf32>
    %6 = arith.addf %3, %5 : vector<16x256xf32>
    %c0_5 = arith.constant 0 : index
    %c0_6 = arith.constant 0 : index
    %7 = vector.load %arg4[%c0_5, %c0_6] : memref<16x256xf32, #tpu.memory_space<vmem>>, vector<16x256xf32>
    tpu.vector_store %arg4[%c0_5, %c0_6], %6 {strides = array<i32>} : memref<16x256xf32, #tpu.memory_space<vmem>>, vector<16x256xf32>,
    return
  }
  func.func @transform_0(%arg0: i32) -> (i32, i32) {
    %c0_i32 = arith.constant 0 : i32
    %c0_i32_0 = arith.constant 0 : i32
    %c0_i32_1 = arith.constant 0 : i32
    return %c0_i32, %c0_i32_0 : i32, i32
  }
  func.func @transform_1(%arg0: i32) -> (i32, i32) {
    %c0_i32 = arith.constant 0 : i32
    %c0_i32_0 = arith.constant 0 : i32
    return %c0_i32, %arg0 : i32, i32
  }
  func.func @transform_2(%arg0: i32) -> (i32, i32) {
    %c0_i32 = arith.constant 0 : i32
    %c0_i32_0 = arith.constant 0 : i32
    return %c0_i32, %arg0 : i32, i32
  }
  func.func @transform_3(%arg0: i32) -> (i32, i32) {
    %c0_i32 = arith.constant 0 : i32
    %c0_i32_0 = arith.constant 0 : i32
    return %c0_i32, %arg0 : i32, i32
  }
}

</mosaic_0001>

<bundles_post_ra>
// kernel: generator_forward.14
= control target key start
LH: loop header
LB: loop body
LE: loop exit
PB: predicated region body
PF: predicated region fallthrough
CT: control target
= control target key end

     0   :  { %s926_s1 = inlined_call_operand.vmem [shape: bf16[768,128], index: 1, kind: input, shape index: {}]   ;;  %s927_s2 = inlined_call_operand.vmem [shape: f32[1,128], index: 2, kind: input, shape index: {}]   ;;  %s928_s0 = inlined_call_operand.vmem [shape: f32[8,768], index: 0, kind: input, shape index: {}]   ;;  %s929_s3 = inlined_call_operand.vmem [shape: f32[8,128], index: 3, kind: output, shape index: {}]  }
   0x1   :  { %v696_v0 = vld [vmem:[%s926_s1 + $0x38] sm:$0xff]  ;;  %v695_v2 = vld [vmem:[%s926_s1 + $0x30] sm:$0xff]  ;;  %v694_v8 = vld [vmem:[%s926_s1 + $0x28] sm:$0xff] }
   0x2   :  { %v704_v1 = vld [vmem:[%s926_s1 + $0x78] sm:$0xff]  ;;  %414 = vmatpush.bf16.msra.mxu0 %v696_v0  ;;  %v703_v3 = vld [vmem:[%s926_s1 + $0x70] sm:$0xff]  ;;  %v702_v9 = vld [vmem:[%s926_s1 + $0x68] sm:$0xff] }
   0x3   :  { %427 = vmatpush.bf16.msra.mxu1 %v704_v1  ;;  %v712_v4 = vld [vmem:[%s926_s1 + $0xb8] sm:$0xff]  ;;  %v711_v6 = vld [vmem:[%s926_s1 + $0xb0] sm:$0xff]  ;;  %v710_v10 = vld [vmem:[%s926_s1 + $0xa8] sm:$0xff] }
   0x4   :  { %v720_v5 = vld [vmem:[%s926_s1 + $0xf8] sm:$0xff]  ;;  %440 = vmatpush.bf16.msra.mxu2 %v712_v4  ;;  %v719_v7 = vld [vmem:[%s926_s1 + $0xf0] sm:$0xff]  ;;  %v718_v11 = vld [vmem:[%s926_s1 + $0xe8] sm:$0xff] }
   0x5   :  { %453 = vmatpush.bf16.msra.mxu3 %v720_v5  ;;  %v693_v12 = vld [vmem:[%s926_s1 + $0x20] sm:$0xff]  ;;  %v692_v16 = vld [vmem:[%s926_s1 + $0x18] sm:$0xff]  ;;  %v691_v20 = vld [vmem:[%s926_s1 + $0x10] sm:$0xff] }
   0x6   :  { %415 = vmatpush.bf16.msra.mxu0 %v695_v2  ;;  %v701_v13 = vld [vmem:[%s926_s1 + $0x60] sm:$0xff]  ;;  %v700_v17 = vld [vmem:[%s926_s1 + $0x58] sm:$0xff]  ;;  %v699_v21 = vld [vmem:[%s926_s1 + $0x50] sm:$0xff] }
   0x7   :  { %428 = vmatpush.bf16.msra.mxu1 %v703_v3  ;;  %v709_v14 = vld [vmem:[%s926_s1 + $0xa0] sm:$0xff]  ;;  %v708_v18 = vld [vmem:[%s926_s1 + $0x98] sm:$0xff]  ;;  %v707_v22 = vld [vmem:[%s926_s1 + $0x90] sm:$0xff] }
   0x8   :  { %441 = vmatpush.bf16.msra.mxu2 %v711_v6  ;;  %v717_v15 = vld [vmem:[%s926_s1 + $0xe0] sm:$0xff]  ;;  %v716_v19 = vld [vmem:[%s926_s1 + $0xd8] sm:$0xff]  ;;  %v715_v23 = vld [vmem:[%s926_s1 + $0xd0] sm:$0xff] }
   0x9   :  { %454 = vmatpush.bf16.msra.mxu3 %v719_v7  ;;  %v690_v24 = vld [vmem:[%s926_s1 + $0x8] sm:$0xff]  ;;  %v689_v28 = vld [vmem:[%s926_s1] sm:$0xff]  ;;  %v728_v32 = vld [vmem:[%s926_s1 + $0x138] sm:$0xff] }
   0xa   :  { %416 = vmatpush.bf16.msra.mxu0 %v694_v8  ;;  %v698_v25 = vld [vmem:[%s926_s1 + $0x48] sm:$0xff]  ;;  %v697_v29 = vld [vmem:[%s926_s1 + $0x40] sm:$0xff]  ;;  %v736_v33 = vld [vmem:[%s926_s1 + $0x178] sm:$0xff] }
   0xb   :  { %429 = vmatpush.bf16.msra.mxu1 %v702_v9  ;;  %v706_v26 = vld [vmem:[%s926_s1 + $0x88] sm:$0xff]  ;;  %v14_v30 = vld [vmem:[%s928_s0] sm:$0xff]  ;;  %v16_v38 = vld [vmem:[%s928_s0 + $0x10] sm:$0xff] }
   0xc   :  { %442 = vmatpush.bf16.msra.mxu2 %v710_v10  ;;  %v714_v27 = vld [vmem:[%s926_s1 + $0xc8] sm:$0xff]  ;;  %v705_v34 = vld [vmem:[%s926_s1 + $0x80] sm:$0xff]  ;;  %v20_v36 = vpack.c.bf16 %v14_v30, %v14_v30  ;;  %v17_v39 = vld [vmem:[%s928_s0 + $0x18] sm:$0xff]  ;;  %v22_v42 = vpack.c.bf16 %v16_v38, %v16_v38 }
   0xd   :  { %455 = vmatpush.bf16.msra.mxu3 %v718_v11  ;;  %v15_v31 = vld [vmem:[%s928_s0 + $0x8] sm:$0xff]  ;;  %v713_v35 = vld [vmem:[%s926_s1 + $0xc0] sm:$0xff]  ;;  %v727_v40 = vld [vmem:[%s926_s1 + $0x130] sm:$0xff]  ;;  %v23_v43 = vpack.c.bf16 %v17_v39, %v17_v39 }
   0xe   :  { %417 = vmatpush.bf16.msra.mxu0 %v693_v12  ;;  %v21_v37 = vpack.c.bf16 %v15_v31, %v15_v31  ;;  %v735_v41 = vld [vmem:[%s926_s1 + $0x170] sm:$0xff]  ;;  %v726_v44 = vld [vmem:[%s926_s1 + $0x128] sm:$0xff]  ;;  %v725_v46 = vld [vmem:[%s926_s1 + $0x120] sm:$0xff] }
   0xf   :  { %430 = vmatpush.bf16.msra.mxu1 %v701_v13  ;;  %v734_v45 = vld [vmem:[%s926_s1 + $0x168] sm:$0xff]  ;;  %v733_v47 = vld [vmem:[%s926_s1 + $0x160] sm:$0xff]  ;;  %v724_v48 = vld [vmem:[%s926_s1 + $0x118] sm:$0xff] }
  0x10   :  { %443 = vmatpush.bf16.msra.mxu2 %v709_v14  ;;  %v732_v49 = vld [vmem:[%s926_s1 + $0x158] sm:$0xff]  ;;  %v723_v50 = vld [vmem:[%s926_s1 + $0x110] sm:$0xff]  ;;  %v722_v52 = vld [vmem:[%s926_s1 + $0x108] sm:$0xff] }
  0x11   :  { %456 = vmatpush.bf16.msra.mxu3 %v717_v15  ;;  %v731_v51 = vld [vmem:[%s926_s1 + $0x150] sm:$0xff]  ;;  %v730_v53 = vld [vmem:[%s926_s1 + $0x148] sm:$0xff]  ;;  %v721_v54 = vld [vmem:[%s926_s1 + $0x100] sm:$0xff] }
  0x12   :  { %418 = vmatpush.bf16.msra.mxu0 %v692_v16  ;;  %v729_v55 = vld [vmem:[%s926_s1 + $0x140] sm:$0xff]  ;;  %v19_v57 = vld [vmem:[%s928_s0 + $0x28] sm:$0xff] }
  0x13   :  { %431 = vmatpush.bf16.msra.mxu1 %v700_v17  ;;  %v18_v56 = vld [vmem:[%s928_s0 + $0x20] sm:$0xff]  ;;  %v25_v59 = vpack.c.bf16 %v19_v57, %v19_v57 }
  0x14   :  { %444 = vmatpush.bf16.msra.mxu2 %v708_v18  ;;  %v24_v58 = vpack.c.bf16 %v18_v56, %v18_v56  ;;  %v737_v2 = vld [vmem:[%s927_s2] ss:$0 sm:$0xff] }
  0x15   :  { %457 = vmatpush.bf16.msra.mxu3 %v716_v19 }
  0x16   :  { %419 = vmatpush.bf16.msra.mxu0 %v691_v20 }
  0x17   :  { %432 = vmatpush.bf16.msra.mxu1 %v699_v21 }
  0x18   :  { %445 = vmatpush.bf16.msra.mxu2 %v707_v22 }
  0x19   :  { %458 = vmatpush.bf16.msra.mxu3 %v715_v23 }
  0x1a   :  { %420 = vmatpush.bf16.msra.mxu0 %v690_v24 }
  0x1b   :  { %433 = vmatpush.bf16.msra.mxu1 %v698_v25 }
  0x1c   :  { %446 = vmatpush.bf16.msra.mxu2 %v706_v26 }
  0x1d   :  { %459 = vmatpush.bf16.msra.mxu3 %v714_v27 }
  0x1e   :  { %421 = vmatpush.bf16.msra.mxu0 %v689_v28 }
  0x1f   :  { %434 = vmatpush.bf16.msra.mxu1 %v697_v29 }
  0x20   :  { %447 = vmatpush.bf16.msra.mxu2 %v705_v34 }
  0x21   :  { %460 = vmatpush.bf16.msra.mxu3 %v713_v35  ;;  %422 = vmatmul.bf16.vlgmr.msra.gmra.mxu0 %v20_v36 }
  0x22   :  { %466 = vmatpush.bf16.msrb.mxu0 %v728_v32  ;;  %435 = vmatmul.bf16.vlgmr.msra.gmra.mxu1 %v21_v37 }
  0x23   :  { %479 = vmatpush.bf16.msrb.mxu1 %v736_v33  ;;  %448 = vmatmul.bf16.vlgmr.msra.gmra.mxu2 %v22_v42 }
  0x24   :  { %461 = vmatmul.bf16.vlgmr.msra.gmra.mxu3 %v23_v43 }
  0x26   :  { %467 = vmatpush.bf16.msrb.mxu0 %v727_v40 }
  0x27   :  { %480 = vmatpush.bf16.msrb.mxu1 %v735_v41 }
  0x2a   :  { %468 = vmatpush.bf16.msrb.mxu0 %v726_v44 }
  0x2b   :  { %481 = vmatpush.bf16.msrb.mxu1 %v734_v45 }
  0x2e   :  { %469 = vmatpush.bf16.msrb.mxu0 %v725_v46 }
  0x2f   :  { %482 = vmatpush.bf16.msrb.mxu1 %v733_v47 }
  0x32   :  { %470 = vmatpush.bf16.msrb.mxu0 %v724_v48 }
  0x33   :  { %483 = vmatpush.bf16.msrb.mxu1 %v732_v49 }
  0x36   :  { %471 = vmatpush.bf16.msrb.mxu0 %v723_v50 }
  0x37   :  { %484 = vmatpush.bf16.msrb.mxu1 %v731_v51 }
  0x3a   :  { %472 = vmatpush.bf16.msrb.mxu0 %v722_v52 }
  0x3b   :  { %485 = vmatpush.bf16.msrb.mxu1 %v730_v53 }
  0x3e   :  { %473 = vmatpush.bf16.msrb.mxu0 %v721_v54 }
  0x3f   :  { %486 = vmatpush.bf16.msrb.mxu1 %v729_v55 }
  0x41   :  { %474 = vmatmul.bf16.vlgmr.msrb.gmra.mxu0 %v24_v58 }
  0x42   :  { %487 = vmatmul.bf16.vlgmr.msrb.gmra.mxu1 %v25_v59 }
  0x9e   :  { %v423_v60 = vpop.f32.mrf.mxu0 }
  0x9f   :  { %v436_v61 = vpop.f32.mrf.mxu1  ;;  %v424_v3 = vadd.f32 %v737_v2, %v423_v60 }
  0xa1   :  { %v437_v6 = vadd.f32 %v436_v61, %v424_v3 }
  0xa6   :  { %v425_v62 = vpop.f32.mrf.mxu0  ;;  %v449_v0 = vpop.f32.mrf.mxu2 }
  0xa7   :  { %v438_v63 = vpop.f32.mrf.mxu1  ;;  %v462_v1 = vpop.f32.mrf.mxu3  ;;  %v450_v7 = vadd.f32 %v449_v0, %v437_v6 }
  0xa9   :  { %v463_v8 = vadd.f32 %v462_v1, %v450_v7 }
  0xae   :  { %v451_v4 = vpop.f32.mrf.mxu2 }
  0xaf   :  { %v464_v5 = vpop.f32.mrf.mxu3 }
  0xbe   :  { %v475_v9 = vpop.f32.mrf.mxu0 }
  0xbf   :  { %v488_v10 = vpop.f32.mrf.mxu1  ;;  %v476_v11 = vadd.f32 %v475_v9, %v463_v8 }
  0xc1   :  { %v489_v12 = vadd.f32 %v488_v10, %v476_v11 }
  0xc3   :  { %492 = vst [vmem:[%s929_s3] sm:$0xff] %v489_v12 }
  0xc6   :  { %v477_v13 = vpop.f32.mrf.mxu0 }
  0xc7   :  { %v490_v14 = vpop.f32.mrf.mxu1 }

// kernel: generator_forward.19
= control target key start
LH: loop header
LB: loop body
LE: loop exit
PB: predicated region body
PF: predicated region fallthrough
CT: control target
= control target key end

     0   :  { %v90_v2 = vmov 128.0   ;;  %s129_s0 = inlined_call_operand.vmem [shape: f32[16,128], index: 0, kind: input, shape index: {}]   ;;  %s130_s1 = inlined_call_operand.vmem [shape: f32[1,128], index: 1, kind: input, shape index: {}]   ;;  %s131_s2 = inlined_call_operand.vmem [shape: f32[1,128], index: 2, kind: input, shape index: {}]   ;;  %s132_s3 = inlined_call_operand.vmem [shape: f32[16,128], index: 3, kind: output, shape index: {}]  }
   0x1   :  { %v14_v0 = vld [vmem:[%s129_s0] sm:$0xff]  ;;  %v15_v1 = vld [vmem:[%s129_s0 + $0x8] sm:$0xff]  ;;  %84 = vrcp.f32 %v90_v2 }
   0x2   :  { %18 = vadd.xlane.f32.xlu0 %v14_v0  ;;  %v82_v31 = vld [vmem:[%s130_s1] ss:$0 sm:$0xff] }
   0x3   :  { %v83_v34 = vld [vmem:[%s131_s2] ss:$0 sm:$0xff] }
   0x7   :  { %v85_v3 = vpop.eup %84 }
   0x8   :  { %v23_v4 = vmul.f32 128.0, %v85_v3  ;;  %vm27_vm0 = vweird.f32 %v85_v3 }
   0xa   :  { %20 = vadd.xlane.f32.xlu0 %v15_v1  ;;  %v24_v5 = vsub.f32 1.0, %v23_v4 }
   0xc   :  { %v25_v6 = vmul.f32 %v85_v3, %v24_v5 }
   0xe   :  { %v26_v7 = vadd.f32 %v85_v3, %v25_v6 }
  0x10   :  { %v28_v8 = vsel %vm27_vm0, %v85_v3, %v26_v7 }
  0x75   :  { %v19_v9 = vpop.xlane.xlu0 %18 }
  0x76   :  { %v29_v10 = vmul.f32 %v28_v8, %v19_v9 }
  0x78   :  { %v31_v11 = vsub.f32 %v14_v0, %v29_v10 }
  0x7a   :  { %v33_v12 = vmul.f32 %v31_v11, %v31_v11 }
  0x7c   :  { %35 = vadd.xlane.f32.xlu1 %v33_v12 }
  0x7d   :  { %v21_v13 = vpop.xlane.xlu0 %20 }
  0x7e   :  { %v30_v14 = vmul.f32 %v28_v8, %v21_v13 }
  0x80   :  { %v32_v15 = vsub.f32 %v15_v1, %v30_v14 }
  0x82   :  { %v34_v16 = vmul.f32 %v32_v15, %v32_v15 }
  0x84   :  { %37 = vadd.xlane.f32.xlu1 %v34_v16 }
  0xef   :  { %v36_v17 = vpop.xlane.xlu1 %35 }
  0xf0   :  { %v39_v18 = vmul.f32 %v36_v17, %v28_v8 }
  0xf2   :  { %v41_v19 = vadd.f32 1e-05, %v39_v18 }
  0xf4   :  { %86 = vrsqrt.f32 %v41_v19  ;;  %vm49_vm2 = vweird.f32 %v41_v19 }
  0xf7   :  { %v38_v20 = vpop.xlane.xlu1 %37 }
  0xf8   :  { %v40_v21 = vmul.f32 %v38_v20, %v28_v8 }
  0xfa   :  { %v87_v22 = vpop.eup %86  ;;  %v42_v23 = vadd.f32 1e-05, %v40_v21 }
  0xfb   :  { %v44_v24 = vmul.f32 %v87_v22, %v41_v19  ;;  %vm50_vm1 = vweird.f32 %v87_v22 }
  0xfc   :  { %88 = vrsqrt.f32 %v42_v23  ;;  %vm51_vm3 = vmor %vm49_vm2, %vm50_vm1  ;;  %vm59_vm5 = vweird.f32 %v42_v23 }
  0xfd   :  { %v45_v25 = vmul.f32 %v87_v22, %v44_v24 }
  0xff   :  { %v46_v26 = vmul.f32 0.5, %v45_v25 }
 0x101   :  { %v47_v27 = vsub.f32 1.5, %v46_v26 }
 0x102   :  { %v89_v28 = vpop.eup %88 }
 0x103   :  { %v48_v29 = vmul.f32 %v87_v22, %v47_v27  ;;  %v54_v30 = vmul.f32 %v89_v28, %v42_v23  ;;  %vm60_vm4 = vweird.f32 %v89_v28 }
 0x104   :  { %vm61_vm6 = vmor %vm59_vm5, %vm60_vm4 }
 0x105   :  { %v52_v32 = vsel %vm51_vm3, %v87_v22, %v48_v29  ;;  %v55_v33 = vmul.f32 %v89_v28, %v54_v30 }
 0x106   :  { %v63_v35 = vmul.f32 %v52_v32, %v31_v11 }
 0x107   :  { %v56_v36 = vmul.f32 0.5, %v55_v33 }
 0x108   :  { %v68_v37 = vmul.f32 %v82_v31, %v63_v35 }
 0x109   :  { %v57_v38 = vsub.f32 1.5, %v56_v36 }
 0x10a   :  { %v73_v39 = vadd.f32 %v83_v34, %v68_v37 }
 0x10b   :  { %v58_v40 = vmul.f32 %v89_v28, %v57_v38 }
 0x10c   :  { %75 = vst [vmem:[%s132_s3] sm:$0xff] %v73_v39 }
 0x10d   :  { %v62_v41 = vsel %vm61_vm6, %v89_v28, %v58_v40 }
 0x10e   :  { %v64_v42 = vmul.f32 %v62_v41, %v32_v15 }
 0x110   :  { %v69_v43 = vmul.f32 %v82_v31, %v64_v42 }
 0x112   :  { %v74_v44 = vadd.f32 %v83_v34, %v69_v43 }
 0x114   :  { %76 = vst [vmem:[%s132_s3 + $0x8] sm:$0xff] %v74_v44 }

// kernel: generator_forward.16
= control target key start
LH: loop header
LB: loop body
LE: loop exit
PB: predicated region body
PF: predicated region fallthrough
CT: control target
= control target key end

     0   :  { %v1092_v2 = vmov 128.0   ;;  %s1505_s0 = inlined_call_operand.vmem [shape: f32[16,128], index: 0, kind: input, shape index: {}]   ;;  %s1506_s5 = inlined_call_operand.vmem [shape: f32[1,128], index: 5, kind: input, shape index: {}]   ;;  %s1507_s6 = inlined_call_operand.vmem [shape: f32[1,128], index: 6, kind: input, shape index: {}]   ;;  %s1508_s1 = inlined_call_operand.vmem [shape: bf16[128,512], index: 1, kind: input, shape index: {}]   ;;  %s1509_s4 = inlined_call_operand.vmem [shape: f32[1,128], index: 4, kind: input, shape index: {}]   ;;  %s1510_s3 = inlined_call_operand.vmem [shape: bf16[512,128], index: 3, kind: input, shape index: {}]   ;;  %s1511_s2 = inlined_call_operand.vmem [shape: f32[1,512], index: 2, kind: input, shape index: {}]   ;;  %s1512_s7 = inlined_call_operand.vmem [shape: f32[16,128], index: 7, kind: output, shape index: {}]  }
   0x1   :  { %v1136_v0 = vld [vmem:[%s1505_s0] sm:$0xff]  ;;  %v1142_v1 = vld [vmem:[%s1505_s0 + $0x8] sm:$0xff]  ;;  %1070 = vrcp.f32 %v1092_v2  ;;  %v1032_v18 = vld [vmem:[%s1508_s1 + $0xec] sm:$0xf0] }
   0x2   :  { %30 = vadd.xlane.f32.xlu0 %v1136_v0  ;;  %v860_v17 = vld [vmem:[%s1508_s1 + $0xe0] sm:$0xf]  ;;  %v1030_v19 = vld [vmem:[%s1508_s1 + $0xe4] sm:$0xf]  ;;  %v862_v21 = vld [vmem:[%s1508_s1 + $0xf0] sm:$0xf0] }
   0x3   :  { %v861_v20 = vor.u32 %v1032_v18, %v860_v17  ;;  %v868_v22 = vld [vmem:[%s1508_s1 + $0xe8] sm:$0xf]  ;;  %v1033_v23 = vld [vmem:[%s1508_s1 + $0xf4] sm:$0xf0]  ;;  %v865_v24 = vor.u32 %v1030_v19, %v862_v21  ;;  %v1031_v26 = vld [vmem:[%s1508_s1 + $0xec] sm:$0xf] }
   0x4   :  { %v869_v25 = vor.u32 %v1033_v23, %v868_v22  ;;  %v870_v27 = vld [vmem:[%s1508_s1 + $0xf8] sm:$0xf0]  ;;  %v844_v29 = vld [vmem:[%s1508_s1 + $0xc0] sm:$0xf]  ;;  %v1028_v30 = vld [vmem:[%s1508_s1 + $0xcc] sm:$0xf0] }
   0x5   :  { %290 = vmatpush.bf16.msra.mxu0 %v861_v20  ;;  %v873_v28 = vor.u32 %v1031_v26, %v870_v27  ;;  %304 = vmatpush.bf16.msra.mxu1 %v865_v24  ;;  %v1026_v31 = vld [vmem:[%s1508_s1 + $0xc4] sm:$0xf]  ;;  %v845_v32 = vor.u32 %v1028_v30, %v844_v29  ;;  %v846_v33 = vld [vmem:[%s1508_s1 + $0xd0] sm:$0xf0]  ;;  %v852_v34 = vld [vmem:[%s1508_s1 + $0xc8] sm:$0xf] }
   0x6   :  { %318 = vmatpush.bf16.msra.mxu2 %v869_v25  ;;  %v1029_v35 = vld [vmem:[%s1508_s1 + $0xd4] sm:$0xf0]  ;;  %v849_v36 = vor.u32 %v1026_v31, %v846_v33  ;;  %v1027_v38 = vld [vmem:[%s1508_s1 + $0xcc] sm:$0xf]  ;;  %v854_v39 = vld [vmem:[%s1508_s1 + $0xd8] sm:$0xf0] }
   0x7   :  { %v1071_v3 = vpop.eup %1070  ;;  %332 = vmatpush.bf16.msra.mxu3 %v873_v28  ;;  %v853_v37 = vor.u32 %v1029_v35, %v852_v34  ;;  %v857_v40 = vor.u32 %v1027_v38, %v854_v39  ;;  %v828_v41 = vld [vmem:[%s1508_s1 + $0xa0] sm:$0xf]  ;;  %v1024_v42 = vld [vmem:[%s1508_s1 + $0xac] sm:$0xf0]  ;;  %v1022_v43 = vld [vmem:[%s1508_s1 + $0xa4] sm:$0xf] }
   0x8   :  { %v35_v4 = vmul.f32 128.0, %v1071_v3  ;;  %vm39_vm0 = vweird.f32 %v1071_v3  ;;  %v829_v44 = vor.u32 %v1024_v42, %v828_v41  ;;  %v830_v45 = vld [vmem:[%s1508_s1 + $0xb0] sm:$0xf0]  ;;  %v836_v46 = vld [vmem:[%s1508_s1 + $0xa8] sm:$0xf] }
   0x9   :  { %291 = vmatpush.bf16.msra.mxu0 %v845_v32  ;;  %305 = vmatpush.bf16.msra.mxu1 %v849_v36  ;;  %v1025_v47 = vld [vmem:[%s1508_s1 + $0xb4] sm:$0xf0]  ;;  %v833_v48 = vor.u32 %v1022_v43, %v830_v45  ;;  %v1023_v50 = vld [vmem:[%s1508_s1 + $0xac] sm:$0xf]  ;;  %v838_v51 = vld [vmem:[%s1508_s1 + $0xb8] sm:$0xf0] }
   0xa   :  { %32 = vadd.xlane.f32.xlu0 %v1142_v1  ;;  %v36_v5 = vsub.f32 1.0, %v35_v4  ;;  %319 = vmatpush.bf16.msra.mxu2 %v853_v37  ;;  %v837_v49 = vor.u32 %v1025_v47, %v836_v46  ;;  %v841_v52 = vor.u32 %v1023_v50, %v838_v51  ;;  %v812_v53 = vld [vmem:[%s1508_s1 + $0x80] sm:$0xf]  ;;  %v1020_v54 = vld [vmem:[%s1508_s1 + $0x8c] sm:$0xf0] }
   0xb   :  { %333 = vmatpush.bf16.msra.mxu3 %v857_v40  ;;  %v1018_v55 = vld [vmem:[%s1508_s1 + $0x84] sm:$0xf]  ;;  %v813_v56 = vor.u32 %v1020_v54, %v812_v53  ;;  %v814_v57 = vld [vmem:[%s1508_s1 + $0x90] sm:$0xf0]  ;;  %v820_v58 = vld [vmem:[%s1508_s1 + $0x88] sm:$0xf] }
   0xc   :  { %v37_v6 = vmul.f32 %v1071_v3, %v36_v5  ;;  %v1021_v59 = vld [vmem:[%s1508_s1 + $0x94] sm:$0xf0]  ;;  %v817_v60 = vor.u32 %v1018_v55, %v814_v57  ;;  %v1019_v62 = vld [vmem:[%s1508_s1 + $0x8c] sm:$0xf]  ;;  %v822_v63 = vld [vmem:[%s1508_s1 + $0x98] sm:$0xf0] }
   0xd   :  { %292 = vmatpush.bf16.msra.mxu0 %v829_v44  ;;  %306 = vmatpush.bf16.msra.mxu1 %v833_v48  ;;  %v821_v61 = vor.u32 %v1021_v59, %v820_v58  ;;  %v825_v2 = vor.u32 %v1019_v62, %v822_v63  ;;  %v1016_v4 = vld [vmem:[%s1508_s1 + $0x6c] sm:$0xf0]  ;;  %v1014_v5 = vld [vmem:[%s1508_s1 + $0x64] sm:$0xf]  ;;  %v780_v18 = vld [vmem:[%s1508_s1 + $0x40] sm:$0xf] }
   0xe   :  { %v38_v7 = vadd.f32 %v1071_v3, %v37_v6  ;;  %320 = vmatpush.bf16.msra.mxu2 %v837_v49  ;;  %v1012_v19 = vld [vmem:[%s1508_s1 + $0x4c] sm:$0xf0]  ;;  %v1010_v20 = vld [vmem:[%s1508_s1 + $0x44] sm:$0xf]  ;;  %v782_v22 = vld [vmem:[%s1508_s1 + $0x50] sm:$0xf0] }
   0xf   :  { %334 = vmatpush.bf16.msra.mxu3 %v841_v52  ;;  %v781_v21 = vor.u32 %v1012_v19, %v780_v18  ;;  %v788_v23 = vld [vmem:[%s1508_s1 + $0x48] sm:$0xf]  ;;  %v1013_v24 = vld [vmem:[%s1508_s1 + $0x54] sm:$0xf0]  ;;  %v785_v25 = vor.u32 %v1010_v20, %v782_v22  ;;  %v1011_v27 = vld [vmem:[%s1508_s1 + $0x4c] sm:$0xf] }
  0x10   :  { %v1145_v8 = vsel %vm39_vm0, %v1071_v3, %v38_v7  ;;  %v796_v3 = vld [vmem:[%s1508_s1 + $0x60] sm:$0xf]  ;;  %v798_v7 = vld [vmem:[%s1508_s1 + $0x70] sm:$0xf0]  ;;  %v789_v26 = vor.u32 %v1013_v24, %v788_v23  ;;  %v790_v28 = vld [vmem:[%s1508_s1 + $0x58] sm:$0xf0] }
  0x11   :  { %293 = vmatpush.bf16.msra.mxu0 %v813_v56  ;;  %307 = vmatpush.bf16.msra.mxu1 %v817_v60  ;;  %v797_v6 = vor.u32 %v1016_v4, %v796_v3  ;;  %v793_v29 = vor.u32 %v1011_v27, %v790_v28  ;;  %v764_v30 = vld [vmem:[%s1508_s1 + $0x20] sm:$0xf]  ;;  %v1008_v31 = vld [vmem:[%s1508_s1 + $0x2c] sm:$0xf0]  ;;  %v1006_v32 = vld [vmem:[%s1508_s1 + $0x24] sm:$0xf] }
  0x12   :  { %321 = vmatpush.bf16.msra.mxu2 %v821_v61  ;;  %v765_v33 = vor.u32 %v1008_v31, %v764_v30  ;;  %v766_v34 = vld [vmem:[%s1508_s1 + $0x30] sm:$0xf0]  ;;  %v772_v35 = vld [vmem:[%s1508_s1 + $0x28] sm:$0xf]  ;;  %v1009_v36 = vld [vmem:[%s1508_s1 + $0x34] sm:$0xf0] }
  0x13   :  { %335 = vmatpush.bf16.msra.mxu3 %v825_v2  ;;  %v769_v37 = vor.u32 %v1006_v32, %v766_v34  ;;  %v773_v38 = vor.u32 %v1009_v36, %v772_v35  ;;  %v1007_v39 = vld [vmem:[%s1508_s1 + $0x2c] sm:$0xf]  ;;  %v774_v40 = vld [vmem:[%s1508_s1 + $0x38] sm:$0xf0]  ;;  %v748_v41 = vld [vmem:[%s1508_s1] sm:$0xf] }
  0x14   :  { %v777_v43 = vor.u32 %v1007_v39, %v774_v40  ;;  %v1004_v44 = vld [vmem:[%s1508_s1 + $0xc] sm:$0xf0]  ;;  %v1002_v45 = vld [vmem:[%s1508_s1 + $0x4] sm:$0xf]  ;;  %v750_v46 = vld [vmem:[%s1508_s1 + $0x10] sm:$0xf0] }
  0x15   :  { %294 = vmatpush.bf16.msra.mxu0 %v797_v6  ;;  %v749_v48 = vor.u32 %v1004_v44, %v748_v41  ;;  %v753_v49 = vor.u32 %v1002_v45, %v750_v46  ;;  %v756_v50 = vld [vmem:[%s1508_s1 + $0x8] sm:$0xf]  ;;  %v1005_v51 = vld [vmem:[%s1508_s1 + $0x14] sm:$0xf0]  ;;  %v1003_v52 = vld [vmem:[%s1508_s1 + $0xc] sm:$0xf] }
  0x16   :  { %v757_v53 = vor.u32 %v1005_v51, %v756_v50  ;;  %v758_v54 = vld [vmem:[%s1508_s1 + $0x18] sm:$0xf0]  ;;  %v1068_v18 = vld [vmem:[%s1507_s6] ss:$0 sm:$0xff]  ;;  %v1040_v23 = vld [vmem:[%s1510_s3 + $0x30] sm:$0xff] }
  0x17   :  { %v761_v56 = vor.u32 %v1003_v52, %v758_v54  ;;  %v1048_v24 = vld [vmem:[%s1510_s3 + $0x70] sm:$0xff]  ;;  %v1039_v27 = vld [vmem:[%s1510_s3 + $0x28] sm:$0xff]  ;;  %v1038_v31 = vld [vmem:[%s1510_s3 + $0x20] sm:$0xff] }
  0x18   :  { %v1047_v28 = vld [vmem:[%s1510_s3 + $0x68] sm:$0xff]  ;;  %v1064_v30 = vld [vmem:[%s1510_s3 + $0xf0] sm:$0xff]  ;;  %v1046_v32 = vld [vmem:[%s1510_s3 + $0x60] sm:$0xff] }
  0x19   :  { %295 = vmatpush.bf16.msra.mxu0 %v781_v21  ;;  %v1063_v34 = vld [vmem:[%s1510_s3 + $0xe8] sm:$0xff]  ;;  %v1037_v35 = vld [vmem:[%s1510_s3 + $0x18] sm:$0xff]  ;;  %v1036_v39 = vld [vmem:[%s1510_s3 + $0x10] sm:$0xff] }
  0x1a   :  { %v1045_v36 = vld [vmem:[%s1510_s3 + $0x58] sm:$0xff]  ;;  %v1044_v40 = vld [vmem:[%s1510_s3 + $0x50] sm:$0xff]  ;;  %v1043_v44 = vld [vmem:[%s1510_s3 + $0x48] sm:$0xff] }
  0x1b   :  { %v1053_v41 = vld [vmem:[%s1510_s3 + $0x98] sm:$0xff]  ;;  %v1436_v45 = vld [vmem:[%s1511_s2] sm:$0xf]  ;;  %v1052_v46 = vld [vmem:[%s1510_s3 + $0x90] sm:$0xff] }
  0x1c   :  { %v122_v50 = vperm.slane %v1436_v45, 0  ;;  %v123_v51 = vperm.slane %v1436_v45, 1  ;;  %v1051_v52 = vld [vmem:[%s1510_s3 + $0x88] sm:$0xff] }
  0x1d   :  { %296 = vmatpush.bf16.msra.mxu0 %v765_v33  ;;  %v1055_v33 = vld [vmem:[%s1510_s3 + $0xa8] sm:$0xff] }
  0x21   :  { %297 = vmatpush.bf16.msra.mxu0 %v749_v48  ;;  %v1034_v48 = vld [vmem:[%s1510_s3] sm:$0xff] }
  0x75   :  { %v31_v9 = vpop.xlane.xlu0 %30 }
  0x76   :  { %v41_v10 = vmul.f32 %v1145_v8, %v31_v9  ;;  %v804_v9 = vld [vmem:[%s1508_s1 + $0x68] sm:$0xf] }
  0x78   :  { %v1149_v11 = vsub.f32 %v1136_v0, %v41_v10  ;;  %v1017_v10 = vld [vmem:[%s1508_s1 + $0x74] sm:$0xf0] }
  0x7a   :  { %v45_v12 = vmul.f32 %v1149_v11, %v1149_v11 }
  0x7c   :  { %47 = vadd.xlane.f32.xlu1 %v45_v12  ;;  %v801_v12 = vor.u32 %v1014_v5, %v798_v7 }
  0x7d   :  { %v33_v13 = vpop.xlane.xlu0 %32 }
  0x7e   :  { %v42_v14 = vmul.f32 %v1145_v8, %v33_v13  ;;  %v805_v13 = vor.u32 %v1017_v10, %v804_v9  ;;  %308 = vmatpush.bf16.msra.mxu1 %v801_v12  ;;  %v1067_v12 = vld [vmem:[%s1506_s5] ss:$0 sm:$0xff] }
  0x80   :  { %v1155_v15 = vsub.f32 %v1142_v1, %v42_v14  ;;  %v1015_v14 = vld [vmem:[%s1508_s1 + $0x6c] sm:$0xf]  ;;  %322 = vmatpush.bf16.msra.mxu2 %v805_v13 }
  0x82   :  { %v46_v16 = vmul.f32 %v1155_v15, %v1155_v15  ;;  %309 = vmatpush.bf16.msra.mxu1 %v785_v25  ;;  %v1057_v25 = vld [vmem:[%s1510_s3 + $0xb8] sm:$0xff] }
  0x84   :  { %49 = vadd.xlane.f32.xlu1 %v46_v16  ;;  %v806_v16 = vld [vmem:[%s1508_s1 + $0x78] sm:$0xf0]  ;;  %323 = vmatpush.bf16.msra.mxu2 %v789_v26 }
  0x85   :  { %v809_v17 = vor.u32 %v1015_v14, %v806_v16  ;;  %v1065_v26 = vld [vmem:[%s1510_s3 + $0xf8] sm:$0xff] }
  0x86   :  { %310 = vmatpush.bf16.msra.mxu1 %v769_v37  ;;  %v1054_v37 = vld [vmem:[%s1510_s3 + $0xa0] sm:$0xff] }
  0x87   :  { %336 = vmatpush.bf16.msra.mxu3 %v809_v17 }
  0x88   :  { %324 = vmatpush.bf16.msra.mxu2 %v773_v38  ;;  %v1062_v38 = vld [vmem:[%s1510_s3 + $0xe0] sm:$0xff] }
  0x8a   :  { %311 = vmatpush.bf16.msra.mxu1 %v753_v49  ;;  %v1042_v49 = vld [vmem:[%s1510_s3 + $0x40] sm:$0xff] }
  0x8b   :  { %337 = vmatpush.bf16.msra.mxu3 %v793_v29  ;;  %v1056_v29 = vld [vmem:[%s1510_s3 + $0xb0] sm:$0xff] }
  0x8c   :  { %325 = vmatpush.bf16.msra.mxu2 %v757_v53  ;;  %v1059_v53 = vld [vmem:[%s1510_s3 + $0xc8] sm:$0xff] }
  0x8f   :  { %338 = vmatpush.bf16.msra.mxu3 %v777_v43  ;;  %v1035_v43 = vld [vmem:[%s1510_s3 + $0x8] sm:$0xff] }
  0x90   :  { %710 = vmatpush.bf16.msrb.mxu2 %v1057_v25 }
  0x93   :  { %339 = vmatpush.bf16.msra.mxu3 %v761_v56 }
  0x94   :  { %711 = vmatpush.bf16.msrb.mxu2 %v1056_v29 }
  0x97   :  { %724 = vmatpush.bf16.msrb.mxu3 %v1065_v26 }
  0x98   :  { %712 = vmatpush.bf16.msrb.mxu2 %v1055_v33 }
  0x9b   :  { %725 = vmatpush.bf16.msrb.mxu3 %v1064_v30 }
  0x9c   :  { %713 = vmatpush.bf16.msrb.mxu2 %v1054_v37 }
  0x9f   :  { %726 = vmatpush.bf16.msrb.mxu3 %v1063_v34 }
  0xa0   :  { %714 = vmatpush.bf16.msrb.mxu2 %v1053_v41 }
  0xa3   :  { %727 = vmatpush.bf16.msrb.mxu3 %v1062_v38 }
  0xa4   :  { %715 = vmatpush.bf16.msrb.mxu2 %v1052_v46 }
  0xa8   :  { %716 = vmatpush.bf16.msrb.mxu2 %v1051_v52 }
  0xef   :  { %v48_v42 = vpop.xlane.xlu1 %47 }
  0xf0   :  { %v51_v47 = vmul.f32 %v48_v42, %v1145_v8  ;;  %v1061_v42 = vld [vmem:[%s1510_s3 + $0xd8] sm:$0xff] }
  0xf1   :  { %728 = vmatpush.bf16.msrb.mxu3 %v1061_v42 }
  0xf2   :  { %v53_v55 = vadd.f32 1e-05, %v51_v47  ;;  %v1060_v47 = vld [vmem:[%s1510_s3 + $0xd0] sm:$0xff] }
  0xf4   :  { %1072 = vrsqrt.f32 %v53_v55  ;;  %vm61_vm2 = vweird.f32 %v53_v55 }
  0xf5   :  { %729 = vmatpush.bf16.msrb.mxu3 %v1060_v47 }
  0xf7   :  { %v50_v57 = vpop.xlane.xlu1 %49 }
  0xf8   :  { %v52_v58 = vmul.f32 %v50_v57, %v1145_v8 }
  0xf9   :  { %730 = vmatpush.bf16.msrb.mxu3 %v1059_v53 }
  0xfa   :  { %v1073_v59 = vpop.eup %1072  ;;  %v54_v60 = vadd.f32 1e-05, %v52_v58 }
  0xfb   :  { %v56_v61 = vmul.f32 %v1073_v59, %v53_v55  ;;  %vm62_vm1 = vweird.f32 %v1073_v59 }
  0xfc   :  { %1074 = vrsqrt.f32 %v54_v60  ;;  %vm63_vm3 = vmor %vm61_vm2, %vm62_vm1  ;;  %vm71_vm5 = vweird.f32 %v54_v60 }
  0xfd   :  { %v57_v62 = vmul.f32 %v1073_v59, %v56_v61  ;;  %v125_v61 = vperm.slane %v1436_v45, 3 }
  0xff   :  { %v58_v63 = vmul.f32 0.5, %v57_v62  ;;  %v1050_v62 = vld [vmem:[%s1510_s3 + $0x80] sm:$0xff] }
 0x100   :  { %717 = vmatpush.bf16.msrb.mxu2 %v1050_v62 }
 0x101   :  { %v59_v2 = vsub.f32 1.5, %v58_v63  ;;  %v1058_v63 = vld [vmem:[%s1510_s3 + $0xc0] sm:$0xff] }
 0x102   :  { %v1075_v3 = vpop.eup %1074  ;;  %731 = vmatpush.bf16.msrb.mxu3 %v1058_v63 }
 0x103   :  { %v60_v4 = vmul.f32 %v1073_v59, %v59_v2  ;;  %v66_v5 = vmul.f32 %v1075_v3, %v54_v60  ;;  %vm72_vm4 = vweird.f32 %v1075_v3  ;;  %v124_v60 = vperm.slane %v1436_v45, 2 }
 0x104   :  { %vm73_vm6 = vmor %vm71_vm5, %vm72_vm4 }
 0x105   :  { %v67_v6 = vmul.f32 %v1075_v3, %v66_v5  ;;  %v64_v7 = vsel %vm63_vm3, %v1073_v59, %v60_v4 }
 0x106   :  { %v75_v8 = vmul.f32 %v64_v7, %v1149_v11  ;;  %v1041_v11 = vld [vmem:[%s1510_s3 + $0x38] sm:$0xff] }
 0x107   :  { %v68_v9 = vmul.f32 0.5, %v67_v6  ;;  %682 = vmatpush.bf16.msrb.mxu0 %v1041_v11 }
 0x108   :  { %v80_v17 = vmul.f32 %v1067_v12, %v75_v8 }
 0x109   :  { %v69_v10 = vsub.f32 1.5, %v68_v9 }
 0x10a   :  { %v85_v20 = vadd.f32 %v1068_v18, %v80_v17 }
 0x10b   :  { %v70_v13 = vmul.f32 %v1075_v3, %v69_v10  ;;  %683 = vmatpush.bf16.msrb.mxu0 %v1040_v23 }
 0x10d   :  { %v74_v14 = vsel %vm73_vm6, %v1075_v3, %v70_v13 }
 0x10e   :  { %v76_v16 = vmul.f32 %v74_v14, %v1155_v15  ;;  %v1049_v15 = vld [vmem:[%s1510_s3 + $0x78] sm:$0xff] }
 0x10f   :  { %696 = vmatpush.bf16.msrb.mxu1 %v1049_v15  ;;  %684 = vmatpush.bf16.msrb.mxu0 %v1039_v27 }
 0x110   :  { %v81_v19 = vmul.f32 %v1067_v12, %v76_v16 }
 0x112   :  { %v86_v21 = vadd.f32 %v1068_v18, %v81_v19 }
 0x113   :  { %697 = vmatpush.bf16.msrb.mxu1 %v1048_v24  ;;  %685 = vmatpush.bf16.msrb.mxu0 %v1038_v31 }
 0x114   :  { %v87_v22 = vpack.c.bf16 %v86_v21, %v85_v20 }
 0x116   :  { %298 = vmatmul.bf16.vlgmr.msra.gmra.mxu0 %v87_v22  ;;  %312 = vmatmul.bf16.vlgmr.msra.gmra.mxu1 %v87_v22 }
 0x117   :  { %326 = vmatmul.bf16.vlgmr.msra.gmra.mxu2 %v87_v22  ;;  %340 = vmatmul.bf16.vlgmr.msra.gmra.mxu3 %v87_v22 }
 0x118   :  { %698 = vmatpush.bf16.msrb.mxu1 %v1047_v28  ;;  %686 = vmatpush.bf16.msrb.mxu0 %v1037_v35 }
 0x11c   :  { %699 = vmatpush.bf16.msrb.mxu1 %v1046_v32  ;;  %687 = vmatpush.bf16.msrb.mxu0 %v1036_v39 }
 0x120   :  { %700 = vmatpush.bf16.msrb.mxu1 %v1045_v36  ;;  %688 = vmatpush.bf16.msrb.mxu0 %v1035_v43 }
 0x124   :  { %701 = vmatpush.bf16.msrb.mxu1 %v1044_v40  ;;  %689 = vmatpush.bf16.msrb.mxu0 %v1034_v48 }
 0x128   :  { %702 = vmatpush.bf16.msrb.mxu1 %v1043_v44 }
 0x12c   :  { %703 = vmatpush.bf16.msrb.mxu1 %v1042_v49 }
 0x193   :  { %v299_v54 = vpop.f32.mrf.mxu0  ;;  %v313_v55 = vpop.f32.mrf.mxu1 }
 0x194   :  { %v1458_v56 = vadd.f32 %v299_v54, %v122_v50  ;;  %v1460_v57 = vadd.f32 %v313_v55, %v123_v51 }
 0x196   :  { %v354_v58 = vmul.f32 0.044715, %v1458_v56  ;;  %v355_v59 = vmul.f32 0.044715, %v1460_v57  ;;  %v347_v63 = vmul.f32 0.5, %v1460_v57 }
 0x198   :  { %v362_v2 = vmul.f32 %v354_v58, %v1458_v56  ;;  %v363_v3 = vmul.f32 %v355_v59, %v1460_v57 }
 0x19a   :  { %v327_v4 = vpop.f32.mrf.mxu2  ;;  %v341_v5 = vpop.f32.mrf.mxu3  ;;  %v370_v6 = vmul.f32 %v362_v2, %v1458_v56  ;;  %v371_v7 = vmul.f32 %v363_v3, %v1460_v57 }
 0x19b   :  { %v1476_v9 = vadd.f32 %v327_v4, %v124_v60  ;;  %v1478_v10 = vadd.f32 %v341_v5, %v125_v61  ;;  %v301_v8 = vpop.f32.mrf.mxu0  ;;  %v315_v12 = vpop.f32.mrf.mxu1 }
 0x19c   :  { %v302_v13 = vadd.f32 %v301_v8, %v122_v50  ;;  %v316_v14 = vadd.f32 %v315_v12, %v123_v51  ;;  %v378_v16 = vadd.f32 %v370_v6, %v1458_v56  ;;  %v379_v19 = vadd.f32 %v371_v7, %v1460_v57 }
 0x19d   :  { %v356_v17 = vmul.f32 0.044715, %v1476_v9  ;;  %v357_v18 = vmul.f32 0.044715, %v1478_v10 }
 0x19e   :  { %v358_v20 = vmul.f32 0.044715, %v302_v13  ;;  %v359_v21 = vmul.f32 0.044715, %v316_v14  ;;  %v386_v24 = vmul.f32 0.7978846, %v378_v16 }
 0x19f   :  { %v364_v22 = vmul.f32 %v356_v17, %v1476_v9  ;;  %v365_v11 = vmul.f32 %v357_v18, %v1478_v10  ;;  %v387_v25 = vmul.f32 0.7978846, %v379_v19  ;;  %v351_v2 = vmul.f32 0.5, %v316_v14 }
 0x1a0   :  { %v366_v15 = vmul.f32 %v358_v20, %v302_v13  ;;  %v367_v23 = vmul.f32 %v359_v21, %v316_v14  ;;  %1076 = vtanh.f32 %v386_v24  ;;  %v348_v20 = vmul.f32 0.5, %v1476_v9 }
 0x1a1   :  { %v372_v26 = vmul.f32 %v364_v22, %v1476_v9  ;;  %v373_v27 = vmul.f32 %v365_v11, %v1478_v10  ;;  %1078 = vtanh.f32 %v387_v25  ;;  %v349_v21 = vmul.f32 0.5, %v1478_v10 }
 0x1a2   :  { %v329_v28 = vpop.f32.mrf.mxu2  ;;  %v343_v29 = vpop.f32.mrf.mxu3  ;;  %v374_v30 = vmul.f32 %v366_v15, %v302_v13  ;;  %v375_v31 = vmul.f32 %v367_v23, %v316_v14 }
 0x1a3   :  { %v330_v32 = vadd.f32 %v329_v28, %v124_v60  ;;  %v344_v33 = vadd.f32 %v343_v29, %v125_v61  ;;  %v380_v34 = vadd.f32 %v372_v26, %v1476_v9  ;;  %v381_v37 = vadd.f32 %v373_v27, %v1478_v10  ;;  %v1069_v29 = vld [vmem:[%s1509_s4] ss:$0 sm:$0xff] }
 0x1a4   :  { %v382_v35 = vadd.f32 %v374_v30, %v302_v13  ;;  %v383_v36 = vadd.f32 %v375_v31, %v316_v14  ;;  %v346_v60 = vmul.f32 0.5, %v1458_v56  ;;  %v350_v61 = vmul.f32 0.5, %v302_v13 }
 0x1a5   :  { %v360_v38 = vmul.f32 0.044715, %v330_v32  ;;  %v361_v39 = vmul.f32 0.044715, %v344_v33  ;;  %v388_v44 = vmul.f32 0.7978846, %v380_v34 }
 0x1a6   :  { %v390_v40 = vmul.f32 0.7978846, %v382_v35  ;;  %v391_v41 = vmul.f32 0.7978846, %v383_v36  ;;  %v389_v45 = vmul.f32 0.7978846, %v381_v37  ;;  %v1077_v48 = vpop.eup %1076 }
 0x1a7   :  { %v368_v42 = vmul.f32 %v360_v38, %v330_v32  ;;  %v369_v43 = vmul.f32 %v361_v39, %v344_v33  ;;  %v1079_v49 = vpop.eup %1078  ;;  %v402_v52 = vadd.f32 1.0, %v1077_v48  ;;  %v352_v57 = vmul.f32 0.5, %v330_v32 }
 0x1a8   :  { %1080 = vtanh.f32 %v390_v40  ;;  %v403_v58 = vadd.f32 1.0, %v1079_v49  ;;  %v353_v22 = vmul.f32 0.5, %v344_v33 }
 0x1a9   :  { %1082 = vtanh.f32 %v391_v41  ;;  %v376_v46 = vmul.f32 %v368_v42, %v330_v32  ;;  %v377_v47 = vmul.f32 %v369_v43, %v344_v33  ;;  %v410_v5 = vmul.f32 %v402_v52, %v346_v60 }
 0x1aa   :  { %1084 = vtanh.f32 %v388_v44  ;;  %v411_v8 = vmul.f32 %v403_v58, %v347_v63 }
 0x1ab   :  { %v384_v50 = vadd.f32 %v376_v46, %v330_v32  ;;  %v385_v51 = vadd.f32 %v377_v47, %v344_v33  ;;  %1086 = vtanh.f32 %v389_v45 }
 0x1ad   :  { %v392_v53 = vmul.f32 0.7978846, %v384_v50  ;;  %v393_v54 = vmul.f32 0.7978846, %v385_v51 }
 0x1ae   :  { %v1081_v55 = vpop.eup %1080 }
 0x1af   :  { %v1083_v59 = vpop.eup %1082  ;;  %v406_v62 = vadd.f32 1.0, %v1081_v55  ;;  %1088 = vtanh.f32 %v392_v53 }
 0x1b0   :  { %v407_v3 = vadd.f32 1.0, %v1083_v59  ;;  %1090 = vtanh.f32 %v393_v54  ;;  %v1085_v4 = vpop.eup %1084 }
 0x1b1   :  { %v414_v6 = vmul.f32 %v406_v62, %v350_v61  ;;  %v1087_v7 = vpop.eup %1086  ;;  %v404_v18 = vadd.f32 1.0, %v1085_v4 }
 0x1b2   :  { %v415_v12 = vmul.f32 %v407_v3, %v351_v2  ;;  %v405_v56 = vadd.f32 1.0, %v1087_v7 }
 0x1b3   :  { %v418_v16 = vpack.c.bf16 %v414_v6, %v410_v5  ;;  %v412_v15 = vmul.f32 %v404_v18, %v348_v20 }
 0x1b4   :  { %v419_v17 = vpack.c.bf16 %v415_v12, %v411_v8  ;;  %v413_v24 = vmul.f32 %v405_v56, %v349_v21 }
 0x1b5   :  { %v1089_v19 = vpop.eup %1088  ;;  %690 = vmatmul.bf16.vlgmr.msrb.gmra.mxu0 %v418_v16 }
 0x1b6   :  { %v1091_v13 = vpop.eup %1090  ;;  %704 = vmatmul.bf16.vlgmr.msrb.gmra.mxu1 %v419_v17  ;;  %v408_v14 = vadd.f32 1.0, %v1089_v19 }
 0x1b7   :  { %v409_v11 = vadd.f32 1.0, %v1091_v13 }
 0x1b8   :  { %v416_v23 = vmul.f32 %v408_v14, %v352_v57 }
 0x1b9   :  { %v417_v25 = vmul.f32 %v409_v11, %v353_v22 }
 0x1ba   :  { %v420_v26 = vpack.c.bf16 %v416_v23, %v412_v15 }
 0x1bb   :  { %v421_v27 = vpack.c.bf16 %v417_v25, %v413_v24 }
 0x1bc   :  { %718 = vmatmul.bf16.vlgmr.msrb.gmra.mxu2 %v420_v26 }
 0x1bd   :  { %732 = vmatmul.bf16.vlgmr.msrb.gmra.mxu3 %v421_v27 }
 0x232   :  { %v691_v28 = vpop.f32.mrf.mxu0 }
 0x233   :  { %v692_v9 = vadd.f32 %v1069_v29, %v691_v28  ;;  %v705_v30 = vpop.f32.mrf.mxu1 }
 0x235   :  { %v706_v31 = vadd.f32 %v705_v30, %v692_v9 }
 0x23a   :  { %v693_v32 = vpop.f32.mrf.mxu0 }
 0x23b   :  { %v694_v35 = vadd.f32 %v1069_v29, %v693_v32  ;;  %v707_v38 = vpop.f32.mrf.mxu1 }
 0x23d   :  { %v708_v39 = vadd.f32 %v707_v38, %v694_v35 }
 0x23f   :  { %v719_v10 = vpop.f32.mrf.mxu2 }
 0x240   :  { %v720_v33 = vadd.f32 %v719_v10, %v706_v31  ;;  %v733_v34 = vpop.f32.mrf.mxu3 }
 0x242   :  { %v734_v36 = vadd.f32 %v733_v34, %v720_v33 }
 0x244   :  { %v738_v37 = vadd.f32 %v734_v36, %v1136_v0 }
 0x246   :  { %740 = vst [vmem:[%s1512_s7] sm:$0xff] %v738_v37 }
 0x247   :  { %v721_v40 = vpop.f32.mrf.mxu2 }
 0x248   :  { %v722_v41 = vadd.f32 %v721_v40, %v708_v39  ;;  %v735_v42 = vpop.f32.mrf.mxu3 }
 0x24a   :  { %v736_v43 = vadd.f32 %v735_v42, %v722_v41 }
 0x24c   :  { %v739_v44 = vadd.f32 %v736_v43, %v1142_v1 }
 0x24e   :  { %741 = vst [vmem:[%s1512_s7 + $0x8] sm:$0xff] %v739_v44 }

// kernel: generator_forward.20
= control target key start
LH: loop header
LB: loop body
LE: loop exit
PB: predicated region body
PF: predicated region fallthrough
CT: control target
= control target key end

     0   :  { %vm105_vm0 = vcmask 261120   ;;  %s266_s1 = inlined_call_operand.vmem [shape: bf16[160,128], index: 1, kind: input, shape index: {}]   ;;  %s267_s0 = inlined_call_operand.vmem [shape: f32[16,160], index: 0, kind: input, shape index: {}]   ;;  %s268_s2 = inlined_call_operand.vmem [shape: f32[1,128], index: 2, kind: input, shape index: {}]   ;;  %s269_s3 = inlined_call_operand.vmem [shape: f32[16,128], index: 3, kind: output, shape index: {}]  }
   0x1   :  { %v191_v0 = vld [vmem:[%s266_s1 + $0x38] sm:$0xff]  ;;  %v193_v1 = vld [vmem:[%s266_s1 + $0x48] sm:$0xff]  ;;  %v190_v2 = vld [vmem:[%s266_s1 + $0x30] sm:$0xff] }
   0x2   :  { %109 = vmatpush.bf16.msra.mxu0 %v191_v0  ;;  %129 = vmatpush.bf16.msra.mxu1 %v193_v1  ;;  %v192_v3 = vld [vmem:[%s266_s1 + $0x40] sm:$0xff]  ;;  %v16_v4 = vld [vmem:[%s267_s0 + $0x8] sm:$0xff]  ;;  %v18_v5 = vld [vmem:[%s267_s0 + $0x18] sm:$0xff] }
   0x3   :  { %v189_v6 = vld [vmem:[%s266_s1 + $0x28] sm:$0xff]  ;;  %v20_v7 = vpack.c.bf16 %v18_v5, %v16_v4  ;;  %v188_v8 = vld [vmem:[%s266_s1 + $0x20] sm:$0xff]  ;;  %v187_v9 = vld [vmem:[%s266_s1 + $0x18] sm:$0xff] }
   0x4   :  { %v186_v10 = vld [vmem:[%s266_s1 + $0x10] sm:$0xff]  ;;  %v185_v11 = vld [vmem:[%s266_s1 + $0x8] sm:$0xff]  ;;  %v184_v12 = vld [vmem:[%s266_s1] sm:$0xff] }
   0x5   :  { %v15_v13 = vld [vmem:[%s267_s0] sm:$0xff]  ;;  %v17_v14 = vld [vmem:[%s267_s0 + $0x10] sm:$0xff] }
   0x6   :  { %110 = vmatpush.bf16.msra.mxu0 %v190_v2  ;;  %130 = vmatpush.bf16.msra.mxu1 %v192_v3  ;;  %v19_v15 = vpack.c.bf16 %v17_v14, %v15_v13  ;;  %v194_v16 = vld [vmem:[%s268_s2] ss:$0 sm:$0xff] }
   0x9   :  { %183 = vmatmul.msk.bf16.vlgmr.msra.gmra.mxu1 %vm105_vm0, %v20_v7 }
   0xa   :  { %111 = vmatpush.bf16.msra.mxu0 %v189_v6 }
   0xe   :  { %112 = vmatpush.bf16.msra.mxu0 %v188_v8 }
  0x12   :  { %113 = vmatpush.bf16.msra.mxu0 %v187_v9 }
  0x16   :  { %114 = vmatpush.bf16.msra.mxu0 %v186_v10 }
  0x1a   :  { %115 = vmatpush.bf16.msra.mxu0 %v185_v11 }
  0x1e   :  { %116 = vmatpush.bf16.msra.mxu0 %v184_v12 }
  0x21   :  { %117 = vmatmul.bf16.vlgmr.msra.gmra.mxu0 %v19_v15 }
  0x86   :  { %v132_v17 = vpop.f32.mrf.mxu1 }
  0x8e   :  { %v134_v23 = vpop.f32.mrf.mxu1 }
  0x9e   :  { %v118_v18 = vpop.f32.mrf.mxu0 }
  0x9f   :  { %v119_v19 = vadd.f32 %v194_v16, %v118_v18 }
  0xa1   :  { %v133_v20 = vadd.f32 %v132_v17, %v119_v19 }
  0xa3   :  { %137 = vst [vmem:[%s269_s3] sm:$0xff] %v133_v20 }
  0xa6   :  { %v120_v21 = vpop.f32.mrf.mxu0 }
  0xa7   :  { %v121_v22 = vadd.f32 %v194_v16, %v120_v21 }
  0xa9   :  { %v135_v24 = vadd.f32 %v134_v23, %v121_v22 }
  0xab   :  { %138 = vst [vmem:[%s269_s3 + $0x8] sm:$0xff] %v135_v24 }

// kernel: generator_forward.15
= control target key start
LH: loop header
LB: loop body
LE: loop exit
PB: predicated region body
PF: predicated region fallthrough
CT: control target
= control target key end

     0   :  { %14 = vsyncpa [#allocation3], 0  ;;  %s1384_s11 = smov [#allocation2]   ;;  %s1385_s13 = smov 192   ;;  %s1771_s0 = inlined_call_operand.vmem [shape: f32[16,128], index: 0, kind: input, shape index: {}, may-alias: {0,1}]   ;;  %s1772_s1 = inlined_call_operand.vmem [shape: f32[16,128], index: 1, kind: input, shape index: {}, may-alias: {0,1}]   ;;  %s1773_s2 = inlined_call_operand.vmem [shape: s32[16,16], index: 2, kind: input, shape index: {}]   ;;  %s1774_s3 = inlined_call_operand.hbm [shape: bf16[128,384], index: 3, kind: input, shape index: {}]   ;;  %s1775_s4 = inlined_call_operand.vmem [shape: f32[1,384], index: 4, kind: input, shape index: {}]   ;;  %s1776_s5 = inlined_call_operand.vmem [shape: bf16[128,128], index: 5, kind: input, shape index: {}]   ;;  %s1777_s6 = inlined_call_operand.vmem [shape: f32[1,128], index: 6, kind: input, shape index: {}]   ;;  %s1778_s7 = inlined_call_operand.vmem [shape: f32[1,128], index: 7, kind: input, shape index: {}]   ;;  %s1779_s8 = inlined_call_operand.vmem [shape: f32[1,128], index: 8, kind: input, shape index: {}]   ;;  %s1780_s9 = inlined_call_operand.vmem [shape: f32[16,128], index: 9, kind: output, shape index: {}]  }
   0x1   :  { %s25_s10 = sshll.u32 %s1774_s3, 4  ;;  %s27_s12 = sshll.u32 %s1384_s11, 4  ;;  %s26_s10 = int_to_ptr.hbm [resolvable:$true] %s25_s10  ;;  %s28_s12 = int_to_ptr.vmem [resolvable:$true] %s27_s12 }
   0x2   :  { %s1386_s14 = smov 12  }
   0x3   :  { %33 = dma.hbm_to_vmem [thread:$0]  %s26_s10, 3072, %s28_s12, [#allocation3], %s1385_s13, %s1385_s13, %s1386_s14  }
   0x4   :  { %1382 = dma.done.wait [#allocation3], 3072  }
   0x5   :  { %1383 = vsyncadd [#allocation3], 4294964224  ;;  %v49_v0 = vld [vmem:[%s1771_s0] sm:$0xff]  ;;  %v50_v1 = vld [vmem:[%s1771_s0 + $0x8] sm:$0xff]  ;;  %v1387_v2 = vmov 128.0   ;;  %vm328_vm7 = vcmask 130048  }
   0x6   :  { %53 = vadd.xlane.f32.xlu0 %v49_v0  ;;  %1286 = vrcp.f32 %v1387_v2  ;;  %v1147_v17 = vld [vmem:[#allocation2 + $0xa8] sm:$0xf]  ;;  %v1227_v18 = vld [vmem:[#allocation2 + $0xb0] sm:$0xf0]  ;;  %v1226_v19 = vld [vmem:[#allocation2 + $0xac] sm:$0xf] }
   0x7   :  { %v1148_v20 = vor.u32 %v1227_v18, %v1147_v17  ;;  %v1149_v21 = vld [vmem:[#allocation2 + $0xb4] sm:$0xf0]  ;;  %v1155_v22 = vld [vmem:[#allocation2 + $0xb0] sm:$0xf]  ;;  %v1228_v23 = vld [vmem:[#allocation2 + $0xb8] sm:$0xf0] }
   0x8   :  { %v1152_v24 = vor.u32 %v1226_v19, %v1149_v21  ;;  %v1156_v25 = vor.u32 %v1228_v23, %v1155_v22  ;;  %v1135_v26 = vld [vmem:[#allocation2 + $0x90] sm:$0xf]  ;;  %v1224_v27 = vld [vmem:[#allocation2 + $0x98] sm:$0xf0]  ;;  %v1223_v28 = vld [vmem:[#allocation2 + $0x94] sm:$0xf] }
   0x9   :  { %279 = vmatpush.bf16.msra.mxu0 %v1148_v20  ;;  %v1136_v29 = vor.u32 %v1224_v27, %v1135_v26  ;;  %v1137_v30 = vld [vmem:[#allocation2 + $0x9c] sm:$0xf0]  ;;  %v1143_v31 = vld [vmem:[#allocation2 + $0x98] sm:$0xf]  ;;  %v1225_v32 = vld [vmem:[#allocation2 + $0xa0] sm:$0xf0] }
   0xa   :  { %293 = vmatpush.bf16.msra.mxu1 %v1152_v24  ;;  %307 = vmatpush.bf16.msra.mxu2 %v1156_v25  ;;  %v1140_v33 = vor.u32 %v1223_v28, %v1137_v30  ;;  %v1144_v34 = vor.u32 %v1225_v32, %v1143_v31  ;;  %v1123_v35 = vld [vmem:[#allocation2 + $0x78] sm:$0xf]  ;;  %v1221_v36 = vld [vmem:[#allocation2 + $0x80] sm:$0xf0]  ;;  %v1220_v37 = vld [vmem:[#allocation2 + $0x7c] sm:$0xf] }
   0xb   :  { %v1124_v38 = vor.u32 %v1221_v36, %v1123_v35  ;;  %v1125_v39 = vld [vmem:[#allocation2 + $0x84] sm:$0xf0]  ;;  %v1131_v40 = vld [vmem:[#allocation2 + $0x80] sm:$0xf]  ;;  %v1222_v41 = vld [vmem:[#allocation2 + $0x88] sm:$0xf0] }
   0xc   :  { %v1287_v3 = vpop.eup %1286  ;;  %v1128_v42 = vor.u32 %v1220_v37, %v1125_v39  ;;  %v1132_v43 = vor.u32 %v1222_v41, %v1131_v40  ;;  %v1111_v44 = vld [vmem:[#allocation2 + $0x60] sm:$0xf]  ;;  %v1218_v45 = vld [vmem:[#allocation2 + $0x68] sm:$0xf0]  ;;  %v1217_v46 = vld [vmem:[#allocation2 + $0x64] sm:$0xf] }
   0xd   :  { %v58_v4 = vmul.f32 128.0, %v1287_v3  ;;  %vm62_vm0 = vweird.f32 %v1287_v3  ;;  %280 = vmatpush.bf16.msra.mxu0 %v1136_v29  ;;  %v1112_v47 = vor.u32 %v1218_v45, %v1111_v44  ;;  %v1113_v48 = vld [vmem:[#allocation2 + $0x6c] sm:$0xf0]  ;;  %v1119_v49 = vld [vmem:[#allocation2 + $0x68] sm:$0xf]  ;;  %s1390_s23 = smov 80  }
   0xe   :  { %55 = vadd.xlane.f32.xlu0 %v50_v1  ;;  %294 = vmatpush.bf16.msra.mxu1 %v1140_v33  ;;  %v1219_v50 = vld [vmem:[#allocation2 + $0x70] sm:$0xf0]  ;;  %v1116_v51 = vor.u32 %v1217_v46, %v1113_v48  ;;  %v1099_v53 = vld [vmem:[#allocation2 + $0x48] sm:$0xf]  ;;  %v1214_v55 = vld [vmem:[#allocation2 + $0x4c] sm:$0xf] }
   0xf   :  { %v59_v5 = vsub.f32 1.0, %v58_v4  ;;  %308 = vmatpush.bf16.msra.mxu2 %v1144_v34  ;;  %v1120_v52 = vor.u32 %v1219_v50, %v1119_v49  ;;  %v1215_v54 = vld [vmem:[#allocation2 + $0x50] sm:$0xf0]  ;;  %v1101_v57 = vld [vmem:[#allocation2 + $0x54] sm:$0xf0]  ;;  %s1391_s24 = smov 64  }
  0x10   :  { %v1100_v56 = vor.u32 %v1215_v54, %v1099_v53  ;;  %v1107_v58 = vld [vmem:[#allocation2 + $0x50] sm:$0xf]  ;;  %v1216_v59 = vld [vmem:[#allocation2 + $0x58] sm:$0xf0]  ;;  %v1104_v60 = vor.u32 %v1214_v55, %v1101_v57  ;;  %v1089_v2 = vld [vmem:[#allocation2 + $0x3c] sm:$0xf0] }
  0x11   :  { %v60_v6 = vmul.f32 %v1287_v3, %v59_v5  ;;  %281 = vmatpush.bf16.msra.mxu0 %v1124_v38  ;;  %v1108_v61 = vor.u32 %v1216_v59, %v1107_v58  ;;  %v1087_v62 = vld [vmem:[#allocation2 + $0x30] sm:$0xf]  ;;  %v1212_v63 = vld [vmem:[#allocation2 + $0x38] sm:$0xf0]  ;;  %v1213_v4 = vld [vmem:[#allocation2 + $0x40] sm:$0xf0] }
  0x12   :  { %295 = vmatpush.bf16.msra.mxu1 %v1128_v42  ;;  %v1063_v19 = vld [vmem:[#allocation2] sm:$0xf]  ;;  %v1206_v20 = vld [vmem:[#allocation2 + $0x8] sm:$0xf0]  ;;  %v1205_v21 = vld [vmem:[#allocation2 + $0x4] sm:$0xf] }
  0x13   :  { %v61_v7 = vadd.f32 %v1287_v3, %v60_v6  ;;  %309 = vmatpush.bf16.msra.mxu2 %v1132_v43  ;;  %v1064_v23 = vor.u32 %v1206_v20, %v1063_v19  ;;  %v1065_v24 = vld [vmem:[#allocation2 + $0xc] sm:$0xf0]  ;;  %v1071_v25 = vld [vmem:[#allocation2 + $0x8] sm:$0xf]  ;;  %v1207_v26 = vld [vmem:[#allocation2 + $0x10] sm:$0xf0] }
  0x14   :  { %v1068_v28 = vor.u32 %v1205_v21, %v1065_v24  ;;  %v1072_v29 = vor.u32 %v1207_v26, %v1071_v25  ;;  %v1283_v46 = vld [vmem:[%s1778_s7] ss:$0 sm:$0xff]  ;;  %s1392_s25 = smov 48   ;;  %s1393_s26 = smov 16   ;;  %vm951_vm10 = vcmask 261120   ;;  %vm954_vm11 = vcmask 392192  }
  0x15   :  { %v1454_v8 = vsel %vm62_vm0, %v1287_v3, %v61_v7  ;;  %282 = vmatpush.bf16.msra.mxu0 %v1112_v47  ;;  %v1095_v3 = vld [vmem:[#allocation2 + $0x38] sm:$0xf]  ;;  %v143_v57 = vld [vmem:[%s1775_s4] sm:$0x7]  ;;  %s1389_s4 = smov 112   ;;  %s1394_s1 = smov 32  }
  0x16   :  { %296 = vmatpush.bf16.msra.mxu1 %v1116_v51  ;;  %v1096_v6 = vor.u32 %v1213_v4, %v1095_v3  ;;  %v1075_v7 = vld [vmem:[#allocation2 + $0x18] sm:$0xf]  ;;  %v1284_v51 = vld [vmem:[%s1779_s8] ss:$0 sm:$0xff]  ;;  %v145_v58 = vperm.slane %v143_v57, 0  ;;  %v147_v4 = vperm.slane %v143_v57, 2 }
  0x17   :  { %310 = vmatpush.bf16.msra.mxu2 %v1120_v52  ;;  %s1388_s8 = smov 96   ;;  %vm957_vm12 = vcmask 523264   ;;  %vm960_vm13 = vcmask 654336   ;;  %vm963_vm14 = vcmask 785408   ;;  %vm966_vm15 = vcmask 916480  }
  0x19   :  { %283 = vmatpush.bf16.msra.mxu0 %v1100_v56 }
  0x1a   :  { %297 = vmatpush.bf16.msra.mxu1 %v1104_v60 }
  0x1b   :  { %311 = vmatpush.bf16.msra.mxu2 %v1108_v61 }
  0x1f   :  { %312 = vmatpush.bf16.msra.mxu2 %v1096_v6 }
  0x79   :  { %v54_v9 = vpop.xlane.xlu0 %53 }
  0x7a   :  { %v64_v10 = vmul.f32 %v1454_v8, %v54_v9  ;;  %v1209_v9 = vld [vmem:[#allocation2 + $0x20] sm:$0xf0] }
  0x7c   :  { %v1457_v11 = vsub.f32 %v49_v0, %v64_v10  ;;  %v1211_v0 = vld [vmem:[#allocation2 + $0x34] sm:$0xf]  ;;  %v1208_v10 = vld [vmem:[#allocation2 + $0x1c] sm:$0xf] }
  0x7d   :  { %v1092_v5 = vor.u32 %v1211_v0, %v1089_v2 }
  0x7e   :  { %v68_v12 = vmul.f32 %v1457_v11, %v1457_v11 }
  0x7f   :  { %298 = vmatpush.bf16.msra.mxu1 %v1092_v5 }
  0x80   :  { %70 = vadd.xlane.f32.xlu1 %v68_v12  ;;  %v1076_v12 = vor.u32 %v1209_v9, %v1075_v7 }
  0x81   :  { %v56_v13 = vpop.xlane.xlu0 %55 }
  0x82   :  { %v65_v14 = vmul.f32 %v1454_v8, %v56_v13  ;;  %v1077_v13 = vld [vmem:[#allocation2 + $0x24] sm:$0xf0] }
  0x83   :  { %v1080_v17 = vor.u32 %v1208_v10, %v1077_v13 }
  0x84   :  { %v1462_v15 = vsub.f32 %v50_v1, %v65_v14  ;;  %v1088_v1 = vor.u32 %v1212_v63, %v1087_v62  ;;  %v1083_v14 = vld [vmem:[#allocation2 + $0x20] sm:$0xf] }
  0x85   :  { %299 = vmatpush.bf16.msra.mxu1 %v1080_v17 }
  0x86   :  { %v69_v16 = vmul.f32 %v1462_v15, %v1462_v15  ;;  %284 = vmatpush.bf16.msra.mxu0 %v1088_v1 }
  0x88   :  { %72 = vadd.xlane.f32.xlu1 %v69_v16  ;;  %v1210_v16 = vld [vmem:[#allocation2 + $0x28] sm:$0xf0] }
  0x89   :  { %v1084_v18 = vor.u32 %v1210_v16, %v1083_v14  ;;  %300 = vmatpush.bf16.msra.mxu1 %v1068_v28 }
  0x8a   :  { %285 = vmatpush.bf16.msra.mxu0 %v1076_v12 }
  0x8b   :  { %313 = vmatpush.bf16.msra.mxu2 %v1084_v18 }
  0x8e   :  { %286 = vmatpush.bf16.msra.mxu0 %v1064_v23  ;;  %v1524_v23 = vld [vmem:[%s1773_s2] sm:$0xff] }
  0x8f   :  { %314 = vmatpush.bf16.msra.mxu2 %v1072_v29  ;;  %vm323_vm8 = vcmp.ne.s32.totalorder %v1524_v23, 0  ;;  %v1536_v29 = vld [vmem:[%s1773_s2 + $0x8] sm:$0xff] }
  0x90   :  { %vm324_vm9 = vcmp.ne.s32.totalorder %v1536_v29, 0 }
  0xf3   :  { %v71_v22 = vpop.xlane.xlu1 %70 }
  0xf4   :  { %v74_v27 = vmul.f32 %v71_v22, %v1454_v8 }
  0xf6   :  { %v76_v30 = vadd.f32 1e-05, %v74_v27 }
  0xf8   :  { %1288 = vrsqrt.f32 %v76_v30  ;;  %vm84_vm2 = vweird.f32 %v76_v30 }
  0xfb   :  { %v73_v31 = vpop.xlane.xlu1 %72 }
  0xfc   :  { %v75_v32 = vmul.f32 %v73_v31, %v1454_v8 }
  0xfe   :  { %v1289_v33 = vpop.eup %1288  ;;  %v77_v34 = vadd.f32 1e-05, %v75_v32 }
  0xff   :  { %v79_v35 = vmul.f32 %v1289_v33, %v76_v30  ;;  %vm85_vm1 = vweird.f32 %v1289_v33 }
 0x100   :  { %1290 = vrsqrt.f32 %v77_v34  ;;  %vm86_vm3 = vmor %vm84_vm2, %vm85_vm1  ;;  %vm94_vm5 = vweird.f32 %v77_v34 }
 0x101   :  { %v80_v36 = vmul.f32 %v1289_v33, %v79_v35 }
 0x103   :  { %v81_v37 = vmul.f32 0.5, %v80_v36 }
 0x105   :  { %v82_v38 = vsub.f32 1.5, %v81_v37 }
 0x106   :  { %v1291_v39 = vpop.eup %1290 }
 0x107   :  { %v83_v40 = vmul.f32 %v1289_v33, %v82_v38  ;;  %v89_v41 = vmul.f32 %v1291_v39, %v77_v34  ;;  %vm95_vm4 = vweird.f32 %v1291_v39 }
 0x108   :  { %vm96_vm6 = vmor %vm94_vm5, %vm95_vm4 }
 0x109   :  { %v90_v42 = vmul.f32 %v1291_v39, %v89_v41  ;;  %v87_v43 = vsel %vm86_vm3, %v1289_v33, %v83_v40 }
 0x10a   :  { %v98_v8 = vmul.f32 %v87_v43, %v1457_v11 }
 0x10b   :  { %v91_v44 = vmul.f32 0.5, %v90_v42 }
 0x10c   :  { %v103_v50 = vmul.f32 %v1283_v46, %v98_v8 }
 0x10d   :  { %v92_v45 = vsub.f32 1.5, %v91_v44 }
 0x10e   :  { %v108_v53 = vadd.f32 %v1284_v51, %v103_v50 }
 0x10f   :  { %v93_v47 = vmul.f32 %v1291_v39, %v92_v45 }
 0x111   :  { %v97_v48 = vsel %vm96_vm6, %v1291_v39, %v93_v47 }
 0x112   :  { %v99_v49 = vmul.f32 %v97_v48, %v1462_v15  ;;  %v146_v15 = vperm.slane %v143_v57, 1 }
 0x114   :  { %v104_v52 = vmul.f32 %v1283_v46, %v99_v49 }
 0x116   :  { %v109_v54 = vadd.f32 %v1284_v51, %v104_v52 }
 0x118   :  { %v110_v55 = vpack.c.bf16 %v109_v54, %v108_v53 }
 0x11a   :  { %287 = vmatmul.bf16.vlgmr.msra.gmra.mxu0 %v110_v55  ;;  %301 = vmatmul.bf16.vlgmr.msra.gmra.mxu1 %v110_v55 }
 0x11b   :  { %315 = vmatmul.bf16.vlgmr.msra.gmra.mxu2 %v110_v55 }
 0x197   :  { %v288_v11 = vpop.f32.mrf.mxu0  ;;  %v302_v56 = vpop.f32.mrf.mxu1 }
 0x198   :  { %v289_v62 = vadd.f32 %v288_v11, %v145_v58  ;;  %v303_v63 = vadd.f32 %v302_v56, %v146_v15 }
 0x19e   :  { %v316_v59 = vpop.f32.mrf.mxu2 }
 0x19f   :  { %v290_v60 = vpop.f32.mrf.mxu0  ;;  %v304_v61 = vpop.f32.mrf.mxu1  ;;  %v317_v7 = vadd.f32 %v316_v59, %v147_v4 }
 0x1a0   :  { %v291_v0 = vadd.f32 %v290_v60, %v145_v58  ;;  %v305_v1 = vadd.f32 %v304_v61, %v146_v15 }
 0x1a2   :  { %v1479_v2 = vpack.c.bf16 %v291_v0, %v289_v62  ;;  %v1481_v3 = vpack.c.bf16 %v305_v1, %v303_v63 }
 0x1a4   :  { %469 = vrot.lane.b32.xlu2 %v1481_v3, %s1388_s8  ;;  %397 = vrot.lane.b32.xlu0 %v1481_v3, %s1389_s4  ;;  %v333_v5 = vsel %vm328_vm7, %v1481_v3, 0 }
 0x1a5   :  { %394 = vrot.lane.b32.xlu1 %v1479_v2, %s1389_s4  ;;  %342 = vmatpush.bf16.xpose.msra.mxu3 %v333_v5 }
 0x1a6   :  { %v318_v6 = vpop.f32.mrf.mxu2 }
 0x1a7   :  { %v319_v9 = vadd.f32 %v318_v6, %v147_v4 }
 0x1a9   :  { %v1491_v10 = vpack.c.bf16 %v319_v9, %v317_v7 }
 0x1ac   :  { %540 = vrot.lane.b32.xlu0 %v1481_v3, %s1390_s23  ;;  %1157 = vmatmul.msk.bf16.vlgmr.msra.gmra.mxu3 %vm328_vm7, %v1479_v2 }
 0x1ad   :  { %382 = vmatpush.bf16.msrb.mxu3 %v1491_v10  ;;  %538 = vrot.lane.b32.xlu1 %v1479_v2, %s1390_s23 }
 0x1b4   :  { %611 = vrot.lane.b32.xlu0 %v1481_v3, %s1391_s24 }
 0x1b5   :  { %609 = vrot.lane.b32.xlu1 %v1479_v2, %s1391_s24 }
 0x1bc   :  { %680 = vrot.lane.b32.xlu0 %v1479_v2, %s1392_s25 }
 0x1bd   :  { %824 = vrot.lane.b32.xlu1 %v1481_v3, %s1393_s26 }
 0x1c4   :  { %751 = vrot.lane.b32.xlu0 %v1479_v2, %s1394_s1 }
 0x1c5   :  { %585 = vrot.lane.b32.xlu1 %v1491_v10, %s1390_s23 }
 0x1cc   :  { %443 = vrot.lane.b32.xlu0 %v1491_v10, %s1389_s4 }
 0x1fe   :  { %v470_v12 = vpop.permute.xlu2 %469 }
 0x1ff   :  { %v475_v13 = vsel %vm328_vm7, %v470_v12, 0 }
 0x200   :  { %484 = vmatpush.bf16.xpose.msrb.mxu2 %v475_v13 }
 0x216   :  { %v398_v14 = vpop.permute.xlu0 %397 }
 0x217   :  { %v403_v16 = vsel %vm328_vm7, %v398_v14, 0  ;;  %v1516_v17 = vpop.permute.xlu1 %394 }
 0x218   :  { %412 = vmatpush.bf16.xpose.msra.mxu3 %v403_v16 }
 0x21e   :  { %v541_v18 = vpop.permute.xlu0 %540 }
 0x21f   :  { %v1518_v19 = vpop.permute.xlu1 %538  ;;  %v546_v55 = vsel %vm328_vm7, %v541_v18, 0 }
 0x226   :  { %v612_v20 = vpop.permute.xlu0 %611 }
 0x227   :  { %v617_v21 = vsel %vm328_vm7, %v612_v20, 0  ;;  %v610_v22 = vpop.permute.xlu1 %609 }
 0x228   :  { %626 = vmatpush.bf16.xpose.msrb.mxu1 %v617_v21 }
 0x22e   :  { %v1526_v24 = vpop.permute.xlu0 %680 }
 0x22f   :  { %v344_v25 = vpop.f32.mrf.mxu3  ;;  %1165 = vmatmul.msk.bf16.vlgmr.msrb.gmra.mxu1 %vm328_vm7, %v610_v22  ;;  %v825_v30 = vpop.permute.xlu1 %824 }
 0x230   :  { %v349_v26 = vmul.f32 0.25, %v344_v25  ;;  %v830_v60 = vsel %vm328_vm7, %v825_v30, 0 }
 0x232   :  { %v351_v27 = vsel %vm323_vm8, %v349_v26, -1e+30 }
 0x233   :  { %v353_v28 = vsel %vm328_vm7, %v351_v27, -inf }
 0x234   :  { %354 = vmax.xlane.f32.xlu2 %v353_v28 }
 0x236   :  { %v752_v31 = vpop.permute.xlu0 %751 }
 0x237   :  { %v346_v32 = vpop.f32.mrf.mxu3  ;;  %v586_v37 = vpop.permute.xlu1 %585 }
 0x238   :  { %v350_v33 = vmul.f32 0.25, %v346_v32 }
 0x23a   :  { %v352_v34 = vsel %vm324_vm9, %v350_v33, -1e+30 }
 0x23b   :  { %v356_v35 = vsel %vm328_vm7, %v352_v34, -inf }
 0x23c   :  { %357 = vmax.xlane.f32.xlu2 %v356_v35 }
 0x23e   :  { %v444_v36 = vpop.permute.xlu0 %443 }
 0x23f   :  { %456 = vmatpush.bf16.msrb.mxu0 %v444_v36 }
 0x243   :  { %598 = vmatpush.bf16.msra.mxu0 %v586_v37 }
 0x254   :  { %467 = vrot.lane.b32.xlu2 %v1479_v2, %s1388_s8 }
 0x25c   :  { %682 = vrot.lane.b32.xlu2 %v1481_v3, %s1392_s25 }
 0x264   :  { %753 = vrot.lane.b32.xlu2 %v1481_v3, %s1394_s1 }
 0x26c   :  { %822 = vrot.lane.b32.xlu2 %v1479_v2, %s1393_s26 }
 0x274   :  { %514 = vrot.lane.b32.xlu2 %v1491_v10, %s1388_s8 }
 0x2a7   :  { %v355_v38 = vpop.xlane.xlu2 %354 }
 0x2a8   :  { %v359_v39 = vsub.f32 %v351_v27, %v355_v38 }
 0x2aa   :  { %v361_v42 = vmul.f32 1.442695, %v359_v39 }
 0x2ac   :  { %v628_v40 = vpop.f32.mrf.mxu1  ;;  %1292 = vpow2.f32 %v361_v42 }
 0x2ad   :  { %v633_v41 = vmul.f32 0.25, %v628_v40 }
 0x2af   :  { %v358_v43 = vpop.xlane.xlu2 %357  ;;  %v1554_v44 = vsel %vm323_vm8, %v633_v41, -1e+30 }
 0x2b0   :  { %v360_v45 = vsub.f32 %v352_v34, %v358_v43  ;;  %v637_v8 = vsel %vm328_vm7, %v1554_v44, -inf }
 0x2b1   :  { %638 = vmax.xlane.f32.xlu1 %v637_v8 }
 0x2b2   :  { %v363_v46 = vmul.f32 1.442695, %v360_v45  ;;  %v1565_v52 = vpop.eup %1292 }
 0x2b4   :  { %1294 = vpow2.f32 %v363_v46  ;;  %v630_v47 = vpop.f32.mrf.mxu1 }
 0x2b5   :  { %v634_v48 = vmul.f32 0.25, %v630_v47 }
 0x2b7   :  { %v468_v49 = vpop.permute.xlu2 %467  ;;  %v1560_v50 = vsel %vm324_vm9, %v634_v48, -1e+30 }
 0x2b8   :  { %1161 = vmatmul.msk.bf16.vlgmr.msrb.gmra.mxu2 %vm328_vm7, %v468_v49  ;;  %v640_v51 = vsel %vm328_vm7, %v1560_v50, -inf }
 0x2b9   :  { %641 = vmax.xlane.f32.xlu0 %v640_v51 }
 0x2ba   :  { %v1567_v53 = vpop.eup %1294 }
 0x2bb   :  { %v371_v54 = vpack.c.bf16 %v1567_v53, %v1565_v52 }
 0x2bd   :  { %1158 = vmatmul.msk.bf16.vlgmr.msrb.gmra.mxu3 %vm328_vm7, %v371_v54 }
 0x2be   :  { %555 = vmatpush.bf16.xpose.msrb.mxu3 %v546_v55 }
 0x2bf   :  { %v683_v11 = vpop.permute.xlu2 %682 }
 0x2c0   :  { %v688_v58 = vsel %vm328_vm7, %v683_v11, 0 }
 0x2c7   :  { %v754_v56 = vpop.permute.xlu2 %753 }
 0x2c8   :  { %v759_v57 = vsel %vm328_vm7, %v754_v56, 0 }
 0x2c9   :  { %768 = vmatpush.bf16.xpose.msra.mxu1 %v759_v57 }
 0x2cd   :  { %1159 = vmatmul.msk.bf16.vlgmr.msra.gmra.mxu3 %vm328_vm7, %v1516_v17 }
 0x2ce   :  { %697 = vmatpush.bf16.xpose.msra.mxu3 %v688_v58 }
 0x2cf   :  { %v823_v15 = vpop.permute.xlu2 %822 }
 0x2d0   :  { %1169 = vmatmul.msk.bf16.vlgmr.msra.gmra.mxu1 %vm328_vm7, %v752_v31 }
 0x2d7   :  { %v515_v59 = vpop.permute.xlu2 %514 }
 0x2d8   :  { %527 = vmatpush.bf16.msra.mxu2 %v515_v59 }
 0x2dd   :  { %1163 = vmatmul.msk.bf16.vlgmr.msrb.gmra.mxu3 %vm328_vm7, %v1518_v19 }
 0x2de   :  { %839 = vmatpush.bf16.xpose.msrb.mxu3 %v830_v60 }
 0x2ed   :  { %1167 = vmatmul.msk.bf16.vlgmr.msra.gmra.mxu3 %vm328_vm7, %v1526_v24 }
 0x2fd   :  { %1171 = vmatmul.msk.bf16.vlgmr.msrb.gmra.mxu3 %vm328_vm7, %v823_v15 }
 0x324   :  { %v639_v11 = vpop.xlane.xlu1 %638 }
 0x325   :  { %v643_v15 = vsub.f32 %v1554_v44, %v639_v11 }
 0x327   :  { %v645_v60 = vmul.f32 1.442695, %v643_v15 }
 0x33b   :  { %v486_v61 = vpop.f32.mrf.mxu2 }
 0x33c   :  { %v491_v62 = vmul.f32 0.25, %v486_v61 }
 0x33e   :  { %v1586_v63 = vsel %vm323_vm8, %v491_v62, -1e+30 }
 0x33f   :  { %v495_v0 = vsel %vm328_vm7, %v1586_v63, -inf }
 0x340   :  { %v1590_v1 = vpop.f32.mrf.mxu3  ;;  %496 = vmax.xlane.f32.xlu2 %v495_v0 }
 0x343   :  { %v488_v2 = vpop.f32.mrf.mxu2 }
 0x344   :  { %v492_v3 = vmul.f32 0.25, %v488_v2 }
 0x346   :  { %v1594_v4 = vsel %vm324_vm9, %v492_v3, -1e+30 }
 0x347   :  { %v498_v5 = vsel %vm328_vm7, %v1594_v4, -inf }
 0x348   :  { %v1598_v6 = vpop.f32.mrf.mxu3  ;;  %499 = vmax.xlane.f32.xlu1 %v498_v5 }
 0x34d   :  { %v770_v7 = vpop.f32.mrf.mxu1 }
 0x34e   :  { %v775_v9 = vmul.f32 0.25, %v770_v7 }
 0x350   :  { %v414_v12 = vpop.f32.mrf.mxu3  ;;  %v1602_v13 = vsel %vm323_vm8, %v775_v9, -1e+30 }
 0x351   :  { %v419_v14 = vmul.f32 0.25, %v414_v12  ;;  %v779_v16 = vsel %vm328_vm7, %v1602_v13, -inf }
 0x352   :  { %780 = vmax.xlane.f32.xlu2 %v779_v16 }
 0x353   :  { %v1608_v17 = vsel %vm323_vm8, %v419_v14, -1e+30 }
 0x354   :  { %v423_v18 = vsel %vm328_vm7, %v1608_v17, -inf }
 0x355   :  { %424 = vmax.xlane.f32.xlu1 %v423_v18  ;;  %v772_v8 = vpop.f32.mrf.mxu1 }
 0x356   :  { %v776_v47 = vmul.f32 0.25, %v772_v8 }
 0x358   :  { %v416_v19 = vpop.f32.mrf.mxu3  ;;  %v1658_v51 = vsel %vm324_vm9, %v776_v47, -1e+30 }
 0x359   :  { %v420_v20 = vmul.f32 0.25, %v416_v19  ;;  %v782_v55 = vsel %vm328_vm7, %v1658_v51, -inf }
 0x35b   :  { %v1614_v21 = vsel %vm324_vm9, %v420_v20, -1e+30 }
 0x35c   :  { %v426_v22 = vsel %vm328_vm7, %v1614_v21, -inf }
 0x35d   :  { %427 = vmax.xlane.f32.xlu0 %v426_v22 }
 0x360   :  { %v557_v24 = vpop.f32.mrf.mxu3 }
 0x361   :  { %v562_v41 = vmul.f32 0.25, %v557_v24 }
 0x363   :  { %v1648_v45 = vsel %vm323_vm8, %v562_v41, -1e+30 }
 0x364   :  { %v566_v46 = vsel %vm328_vm7, %v1648_v45, -inf }
 0x368   :  { %v559_v25 = vpop.f32.mrf.mxu3 }
 0x369   :  { %v563_v26 = vmul.f32 0.25, %v559_v25 }
 0x36a   :  { %727 = vrot.lane.b32.xlu2 %v1491_v10, %s1392_s25 }
 0x36b   :  { %v1622_v27 = vsel %vm324_vm9, %v563_v26, -1e+30 }
 0x36c   :  { %v569_v28 = vsel %vm328_vm7, %v1622_v27, -inf }
 0x36d   :  { %570 = vmax.xlane.f32.xlu1 %v569_v28 }
 0x370   :  { %v699_v30 = vpop.f32.mrf.mxu3 }
 0x371   :  { %656 = vrot.lane.b32.xlu0 %v1491_v10, %s1391_s24  ;;  %v704_v48 = vmul.f32 0.25, %v699_v30 }
 0x373   :  { %v1654_v49 = vsel %vm323_vm8, %v704_v48, -1e+30 }
 0x374   :  { %v708_v54 = vsel %vm328_vm7, %v1654_v49, -inf }
 0x378   :  { %v701_v31 = vpop.f32.mrf.mxu3 }
 0x379   :  { %v705_v32 = vmul.f32 0.25, %v701_v31  ;;  %v368_v31 = vsel %vm328_vm7, %v1567_v53, 0.0 }
 0x37b   :  { %v1630_v33 = vsel %vm324_vm9, %v705_v32, -1e+30 }
 0x37c   :  { %v711_v34 = vsel %vm328_vm7, %v1630_v33, -inf }
 0x37d   :  { %712 = vmax.xlane.f32.xlu1 %v711_v34 }
 0x380   :  { %v841_v35 = vpop.f32.mrf.mxu3 }
 0x381   :  { %v846_v36 = vmul.f32 0.25, %v841_v35 }
 0x383   :  { %v1636_v37 = vsel %vm323_vm8, %v846_v36, -1e+30 }
 0x384   :  { %v850_v38 = vsel %vm328_vm7, %v1636_v37, -inf }
 0x385   :  { %851 = vmax.xlane.f32.xlu1 %v850_v38 }
 0x388   :  { %v843_v39 = vpop.f32.mrf.mxu3 }
 0x389   :  { %v847_v40 = vmul.f32 0.25, %v843_v39 }
 0x38b   :  { %v1642_v42 = vsel %vm324_vm9, %v847_v40, -1e+30 }
 0x38c   :  { %v853_v43 = vsel %vm328_vm7, %v1642_v42, -inf }
 0x38d   :  { %854 = vmax.xlane.f32.xlu1 %v853_v43 }
 0x393   :  { %567 = vmax.xlane.f32.xlu2 %v566_v46 }
 0x39b   :  { %709 = vmax.xlane.f32.xlu2 %v708_v54  ;;  %783 = vmax.xlane.f32.xlu0 %v782_v55 }
 0x3a6   :  { %798 = vrot.lane.b32.xlu1 %v1491_v10, %s1394_s1 }
 0x3b3   :  { %869 = vrot.lane.b32.xlu2 %v1491_v10, %s1393_s26  ;;  %v497_v23 = vpop.xlane.xlu2 %496  ;;  %v642_v10 = vpop.xlane.xlu0 %641 }
 0x3b4   :  { %v501_v29 = vsub.f32 %v1586_v63, %v497_v23  ;;  %v644_v44 = vsub.f32 %v1560_v50, %v642_v10 }
 0x3b6   :  { %v503_v56 = vmul.f32 1.442695, %v501_v29  ;;  %v647_v12 = vmul.f32 1.442695, %v644_v44 }
 0x3b8   :  { %1296 = vpow2.f32 %v503_v56 }
 0x3bb   :  { %v500_v57 = vpop.xlane.xlu1 %499 }
 0x3bc   :  { %v502_v58 = vsub.f32 %v1594_v4, %v500_v57 }
 0x3be   :  { %v505_v59 = vmul.f32 1.442695, %v502_v58  ;;  %v1297_v61 = vpop.eup %1296 }
 0x3c0   :  { %1298 = vpow2.f32 %v505_v59 }
 0x3c1   :  { %1300 = vpow2.f32 %v645_v60 }
 0x3c5   :  { %v781_v62 = vpop.xlane.xlu2 %780 }
 0x3c6   :  { %v1299_v0 = vpop.eup %1298  ;;  %v785_v2 = vsub.f32 %v1602_v13, %v781_v62  ;;  %v507_v13 = vsel %vm328_vm7, %v1297_v61, 0.0 }
 0x3c7   :  { %v513_v3 = vpack.c.bf16 %v1299_v0, %v1297_v61  ;;  %v510_v63 = vsel %vm328_vm7, %v1299_v0, 0.0  ;;  %v1301_v7 = vpop.eup %1300 }
 0x3c8   :  { %511 = vadd.xlane.f32.xlu0 %v510_v63  ;;  %v425_v5 = vpop.xlane.xlu1 %424  ;;  %v787_v4 = vmul.f32 1.442695, %v785_v2  ;;  %v649_v14 = vsel %vm328_vm7, %v1301_v7, 0.0 }
 0x3c9   :  { %1162 = vmatmul.msk.bf16.vlgmr.msra.gmra.mxu2 %vm328_vm7, %v513_v3  ;;  %v429_v9 = vsub.f32 %v1608_v17, %v425_v5  ;;  %v365_v5 = vsel %vm328_vm7, %v1565_v52, 0.0 }
 0x3ca   :  { %1302 = vpow2.f32 %v787_v4 }
 0x3cb   :  { %v431_v16 = vmul.f32 1.442695, %v429_v9  ;;  %1304 = vpow2.f32 %v647_v12 }
 0x3cd   :  { %1306 = vpow2.f32 %v431_v16 }
 0x3d0   :  { %v428_v18 = vpop.xlane.xlu0 %427  ;;  %650 = vadd.xlane.f32.xlu0 %v649_v14  ;;  %508 = vadd.xlane.f32.xlu1 %v507_v13  ;;  %v1679_v22 = vpop.eup %1302 }
 0x3d1   :  { %v430_v19 = vsub.f32 %v1614_v21, %v428_v18  ;;  %v791_v50 = vsel %vm328_vm7, %v1679_v22, 0.0  ;;  %v1305_v17 = vpop.eup %1304  ;;  %v728_v21 = vpop.permute.xlu2 %727 }
 0x3d2   :  { %v652_v26 = vsel %vm328_vm7, %v1305_v17, 0.0  ;;  %v655_v32 = vpack.c.bf16 %v1305_v17, %v1301_v7 }
 0x3d3   :  { %v433_v20 = vmul.f32 1.442695, %v430_v19  ;;  %v1307_v24 = vpop.eup %1306 }
 0x3d4   :  { %v435_v35 = vsel %vm328_vm7, %v1307_v24, 0.0 }
 0x3d5   :  { %1308 = vpow2.f32 %v433_v20 }
 0x3d8   :  { %792 = vadd.xlane.f32.xlu1 %v791_v50 }
 0x3db   :  { %v1683_v25 = vpop.eup %1308 }
 0x3dc   :  { %653 = vadd.xlane.f32.xlu2 %v652_v26  ;;  %v441_v28 = vpack.c.bf16 %v1683_v25, %v1307_v24  ;;  %v438_v44 = vsel %vm328_vm7, %v1683_v25, 0.0 }
 0x3de   :  { %1160 = vmatmul.msk.bf16.vlgmr.msrb.gmra.mxu0 %vm328_vm7, %v441_v28 }
 0x3df   :  { %740 = vmatpush.bf16.msrb.mxu0 %v728_v21 }
 0x3e0   :  { %v571_v34 = vpop.xlane.xlu1 %570 }
 0x3e1   :  { %v573_v48 = vsub.f32 %v1622_v27, %v571_v34 }
 0x3e3   :  { %v657_v30 = vpop.permute.xlu0 %656  ;;  %v576_v11 = vmul.f32 1.442695, %v573_v48 }
 0x3e4   :  { %369 = vadd.xlane.f32.xlu2 %v368_v31  ;;  %669 = vmatpush.bf16.msrb.mxu2 %v657_v30 }
 0x3e7   :  { %1166 = vmatmul.msk.bf16.vlgmr.msrb.gmra.mxu2 %vm328_vm7, %v655_v32 }
 0x3ec   :  { %436 = vadd.xlane.f32.xlu2 %v435_v35 }
 0x3f0   :  { %v713_v36 = vpop.xlane.xlu1 %712 }
 0x3f1   :  { %v715_v38 = vsub.f32 %v1630_v33, %v713_v36 }
 0x3f3   :  { %v718_v39 = vmul.f32 1.442695, %v715_v38 }
 0x3f5   :  { %1310 = vpow2.f32 %v718_v39 }
 0x3f8   :  { %v852_v40 = vpop.xlane.xlu1 %851 }
 0x3f9   :  { %v856_v41 = vsub.f32 %v1636_v37, %v852_v40 }
 0x3fb   :  { %v1311_v43 = vpop.eup %1310  ;;  %v858_v8 = vmul.f32 1.442695, %v856_v41 }
 0x3fc   :  { %v723_v53 = vsel %vm328_vm7, %v1311_v43, 0.0 }
 0x3fd   :  { %1312 = vpow2.f32 %v858_v8  ;;  %724 = vadd.xlane.f32.xlu2 %v723_v53 }
 0x400   :  { %v855_v46 = vpop.xlane.xlu1 %854 }
 0x401   :  { %v857_v47 = vsub.f32 %v1642_v42, %v855_v46 }
 0x403   :  { %v1313_v54 = vpop.eup %1312  ;;  %v860_v55 = vmul.f32 1.442695, %v857_v47 }
 0x404   :  { %v862_v33 = vsel %vm328_vm7, %v1313_v54, 0.0 }
 0x405   :  { %1314 = vpow2.f32 %v860_v55  ;;  %863 = vadd.xlane.f32.xlu2 %v862_v33 }
 0x406   :  { %v568_v23 = vpop.xlane.xlu2 %567  ;;  %1316 = vpow2.f32 %v576_v11 }
 0x407   :  { %v572_v37 = vsub.f32 %v1648_v45, %v568_v23 }
 0x409   :  { %v574_v29 = vmul.f32 1.442695, %v572_v37 }
 0x40b   :  { %v1315_v56 = vpop.eup %1314  ;;  %1318 = vpow2.f32 %v574_v29 }
 0x40c   :  { %v865_v57 = vsel %vm328_vm7, %v1315_v56, 0.0  ;;  %v1317_v15 = vpop.eup %1316  ;;  %v868_v4 = vpack.c.bf16 %v1315_v56, %v1313_v54 }
 0x40d   :  { %866 = vadd.xlane.f32.xlu1 %v865_v57  ;;  %v581_v9 = vsel %vm328_vm7, %v1317_v15, 0.0 }
 0x40e   :  { %v784_v42 = vpop.xlane.xlu0 %783  ;;  %v710_v58 = vpop.xlane.xlu2 %709 }
 0x40f   :  { %v786_v27 = vsub.f32 %v1658_v51, %v784_v42  ;;  %v714_v61 = vsub.f32 %v1654_v49, %v710_v58 }
 0x411   :  { %v1319_v59 = vpop.eup %1318  ;;  %v789_v60 = vmul.f32 1.442695, %v786_v27  ;;  %v716_v45 = vmul.f32 1.442695, %v714_v61 }
 0x412   :  { %v584_v62 = vpack.c.bf16 %v1317_v15, %v1319_v59  ;;  %v578_v7 = vsel %vm328_vm7, %v1319_v59, 0.0 }
 0x413   :  { %1320 = vpow2.f32 %v789_v60 }
 0x414   :  { %1164 = vmatmul.msk.bf16.vlgmr.msra.gmra.mxu0 %vm328_vm7, %v584_v62  ;;  %1322 = vpow2.f32 %v716_v45 }
 0x416   :  { %v870_v0 = vpop.permute.xlu2 %869 }
 0x417   :  { %882 = vmatpush.bf16.msra.mxu0 %v870_v0 }
 0x418   :  { %v799_v2 = vpop.permute.xlu1 %798 }
 0x419   :  { %v1321_v10 = vpop.eup %1320  ;;  %811 = vmatpush.bf16.msra.mxu2 %v799_v2 }
 0x41a   :  { %v797_v3 = vpack.c.bf16 %v1321_v10, %v1679_v22  ;;  %v794_v51 = vsel %vm328_vm7, %v1321_v10, 0.0  ;;  %v1323_v63 = vpop.eup %1322 }
 0x41b   :  { %795 = vadd.xlane.f32.xlu0 %v794_v51  ;;  %v726_v49 = vpack.c.bf16 %v1311_v43, %v1323_v63  ;;  %v720_v12 = vsel %vm328_vm7, %v1323_v63, 0.0 }
 0x41c   :  { %1170 = vmatmul.msk.bf16.vlgmr.msra.gmra.mxu2 %vm328_vm7, %v797_v3 }
 0x423   :  { %366 = vadd.xlane.f32.xlu0 %v365_v5 }
 0x424   :  { %1168 = vmatmul.msk.bf16.vlgmr.msrb.gmra.mxu0 %vm328_vm7, %v726_v49 }
 0x42b   :  { %439 = vadd.xlane.f32.xlu0 %v438_v44 }
 0x433   :  { %579 = vadd.xlane.f32.xlu0 %v578_v7 }
 0x434   :  { %1172 = vmatmul.msk.bf16.vlgmr.msra.gmra.mxu0 %vm328_vm7, %v868_v4 }
 0x43b   :  { %582 = vadd.xlane.f32.xlu0 %v581_v9  ;;  %v512_v52 = vpop.xlane.xlu0 %511 }
 0x43c   :  { %1324 = vrcp.f32 %v512_v52 }
 0x442   :  { %v1325_v16 = vpop.eup %1324 }
 0x443   :  { %721 = vadd.xlane.f32.xlu0 %v720_v12  ;;  %v509_v14 = vpop.xlane.xlu1 %508  ;;  %v651_v17 = vpop.xlane.xlu0 %650 }
 0x444   :  { %1326 = vrcp.f32 %v509_v14 }
 0x445   :  { %1328 = vrcp.f32 %v651_v17  ;;  %v1230_v17 = vld [vmem:[%s1776_s5 + $0x8] sm:$0xff] }
 0x44a   :  { %v1327_v18 = vpop.eup %1326 }
 0x44b   :  { %v1329_v26 = vpop.eup %1328  ;;  %v793_v11 = vpop.xlane.xlu1 %792 }
 0x44c   :  { %v529_v13 = vpop.f32.mrf.mxu2 }
 0x44d   :  { %v536_v20 = vmul.f32 %v1327_v18, %v529_v13  ;;  %v1235_v18 = vld [vmem:[%s1776_s5 + $0x30] sm:$0xff] }
 0x44f   :  { %v654_v24 = vpop.xlane.xlu2 %653 }
 0x450   :  { %1330 = vrcp.f32 %v654_v24  ;;  %v1229_v24 = vld [vmem:[%s1776_s5] sm:$0xff] }
 0x454   :  { %v531_v19 = vpop.f32.mrf.mxu2 }
 0x455   :  { %v537_v22 = vmul.f32 %v1325_v16, %v531_v19  ;;  %v1236_v16 = vld [vmem:[%s1776_s5 + $0x38] sm:$0xff]  ;;  %v1234_v19 = vld [vmem:[%s1776_s5 + $0x28] sm:$0xff] }
 0x456   :  { %v1331_v28 = vpop.eup %1330  ;;  %1038 = vmatpush.bf16.msrb.mxu1 %v1236_v16 }
 0x457   :  { %v1248_v50 = vpack.i.bf16 %v537_v22, %v536_v20  ;;  %v1717_v38 = vpop.xlane.xlu2 %369  ;;  %v1233_v20 = vld [vmem:[%s1776_s5 + $0x20] sm:$0xff]  ;;  %v1232_v22 = vld [vmem:[%s1776_s5 + $0x18] sm:$0xff] }
 0x459   :  { %1249 = vrot.lane.b32.xlu0 %v1248_v50, %s1394_s1  ;;  %v1231_v50 = vld [vmem:[%s1776_s5 + $0x10] sm:$0xff] }
 0x45a   :  { %1039 = vmatpush.bf16.msrb.mxu1 %v1235_v18 }
 0x45b   :  { %v458_v34 = vpop.f32.mrf.mxu0 }
 0x45e   :  { %1040 = vmatpush.bf16.msrb.mxu1 %v1234_v19 }
 0x45f   :  { %v437_v43 = vpop.xlane.xlu2 %436 }
 0x460   :  { %1332 = vrcp.f32 %v437_v43 }
 0x462   :  { %1041 = vmatpush.bf16.msrb.mxu1 %v1233_v20 }
 0x463   :  { %v460_v35 = vpop.f32.mrf.mxu0 }
 0x466   :  { %v1333_v46 = vpop.eup %1332  ;;  %1042 = vmatpush.bf16.msrb.mxu1 %v1232_v22 }
 0x467   :  { %v465_v55 = vmul.f32 %v1333_v46, %v458_v34 }
 0x46a   :  { %v671_v25 = vpop.f32.mrf.mxu2  ;;  %1043 = vmatpush.bf16.msrb.mxu1 %v1231_v50 }
 0x46b   :  { %v678_v30 = vmul.f32 %v1329_v26, %v671_v25 }
 0x46e   :  { %1044 = vmatpush.bf16.msrb.mxu1 %v1230_v17 }
 0x470   :  { %v725_v48 = vpop.xlane.xlu2 %724 }
 0x472   :  { %v673_v21 = vpop.f32.mrf.mxu2  ;;  %1045 = vmatpush.bf16.msrb.mxu1 %v1229_v24 }
 0x473   :  { %v679_v31 = vmul.f32 %v1331_v28, %v673_v21 }
 0x475   :  { %v1253_v32 = vpack.i.bf16 %v679_v31, %v678_v30 }
 0x477   :  { %1254 = vrot.lane.b32.xlu0 %v1253_v32, %s1391_s24 }
 0x478   :  { %v864_v56 = vpop.xlane.xlu2 %863 }
 0x480   :  { %v867_v42 = vpop.xlane.xlu1 %866 }
 0x48e   :  { %v796_v36 = vpop.xlane.xlu0 %795 }
 0x491   :  { %v600_v39 = vpop.f32.mrf.mxu0 }
 0x496   :  { %v1719_v40 = vpop.xlane.xlu0 %366 }
 0x499   :  { %v602_v41 = vpop.f32.mrf.mxu0 }
 0x49e   :  { %v440_v8 = vpop.xlane.xlu0 %439 }
 0x49f   :  { %1334 = vrcp.f32 %v440_v8  ;;  %v813_v57 = vpop.f32.mrf.mxu2 }
 0x4a1   :  { %v742_v53 = vpop.f32.mrf.mxu0 }
 0x4a5   :  { %v1335_v47 = vpop.eup %1334 }
 0x4a6   :  { %v580_v54 = vpop.xlane.xlu0 %579  ;;  %v466_v33 = vmul.f32 %v1335_v47, %v460_v35 }
 0x4a7   :  { %1336 = vrcp.f32 %v580_v54  ;;  %v815_v2 = vpop.f32.mrf.mxu2 }
 0x4a8   :  { %v1258_v23 = vpack.i.bf16 %v466_v33, %v465_v55 }
 0x4a9   :  { %v744_v37 = vpop.f32.mrf.mxu0 }
 0x4aa   :  { %1259 = vrot.lane.b32.xlu1 %v1258_v23, %s1393_s26 }
 0x4ad   :  { %v1337_v27 = vpop.eup %1336 }
 0x4ae   :  { %v583_v29 = vpop.xlane.xlu0 %582  ;;  %v607_v60 = vmul.f32 %v1337_v27, %v600_v39 }
 0x4af   :  { %1338 = vrcp.f32 %v583_v29 }
 0x4b0   :  { %1340 = vrcp.f32 %v864_v56 }
 0x4b1   :  { %v884_v58 = vpop.f32.mrf.mxu0  ;;  %1342 = vrcp.f32 %v867_v42 }
 0x4b2   :  { %1344 = vrcp.f32 %v793_v11 }
 0x4b3   :  { %1346 = vrcp.f32 %v796_v36 }
 0x4b4   :  { %1348 = vrcp.f32 %v725_v48 }
 0x4b5   :  { %v1339_v15 = vpop.eup %1338 }
 0x4b6   :  { %v722_v59 = vpop.xlane.xlu0 %721  ;;  %v608_v61 = vmul.f32 %v1339_v15, %v602_v41  ;;  %v1341_v62 = vpop.eup %1340 }
 0x4b7   :  { %1350 = vrcp.f32 %v722_v59  ;;  %v1343_v0 = vpop.eup %1342  ;;  %v891_v51 = vmul.f32 %v1341_v62, %v884_v58 }
 0x4b8   :  { %v1263_v45 = vpack.i.bf16 %v608_v61, %v607_v60  ;;  %v1345_v3 = vpop.eup %1344  ;;  %1352 = vrcp.f32 %v1717_v38 }
 0x4b9   :  { %v886_v10 = vpop.f32.mrf.mxu0  ;;  %v1347_v49 = vpop.eup %1346  ;;  %v820_v9 = vmul.f32 %v1345_v3, %v813_v57  ;;  %1354 = vrcp.f32 %v1719_v40  ;;  %v1356_v3 = vld [vmem:[%s1771_s0] sm:$0xff] }
 0x4ba   :  { %v892_v63 = vmul.f32 %v1343_v0, %v886_v10  ;;  %1264 = vrot.lane.b32.xlu2 %v1263_v45, %s1392_s25  ;;  %v1349_v5 = vpop.eup %1348  ;;  %v821_v44 = vmul.f32 %v1347_v49, %v815_v2  ;;  %v1285_v0 = vld [vmem:[%s1777_s6] ss:$0 sm:$0xff] }
 0x4bb   :  { %v750_v12 = vmul.f32 %v1349_v5, %v744_v37  ;;  %v1357_v5 = vld [vmem:[%s1771_s0 + $0x8] sm:$0xff] }
 0x4bc   :  { %v1278_v4 = vpack.i.bf16 %v892_v63, %v891_v51  ;;  %v1273_v14 = vpack.i.bf16 %v821_v44, %v820_v9 }
 0x4bd   :  { %v1351_v7 = vpop.eup %1350 }
 0x4be   :  { %1279 = vrot.lane.b32.xlu0 %v1278_v4, %s1389_s4  ;;  %v749_v52 = vmul.f32 %v1351_v7, %v742_v53  ;;  %v1353_v28 = vpop.eup %1352 }
 0x4bf   :  { %v1355_v21 = vpop.eup %1354  ;;  %v392_v34 = vmul.f32 %v1353_v28, %v1598_v6 }
 0x4c0   :  { %v1268_v13 = vpack.i.bf16 %v750_v12, %v749_v52  ;;  %v391_v35 = vmul.f32 %v1355_v21, %v1590_v1 }
 0x4c2   :  { %1274 = vrot.lane.b32.xlu2 %v1273_v14, %s1388_s8  ;;  %1269 = vrot.lane.b32.xlu1 %v1268_v13, %s1390_s23 }
 0x4cb   :  { %v1250_v25 = vpop.permute.xlu0 %1249 }
 0x4cc   :  { %v1252_v38 = vunpack.i.h.bf16 %v1250_v25  ;;  %v1251_v43 = vunpack.i.l.bf16 %v1250_v25 }
 0x4e9   :  { %v1255_v36 = vpop.permute.xlu0 %1254 }
 0x4ea   :  { %v1257_v6 = vunpack.i.h.bf16 %v1255_v36  ;;  %v1256_v55 = vunpack.i.l.bf16 %v1255_v36 }
 0x514   :  { %v1265_v30 = vpop.permute.xlu2 %1264 }
 0x515   :  { %v1267_v53 = vunpack.i.h.bf16 %v1265_v30  ;;  %v1266_v46 = vunpack.i.l.bf16 %v1265_v30 }
 0x51c   :  { %v1260_v26 = vpop.permute.xlu1 %1259  ;;  %v1275_v47 = vpop.permute.xlu2 %1274 }
 0x51d   :  { %v1262_v31 = vunpack.i.h.bf16 %v1260_v26  ;;  %v1261_v32 = vunpack.i.l.bf16 %v1260_v26  ;;  %v1277_v37 = vunpack.i.h.bf16 %v1275_v47  ;;  %v1276_v29 = vunpack.i.l.bf16 %v1275_v47 }
 0x51f   :  { %v950_v39 = vsel %vm328_vm7, %v392_v34, %v1262_v31  ;;  %v949_v41 = vsel %vm328_vm7, %v391_v35, %v1261_v32 }
 0x520   :  { %v953_v40 = vsel %vm951_vm10, %v950_v39, %v1252_v38  ;;  %v952_v8 = vsel %vm951_vm10, %v949_v41, %v1251_v43 }
 0x521   :  { %v955_v48 = vsel %vm954_vm11, %v952_v8, %v1266_v46  ;;  %v956_v54 = vsel %vm954_vm11, %v953_v40, %v1267_v53 }
 0x522   :  { %v958_v56 = vsel %vm957_vm12, %v955_v48, %v1256_v55  ;;  %v959_v57 = vsel %vm957_vm12, %v956_v54, %v1257_v6 }
 0x530   :  { %v1280_v1 = vpop.permute.xlu0 %1279 }
 0x531   :  { %v1282_v42 = vunpack.i.h.bf16 %v1280_v1  ;;  %v1281_v58 = vunpack.i.l.bf16 %v1280_v1 }
 0x534   :  { %v1270_v33 = vpop.permute.xlu1 %1269 }
 0x535   :  { %v1272_v11 = vunpack.i.h.bf16 %v1270_v33  ;;  %v1271_v23 = vunpack.i.l.bf16 %v1270_v33 }
 0x537   :  { %v961_v27 = vsel %vm960_vm13, %v958_v56, %v1271_v23  ;;  %v962_v15 = vsel %vm960_vm13, %v959_v57, %v1272_v11 }
 0x538   :  { %v964_v59 = vsel %vm963_vm14, %v961_v27, %v1276_v29  ;;  %v965_v60 = vsel %vm963_vm14, %v962_v15, %v1277_v37 }
 0x539   :  { %v967_v61 = vsel %vm966_vm15, %v964_v59, %v1281_v58  ;;  %v968_v62 = vsel %vm966_vm15, %v965_v60, %v1282_v42 }
 0x53a   :  { %v969_v45 = vpack.c.bf16 %v968_v62, %v967_v61 }
 0x53c   :  { %1046 = vmatmul.bf16.vlgmr.msrb.gmra.mxu1 %v969_v45 }
 0x5b9   :  { %v1047_v2 = vpop.f32.mrf.mxu1 }
 0x5ba   :  { %v1048_v10 = vadd.f32 %v1285_v0, %v1047_v2 }
 0x5bc   :  { %v1052_v51 = vadd.f32 %v1356_v3, %v1048_v10 }
 0x5be   :  { %1054 = vst [vmem:[%s1780_s9] sm:$0xff] %v1052_v51 }
 0x5c1   :  { %v1049_v63 = vpop.f32.mrf.mxu1 }
 0x5c2   :  { %v1050_v49 = vadd.f32 %v1285_v0, %v1049_v63 }
 0x5c4   :  { %v1053_v44 = vadd.f32 %v1357_v5, %v1050_v49 }
 0x5c6   :  { %1055 = vst [vmem:[%s1780_s9 + $0x8] sm:$0xff] %v1053_v44 }
 0x5c7   :  { %1060 = vsyncpa [#allocation3], 1 }

// kernel: generator_forward.23
= control target key start
LH: loop header
LB: loop body
LE: loop exit
PB: predicated region body
PF: predicated region fallthrough
CT: control target
= control target key end

     0   :  { %12 = vsyncpa [#allocation3], 0  ;;  %s1058_s27 = smov [#allocation2]   ;;  %s1059_s29 = smov 64   ;;  %s1329_s0 = inlined_call_operand.vmem [shape: f32[16,128], index: 0, kind: input, shape index: {}]   ;;  %s1330_s1 = inlined_call_operand.vmem [shape: bf16[128,512], index: 1, kind: input, shape index: {}]   ;;  %s1331_s2 = inlined_call_operand.vmem [shape: f32[1,512], index: 2, kind: input, shape index: {}]   ;;  %s1332_s3 = inlined_call_operand.hbm [shape: bf16[512,128], index: 3, kind: input, shape index: {}]   ;;  %s1333_s4 = inlined_call_operand.vmem [shape: f32[1,128], index: 4, kind: input, shape index: {}]   ;;  %s1334_s5 = inlined_call_operand.vmem [shape: f32[1,128], index: 5, kind: input, shape index: {}]   ;;  %s1335_s6 = inlined_call_operand.vmem [shape: f32[1,128], index: 6, kind: input, shape index: {}]   ;;  %s1336_s7 = inlined_call_operand.vmem [shape: f32[16,128], index: 7, kind: output, shape index: {}]  }
   0x1   :  { %s23_s26 = sshll.u32 %s1332_s3, 4  ;;  %s25_s28 = sshll.u32 %s1058_s27, 4  ;;  %s24_s26 = int_to_ptr.hbm [resolvable:$true] %s23_s26  ;;  %s26_s28 = int_to_ptr.vmem [resolvable:$true] %s25_s28 }
   0x2   :  { %s1060_s30 = smov 4  }
   0x3   :  { %31 = dma.hbm_to_vmem [thread:$0]  %s24_s26, 4096, %s26_s28, [#allocation3], %s1059_s29, %s1059_s29, %s1060_s30  }
   0x4   :  { %1056 = dma.done.wait [#allocation3], 4096  }
   0x5   :  { %1057 = vsyncadd [#allocation3], 4294963200  ;;  %v813_v0 = vld [vmem:[%s1330_s1 + $0xe0] sm:$0xf]  ;;  %v985_v1 = vld [vmem:[%s1330_s1 + $0xec] sm:$0xf0] }
   0x6   :  { %v983_v2 = vld [vmem:[%s1330_s1 + $0xe4] sm:$0xf]  ;;  %v814_v3 = vor.u32 %v985_v1, %v813_v0  ;;  %v815_v4 = vld [vmem:[%s1330_s1 + $0xf0] sm:$0xf0]  ;;  %v821_v5 = vld [vmem:[%s1330_s1 + $0xe8] sm:$0xf] }
   0x7   :  { %v986_v6 = vld [vmem:[%s1330_s1 + $0xf4] sm:$0xf0]  ;;  %v818_v7 = vor.u32 %v983_v2, %v815_v4  ;;  %v984_v9 = vld [vmem:[%s1330_s1 + $0xec] sm:$0xf]  ;;  %v823_v10 = vld [vmem:[%s1330_s1 + $0xf8] sm:$0xf0] }
   0x8   :  { %v822_v8 = vor.u32 %v986_v6, %v821_v5  ;;  %v797_v11 = vld [vmem:[%s1330_s1 + $0xc0] sm:$0xf]  ;;  %249 = vmatpush.bf16.msra.mxu0 %v814_v3  ;;  %v826_v12 = vor.u32 %v984_v9, %v823_v10  ;;  %v981_v13 = vld [vmem:[%s1330_s1 + $0xcc] sm:$0xf0]  ;;  %v979_v14 = vld [vmem:[%s1330_s1 + $0xc4] sm:$0xf] }
   0x9   :  { %v799_v15 = vld [vmem:[%s1330_s1 + $0xd0] sm:$0xf0]  ;;  %263 = vmatpush.bf16.msra.mxu1 %v818_v7  ;;  %v798_v16 = vor.u32 %v981_v13, %v797_v11  ;;  %v805_v18 = vld [vmem:[%s1330_s1 + $0xc8] sm:$0xf]  ;;  %v982_v19 = vld [vmem:[%s1330_s1 + $0xd4] sm:$0xf0] }
   0xa   :  { %277 = vmatpush.bf16.msra.mxu2 %v822_v8  ;;  %v802_v17 = vor.u32 %v979_v14, %v799_v15  ;;  %v980_v20 = vld [vmem:[%s1330_s1 + $0xcc] sm:$0xf]  ;;  %291 = vmatpush.bf16.msra.mxu3 %v826_v12  ;;  %v806_v21 = vor.u32 %v982_v19, %v805_v18  ;;  %v807_v22 = vld [vmem:[%s1330_s1 + $0xd8] sm:$0xf0]  ;;  %v781_v23 = vld [vmem:[%s1330_s1 + $0xa0] sm:$0xf] }
   0xb   :  { %v977_v24 = vld [vmem:[%s1330_s1 + $0xac] sm:$0xf0]  ;;  %v810_v25 = vor.u32 %v980_v20, %v807_v22  ;;  %v975_v26 = vld [vmem:[%s1330_s1 + $0xa4] sm:$0xf]  ;;  %v783_v27 = vld [vmem:[%s1330_s1 + $0xb0] sm:$0xf0] }
   0xc   :  { %v789_v28 = vld [vmem:[%s1330_s1 + $0xa8] sm:$0xf]  ;;  %250 = vmatpush.bf16.msra.mxu0 %v798_v16  ;;  %v782_v29 = vor.u32 %v977_v24, %v781_v23  ;;  %v978_v30 = vld [vmem:[%s1330_s1 + $0xb4] sm:$0xf0]  ;;  %v976_v31 = vld [vmem:[%s1330_s1 + $0xac] sm:$0xf]  ;;  %v786_v33 = vor.u32 %v975_v26, %v783_v27 }
   0xd   :  { %v791_v32 = vld [vmem:[%s1330_s1 + $0xb8] sm:$0xf0]  ;;  %264 = vmatpush.bf16.msra.mxu1 %v802_v17  ;;  %v790_v34 = vor.u32 %v978_v30, %v789_v28  ;;  %v765_v35 = vld [vmem:[%s1330_s1 + $0x80] sm:$0xf]  ;;  %v973_v36 = vld [vmem:[%s1330_s1 + $0x8c] sm:$0xf0] }
   0xe   :  { %278 = vmatpush.bf16.msra.mxu2 %v806_v21  ;;  %v971_v37 = vld [vmem:[%s1330_s1 + $0x84] sm:$0xf]  ;;  %292 = vmatpush.bf16.msra.mxu3 %v810_v25  ;;  %v794_v38 = vor.u32 %v976_v31, %v791_v32  ;;  %v767_v39 = vld [vmem:[%s1330_s1 + $0x90] sm:$0xf0]  ;;  %v773_v40 = vld [vmem:[%s1330_s1 + $0x88] sm:$0xf]  ;;  %v766_v44 = vor.u32 %v973_v36, %v765_v35 }
   0xf   :  { %v974_v41 = vld [vmem:[%s1330_s1 + $0x94] sm:$0xf0]  ;;  %v972_v42 = vld [vmem:[%s1330_s1 + $0x8c] sm:$0xf]  ;;  %v775_v43 = vld [vmem:[%s1330_s1 + $0x98] sm:$0xf0]  ;;  %v770_v45 = vor.u32 %v971_v37, %v767_v39 }
  0x10   :  { %251 = vmatpush.bf16.msra.mxu0 %v782_v29  ;;  %v774_v46 = vor.u32 %v974_v41, %v773_v40  ;;  %v749_v47 = vld [vmem:[%s1330_s1 + $0x60] sm:$0xf]  ;;  %v969_v48 = vld [vmem:[%s1330_s1 + $0x6c] sm:$0xf0]  ;;  %v967_v49 = vld [vmem:[%s1330_s1 + $0x64] sm:$0xf]  ;;  %v778_v50 = vor.u32 %v972_v42, %v775_v43 }
  0x11   :  { %265 = vmatpush.bf16.msra.mxu1 %v786_v33  ;;  %v751_v51 = vld [vmem:[%s1330_s1 + $0x70] sm:$0xf0]  ;;  %v757_v52 = vld [vmem:[%s1330_s1 + $0x68] sm:$0xf]  ;;  %v970_v53 = vld [vmem:[%s1330_s1 + $0x74] sm:$0xf0]  ;;  %v750_v56 = vor.u32 %v969_v48, %v749_v47 }
  0x12   :  { %279 = vmatpush.bf16.msra.mxu2 %v790_v34  ;;  %293 = vmatpush.bf16.msra.mxu3 %v794_v38  ;;  %v968_v54 = vld [vmem:[%s1330_s1 + $0x6c] sm:$0xf]  ;;  %v759_v55 = vld [vmem:[%s1330_s1 + $0x78] sm:$0xf0]  ;;  %v754_v57 = vor.u32 %v967_v49, %v751_v51  ;;  %v758_v58 = vor.u32 %v970_v53, %v757_v52  ;;  %v733_v59 = vld [vmem:[%s1330_s1 + $0x40] sm:$0xf] }
  0x13   :  { %v965_v60 = vld [vmem:[%s1330_s1 + $0x4c] sm:$0xf0]  ;;  %v963_v61 = vld [vmem:[%s1330_s1 + $0x44] sm:$0xf]  ;;  %v762_v62 = vor.u32 %v968_v54, %v759_v55  ;;  %v735_v63 = vld [vmem:[%s1330_s1 + $0x50] sm:$0xf0] }
  0x14   :  { %252 = vmatpush.bf16.msra.mxu0 %v766_v44  ;;  %v741_v0 = vld [vmem:[%s1330_s1 + $0x48] sm:$0xf]  ;;  %v966_v1 = vld [vmem:[%s1330_s1 + $0x54] sm:$0xf0]  ;;  %v964_v2 = vld [vmem:[%s1330_s1 + $0x4c] sm:$0xf]  ;;  %v734_v4 = vor.u32 %v965_v60, %v733_v59  ;;  %v738_v5 = vor.u32 %v963_v61, %v735_v63 }
  0x15   :  { %266 = vmatpush.bf16.msra.mxu1 %v770_v45  ;;  %v743_v3 = vld [vmem:[%s1330_s1 + $0x58] sm:$0xf0]  ;;  %v742_v6 = vor.u32 %v966_v1, %v741_v0  ;;  %v717_v7 = vld [vmem:[%s1330_s1 + $0x20] sm:$0xf]  ;;  %v961_v8 = vld [vmem:[%s1330_s1 + $0x2c] sm:$0xf0] }
  0x16   :  { %280 = vmatpush.bf16.msra.mxu2 %v774_v46  ;;  %294 = vmatpush.bf16.msra.mxu3 %v778_v50  ;;  %v959_v9 = vld [vmem:[%s1330_s1 + $0x24] sm:$0xf]  ;;  %v746_v10 = vor.u32 %v964_v2, %v743_v3  ;;  %v719_v11 = vld [vmem:[%s1330_s1 + $0x30] sm:$0xf0]  ;;  %v725_v12 = vld [vmem:[%s1330_s1 + $0x28] sm:$0xf]  ;;  %v718_v16 = vor.u32 %v961_v8, %v717_v7 }
  0x17   :  { %v962_v13 = vld [vmem:[%s1330_s1 + $0x34] sm:$0xf0]  ;;  %v960_v14 = vld [vmem:[%s1330_s1 + $0x2c] sm:$0xf]  ;;  %v727_v15 = vld [vmem:[%s1330_s1 + $0x38] sm:$0xf0]  ;;  %v722_v17 = vor.u32 %v959_v9, %v719_v11 }
  0x18   :  { %253 = vmatpush.bf16.msra.mxu0 %v750_v56  ;;  %v726_v18 = vor.u32 %v962_v13, %v725_v12  ;;  %v701_v19 = vld [vmem:[%s1330_s1] sm:$0xf]  ;;  %v957_v20 = vld [vmem:[%s1330_s1 + $0xc] sm:$0xf0]  ;;  %v955_v21 = vld [vmem:[%s1330_s1 + $0x4] sm:$0xf]  ;;  %v730_v22 = vor.u32 %v960_v14, %v727_v15 }
  0x19   :  { %267 = vmatpush.bf16.msra.mxu1 %v754_v57  ;;  %v703_v23 = vld [vmem:[%s1330_s1 + $0x10] sm:$0xf0]  ;;  %v709_v24 = vld [vmem:[%s1330_s1 + $0x8] sm:$0xf]  ;;  %v958_v25 = vld [vmem:[%s1330_s1 + $0x14] sm:$0xf0]  ;;  %v702_v29 = vor.u32 %v957_v20, %v701_v19 }
  0x1a   :  { %281 = vmatpush.bf16.msra.mxu2 %v758_v58  ;;  %295 = vmatpush.bf16.msra.mxu3 %v762_v62  ;;  %v956_v26 = vld [vmem:[%s1330_s1 + $0xc] sm:$0xf]  ;;  %v711_v27 = vld [vmem:[%s1330_s1 + $0x18] sm:$0xf0]  ;;  %v1300_v28 = vld [vmem:[%s1329_s0] sm:$0xff]  ;;  %v706_v31 = vor.u32 %v955_v21, %v703_v23  ;;  %v710_v32 = vor.u32 %v958_v25, %v709_v24 }
  0x1b   :  { %v1305_v30 = vld [vmem:[%s1329_s0 + $0x8] sm:$0xff]  ;;  %v714_v33 = vor.u32 %v956_v26, %v711_v27  ;;  %v994_v34 = vld [vmem:[#allocation2 + $0x38] sm:$0xff]  ;;  %v993_v38 = vld [vmem:[#allocation2 + $0x30] sm:$0xff] }
  0x1c   :  { %254 = vmatpush.bf16.msra.mxu0 %v734_v4  ;;  %v46_v35 = vpack.c.bf16 %v1305_v30, %v1300_v28  ;;  %v1002_v36 = vld [vmem:[#allocation2 + $0x78] sm:$0xff]  ;;  %v1001_v40 = vld [vmem:[#allocation2 + $0x70] sm:$0xff]  ;;  %v992_v42 = vld [vmem:[#allocation2 + $0x28] sm:$0xff] }
  0x1d   :  { %268 = vmatpush.bf16.msra.mxu1 %v738_v5  ;;  %v1010_v37 = vld [vmem:[#allocation2 + $0xb8] sm:$0xff]  ;;  %v1009_v41 = vld [vmem:[#allocation2 + $0xb0] sm:$0xff]  ;;  %v1000_v44 = vld [vmem:[#allocation2 + $0x68] sm:$0xff] }
  0x1e   :  { %282 = vmatpush.bf16.msra.mxu2 %v742_v6  ;;  %296 = vmatpush.bf16.msra.mxu3 %v746_v10  ;;  %v1018_v39 = vld [vmem:[#allocation2 + $0xf8] sm:$0xff]  ;;  %v1017_v43 = vld [vmem:[#allocation2 + $0xf0] sm:$0xff]  ;;  %v1008_v45 = vld [vmem:[#allocation2 + $0xa8] sm:$0xff] }
  0x1f   :  { %v991_v46 = vld [vmem:[#allocation2 + $0x20] sm:$0xff]  ;;  %v1016_v47 = vld [vmem:[#allocation2 + $0xe8] sm:$0xff]  ;;  %v990_v49 = vld [vmem:[#allocation2 + $0x18] sm:$0xff] }
  0x20   :  { %255 = vmatpush.bf16.msra.mxu0 %v718_v16  ;;  %v999_v48 = vld [vmem:[#allocation2 + $0x60] sm:$0xff]  ;;  %v998_v50 = vld [vmem:[#allocation2 + $0x58] sm:$0xff]  ;;  %v989_v53 = vld [vmem:[#allocation2 + $0x10] sm:$0xff] }
  0x21   :  { %269 = vmatpush.bf16.msra.mxu1 %v722_v17  ;;  %v1007_v51 = vld [vmem:[#allocation2 + $0xa0] sm:$0xff]  ;;  %v997_v54 = vld [vmem:[#allocation2 + $0x50] sm:$0xff]  ;;  %v1006_v55 = vld [vmem:[#allocation2 + $0x98] sm:$0xff] }
  0x22   :  { %283 = vmatpush.bf16.msra.mxu2 %v726_v18  ;;  %297 = vmatpush.bf16.msra.mxu3 %v730_v22  ;;  %v1015_v52 = vld [vmem:[#allocation2 + $0xe0] sm:$0xff]  ;;  %v1014_v56 = vld [vmem:[#allocation2 + $0xd8] sm:$0xff]  ;;  %v988_v57 = vld [vmem:[#allocation2 + $0x8] sm:$0xff] }
  0x23   :  { %v996_v58 = vld [vmem:[#allocation2 + $0x48] sm:$0xff]  ;;  %v1005_v59 = vld [vmem:[#allocation2 + $0x90] sm:$0xff]  ;;  %v987_v61 = vld [vmem:[#allocation2] sm:$0xff] }
  0x24   :  { %256 = vmatpush.bf16.msra.mxu0 %v702_v29  ;;  %v1013_v60 = vld [vmem:[#allocation2 + $0xd0] sm:$0xff]  ;;  %v995_v62 = vld [vmem:[#allocation2 + $0x40] sm:$0xff]  ;;  %v1004_v63 = vld [vmem:[#allocation2 + $0x88] sm:$0xff] }
  0x25   :  { %270 = vmatpush.bf16.msra.mxu1 %v706_v31  ;;  %v1012_v0 = vld [vmem:[#allocation2 + $0xc8] sm:$0xff]  ;;  %v1003_v1 = vld [vmem:[#allocation2 + $0x80] sm:$0xff] }
  0x26   :  { %284 = vmatpush.bf16.msra.mxu2 %v710_v32  ;;  %298 = vmatpush.bf16.msra.mxu3 %v714_v33  ;;  %v1011_v2 = vld [vmem:[#allocation2 + $0xc0] sm:$0xff] }
  0x27   :  { %257 = vmatmul.bf16.vlgmr.msra.gmra.mxu0 %v46_v35  ;;  %v79_v3 = vld [vmem:[%s1331_s2] sm:$0xf] }
  0x28   :  { %577 = vmatpush.bf16.msrb.mxu0 %v994_v34  ;;  %271 = vmatmul.bf16.vlgmr.msra.gmra.mxu1 %v46_v35  ;;  %v81_v5 = vperm.slane %v79_v3, 0  ;;  %v82_v7 = vperm.slane %v79_v3, 1  ;;  %v83_v17 = vperm.slane %v79_v3, 2  ;;  %v84_v19 = vperm.slane %v79_v3, 3 }
  0x29   :  { %591 = vmatpush.bf16.msrb.mxu1 %v1002_v36  ;;  %285 = vmatmul.bf16.vlgmr.msra.gmra.mxu2 %v46_v35 }
  0x2a   :  { %299 = vmatmul.bf16.vlgmr.msra.gmra.mxu3 %v46_v35  ;;  %605 = vmatpush.bf16.msrb.mxu2 %v1010_v37 }
  0x2b   :  { %619 = vmatpush.bf16.msrb.mxu3 %v1018_v39  ;;  %v1023_v39 = vld [vmem:[%s1333_s4] ss:$0 sm:$0xff] }
  0x2c   :  { %578 = vmatpush.bf16.msrb.mxu0 %v993_v38 }
  0x2d   :  { %592 = vmatpush.bf16.msrb.mxu1 %v1001_v40 }
  0x2e   :  { %606 = vmatpush.bf16.msrb.mxu2 %v1009_v41 }
  0x2f   :  { %620 = vmatpush.bf16.msrb.mxu3 %v1017_v43 }
  0x30   :  { %579 = vmatpush.bf16.msrb.mxu0 %v992_v42 }
  0x31   :  { %593 = vmatpush.bf16.msrb.mxu1 %v1000_v44 }
  0x32   :  { %607 = vmatpush.bf16.msrb.mxu2 %v1008_v45 }
  0x33   :  { %621 = vmatpush.bf16.msrb.mxu3 %v1016_v47 }
  0x34   :  { %580 = vmatpush.bf16.msrb.mxu0 %v991_v46 }
  0x35   :  { %594 = vmatpush.bf16.msrb.mxu1 %v999_v48 }
  0x36   :  { %608 = vmatpush.bf16.msrb.mxu2 %v1007_v51 }
  0x37   :  { %622 = vmatpush.bf16.msrb.mxu3 %v1015_v52 }
  0x38   :  { %581 = vmatpush.bf16.msrb.mxu0 %v990_v49 }
  0x39   :  { %595 = vmatpush.bf16.msrb.mxu1 %v998_v50 }
  0x3a   :  { %609 = vmatpush.bf16.msrb.mxu2 %v1006_v55 }
  0x3b   :  { %623 = vmatpush.bf16.msrb.mxu3 %v1014_v56 }
  0x3c   :  { %582 = vmatpush.bf16.msrb.mxu0 %v989_v53 }
  0x3d   :  { %596 = vmatpush.bf16.msrb.mxu1 %v997_v54 }
  0x3e   :  { %610 = vmatpush.bf16.msrb.mxu2 %v1005_v59 }
  0x3f   :  { %624 = vmatpush.bf16.msrb.mxu3 %v1013_v60 }
  0x40   :  { %583 = vmatpush.bf16.msrb.mxu0 %v988_v57  ;;  %v1061_v57 = vmov 128.0  }
  0x41   :  { %597 = vmatpush.bf16.msrb.mxu1 %v996_v58  ;;  %1026 = vrcp.f32 %v1061_v57 }
  0x42   :  { %611 = vmatpush.bf16.msrb.mxu2 %v1004_v63 }
  0x43   :  { %625 = vmatpush.bf16.msrb.mxu3 %v1012_v0 }
  0x44   :  { %584 = vmatpush.bf16.msrb.mxu0 %v987_v61 }
  0x45   :  { %598 = vmatpush.bf16.msrb.mxu1 %v995_v62 }
  0x46   :  { %612 = vmatpush.bf16.msrb.mxu2 %v1003_v1 }
  0x47   :  { %626 = vmatpush.bf16.msrb.mxu3 %v1011_v2  ;;  %v1027_v58 = vpop.eup %1026 }
  0x48   :  { %v640_v59 = vmul.f32 128.0, %v1027_v58  ;;  %vm644_vm0 = vweird.f32 %v1027_v58 }
  0x4a   :  { %v641_v60 = vsub.f32 1.0, %v640_v59 }
  0x4c   :  { %v642_v61 = vmul.f32 %v1027_v58, %v641_v60 }
  0x4e   :  { %v643_v62 = vadd.f32 %v1027_v58, %v642_v61 }
  0x50   :  { %v645_v63 = vsel %vm644_vm0, %v1027_v58, %v643_v62 }
  0xa4   :  { %v258_v4 = vpop.f32.mrf.mxu0 }
  0xa5   :  { %v272_v6 = vpop.f32.mrf.mxu1  ;;  %v259_v8 = vadd.f32 %v258_v4, %v81_v5 }
  0xa6   :  { %v273_v9 = vadd.f32 %v272_v6, %v82_v7 }
  0xa7   :  { %v305_v13 = vmax.f32 %v259_v8, 0.0 }
  0xa8   :  { %v306_v16 = vmax.f32 %v273_v9, 0.0 }
  0xac   :  { %v286_v10 = vpop.f32.mrf.mxu2  ;;  %v260_v12 = vpop.f32.mrf.mxu0 }
  0xad   :  { %v300_v11 = vpop.f32.mrf.mxu3  ;;  %v261_v14 = vadd.f32 %v260_v12, %v81_v5  ;;  %v274_v15 = vpop.f32.mrf.mxu1  ;;  %v287_v23 = vadd.f32 %v286_v10, %v83_v17 }
  0xae   :  { %v275_v18 = vadd.f32 %v274_v15, %v82_v7  ;;  %v301_v25 = vadd.f32 %v300_v11, %v84_v19 }
  0xaf   :  { %v309_v20 = vmax.f32 %v261_v14, 0.0  ;;  %v307_v32 = vmax.f32 %v287_v23, 0.0  ;;  %v1025_v23 = vld [vmem:[%s1335_s6] ss:$0 sm:$0xff] }
  0xb0   :  { %v310_v21 = vmax.f32 %v275_v18, 0.0  ;;  %v308_v34 = vmax.f32 %v301_v25, 0.0 }
  0xb1   :  { %v313_v22 = vpack.c.bf16 %v309_v20, %v305_v13  ;;  %v1024_v20 = vld [vmem:[%s1334_s5] ss:$0 sm:$0xff] }
  0xb2   :  { %v314_v24 = vpack.c.bf16 %v310_v21, %v306_v16 }
  0xb3   :  { %585 = vmatmul.bf16.vlgmr.msrb.gmra.mxu0 %v313_v22 }
  0xb4   :  { %v288_v26 = vpop.f32.mrf.mxu2  ;;  %599 = vmatmul.bf16.vlgmr.msrb.gmra.mxu1 %v314_v24 }
  0xb5   :  { %v289_v27 = vadd.f32 %v288_v26, %v83_v17  ;;  %v302_v29 = vpop.f32.mrf.mxu3 }
  0xb6   :  { %v303_v31 = vadd.f32 %v302_v29, %v84_v19 }
  0xb7   :  { %v311_v33 = vmax.f32 %v289_v27, 0.0 }
  0xb8   :  { %v312_v35 = vmax.f32 %v303_v31, 0.0 }
  0xb9   :  { %v315_v36 = vpack.c.bf16 %v311_v33, %v307_v32 }
  0xba   :  { %v316_v37 = vpack.c.bf16 %v312_v35, %v308_v34 }
  0xbb   :  { %613 = vmatmul.bf16.vlgmr.msrb.gmra.mxu2 %v315_v36 }
  0xbc   :  { %627 = vmatmul.bf16.vlgmr.msrb.gmra.mxu3 %v316_v37 }
 0x130   :  { %v586_v38 = vpop.f32.mrf.mxu0 }
 0x131   :  { %v587_v40 = vadd.f32 %v1023_v39, %v586_v38  ;;  %v600_v41 = vpop.f32.mrf.mxu1 }
 0x133   :  { %v601_v42 = vadd.f32 %v600_v41, %v587_v40 }
 0x138   :  { %v588_v43 = vpop.f32.mrf.mxu0 }
 0x139   :  { %v589_v47 = vadd.f32 %v1023_v39, %v588_v43  ;;  %v602_v50 = vpop.f32.mrf.mxu1 }
 0x13b   :  { %v603_v51 = vadd.f32 %v602_v50, %v589_v47 }
 0x13e   :  { %v614_v44 = vpop.f32.mrf.mxu2 }
 0x13f   :  { %v615_v45 = vadd.f32 %v614_v44, %v601_v42  ;;  %v628_v46 = vpop.f32.mrf.mxu3 }
 0x141   :  { %v629_v48 = vadd.f32 %v628_v46, %v615_v45 }
 0x143   :  { %v633_v49 = vadd.f32 %v629_v48, %v1300_v28 }
 0x145   :  { %635 = vadd.xlane.f32.xlu0 %v633_v49 }
 0x146   :  { %v616_v52 = vpop.f32.mrf.mxu2 }
 0x147   :  { %v617_v53 = vadd.f32 %v616_v52, %v603_v51  ;;  %v630_v54 = vpop.f32.mrf.mxu3 }
 0x149   :  { %v631_v55 = vadd.f32 %v630_v54, %v617_v53 }
 0x14b   :  { %v634_v56 = vadd.f32 %v631_v55, %v1305_v30 }
 0x14d   :  { %637 = vadd.xlane.f32.xlu0 %v634_v56 }
 0x1b8   :  { %v636_v28 = vpop.xlane.xlu0 %635 }
 0x1b9   :  { %v646_v0 = vmul.f32 %v645_v63, %v636_v28 }
 0x1bb   :  { %v648_v1 = vsub.f32 %v633_v49, %v646_v0 }
 0x1bd   :  { %v650_v2 = vmul.f32 %v648_v1, %v648_v1 }
 0x1bf   :  { %652 = vadd.xlane.f32.xlu1 %v650_v2 }
 0x1c0   :  { %v638_v3 = vpop.xlane.xlu0 %637 }
 0x1c1   :  { %v647_v4 = vmul.f32 %v645_v63, %v638_v3 }
 0x1c3   :  { %v649_v5 = vsub.f32 %v634_v56, %v647_v4 }
 0x1c5   :  { %v651_v6 = vmul.f32 %v649_v5, %v649_v5 }
 0x1c7   :  { %654 = vadd.xlane.f32.xlu1 %v651_v6 }
 0x232   :  { %v653_v30 = vpop.xlane.xlu1 %652 }
 0x233   :  { %v656_v7 = vmul.f32 %v653_v30, %v645_v63 }
 0x235   :  { %v658_v8 = vadd.f32 1e-05, %v656_v7 }
 0x237   :  { %1028 = vrsqrt.f32 %v658_v8  ;;  %vm666_vm2 = vweird.f32 %v658_v8 }
 0x23a   :  { %v655_v9 = vpop.xlane.xlu1 %654 }
 0x23b   :  { %v657_v10 = vmul.f32 %v655_v9, %v645_v63 }
 0x23d   :  { %v1029_v11 = vpop.eup %1028  ;;  %v659_v12 = vadd.f32 1e-05, %v657_v10 }
 0x23e   :  { %v661_v13 = vmul.f32 %v1029_v11, %v658_v8  ;;  %vm667_vm1 = vweird.f32 %v1029_v11 }
 0x23f   :  { %1030 = vrsqrt.f32 %v659_v12  ;;  %vm668_vm3 = vmor %vm666_vm2, %vm667_vm1  ;;  %vm676_vm5 = vweird.f32 %v659_v12 }
 0x240   :  { %v662_v14 = vmul.f32 %v1029_v11, %v661_v13 }
 0x242   :  { %v663_v15 = vmul.f32 0.5, %v662_v14 }
 0x244   :  { %v664_v16 = vsub.f32 1.5, %v663_v15 }
 0x245   :  { %v1031_v17 = vpop.eup %1030 }
 0x246   :  { %v665_v18 = vmul.f32 %v1029_v11, %v664_v16  ;;  %v671_v19 = vmul.f32 %v1031_v17, %v659_v12  ;;  %vm677_vm4 = vweird.f32 %v1031_v17 }
 0x247   :  { %vm678_vm6 = vmor %vm676_vm5, %vm677_vm4 }
 0x248   :  { %v669_v21 = vsel %vm668_vm3, %v1029_v11, %v665_v18  ;;  %v672_v22 = vmul.f32 %v1031_v17, %v671_v19 }
 0x249   :  { %v680_v24 = vmul.f32 %v669_v21, %v648_v1 }
 0x24a   :  { %v673_v25 = vmul.f32 0.5, %v672_v22 }
 0x24b   :  { %v685_v26 = vmul.f32 %v1024_v20, %v680_v24 }
 0x24c   :  { %v674_v27 = vsub.f32 1.5, %v673_v25 }
 0x24d   :  { %v690_v29 = vadd.f32 %v1025_v23, %v685_v26 }
 0x24e   :  { %v675_v31 = vmul.f32 %v1031_v17, %v674_v27 }
 0x24f   :  { %692 = vst [vmem:[%s1336_s7] sm:$0xff] %v690_v29 }
 0x250   :  { %v679_v32 = vsel %vm678_vm6, %v1031_v17, %v675_v31 }
 0x251   :  { %v681_v33 = vmul.f32 %v679_v32, %v649_v5 }
 0x253   :  { %v686_v34 = vmul.f32 %v1024_v20, %v681_v33 }
 0x255   :  { %v691_v35 = vadd.f32 %v1025_v23, %v686_v34 }
 0x257   :  { %693 = vst [vmem:[%s1336_s7 + $0x8] sm:$0xff] %v691_v35 }
 0x258   :  { %698 = vsyncpa [#allocation3], 1 }

// kernel: generator_forward.22
= control target key start
LH: loop header
LB: loop body
LE: loop exit
PB: predicated region body
PF: predicated region fallthrough
CT: control target
= control target key end

     0   :  { %14 = vsyncpa [#allocation3], 0  ;;  %s1388_s12 = smov [#allocation2]   ;;  %s1389_s14 = smov 192   ;;  %s1745_s0 = inlined_call_operand.vmem [shape: f32[16,128], index: 0, kind: input, shape index: {}]   ;;  %s1746_s1 = inlined_call_operand.vmem [shape: f32[16,128], index: 1, kind: input, shape index: {}]   ;;  %s1747_s2 = inlined_call_operand.vmem [shape: s32[16,16], index: 2, kind: input, shape index: {}]   ;;  %s1748_s3 = inlined_call_operand.hbm [shape: bf16[128,384], index: 3, kind: input, shape index: {}]   ;;  %s1749_s4 = inlined_call_operand.vmem [shape: f32[1,384], index: 4, kind: input, shape index: {}]   ;;  %s1750_s5 = inlined_call_operand.vmem [shape: bf16[128,128], index: 5, kind: input, shape index: {}]   ;;  %s1751_s6 = inlined_call_operand.vmem [shape: f32[1,128], index: 6, kind: input, shape index: {}]   ;;  %s1752_s7 = inlined_call_operand.vmem [shape: f32[1,128], index: 7, kind: input, shape index: {}]   ;;  %s1753_s8 = inlined_call_operand.vmem [shape: f32[1,128], index: 8, kind: input, shape index: {}]   ;;  %s1754_s9 = inlined_call_operand.vmem [shape: f32[16,128], index: 9, kind: output, shape index: {}]  }
   0x1   :  { %s25_s11 = sshll.u32 %s1748_s3, 4  ;;  %s27_s13 = sshll.u32 %s1388_s12, 4  ;;  %s26_s11 = int_to_ptr.hbm [resolvable:$true] %s25_s11  ;;  %s28_s13 = int_to_ptr.vmem [resolvable:$true] %s27_s13 }
   0x2   :  { %s1390_s15 = smov 12  }
   0x3   :  { %33 = dma.hbm_to_vmem [thread:$0]  %s26_s11, 3072, %s28_s13, [#allocation3], %s1389_s14, %s1389_s14, %s1390_s15  }
   0x4   :  { %1386 = dma.done.wait [#allocation3], 3072  }
   0x5   :  { %1387 = vsyncadd [#allocation3], 4294964224  ;;  %v1096_v0 = vld [vmem:[#allocation2 + $0xa8] sm:$0xf]  ;;  %v1217_v1 = vld [vmem:[#allocation2 + $0xb0] sm:$0xf0] }
   0x6   :  { %v1156_v2 = vld [vmem:[#allocation2 + $0xac] sm:$0xf]  ;;  %v1097_v3 = vor.u32 %v1217_v1, %v1096_v0  ;;  %v1233_v4 = vld [vmem:[#allocation2 + $0xb4] sm:$0xf0]  ;;  %v1092_v5 = vld [vmem:[#allocation2 + $0x90] sm:$0xf] }
   0x7   :  { %v1216_v6 = vld [vmem:[#allocation2 + $0x98] sm:$0xf0]  ;;  %v1157_v7 = vor.u32 %v1233_v4, %v1156_v2  ;;  %v1148_v8 = vld [vmem:[#allocation2 + $0x94] sm:$0xf]  ;;  %v1231_v9 = vld [vmem:[#allocation2 + $0x9c] sm:$0xf0] }
   0x8   :  { %124 = vmatpush.bf16.msra.mxu0 %v1097_v3  ;;  %v1093_v10 = vor.u32 %v1216_v6, %v1092_v5  ;;  %v1149_v11 = vor.u32 %v1231_v9, %v1148_v8  ;;  %v1088_v12 = vld [vmem:[#allocation2 + $0x78] sm:$0xf]  ;;  %v1215_v13 = vld [vmem:[#allocation2 + $0x80] sm:$0xf0]  ;;  %v1140_v14 = vld [vmem:[#allocation2 + $0x7c] sm:$0xf] }
   0x9   :  { %241 = vmatpush.bf16.msra.mxu1 %v1157_v7  ;;  %v1229_v15 = vld [vmem:[#allocation2 + $0x84] sm:$0xf0]  ;;  %v1089_v16 = vor.u32 %v1215_v13, %v1088_v12  ;;  %v1084_v18 = vld [vmem:[#allocation2 + $0x60] sm:$0xf]  ;;  %v1214_v19 = vld [vmem:[#allocation2 + $0x68] sm:$0xf0] }
   0xa   :  { %v1141_v17 = vor.u32 %v1229_v15, %v1140_v14  ;;  %v1132_v20 = vld [vmem:[#allocation2 + $0x64] sm:$0xf]  ;;  %v1227_v21 = vld [vmem:[#allocation2 + $0x6c] sm:$0xf0]  ;;  %v1085_v22 = vor.u32 %v1214_v19, %v1084_v18  ;;  %v1080_v23 = vld [vmem:[#allocation2 + $0x48] sm:$0xf] }
   0xb   :  { %v1213_v24 = vld [vmem:[#allocation2 + $0x50] sm:$0xf0]  ;;  %v1133_v25 = vor.u32 %v1227_v21, %v1132_v20  ;;  %v1232_v26 = vld [vmem:[#allocation2 + $0xb0] sm:$0xf]  ;;  %v1158_v27 = vld [vmem:[#allocation2 + $0xb8] sm:$0xf0] }
   0xc   :  { %125 = vmatpush.bf16.msra.mxu0 %v1093_v10  ;;  %v1230_v28 = vld [vmem:[#allocation2 + $0x98] sm:$0xf]  ;;  %v1124_v29 = vld [vmem:[#allocation2 + $0x4c] sm:$0xf]  ;;  %v1161_v31 = vor.u32 %v1232_v26, %v1158_v27  ;;  %v1150_v32 = vld [vmem:[#allocation2 + $0xa0] sm:$0xf0]  ;;  %v1081_v33 = vor.u32 %v1213_v24, %v1080_v23 }
   0xd   :  { %242 = vmatpush.bf16.msra.mxu1 %v1149_v11  ;;  %v1225_v30 = vld [vmem:[#allocation2 + $0x54] sm:$0xf0]  ;;  %v1076_v34 = vld [vmem:[#allocation2 + $0x30] sm:$0xf]  ;;  %v1153_v35 = vor.u32 %v1230_v28, %v1150_v32  ;;  %v1212_v37 = vld [vmem:[#allocation2 + $0x38] sm:$0xf0] }
   0xe   :  { %255 = vmatpush.bf16.msra.mxu2 %v1161_v31  ;;  %v1125_v36 = vor.u32 %v1225_v30, %v1124_v29  ;;  %v1228_v38 = vld [vmem:[#allocation2 + $0x80] sm:$0xf]  ;;  %v1142_v39 = vld [vmem:[#allocation2 + $0x88] sm:$0xf0]  ;;  %v1116_v40 = vld [vmem:[#allocation2 + $0x34] sm:$0xf]  ;;  %v1077_v42 = vor.u32 %v1212_v37, %v1076_v34 }
   0xf   :  { %v1223_v41 = vld [vmem:[#allocation2 + $0x3c] sm:$0xf0]  ;;  %v1072_v43 = vld [vmem:[#allocation2 + $0x18] sm:$0xf]  ;;  %v1145_v44 = vor.u32 %v1228_v38, %v1142_v39  ;;  %v1211_v46 = vld [vmem:[#allocation2 + $0x20] sm:$0xf0] }
  0x10   :  { %126 = vmatpush.bf16.msra.mxu0 %v1089_v16  ;;  %v1117_v45 = vor.u32 %v1223_v41, %v1116_v40  ;;  %v1226_v47 = vld [vmem:[#allocation2 + $0x68] sm:$0xf]  ;;  %v1134_v48 = vld [vmem:[#allocation2 + $0x70] sm:$0xf0]  ;;  %v1108_v49 = vld [vmem:[#allocation2 + $0x1c] sm:$0xf]  ;;  %v1073_v51 = vor.u32 %v1211_v46, %v1072_v43 }
  0x11   :  { %243 = vmatpush.bf16.msra.mxu1 %v1141_v17  ;;  %v1221_v50 = vld [vmem:[#allocation2 + $0x24] sm:$0xf0]  ;;  %v1068_v52 = vld [vmem:[#allocation2] sm:$0xf]  ;;  %v1137_v53 = vor.u32 %v1226_v47, %v1134_v48  ;;  %v1210_v55 = vld [vmem:[#allocation2 + $0x8] sm:$0xf0] }
  0x12   :  { %256 = vmatpush.bf16.msra.mxu2 %v1153_v35  ;;  %v1109_v54 = vor.u32 %v1221_v50, %v1108_v49  ;;  %v1224_v56 = vld [vmem:[#allocation2 + $0x50] sm:$0xf]  ;;  %v1126_v57 = vld [vmem:[#allocation2 + $0x58] sm:$0xf0]  ;;  %v1100_v58 = vld [vmem:[#allocation2 + $0x4] sm:$0xf]  ;;  %v1069_v60 = vor.u32 %v1210_v55, %v1068_v52 }
  0x13   :  { %v1219_v59 = vld [vmem:[#allocation2 + $0xc] sm:$0xf0]  ;;  %v1455_v61 = vld [vmem:[%s1745_s0] sm:$0xff]  ;;  %v1460_v62 = vld [vmem:[%s1745_s0 + $0x8] sm:$0xff]  ;;  %v1129_v0 = vor.u32 %v1224_v56, %v1126_v57  ;;  %vm276_vm0 = vcmask 130048   ;;  %s1391_s25 = smov 96  }
  0x14   :  { %127 = vmatpush.bf16.msra.mxu0 %v1085_v22  ;;  %v53_v63 = vld [vmem:[%s1746_s1] sm:$0xff]  ;;  %v1101_v1 = vor.u32 %v1219_v59, %v1100_v58  ;;  %v54_v2 = vld [vmem:[%s1746_s1 + $0x8] sm:$0xff]  ;;  %v1222_v3 = vld [vmem:[#allocation2 + $0x38] sm:$0xf]  ;;  %v55_v5 = vpack.c.bf16 %v1460_v62, %v1455_v61  ;;  %s1392_s26 = smov 112   ;;  %s1393_s27 = smov 80  }
  0x15   :  { %244 = vmatpush.bf16.msra.mxu1 %v1133_v25  ;;  %v1118_v4 = vld [vmem:[#allocation2 + $0x40] sm:$0xf0]  ;;  %v138_v6 = vpack.c.bf16 %v54_v2, %v53_v63  ;;  %v1220_v8 = vld [vmem:[#allocation2 + $0x20] sm:$0xf]  ;;  %v1110_v9 = vld [vmem:[#allocation2 + $0x28] sm:$0xf0] }
  0x16   :  { %257 = vmatpush.bf16.msra.mxu2 %v1145_v44  ;;  %v1121_v7 = vor.u32 %v1222_v3, %v1118_v4  ;;  %v1113_v10 = vor.u32 %v1220_v8, %v1110_v9  ;;  %v1218_v11 = vld [vmem:[#allocation2 + $0x8] sm:$0xf]  ;;  %v1102_v12 = vld [vmem:[#allocation2 + $0x10] sm:$0xf0]  ;;  %v155_v16 = vld [vmem:[%s1749_s4 + $0x1] sm:$0x3] }
  0x17   :  { %v1105_v13 = vor.u32 %v1218_v11, %v1102_v12  ;;  %v157_v17 = vperm.slane %v155_v16, 0  ;;  %v1288_v21 = vld [vmem:[%s1749_s4] ss:$0 sm:$0xff]  ;;  %s1394_s4 = smov 64   ;;  %s1395_s28 = smov 48   ;;  %v158_v29 = vperm.slane %v155_v16, 1 }
  0x18   :  { %128 = vmatpush.bf16.msra.mxu0 %v1081_v33  ;;  %s1396_s29 = smov 32   ;;  %s1397_s30 = smov 16   ;;  %v1516_v46 = vld [vmem:[%s1747_s2] sm:$0xff]  ;;  %v1525_v52 = vld [vmem:[%s1747_s2 + $0x8] sm:$0xff]  ;;  %vm899_vm3 = vcmask 261120   ;;  %vm902_vm4 = vcmask 392192  }
  0x19   :  { %245 = vmatpush.bf16.msra.mxu1 %v1125_v36  ;;  %vm271_vm1 = vcmp.ne.s32.totalorder %v1516_v46, 0  ;;  %vm272_vm2 = vcmp.ne.s32.totalorder %v1525_v52, 0  ;;  %vm905_vm5 = vcmask 523264   ;;  %vm908_vm6 = vcmask 654336  }
  0x1a   :  { %258 = vmatpush.bf16.msra.mxu2 %v1137_v53  ;;  %vm911_vm7 = vcmask 785408   ;;  %vm914_vm8 = vcmask 916480  }
  0x1c   :  { %129 = vmatpush.bf16.msra.mxu0 %v1077_v42 }
  0x1d   :  { %246 = vmatpush.bf16.msra.mxu1 %v1117_v45 }
  0x1e   :  { %259 = vmatpush.bf16.msra.mxu2 %v1129_v0 }
  0x20   :  { %130 = vmatpush.bf16.msra.mxu0 %v1073_v51 }
  0x21   :  { %247 = vmatpush.bf16.msra.mxu1 %v1109_v54 }
  0x22   :  { %260 = vmatpush.bf16.msra.mxu2 %v1121_v7 }
  0x24   :  { %131 = vmatpush.bf16.msra.mxu0 %v1069_v60 }
  0x25   :  { %248 = vmatpush.bf16.msra.mxu1 %v1101_v1 }
  0x26   :  { %261 = vmatpush.bf16.msra.mxu2 %v1113_v10 }
  0x27   :  { %132 = vmatmul.bf16.vlgmr.msra.gmra.mxu0 %v55_v5 }
  0x28   :  { %249 = vmatmul.bf16.vlgmr.msra.gmra.mxu1 %v138_v6 }
  0x2a   :  { %262 = vmatpush.bf16.msra.mxu2 %v1105_v13 }
  0x2d   :  { %263 = vmatmul.bf16.vlgmr.msra.gmra.mxu2 %v138_v6 }
  0xa4   :  { %v133_v15 = vpop.f32.mrf.mxu0 }
  0xa5   :  { %v250_v14 = vpop.f32.mrf.mxu1  ;;  %v134_v25 = vadd.f32 %v1288_v21, %v133_v15 }
  0xa6   :  { %v251_v19 = vadd.f32 %v250_v14, %v157_v17 }
  0xac   :  { %v135_v23 = vpop.f32.mrf.mxu0 }
  0xad   :  { %v252_v18 = vpop.f32.mrf.mxu1  ;;  %v136_v26 = vadd.f32 %v1288_v21, %v135_v23 }
  0xae   :  { %v253_v20 = vadd.f32 %v252_v18, %v157_v17 }
  0xaf   :  { %v273_v27 = vpack.c.bf16 %v136_v26, %v134_v25 }
  0xb0   :  { %v1476_v22 = vpack.c.bf16 %v253_v20, %v251_v19  ;;  %v264_v28 = vpop.f32.mrf.mxu2 }
  0xb1   :  { %v265_v30 = vadd.f32 %v264_v28, %v158_v29 }
  0xb2   :  { %417 = vrot.lane.b32.xlu2 %v1476_v22, %s1391_s25  ;;  %345 = vrot.lane.b32.xlu1 %v1476_v22, %s1392_s26  ;;  %v281_v24 = vsel %vm276_vm0, %v1476_v22, 0 }
  0xb3   :  { %290 = vmatpush.bf16.xpose.msra.mxu3 %v281_v24 }
  0xb8   :  { %v266_v31 = vpop.f32.mrf.mxu2 }
  0xb9   :  { %v267_v32 = vadd.f32 %v266_v31, %v158_v29 }
  0xba   :  { %488 = vrot.lane.b32.xlu2 %v1476_v22, %s1393_s27  ;;  %342 = vrot.lane.b32.xlu1 %v273_v27, %s1392_s26 }
  0xbb   :  { %1162 = vmatmul.msk.bf16.vlgmr.msra.gmra.mxu3 %vm276_vm0, %v273_v27  ;;  %v1499_v33 = vpack.c.bf16 %v267_v32, %v265_v30 }
  0xbd   :  { %330 = vmatpush.bf16.msrb.mxu3 %v1499_v33 }
  0xc2   :  { %559 = vrot.lane.b32.xlu2 %v1476_v22, %s1394_s4  ;;  %486 = vrot.lane.b32.xlu1 %v273_v27, %s1393_s27 }
  0xca   :  { %557 = vrot.lane.b32.xlu2 %v273_v27, %s1394_s4  ;;  %630 = vrot.lane.b32.xlu1 %v1476_v22, %s1395_s28 }
  0xd2   :  { %701 = vrot.lane.b32.xlu2 %v1476_v22, %s1396_s29  ;;  %628 = vrot.lane.b32.xlu1 %v273_v27, %s1395_s28 }
  0xda   :  { %770 = vrot.lane.b32.xlu2 %v273_v27, %s1397_s30  ;;  %699 = vrot.lane.b32.xlu1 %v273_v27, %s1396_s29 }
  0xe2   :  { %391 = vrot.lane.b32.xlu2 %v1499_v33, %s1392_s26  ;;  %462 = vrot.lane.b32.xlu1 %v1499_v33, %s1391_s25 }
  0xea   :  { %533 = vrot.lane.b32.xlu2 %v1499_v33, %s1393_s27 }
 0x10c   :  { %v418_v34 = vpop.permute.xlu2 %417 }
 0x10d   :  { %v423_v35 = vsel %vm276_vm0, %v418_v34, 0 }
 0x10e   :  { %432 = vmatpush.bf16.xpose.msrb.mxu2 %v423_v35 }
 0x114   :  { %v489_v36 = vpop.permute.xlu2 %488 }
 0x115   :  { %v494_v14 = vsel %vm276_vm0, %v489_v36, 0 }
 0x11c   :  { %v560_v37 = vpop.permute.xlu2 %559 }
 0x11d   :  { %v565_v38 = vsel %vm276_vm0, %v560_v37, 0 }
 0x11e   :  { %574 = vmatpush.bf16.xpose.msrb.mxu1 %v565_v38 }
 0x124   :  { %v346_v39 = vpop.permute.xlu1 %345  ;;  %v558_v40 = vpop.permute.xlu2 %557 }
 0x125   :  { %v351_v41 = vsel %vm276_vm0, %v346_v39, 0  ;;  %1170 = vmatmul.msk.bf16.vlgmr.msrb.gmra.mxu1 %vm276_vm0, %v558_v40 }
 0x126   :  { %360 = vmatpush.bf16.xpose.msra.mxu3 %v351_v41 }
 0x12c   :  { %v702_v42 = vpop.permute.xlu2 %701  ;;  %v343_v43 = vpop.permute.xlu1 %342 }
 0x12d   :  { %v707_v44 = vsel %vm276_vm0, %v702_v42, 0 }
 0x12e   :  { %716 = vmatpush.bf16.xpose.msra.mxu1 %v707_v44 }
 0x134   :  { %v487_v45 = vpop.permute.xlu1 %486  ;;  %v771_v16 = vpop.permute.xlu2 %770 }
 0x13c   :  { %v631_v47 = vpop.permute.xlu1 %630  ;;  %v392_v18 = vpop.permute.xlu2 %391 }
 0x13d   :  { %v636_v17 = vsel %vm276_vm0, %v631_v47, 0  ;;  %404 = vmatpush.bf16.msrb.mxu0 %v392_v18 }
 0x13e   :  { %v292_v48 = vpop.f32.mrf.mxu3 }
 0x13f   :  { %v297_v49 = vmul.f32 0.25, %v292_v48 }
 0x141   :  { %v299_v50 = vsel %vm271_vm1, %v297_v49, -1e+30 }
 0x142   :  { %v301_v51 = vsel %vm276_vm0, %v299_v50, -inf }
 0x143   :  { %302 = vmax.xlane.f32.xlu0 %v301_v51 }
 0x144   :  { %v629_v53 = vpop.permute.xlu1 %628  ;;  %v534_v21 = vpop.permute.xlu2 %533 }
 0x145   :  { %546 = vmatpush.bf16.msra.mxu0 %v534_v21 }
 0x146   :  { %v294_v54 = vpop.f32.mrf.mxu3 }
 0x147   :  { %v298_v55 = vmul.f32 0.25, %v294_v54 }
 0x149   :  { %v300_v56 = vsel %vm272_vm2, %v298_v55, -1e+30 }
 0x14a   :  { %v304_v57 = vsel %vm276_vm0, %v300_v56, -inf }
 0x14b   :  { %305 = vmax.xlane.f32.xlu0 %v304_v57 }
 0x14c   :  { %v700_v58 = vpop.permute.xlu1 %699 }
 0x14d   :  { %1174 = vmatmul.msk.bf16.vlgmr.msra.gmra.mxu1 %vm276_vm0, %v700_v58 }
 0x15f   :  { %415 = vrot.lane.b32.xlu0 %v273_v27, %s1391_s25 }
 0x167   :  { %772 = vrot.lane.b32.xlu0 %v1476_v22, %s1397_s30  ;;  %v463_v22 = vpop.permute.xlu1 %462 }
 0x168   :  { %475 = vmatpush.bf16.msra.mxu2 %v463_v22 }
 0x1a2   :  { %v576_v59 = vpop.f32.mrf.mxu1 }
 0x1a3   :  { %v581_v60 = vmul.f32 0.25, %v576_v59 }
 0x1a5   :  { %v1537_v63 = vsel %vm271_vm1, %v581_v60, -1e+30 }
 0x1a6   :  { %v585_v0 = vsel %vm276_vm0, %v1537_v63, -inf }
 0x1a7   :  { %586 = vmax.xlane.f32.xlu0 %v585_v0 }
 0x1aa   :  { %v578_v1 = vpop.f32.mrf.mxu1 }
 0x1ab   :  { %v582_v2 = vmul.f32 0.25, %v578_v1 }
 0x1ad   :  { %v1543_v3 = vsel %vm272_vm2, %v582_v2, -1e+30 }
 0x1ae   :  { %v588_v4 = vsel %vm276_vm0, %v1543_v3, -inf }
 0x1af   :  { %589 = vmax.xlane.f32.xlu0 %v588_v4 }
 0x1b6   :  { %v303_v5 = vpop.xlane.xlu0 %302 }
 0x1b7   :  { %v307_v6 = vsub.f32 %v299_v50, %v303_v5 }
 0x1b9   :  { %v309_v7 = vmul.f32 1.442695, %v307_v6 }
 0x1bb   :  { %1292 = vpow2.f32 %v309_v7 }
 0x1be   :  { %v306_v8 = vpop.xlane.xlu0 %305 }
 0x1bf   :  { %v308_v9 = vsub.f32 %v300_v56, %v306_v8 }
 0x1c1   :  { %v311_v10 = vmul.f32 1.442695, %v308_v9  ;;  %v1547_v11 = vpop.eup %1292 }
 0x1c3   :  { %1294 = vpow2.f32 %v311_v10 }
 0x1c9   :  { %v1549_v12 = vpop.eup %1294 }
 0x1ca   :  { %v319_v13 = vpack.c.bf16 %v1549_v12, %v1547_v11  ;;  %v718_v37 = vpop.f32.mrf.mxu1 }
 0x1cb   :  { %v723_v41 = vmul.f32 0.25, %v718_v37 }
 0x1cc   :  { %1163 = vmatmul.msk.bf16.vlgmr.msrb.gmra.mxu3 %vm276_vm0, %v319_v13 }
 0x1cd   :  { %503 = vmatpush.bf16.xpose.msrb.mxu3 %v494_v14  ;;  %v1592_v44 = vsel %vm271_vm1, %v723_v41, -1e+30 }
 0x1ce   :  { %v727_v47 = vsel %vm276_vm0, %v1592_v44, -inf }
 0x1d1   :  { %v416_v15 = vpop.permute.xlu0 %415 }
 0x1d2   :  { %1166 = vmatmul.msk.bf16.vlgmr.msrb.gmra.mxu2 %vm276_vm0, %v416_v15  ;;  %v720_v8 = vpop.f32.mrf.mxu1 }
 0x1d3   :  { %v724_v10 = vmul.f32 0.25, %v720_v8 }
 0x1d5   :  { %v1632_v13 = vsel %vm272_vm2, %v724_v10, -1e+30 }
 0x1d6   :  { %v730_v14 = vsel %vm276_vm0, %v1632_v13, -inf }
 0x1d9   :  { %v773_v19 = vpop.permute.xlu0 %772 }
 0x1da   :  { %v778_v20 = vsel %vm276_vm0, %v773_v19, 0 }
 0x1dc   :  { %1164 = vmatmul.msk.bf16.vlgmr.msra.gmra.mxu3 %vm276_vm0, %v343_v43 }
 0x1dd   :  { %645 = vmatpush.bf16.xpose.msra.mxu3 %v636_v17 }
 0x1ec   :  { %1168 = vmatmul.msk.bf16.vlgmr.msrb.gmra.mxu3 %vm276_vm0, %v487_v45 }
 0x1ed   :  { %787 = vmatpush.bf16.xpose.msrb.mxu3 %v778_v20 }
 0x1fc   :  { %1172 = vmatmul.msk.bf16.vlgmr.msra.gmra.mxu3 %vm276_vm0, %v629_v53 }
 0x20c   :  { %1176 = vmatmul.msk.bf16.vlgmr.msrb.gmra.mxu3 %vm276_vm0, %v771_v16 }
 0x21a   :  { %v587_v16 = vpop.xlane.xlu0 %586 }
 0x222   :  { %v590_v52 = vpop.xlane.xlu0 %589 }
 0x223   :  { %v592_v19 = vsub.f32 %v1543_v3, %v590_v52 }
 0x225   :  { %v595_v21 = vmul.f32 1.442695, %v592_v19 }
 0x227   :  { %1296 = vpow2.f32 %v595_v21 }
 0x24f   :  { %v1562_v23 = vpop.f32.mrf.mxu3 }
 0x255   :  { %v434_v24 = vpop.f32.mrf.mxu2 }
 0x256   :  { %v439_v25 = vmul.f32 0.25, %v434_v24 }
 0x257   :  { %v1564_v26 = vpop.f32.mrf.mxu3 }
 0x258   :  { %v1568_v27 = vsel %vm271_vm1, %v439_v25, -1e+30 }
 0x259   :  { %v443_v28 = vsel %vm276_vm0, %v1568_v27, -inf }
 0x25a   :  { %444 = vmax.xlane.f32.xlu2 %v443_v28  ;;  %v591_v28 = vsub.f32 %v1537_v63, %v587_v16 }
 0x25d   :  { %v436_v29 = vpop.f32.mrf.mxu2 }
 0x25e   :  { %v440_v30 = vmul.f32 0.25, %v436_v29 }
 0x25f   :  { %v362_v31 = vpop.f32.mrf.mxu3 }
 0x260   :  { %v1574_v32 = vsel %vm272_vm2, %v440_v30, -1e+30  ;;  %v367_v35 = vmul.f32 0.25, %v362_v31  ;;  %v1297_v30 = vpop.eup %1296  ;;  %v593_v31 = vmul.f32 1.442695, %v591_v28 }
 0x261   :  { %v446_v34 = vsel %vm276_vm0, %v1574_v32, -inf  ;;  %v600_v3 = vsel %vm276_vm0, %v1297_v30, 0.0 }
 0x262   :  { %447 = vmax.xlane.f32.xlu0 %v446_v34  ;;  %v1580_v36 = vsel %vm271_vm1, %v367_v35, -1e+30 }
 0x263   :  { %v371_v40 = vsel %vm276_vm0, %v1580_v36, -inf }
 0x267   :  { %v364_v38 = vpop.f32.mrf.mxu3 }
 0x268   :  { %v368_v39 = vmul.f32 0.25, %v364_v38 }
 0x26a   :  { %372 = vmax.xlane.f32.xlu0 %v371_v40  ;;  %v1586_v42 = vsel %vm272_vm2, %v368_v39, -1e+30 }
 0x26b   :  { %v374_v43 = vsel %vm276_vm0, %v1586_v42, -inf }
 0x26c   :  { %375 = vmax.xlane.f32.xlu1 %v374_v43 }
 0x26f   :  { %v505_v45 = vpop.f32.mrf.mxu3 }
 0x270   :  { %v510_v6 = vmul.f32 0.25, %v505_v45 }
 0x272   :  { %728 = vmax.xlane.f32.xlu0 %v727_v47  ;;  %v1626_v7 = vsel %vm271_vm1, %v510_v6, -1e+30 }
 0x273   :  { %v514_v9 = vsel %vm276_vm0, %v1626_v7, -inf }
 0x277   :  { %v507_v48 = vpop.f32.mrf.mxu3 }
 0x278   :  { %v511_v49 = vmul.f32 0.25, %v507_v48 }
 0x27a   :  { %v1598_v50 = vsel %vm272_vm2, %v511_v49, -1e+30 }
 0x27b   :  { %v517_v51 = vsel %vm276_vm0, %v1598_v50, -inf }
 0x27c   :  { %518 = vmax.xlane.f32.xlu0 %v517_v51 }
 0x27f   :  { %v647_v53 = vpop.f32.mrf.mxu3 }
 0x280   :  { %v652_v54 = vmul.f32 0.25, %v647_v53 }
 0x282   :  { %v1604_v55 = vsel %vm271_vm1, %v652_v54, -1e+30 }
 0x283   :  { %v656_v56 = vsel %vm276_vm0, %v1604_v55, -inf }
 0x284   :  { %657 = vmax.xlane.f32.xlu0 %v656_v56 }
 0x285   :  { %604 = vrot.lane.b32.xlu1 %v1499_v33, %s1394_s4 }
 0x287   :  { %v649_v57 = vpop.f32.mrf.mxu3 }
 0x288   :  { %v653_v58 = vmul.f32 0.25, %v649_v57 }
 0x28a   :  { %v1612_v59 = vsel %vm272_vm2, %v653_v58, -1e+30 }
 0x28b   :  { %v659_v60 = vsel %vm276_vm0, %v1612_v59, -inf }
 0x28c   :  { %660 = vmax.xlane.f32.xlu2 %v659_v60 }
 0x28f   :  { %v789_v0 = vpop.f32.mrf.mxu3 }
 0x290   :  { %v794_v15 = vmul.f32 0.25, %v789_v0 }
 0x292   :  { %v1640_v17 = vsel %vm271_vm1, %v794_v15, -1e+30 }
 0x293   :  { %v798_v18 = vsel %vm276_vm0, %v1640_v17, -inf }
 0x297   :  { %v791_v1 = vpop.f32.mrf.mxu3 }
 0x298   :  { %v795_v2 = vmul.f32 0.25, %v791_v1  ;;  %675 = vrot.lane.b32.xlu0 %v1499_v33, %s1395_s28  ;;  %v316_v1 = vsel %vm276_vm0, %v1549_v12, 0.0 }
 0x29a   :  { %v1620_v4 = vsel %vm272_vm2, %v795_v2, -1e+30 }
 0x29b   :  { %v801_v5 = vsel %vm276_vm0, %v1620_v4, -inf }
 0x29c   :  { %802 = vmax.xlane.f32.xlu2 %v801_v5 }
 0x2af   :  { %515 = vmax.xlane.f32.xlu1 %v514_v9 }
 0x2b4   :  { %746 = vrot.lane.b32.xlu2 %v1499_v33, %s1396_s29 }
 0x2b7   :  { %731 = vmax.xlane.f32.xlu1 %v730_v14 }
 0x2c2   :  { %799 = vmax.xlane.f32.xlu0 %v798_v18 }
 0x2cd   :  { %v445_v20 = vpop.xlane.xlu2 %444 }
 0x2ce   :  { %v449_v22 = vsub.f32 %v1568_v27, %v445_v20 }
 0x2d0   :  { %817 = vrot.lane.b32.xlu1 %v1499_v33, %s1397_s30  ;;  %v451_v24 = vmul.f32 1.442695, %v449_v22 }
 0x2d2   :  { %1298 = vpow2.f32 %v451_v24 }
 0x2d5   :  { %v448_v25 = vpop.xlane.xlu0 %447 }
 0x2d6   :  { %v450_v46 = vsub.f32 %v1574_v32, %v448_v25 }
 0x2d8   :  { %v453_v29 = vmul.f32 1.442695, %v450_v46  ;;  %v1299_v35 = vpop.eup %1298 }
 0x2d9   :  { %v455_v57 = vsel %vm276_vm0, %v1299_v35, 0.0 }
 0x2da   :  { %1300 = vpow2.f32 %v453_v29 }
 0x2db   :  { %1302 = vpow2.f32 %v593_v31 }
 0x2dd   :  { %601 = vadd.xlane.f32.xlu2 %v600_v3  ;;  %v373_v34 = vpop.xlane.xlu0 %372 }
 0x2de   :  { %v377_v33 = vsub.f32 %v1580_v36, %v373_v34 }
 0x2df   :  { %v376_v27 = vpop.xlane.xlu1 %375 }
 0x2e0   :  { %v1301_v37 = vpop.eup %1300  ;;  %v379_v38 = vmul.f32 1.442695, %v377_v33  ;;  %v378_v32 = vsub.f32 %v1586_v42, %v376_v27 }
 0x2e1   :  { %v461_v39 = vpack.c.bf16 %v1301_v37, %v1299_v35  ;;  %v458_v63 = vsel %vm276_vm0, %v1301_v37, 0.0  ;;  %v1303_v43 = vpop.eup %1302 }
 0x2e2   :  { %v381_v40 = vmul.f32 1.442695, %v378_v32  ;;  %459 = vadd.xlane.f32.xlu0 %v458_v63  ;;  %1304 = vpow2.f32 %v379_v38  ;;  %v597_v48 = vsel %vm276_vm0, %v1303_v43, 0.0 }
 0x2e3   :  { %1167 = vmatmul.msk.bf16.vlgmr.msra.gmra.mxu2 %vm276_vm0, %v461_v39 }
 0x2e4   :  { %1306 = vpow2.f32 %v381_v40 }
 0x2e5   :  { %v729_v41 = vpop.xlane.xlu0 %728 }
 0x2e6   :  { %v733_v36 = vsub.f32 %v1592_v44, %v729_v41  ;;  %v603_v44 = vpack.c.bf16 %v1297_v30, %v1303_v43 }
 0x2e8   :  { %v735_v45 = vmul.f32 1.442695, %v733_v36  ;;  %v1305_v47 = vpop.eup %1304 }
 0x2e9   :  { %v383_v58 = vsel %vm276_vm0, %v1305_v47, 0.0 }
 0x2ea   :  { %v1657_v49 = vpop.eup %1306  ;;  %1308 = vpow2.f32 %v735_v45  ;;  %598 = vadd.xlane.f32.xlu0 %v597_v48 }
 0x2eb   :  { %v389_v42 = vpack.c.bf16 %v1657_v49, %v1305_v47  ;;  %v386_v47 = vsel %vm276_vm0, %v1657_v49, 0.0 }
 0x2ed   :  { %1165 = vmatmul.msk.bf16.vlgmr.msrb.gmra.mxu0 %vm276_vm0, %v389_v42 }
 0x2ef   :  { %v519_v56 = vpop.xlane.xlu0 %518 }
 0x2f0   :  { %v1309_v51 = vpop.eup %1308  ;;  %v521_v18 = vsub.f32 %v1598_v50, %v519_v56 }
 0x2f1   :  { %v739_v53 = vsel %vm276_vm0, %v1309_v51, 0.0 }
 0x2f2   :  { %740 = vadd.xlane.f32.xlu2 %v739_v53  ;;  %v524_v52 = vmul.f32 1.442695, %v521_v18 }
 0x2f7   :  { %v605_v54 = vpop.permute.xlu1 %604  ;;  %v658_v2 = vpop.xlane.xlu0 %657 }
 0x2f8   :  { %617 = vmatpush.bf16.msrb.mxu2 %v605_v54  ;;  %v662_v29 = vsub.f32 %v1604_v55, %v658_v2  ;;  %v313_v55 = vsel %vm276_vm0, %v1547_v11, 0.0 }
 0x2fa   :  { %456 = vadd.xlane.f32.xlu1 %v455_v57  ;;  %384 = vadd.xlane.f32.xlu2 %v383_v58  ;;  %v664_v50 = vmul.f32 1.442695, %v662_v29 }
 0x2fb   :  { %1171 = vmatmul.msk.bf16.vlgmr.msrb.gmra.mxu2 %vm276_vm0, %v603_v44 }
 0x2ff   :  { %v661_v60 = vpop.xlane.xlu2 %660 }
 0x300   :  { %v663_v0 = vsub.f32 %v1612_v59, %v661_v60 }
 0x302   :  { %v666_v5 = vmul.f32 1.442695, %v663_v0  ;;  %317 = vadd.xlane.f32.xlu1 %v316_v1 }
 0x304   :  { %1310 = vpow2.f32 %v666_v5 }
 0x30a   :  { %v1311_v6 = vpop.eup %1310  ;;  %v676_v8 = vpop.permute.xlu0 %675 }
 0x30b   :  { %688 = vmatpush.bf16.msrb.mxu0 %v676_v8  ;;  %v671_v9 = vsel %vm276_vm0, %v1311_v6, 0.0 }
 0x30c   :  { %672 = vadd.xlane.f32.xlu1 %v671_v9 }
 0x30f   :  { %v803_v10 = vpop.xlane.xlu2 %802 }
 0x310   :  { %v805_v14 = vsub.f32 %v1620_v4, %v803_v10 }
 0x312   :  { %v808_v15 = vmul.f32 1.442695, %v805_v14 }
 0x314   :  { %1312 = vpow2.f32 %v808_v15 }
 0x315   :  { %1314 = vpow2.f32 %v524_v52 }
 0x317   :  { %v747_v16 = vpop.permute.xlu2 %746 }
 0x318   :  { %759 = vmatpush.bf16.msra.mxu2 %v747_v16 }
 0x31a   :  { %v1313_v59 = vpop.eup %1312 }
 0x31b   :  { %v813_v12 = vsel %vm276_vm0, %v1313_v59, 0.0  ;;  %v1315_v24 = vpop.eup %1314 }
 0x31c   :  { %814 = vadd.xlane.f32.xlu2 %v813_v12 }
 0x322   :  { %v516_v19 = vpop.xlane.xlu1 %515 }
 0x323   :  { %v520_v20 = vsub.f32 %v1626_v7, %v516_v19 }
 0x325   :  { %v522_v21 = vmul.f32 1.442695, %v520_v20 }
 0x327   :  { %1316 = vpow2.f32 %v522_v21 }
 0x32a   :  { %v732_v22 = vpop.xlane.xlu1 %731 }
 0x32b   :  { %v734_v4 = vsub.f32 %v1632_v13, %v732_v22 }
 0x32d   :  { %v1317_v25 = vpop.eup %1316  ;;  %v737_v46 = vmul.f32 1.442695, %v734_v4 }
 0x32e   :  { %v532_v28 = vpack.c.bf16 %v1315_v24, %v1317_v25  ;;  %v526_v48 = vsel %vm276_vm0, %v1317_v25, 0.0 }
 0x32f   :  { %1318 = vpow2.f32 %v737_v46 }
 0x330   :  { %1169 = vmatmul.msk.bf16.vlgmr.msra.gmra.mxu0 %vm276_vm0, %v532_v28  ;;  %1320 = vpow2.f32 %v664_v50 }
 0x335   :  { %v1319_v30 = vpop.eup %1318  ;;  %v800_v31 = vpop.xlane.xlu0 %799 }
 0x336   :  { %v745_v3 = vpack.c.bf16 %v1319_v30, %v1309_v51  ;;  %v804_v7 = vsub.f32 %v1640_v17, %v800_v31  ;;  %v742_v34 = vsel %vm276_vm0, %v1319_v30, 0.0  ;;  %v1321_v33 = vpop.eup %1320  ;;  %v529_v51 = vsel %vm276_vm0, %v1315_v24, 0.0 }
 0x337   :  { %743 = vadd.xlane.f32.xlu0 %v742_v34  ;;  %v674_v35 = vpack.c.bf16 %v1311_v6, %v1321_v33  ;;  %v668_v53 = vsel %vm276_vm0, %v1321_v33, 0.0 }
 0x338   :  { %v806_v13 = vmul.f32 1.442695, %v804_v7  ;;  %1175 = vmatmul.msk.bf16.vlgmr.msra.gmra.mxu2 %vm276_vm0, %v745_v3 }
 0x33a   :  { %1322 = vpow2.f32 %v806_v13 }
 0x33f   :  { %314 = vadd.xlane.f32.xlu0 %v313_v55 }
 0x340   :  { %v1323_v27 = vpop.eup %1322  ;;  %1173 = vmatmul.msk.bf16.vlgmr.msrb.gmra.mxu0 %vm276_vm0, %v674_v35 }
 0x341   :  { %v810_v37 = vsel %vm276_vm0, %v1323_v27, 0.0  ;;  %v816_v38 = vpack.c.bf16 %v1313_v59, %v1323_v27 }
 0x342   :  { %v818_v17 = vpop.permute.xlu1 %817  ;;  %811 = vadd.xlane.f32.xlu1 %v810_v37 }
 0x343   :  { %830 = vmatpush.bf16.msra.mxu0 %v818_v17 }
 0x350   :  { %1177 = vmatmul.msk.bf16.vlgmr.msra.gmra.mxu0 %vm276_vm0, %v816_v38  ;;  %v602_v56 = vpop.xlane.xlu2 %601 }
 0x355   :  { %v460_v39 = vpop.xlane.xlu0 %459 }
 0x356   :  { %1324 = vrcp.f32 %v460_v39 }
 0x35c   :  { %v1325_v41 = vpop.eup %1324 }
 0x35d   :  { %v599_v44 = vpop.xlane.xlu0 %598 }
 0x365   :  { %v741_v49 = vpop.xlane.xlu2 %740 }
 0x366   :  { %v477_v32 = vpop.f32.mrf.mxu2 }
 0x36a   :  { %v406_v16 = vpop.f32.mrf.mxu0 }
 0x36d   :  { %v457_v63 = vpop.xlane.xlu1 %456  ;;  %v385_v20 = vpop.xlane.xlu2 %384 }
 0x36e   :  { %1326 = vrcp.f32 %v457_v63  ;;  %v479_v40 = vpop.f32.mrf.mxu2 }
 0x36f   :  { %v485_v36 = vmul.f32 %v1325_v41, %v479_v40  ;;  %1328 = vrcp.f32 %v602_v56  ;;  %v1238_v56 = vld [vmem:[%s1750_s5 + $0x20] sm:$0xff] }
 0x370   :  { %1330 = vrcp.f32 %v599_v44 }
 0x372   :  { %v408_v59 = vpop.f32.mrf.mxu0 }
 0x374   :  { %v1327_v11 = vpop.eup %1326 }
 0x375   :  { %v484_v43 = vmul.f32 %v1327_v11, %v477_v32  ;;  %v1329_v60 = vpop.eup %1328  ;;  %v318_v24 = vpop.xlane.xlu1 %317 }
 0x376   :  { %v1331_v1 = vpop.eup %1330 }
 0x377   :  { %v1253_v45 = vpack.i.bf16 %v485_v36, %v484_v43 }
 0x379   :  { %1254 = vrot.lane.b32.xlu0 %v1253_v45, %s1396_s29 }
 0x37e   :  { %v619_v42 = vpop.f32.mrf.mxu2 }
 0x37f   :  { %v626_v2 = vmul.f32 %v1331_v1, %v619_v42  ;;  %v673_v31 = vpop.xlane.xlu1 %672  ;;  %v1240_v42 = vld [vmem:[%s1750_s5 + $0x30] sm:$0xff] }
 0x386   :  { %v621_v54 = vpop.f32.mrf.mxu2 }
 0x387   :  { %v627_v0 = vmul.f32 %v1329_v60, %v621_v54 }
 0x389   :  { %v1258_v5 = vpack.i.bf16 %v627_v0, %v626_v2 }
 0x38f   :  { %v815_v34 = vpop.xlane.xlu2 %814 }
 0x3a3   :  { %387 = vadd.xlane.f32.xlu0 %v386_v47 }
 0x3aa   :  { %v744_v58 = vpop.xlane.xlu0 %743 }
 0x3ab   :  { %527 = vadd.xlane.f32.xlu0 %v526_v48  ;;  %1332 = vrcp.f32 %v744_v58  ;;  %v1241_v48 = vld [vmem:[%s1750_s5 + $0x38] sm:$0xff] }
 0x3ac   :  { %1334 = vrcp.f32 %v741_v49  ;;  %986 = vmatpush.bf16.msrb.mxu1 %v1241_v48 }
 0x3ad   :  { %v548_v12 = vpop.f32.mrf.mxu0  ;;  %1336 = vrcp.f32 %v385_v20 }
 0x3b0   :  { %987 = vmatpush.bf16.msrb.mxu1 %v1240_v42 }
 0x3b1   :  { %v1333_v8 = vpop.eup %1332 }
 0x3b2   :  { %v1335_v10 = vpop.eup %1334  ;;  %v315_v18 = vpop.xlane.xlu0 %314 }
 0x3b3   :  { %530 = vadd.xlane.f32.xlu0 %v529_v51  ;;  %v1337_v4 = vpop.eup %1336  ;;  %v1239_v51 = vld [vmem:[%s1750_s5 + $0x28] sm:$0xff] }
 0x3b4   :  { %v413_v29 = vmul.f32 %v1337_v4, %v406_v16  ;;  %988 = vmatpush.bf16.msrb.mxu1 %v1239_v51 }
 0x3b5   :  { %v550_v52 = vpop.f32.mrf.mxu0  ;;  %v812_v33 = vpop.xlane.xlu1 %811 }
 0x3b8   :  { %989 = vmatpush.bf16.msrb.mxu1 %v1238_v56 }
 0x3bb   :  { %669 = vadd.xlane.f32.xlu0 %v668_v53  ;;  %v761_v57 = vpop.f32.mrf.mxu2 }
 0x3bc   :  { %v768_v14 = vmul.f32 %v1335_v10, %v761_v57  ;;  %v1234_v10 = vld [vmem:[%s1750_s5] sm:$0xff] }
 0x3bd   :  { %v690_v21 = vpop.f32.mrf.mxu0 }
 0x3c3   :  { %v763_v6 = vpop.f32.mrf.mxu2 }
 0x3c4   :  { %v769_v9 = vmul.f32 %v1333_v8, %v763_v6  ;;  %v1237_v6 = vld [vmem:[%s1750_s5 + $0x18] sm:$0xff] }
 0x3c5   :  { %v692_v46 = vpop.f32.mrf.mxu0  ;;  %990 = vmatpush.bf16.msrb.mxu1 %v1237_v6 }
 0x3c6   :  { %v1278_v15 = vpack.i.bf16 %v769_v9, %v768_v14  ;;  %v1235_v9 = vld [vmem:[%s1750_s5 + $0x8] sm:$0xff] }
 0x3cd   :  { %v832_v7 = vpop.f32.mrf.mxu0 }
 0x3cf   :  { %1259 = vrot.lane.b32.xlu0 %v1258_v5, %s1394_s4 }
 0x3d5   :  { %v834_v38 = vpop.f32.mrf.mxu0 }
 0x3d7   :  { %1279 = vrot.lane.b32.xlu0 %v1278_v15, %s1391_s25 }
 0x3eb   :  { %v1692_v19 = vpop.permute.xlu0 %1254 }
 0x3ec   :  { %v1257_v0 = vunpack.i.h.bf16 %v1692_v19  ;;  %v1256_v1 = vunpack.i.l.bf16 %v1692_v19 }
 0x416   :  { %v388_v22 = vpop.xlane.xlu0 %387 }
 0x417   :  { %1338 = vrcp.f32 %v388_v22 }
 0x41d   :  { %v1339_v25 = vpop.eup %1338 }
 0x41e   :  { %v528_v28 = vpop.xlane.xlu0 %527  ;;  %v414_v50 = vmul.f32 %v1339_v25, %v408_v59 }
 0x41f   :  { %1340 = vrcp.f32 %v528_v28 }
 0x420   :  { %v1263_v30 = vpack.i.bf16 %v414_v50, %v413_v29 }
 0x422   :  { %1264 = vrot.lane.b32.xlu2 %v1263_v30, %s1397_s30 }
 0x425   :  { %v1341_v13 = vpop.eup %1340 }
 0x426   :  { %v531_v3 = vpop.xlane.xlu0 %530  ;;  %v555_v27 = vmul.f32 %v1341_v13, %v548_v12 }
 0x427   :  { %1342 = vrcp.f32 %v531_v3 }
 0x428   :  { %1344 = vrcp.f32 %v673_v31 }
 0x429   :  { %1346 = vrcp.f32 %v815_v34 }
 0x42a   :  { %1348 = vrcp.f32 %v812_v33 }
 0x42d   :  { %v1343_v35 = vpop.eup %1342 }
 0x42e   :  { %v670_v55 = vpop.xlane.xlu0 %669  ;;  %v556_v37 = vmul.f32 %v1343_v35, %v550_v52  ;;  %v1345_v32 = vpop.eup %1344 }
 0x42f   :  { %1350 = vrcp.f32 %v670_v55  ;;  %v1347_v39 = vpop.eup %1346  ;;  %v698_v11 = vmul.f32 %v1345_v32, %v692_v46  ;;  %v1289_v55 = vld [vmem:[%s1751_s6] ss:$0 sm:$0xff] }
 0x430   :  { %v1268_v17 = vpack.i.bf16 %v556_v37, %v555_v27  ;;  %v1349_v63 = vpop.eup %1348  ;;  %v840_v40 = vmul.f32 %v1347_v39, %v834_v38  ;;  %1352 = vrcp.f32 %v318_v24 }
 0x431   :  { %v839_v43 = vmul.f32 %v1349_v63, %v832_v7  ;;  %1354 = vrcp.f32 %v315_v18  ;;  %v1398_v63 = vmov 128.0  }
 0x432   :  { %1269 = vrot.lane.b32.xlu1 %v1268_v17, %s1395_s28  ;;  %1356 = vrcp.f32 %v1398_v63 }
 0x433   :  { %v1283_v45 = vpack.i.bf16 %v840_v40, %v839_v43 }
 0x435   :  { %v1351_v41 = vpop.eup %1350 }
 0x436   :  { %v697_v36 = vmul.f32 %v1351_v41, %v690_v21  ;;  %v1353_v53 = vpop.eup %1352 }
 0x437   :  { %v1355_v54 = vpop.eup %1354  ;;  %v340_v44 = vmul.f32 %v1353_v53, %v1564_v26 }
 0x438   :  { %v1273_v47 = vpack.i.bf16 %v698_v11, %v697_v36  ;;  %v339_v58 = vmul.f32 %v1355_v54, %v1562_v23  ;;  %v1236_v23 = vld [vmem:[%s1750_s5 + $0x10] sm:$0xff]  ;;  %v1357_v40 = vpop.eup %1356 }
 0x439   :  { %991 = vmatpush.bf16.msrb.mxu1 %v1236_v23  ;;  %v1007_v41 = vmul.f32 128.0, %v1357_v40  ;;  %vm1011_vm9 = vweird.f32 %v1357_v40 }
 0x43a   :  { %1284 = vrot.lane.b32.xlu1 %v1283_v45, %s1392_s26  ;;  %1274 = vrot.lane.b32.xlu2 %v1273_v47, %s1393_s27 }
 0x43b   :  { %v1008_v11 = vsub.f32 1.0, %v1007_v41 }
 0x43d   :  { %992 = vmatpush.bf16.msrb.mxu1 %v1235_v9  ;;  %v1009_v43 = vmul.f32 %v1357_v40, %v1008_v11  ;;  %v1290_v9 = vld [vmem:[%s1752_s7] ss:$0 sm:$0xff] }
 0x43f   :  { %v1010_v36 = vadd.f32 %v1357_v40, %v1009_v43 }
 0x441   :  { %993 = vmatpush.bf16.msrb.mxu1 %v1234_v10  ;;  %v1260_v14 = vpop.permute.xlu0 %1259  ;;  %v1012_v45 = vsel %vm1011_vm9, %v1357_v40, %v1010_v36 }
 0x442   :  { %v1262_v12 = vunpack.i.h.bf16 %v1260_v14  ;;  %v1261_v18 = vunpack.i.l.bf16 %v1260_v14 }
 0x449   :  { %v1280_v4 = vpop.permute.xlu0 %1279 }
 0x44a   :  { %v1282_v29 = vunpack.i.h.bf16 %v1280_v4  ;;  %v1281_v50 = vunpack.i.l.bf16 %v1280_v4 }
 0x47c   :  { %v1265_v57 = vpop.permute.xlu2 %1264 }
 0x47d   :  { %v1267_v60 = vunpack.i.h.bf16 %v1265_v57  ;;  %v1266_v49 = vunpack.i.l.bf16 %v1265_v57 }
 0x47f   :  { %v898_v2 = vsel %vm276_vm0, %v340_v44, %v1267_v60  ;;  %v897_v5 = vsel %vm276_vm0, %v339_v58, %v1266_v49 }
 0x480   :  { %v900_v26 = vsel %vm899_vm3, %v897_v5, %v1256_v1  ;;  %v901_v8 = vsel %vm899_vm3, %v898_v2, %v1257_v0 }
 0x494   :  { %v1275_v52 = vpop.permute.xlu2 %1274 }
 0x495   :  { %v1277_v24 = vunpack.i.h.bf16 %v1275_v52  ;;  %v1276_v25 = vunpack.i.l.bf16 %v1275_v52 }
 0x4a4   :  { %v1270_v15 = vpop.permute.xlu1 %1269 }
 0x4a5   :  { %v1272_v16 = vunpack.i.h.bf16 %v1270_v15  ;;  %v1271_v59 = vunpack.i.l.bf16 %v1270_v15  ;;  %v1291_v15 = vld [vmem:[%s1753_s8] ss:$0 sm:$0xff] }
 0x4a7   :  { %v903_v19 = vsel %vm902_vm4, %v900_v26, %v1271_v59  ;;  %v904_v20 = vsel %vm902_vm4, %v901_v8, %v1272_v16 }
 0x4a8   :  { %v906_v21 = vsel %vm905_vm5, %v903_v19, %v1261_v18  ;;  %v907_v22 = vsel %vm905_vm5, %v904_v20, %v1262_v12 }
 0x4a9   :  { %v909_v46 = vsel %vm908_vm6, %v906_v21, %v1276_v25  ;;  %v910_v28 = vsel %vm908_vm6, %v907_v22, %v1277_v24 }
 0x4aa   :  { %v912_v7 = vsel %vm911_vm7, %v909_v46, %v1281_v50  ;;  %v913_v34 = vsel %vm911_vm7, %v910_v28, %v1282_v29 }
 0x4ac   :  { %v1285_v30 = vpop.permute.xlu1 %1284 }
 0x4ad   :  { %v1287_v31 = vunpack.i.h.bf16 %v1285_v30  ;;  %v1286_v3 = vunpack.i.l.bf16 %v1285_v30 }
 0x4af   :  { %v915_v13 = vsel %vm914_vm8, %v912_v7, %v1286_v3  ;;  %v916_v33 = vsel %vm914_vm8, %v913_v34, %v1287_v31 }
 0x4b0   :  { %v917_v35 = vpack.c.bf16 %v916_v33, %v915_v13 }
 0x4b2   :  { %994 = vmatmul.bf16.vlgmr.msrb.gmra.mxu1 %v917_v35 }
 0x52f   :  { %v995_v27 = vpop.f32.mrf.mxu1 }
 0x530   :  { %v996_v37 = vadd.f32 %v1289_v55, %v995_v27 }
 0x532   :  { %v1000_v17 = vadd.f32 %v996_v37, %v1455_v61 }
 0x534   :  { %1002 = vadd.xlane.f32.xlu2 %v1000_v17 }
 0x537   :  { %v997_v38 = vpop.f32.mrf.mxu1 }
 0x538   :  { %v998_v32 = vadd.f32 %v1289_v55, %v997_v38 }
 0x53a   :  { %v1001_v39 = vadd.f32 %v998_v32, %v1460_v62 }
 0x53c   :  { %1004 = vadd.xlane.f32.xlu0 %v1001_v39 }
 0x5a7   :  { %v1003_v47 = vpop.xlane.xlu2 %1002 }
 0x5a8   :  { %v1013_v48 = vmul.f32 %v1012_v45, %v1003_v47 }
 0x5aa   :  { %v1015_v42 = vsub.f32 %v1000_v17, %v1013_v48 }
 0x5ac   :  { %v1017_v51 = vmul.f32 %v1015_v42, %v1015_v42 }
 0x5ae   :  { %1019 = vadd.xlane.f32.xlu1 %v1017_v51 }
 0x5af   :  { %v1005_v61 = vpop.xlane.xlu0 %1004 }
 0x5b0   :  { %v1014_v53 = vmul.f32 %v1012_v45, %v1005_v61 }
 0x5b2   :  { %v1016_v54 = vsub.f32 %v1001_v39, %v1014_v53 }
 0x5b4   :  { %v1018_v56 = vmul.f32 %v1016_v54, %v1016_v54 }
 0x5b6   :  { %1021 = vadd.xlane.f32.xlu2 %v1018_v56 }
 0x621   :  { %v1020_v62 = vpop.xlane.xlu1 %1019 }
 0x622   :  { %v1023_v44 = vmul.f32 %v1020_v62, %v1012_v45 }
 0x624   :  { %v1025_v57 = vadd.f32 1e-05, %v1023_v44 }
 0x626   :  { %1358 = vrsqrt.f32 %v1025_v57  ;;  %vm1033_vm11 = vweird.f32 %v1025_v57 }
 0x629   :  { %v1022_v58 = vpop.xlane.xlu2 %1021 }
 0x62a   :  { %v1024_v60 = vmul.f32 %v1022_v58, %v1012_v45 }
 0x62c   :  { %v1359_v49 = vpop.eup %1358  ;;  %v1026_v0 = vadd.f32 1e-05, %v1024_v60 }
 0x62d   :  { %v1028_v1 = vmul.f32 %v1359_v49, %v1025_v57  ;;  %vm1034_vm10 = vweird.f32 %v1359_v49 }
 0x62e   :  { %1360 = vrsqrt.f32 %v1026_v0  ;;  %vm1035_vm12 = vmor %vm1033_vm11, %vm1034_vm10  ;;  %vm1043_vm14 = vweird.f32 %v1026_v0 }
 0x62f   :  { %v1029_v2 = vmul.f32 %v1359_v49, %v1028_v1 }
 0x631   :  { %v1030_v5 = vmul.f32 0.5, %v1029_v2 }
 0x633   :  { %v1031_v6 = vsub.f32 1.5, %v1030_v5 }
 0x634   :  { %v1361_v26 = vpop.eup %1360 }
 0x635   :  { %v1032_v8 = vmul.f32 %v1359_v49, %v1031_v6  ;;  %v1038_v23 = vmul.f32 %v1361_v26, %v1026_v0  ;;  %vm1044_vm13 = vweird.f32 %v1361_v26 }
 0x636   :  { %vm1045_vm15 = vmor %vm1043_vm14, %vm1044_vm13 }
 0x637   :  { %v1036_v10 = vsel %vm1035_vm12, %v1359_v49, %v1032_v8  ;;  %v1039_v14 = vmul.f32 %v1361_v26, %v1038_v23 }
 0x638   :  { %v1047_v16 = vmul.f32 %v1036_v10, %v1015_v42 }
 0x639   :  { %v1040_v59 = vmul.f32 0.5, %v1039_v14 }
 0x63a   :  { %v1052_v12 = vmul.f32 %v1290_v9, %v1047_v16 }
 0x63b   :  { %v1041_v18 = vsub.f32 1.5, %v1040_v59 }
 0x63c   :  { %v1057_v52 = vadd.f32 %v1291_v15, %v1052_v12 }
 0x63d   :  { %v1042_v19 = vmul.f32 %v1361_v26, %v1041_v18 }
 0x63e   :  { %1059 = vst [vmem:[%s1754_s9] sm:$0xff] %v1057_v52 }
 0x63f   :  { %v1046_v20 = vsel %vm1045_vm15, %v1361_v26, %v1042_v19 }
 0x640   :  { %v1048_v21 = vmul.f32 %v1046_v20, %v1016_v54 }
 0x642   :  { %v1053_v22 = vmul.f32 %v1290_v9, %v1048_v21 }
 0x644   :  { %v1058_v4 = vadd.f32 %v1291_v15, %v1053_v22 }
 0x646   :  { %1060 = vst [vmem:[%s1754_s9 + $0x8] sm:$0xff] %v1058_v4 }
 0x647   :  { %1065 = vsyncpa [#allocation3], 1 }

// kernel: generator_forward.21
= control target key start
LH: loop header
LB: loop body
LE: loop exit
PB: predicated region body
PF: predicated region fallthrough
CT: control target
= control target key end

     0   :  { %14 = vsyncpa [#allocation3], 0  ;;  %s1382_s11 = smov [#allocation2]   ;;  %s1383_s13 = smov 192   ;;  %s1730_s0 = inlined_call_operand.vmem [shape: f32[16,128], index: 0, kind: input, shape index: {}, may-alias: {0,1}]   ;;  %s1731_s1 = inlined_call_operand.vmem [shape: f32[16,128], index: 1, kind: input, shape index: {}, may-alias: {0,1}]   ;;  %s1732_s2 = inlined_call_operand.vmem [shape: s32[16,16], index: 2, kind: input, shape index: {}]   ;;  %s1733_s3 = inlined_call_operand.hbm [shape: bf16[128,384], index: 3, kind: input, shape index: {}]   ;;  %s1734_s4 = inlined_call_operand.vmem [shape: f32[1,384], index: 4, kind: input, shape index: {}]   ;;  %s1735_s5 = inlined_call_operand.vmem [shape: bf16[128,128], index: 5, kind: input, shape index: {}]   ;;  %s1736_s6 = inlined_call_operand.vmem [shape: f32[1,128], index: 6, kind: input, shape index: {}]   ;;  %s1737_s7 = inlined_call_operand.vmem [shape: f32[1,128], index: 7, kind: input, shape index: {}]   ;;  %s1738_s8 = inlined_call_operand.vmem [shape: f32[1,128], index: 8, kind: input, shape index: {}]   ;;  %s1739_s9 = inlined_call_operand.vmem [shape: f32[16,128], index: 9, kind: output, shape index: {}]  }
   0x1   :  { %s25_s10 = sshll.u32 %s1733_s3, 4  ;;  %s27_s12 = sshll.u32 %s1382_s11, 4  ;;  %s26_s10 = int_to_ptr.hbm [resolvable:$true] %s25_s10  ;;  %s28_s12 = int_to_ptr.vmem [resolvable:$true] %s27_s12 }
   0x2   :  { %s1384_s14 = smov 12  }
   0x3   :  { %33 = dma.hbm_to_vmem [thread:$0]  %s26_s10, 3072, %s28_s12, [#allocation3], %s1383_s13, %s1383_s13, %s1384_s14  }
   0x4   :  { %1380 = dma.done.wait [#allocation3], 3072  }
   0x5   :  { %1381 = vsyncadd [#allocation3], 4294964224  ;;  %v1147_v0 = vld [vmem:[#allocation2 + $0xa8] sm:$0xf]  ;;  %v1227_v1 = vld [vmem:[#allocation2 + $0xb0] sm:$0xf0] }
   0x6   :  { %v1226_v2 = vld [vmem:[#allocation2 + $0xac] sm:$0xf]  ;;  %v1148_v3 = vor.u32 %v1227_v1, %v1147_v0  ;;  %v1149_v4 = vld [vmem:[#allocation2 + $0xb4] sm:$0xf0]  ;;  %v1135_v5 = vld [vmem:[#allocation2 + $0x90] sm:$0xf] }
   0x7   :  { %v1224_v6 = vld [vmem:[#allocation2 + $0x98] sm:$0xf0]  ;;  %v1152_v7 = vor.u32 %v1226_v2, %v1149_v4  ;;  %v1223_v8 = vld [vmem:[#allocation2 + $0x94] sm:$0xf]  ;;  %v1137_v9 = vld [vmem:[#allocation2 + $0x9c] sm:$0xf0] }
   0x8   :  { %222 = vmatpush.bf16.msra.mxu0 %v1148_v3  ;;  %v1136_v10 = vor.u32 %v1224_v6, %v1135_v5  ;;  %v1140_v11 = vor.u32 %v1223_v8, %v1137_v9  ;;  %v1123_v12 = vld [vmem:[#allocation2 + $0x78] sm:$0xf]  ;;  %v1221_v13 = vld [vmem:[#allocation2 + $0x80] sm:$0xf0]  ;;  %v1220_v14 = vld [vmem:[#allocation2 + $0x7c] sm:$0xf] }
   0x9   :  { %236 = vmatpush.bf16.msra.mxu1 %v1152_v7  ;;  %v1125_v15 = vld [vmem:[#allocation2 + $0x84] sm:$0xf0]  ;;  %v1124_v16 = vor.u32 %v1221_v13, %v1123_v12  ;;  %v1111_v18 = vld [vmem:[#allocation2 + $0x60] sm:$0xf]  ;;  %v1218_v19 = vld [vmem:[#allocation2 + $0x68] sm:$0xf0] }
   0xa   :  { %v1128_v17 = vor.u32 %v1220_v14, %v1125_v15  ;;  %v1217_v20 = vld [vmem:[#allocation2 + $0x64] sm:$0xf]  ;;  %v1113_v21 = vld [vmem:[#allocation2 + $0x6c] sm:$0xf0]  ;;  %v1112_v22 = vor.u32 %v1218_v19, %v1111_v18  ;;  %v1099_v23 = vld [vmem:[#allocation2 + $0x48] sm:$0xf] }
   0xb   :  { %v1155_v24 = vld [vmem:[#allocation2 + $0xb0] sm:$0xf]  ;;  %v1228_v25 = vld [vmem:[#allocation2 + $0xb8] sm:$0xf0]  ;;  %v1116_v26 = vor.u32 %v1217_v20, %v1113_v21  ;;  %v1215_v27 = vld [vmem:[#allocation2 + $0x50] sm:$0xf0] }
   0xc   :  { %223 = vmatpush.bf16.msra.mxu0 %v1136_v10  ;;  %v1156_v28 = vor.u32 %v1228_v25, %v1155_v24  ;;  %v1143_v29 = vld [vmem:[#allocation2 + $0x98] sm:$0xf]  ;;  %v1225_v30 = vld [vmem:[#allocation2 + $0xa0] sm:$0xf0]  ;;  %v1214_v31 = vld [vmem:[#allocation2 + $0x4c] sm:$0xf]  ;;  %v1100_v34 = vor.u32 %v1215_v27, %v1099_v23 }
   0xd   :  { %237 = vmatpush.bf16.msra.mxu1 %v1140_v11  ;;  %v1101_v32 = vld [vmem:[#allocation2 + $0x54] sm:$0xf0]  ;;  %v1144_v33 = vor.u32 %v1225_v30, %v1143_v29  ;;  %v1131_v35 = vld [vmem:[#allocation2 + $0x80] sm:$0xf]  ;;  %v1222_v36 = vld [vmem:[#allocation2 + $0x88] sm:$0xf0] }
   0xe   :  { %250 = vmatpush.bf16.msra.mxu2 %v1156_v28  ;;  %v1104_v37 = vor.u32 %v1214_v31, %v1101_v32  ;;  %v1087_v38 = vld [vmem:[#allocation2 + $0x30] sm:$0xf]  ;;  %v1212_v39 = vld [vmem:[#allocation2 + $0x38] sm:$0xf0]  ;;  %v1211_v40 = vld [vmem:[#allocation2 + $0x34] sm:$0xf]  ;;  %v1132_v42 = vor.u32 %v1222_v36, %v1131_v35 }
   0xf   :  { %v1089_v41 = vld [vmem:[#allocation2 + $0x3c] sm:$0xf0]  ;;  %v1088_v43 = vor.u32 %v1212_v39, %v1087_v38  ;;  %v1119_v44 = vld [vmem:[#allocation2 + $0x68] sm:$0xf]  ;;  %v1219_v45 = vld [vmem:[#allocation2 + $0x70] sm:$0xf0] }
  0x10   :  { %224 = vmatpush.bf16.msra.mxu0 %v1124_v16  ;;  %v1092_v46 = vor.u32 %v1211_v40, %v1089_v41  ;;  %v1075_v47 = vld [vmem:[#allocation2 + $0x18] sm:$0xf]  ;;  %v1209_v48 = vld [vmem:[#allocation2 + $0x20] sm:$0xf0]  ;;  %v1208_v49 = vld [vmem:[#allocation2 + $0x1c] sm:$0xf]  ;;  %v1120_v51 = vor.u32 %v1219_v45, %v1119_v44 }
  0x11   :  { %238 = vmatpush.bf16.msra.mxu1 %v1128_v17  ;;  %v1077_v50 = vld [vmem:[#allocation2 + $0x24] sm:$0xf0]  ;;  %v1076_v52 = vor.u32 %v1209_v48, %v1075_v47  ;;  %v1107_v53 = vld [vmem:[#allocation2 + $0x50] sm:$0xf]  ;;  %v1216_v54 = vld [vmem:[#allocation2 + $0x58] sm:$0xf0] }
  0x12   :  { %251 = vmatpush.bf16.msra.mxu2 %v1144_v33  ;;  %v1080_v55 = vor.u32 %v1208_v49, %v1077_v50  ;;  %v1063_v56 = vld [vmem:[#allocation2] sm:$0xf]  ;;  %v1206_v57 = vld [vmem:[#allocation2 + $0x8] sm:$0xf0]  ;;  %v1205_v58 = vld [vmem:[#allocation2 + $0x4] sm:$0xf]  ;;  %v1108_v61 = vor.u32 %v1216_v54, %v1107_v53 }
  0x13   :  { %v1065_v59 = vld [vmem:[#allocation2 + $0xc] sm:$0xf0]  ;;  %v1449_v60 = vld [vmem:[%s1730_s0] sm:$0xff]  ;;  %v1064_v62 = vor.u32 %v1206_v57, %v1063_v56  ;;  %v1454_v63 = vld [vmem:[%s1730_s0 + $0x8] sm:$0xff]  ;;  %vm271_vm0 = vcmask 130048   ;;  %s1385_s19 = smov 96  }
  0x14   :  { %225 = vmatpush.bf16.msra.mxu0 %v1112_v22  ;;  %v1095_v0 = vld [vmem:[#allocation2 + $0x38] sm:$0xf]  ;;  %v1213_v1 = vld [vmem:[#allocation2 + $0x40] sm:$0xf0]  ;;  %v1068_v2 = vor.u32 %v1205_v58, %v1065_v59  ;;  %v53_v3 = vpack.c.bf16 %v1454_v63, %v1449_v60  ;;  %v1083_v5 = vld [vmem:[#allocation2 + $0x20] sm:$0xf] }
  0x15   :  { %239 = vmatpush.bf16.msra.mxu1 %v1116_v26  ;;  %v1096_v4 = vor.u32 %v1213_v1, %v1095_v0  ;;  %v1210_v6 = vld [vmem:[#allocation2 + $0x28] sm:$0xf0]  ;;  %v1071_v8 = vld [vmem:[#allocation2 + $0x8] sm:$0xf]  ;;  %v1207_v9 = vld [vmem:[#allocation2 + $0x10] sm:$0xf0] }
  0x16   :  { %252 = vmatpush.bf16.msra.mxu2 %v1132_v42  ;;  %v1084_v7 = vor.u32 %v1210_v6, %v1083_v5  ;;  %v1072_v10 = vor.u32 %v1207_v9, %v1071_v8  ;;  %v86_v12 = vld [vmem:[%s1734_s4] sm:$0x7]  ;;  %s1386_s20 = smov 112   ;;  %s1387_s4 = smov 80   ;;  %v1510_v49 = vld [vmem:[%s1732_s2 + $0x8] sm:$0xff]  ;;  %vm894_vm3 = vcmask 261120  }
  0x17   :  { %v89_v14 = vperm.slane %v86_v12, 1  ;;  %v88_v18 = vperm.slane %v86_v12, 0  ;;  %s1388_s21 = smov 64   ;;  %s1389_s22 = smov 48   ;;  %v90_v26 = vperm.slane %v86_v12, 2  ;;  %vm267_vm2 = vcmp.ne.s32.totalorder %v1510_v49, 0 }
  0x18   :  { %226 = vmatpush.bf16.msra.mxu0 %v1100_v34  ;;  %s1390_s23 = smov 32   ;;  %s1391_s24 = smov 16   ;;  %vm897_vm4 = vcmask 392192   ;;  %vm900_vm5 = vcmask 523264   ;;  %vm903_vm6 = vcmask 654336   ;;  %vm906_vm7 = vcmask 785408  }
  0x19   :  { %240 = vmatpush.bf16.msra.mxu1 %v1104_v37  ;;  %vm909_vm8 = vcmask 916480  }
  0x1a   :  { %253 = vmatpush.bf16.msra.mxu2 %v1120_v51 }
  0x1c   :  { %227 = vmatpush.bf16.msra.mxu0 %v1088_v43  ;;  %v1501_v43 = vld [vmem:[%s1732_s2] sm:$0xff] }
  0x1d   :  { %241 = vmatpush.bf16.msra.mxu1 %v1092_v46  ;;  %vm266_vm1 = vcmp.ne.s32.totalorder %v1501_v43, 0 }
  0x1e   :  { %254 = vmatpush.bf16.msra.mxu2 %v1108_v61 }
  0x20   :  { %228 = vmatpush.bf16.msra.mxu0 %v1076_v52 }
  0x21   :  { %242 = vmatpush.bf16.msra.mxu1 %v1080_v55 }
  0x22   :  { %255 = vmatpush.bf16.msra.mxu2 %v1096_v4 }
  0x24   :  { %229 = vmatpush.bf16.msra.mxu0 %v1064_v62 }
  0x25   :  { %243 = vmatpush.bf16.msra.mxu1 %v1068_v2 }
  0x26   :  { %256 = vmatpush.bf16.msra.mxu2 %v1084_v7 }
  0x27   :  { %230 = vmatmul.bf16.vlgmr.msra.gmra.mxu0 %v53_v3 }
  0x28   :  { %244 = vmatmul.bf16.vlgmr.msra.gmra.mxu1 %v53_v3 }
  0x2a   :  { %257 = vmatpush.bf16.msra.mxu2 %v1072_v10 }
  0x2d   :  { %258 = vmatmul.bf16.vlgmr.msra.gmra.mxu2 %v53_v3 }
  0xa4   :  { %v231_v13 = vpop.f32.mrf.mxu0 }
  0xa5   :  { %v245_v11 = vpop.f32.mrf.mxu1  ;;  %v232_v22 = vadd.f32 %v231_v13, %v88_v18 }
  0xa6   :  { %v246_v16 = vadd.f32 %v245_v11, %v89_v14 }
  0xac   :  { %v233_v20 = vpop.f32.mrf.mxu0 }
  0xad   :  { %v247_v15 = vpop.f32.mrf.mxu1  ;;  %v234_v23 = vadd.f32 %v233_v20, %v88_v18 }
  0xae   :  { %v248_v17 = vadd.f32 %v247_v15, %v89_v14 }
  0xaf   :  { %v268_v24 = vpack.c.bf16 %v234_v23, %v232_v22 }
  0xb0   :  { %v1461_v19 = vpack.c.bf16 %v248_v17, %v246_v16  ;;  %v259_v25 = vpop.f32.mrf.mxu2 }
  0xb1   :  { %v260_v27 = vadd.f32 %v259_v25, %v90_v26 }
  0xb2   :  { %412 = vrot.lane.b32.xlu2 %v1461_v19, %s1385_s19  ;;  %340 = vrot.lane.b32.xlu1 %v1461_v19, %s1386_s20  ;;  %v276_v21 = vsel %vm271_vm0, %v1461_v19, 0 }
  0xb3   :  { %285 = vmatpush.bf16.xpose.msra.mxu3 %v276_v21 }
  0xb8   :  { %v261_v28 = vpop.f32.mrf.mxu2 }
  0xb9   :  { %v262_v29 = vadd.f32 %v261_v28, %v90_v26 }
  0xba   :  { %483 = vrot.lane.b32.xlu2 %v1461_v19, %s1387_s4  ;;  %337 = vrot.lane.b32.xlu1 %v268_v24, %s1386_s20 }
  0xbb   :  { %1157 = vmatmul.msk.bf16.vlgmr.msra.gmra.mxu3 %vm271_vm0, %v268_v24  ;;  %v1484_v30 = vpack.c.bf16 %v262_v29, %v260_v27 }
  0xbd   :  { %325 = vmatpush.bf16.msrb.mxu3 %v1484_v30 }
  0xc2   :  { %554 = vrot.lane.b32.xlu2 %v1461_v19, %s1388_s21  ;;  %481 = vrot.lane.b32.xlu1 %v268_v24, %s1387_s4 }
  0xca   :  { %552 = vrot.lane.b32.xlu2 %v268_v24, %s1388_s21  ;;  %625 = vrot.lane.b32.xlu1 %v1461_v19, %s1389_s22 }
  0xd2   :  { %696 = vrot.lane.b32.xlu2 %v1461_v19, %s1390_s23  ;;  %623 = vrot.lane.b32.xlu1 %v268_v24, %s1389_s22 }
  0xda   :  { %765 = vrot.lane.b32.xlu2 %v268_v24, %s1391_s24  ;;  %694 = vrot.lane.b32.xlu1 %v268_v24, %s1390_s23 }
  0xe2   :  { %386 = vrot.lane.b32.xlu2 %v1484_v30, %s1386_s20  ;;  %457 = vrot.lane.b32.xlu1 %v1484_v30, %s1385_s19 }
  0xea   :  { %528 = vrot.lane.b32.xlu2 %v1484_v30, %s1387_s4 }
 0x10c   :  { %v413_v31 = vpop.permute.xlu2 %412 }
 0x10d   :  { %v418_v32 = vsel %vm271_vm0, %v413_v31, 0 }
 0x10e   :  { %427 = vmatpush.bf16.xpose.msrb.mxu2 %v418_v32 }
 0x114   :  { %v484_v33 = vpop.permute.xlu2 %483 }
 0x115   :  { %v489_v11 = vsel %vm271_vm0, %v484_v33, 0 }
 0x11c   :  { %v555_v34 = vpop.permute.xlu2 %554 }
 0x11d   :  { %v560_v35 = vsel %vm271_vm0, %v555_v34, 0 }
 0x11e   :  { %569 = vmatpush.bf16.xpose.msrb.mxu1 %v560_v35 }
 0x124   :  { %v341_v36 = vpop.permute.xlu1 %340  ;;  %v553_v37 = vpop.permute.xlu2 %552 }
 0x125   :  { %v346_v38 = vsel %vm271_vm0, %v341_v36, 0  ;;  %1165 = vmatmul.msk.bf16.vlgmr.msrb.gmra.mxu1 %vm271_vm0, %v553_v37 }
 0x126   :  { %355 = vmatpush.bf16.xpose.msra.mxu3 %v346_v38 }
 0x12c   :  { %v697_v39 = vpop.permute.xlu2 %696  ;;  %v338_v40 = vpop.permute.xlu1 %337 }
 0x12d   :  { %v702_v41 = vsel %vm271_vm0, %v697_v39, 0 }
 0x12e   :  { %711 = vmatpush.bf16.xpose.msra.mxu1 %v702_v41 }
 0x134   :  { %v482_v42 = vpop.permute.xlu1 %481  ;;  %v766_v13 = vpop.permute.xlu2 %765 }
 0x13c   :  { %v626_v44 = vpop.permute.xlu1 %625  ;;  %v387_v15 = vpop.permute.xlu2 %386 }
 0x13d   :  { %v631_v14 = vsel %vm271_vm0, %v626_v44, 0  ;;  %399 = vmatpush.bf16.msrb.mxu0 %v387_v15 }
 0x13e   :  { %v287_v45 = vpop.f32.mrf.mxu3 }
 0x13f   :  { %v292_v46 = vmul.f32 0.25, %v287_v45 }
 0x141   :  { %v294_v47 = vsel %vm266_vm1, %v292_v46, -1e+30 }
 0x142   :  { %v296_v48 = vsel %vm271_vm0, %v294_v47, -inf }
 0x143   :  { %297 = vmax.xlane.f32.xlu0 %v296_v48 }
 0x144   :  { %v624_v50 = vpop.permute.xlu1 %623  ;;  %v529_v18 = vpop.permute.xlu2 %528 }
 0x145   :  { %541 = vmatpush.bf16.msra.mxu0 %v529_v18 }
 0x146   :  { %v289_v51 = vpop.f32.mrf.mxu3 }
 0x147   :  { %v293_v52 = vmul.f32 0.25, %v289_v51 }
 0x149   :  { %v295_v53 = vsel %vm267_vm2, %v293_v52, -1e+30 }
 0x14a   :  { %v299_v54 = vsel %vm271_vm0, %v295_v53, -inf }
 0x14b   :  { %300 = vmax.xlane.f32.xlu0 %v299_v54 }
 0x14c   :  { %v695_v55 = vpop.permute.xlu1 %694 }
 0x14d   :  { %1169 = vmatmul.msk.bf16.vlgmr.msra.gmra.mxu1 %vm271_vm0, %v695_v55 }
 0x15f   :  { %410 = vrot.lane.b32.xlu0 %v268_v24, %s1385_s19 }
 0x167   :  { %767 = vrot.lane.b32.xlu0 %v1461_v19, %s1391_s24  ;;  %v458_v19 = vpop.permute.xlu1 %457 }
 0x168   :  { %470 = vmatpush.bf16.msra.mxu2 %v458_v19 }
 0x1a2   :  { %v571_v56 = vpop.f32.mrf.mxu1 }
 0x1a3   :  { %v576_v57 = vmul.f32 0.25, %v571_v56 }
 0x1a5   :  { %v1522_v58 = vsel %vm266_vm1, %v576_v57, -1e+30 }
 0x1a6   :  { %v580_v59 = vsel %vm271_vm0, %v1522_v58, -inf }
 0x1a7   :  { %581 = vmax.xlane.f32.xlu0 %v580_v59 }
 0x1aa   :  { %v573_v61 = vpop.f32.mrf.mxu1 }
 0x1ab   :  { %v577_v62 = vmul.f32 0.25, %v573_v61 }
 0x1ad   :  { %v1528_v0 = vsel %vm267_vm2, %v577_v62, -1e+30 }
 0x1ae   :  { %v583_v1 = vsel %vm271_vm0, %v1528_v0, -inf }
 0x1af   :  { %584 = vmax.xlane.f32.xlu0 %v583_v1 }
 0x1b6   :  { %v298_v2 = vpop.xlane.xlu0 %297 }
 0x1b7   :  { %v302_v3 = vsub.f32 %v294_v47, %v298_v2 }
 0x1b9   :  { %v304_v4 = vmul.f32 1.442695, %v302_v3 }
 0x1bb   :  { %1286 = vpow2.f32 %v304_v4 }
 0x1be   :  { %v301_v5 = vpop.xlane.xlu0 %300 }
 0x1bf   :  { %v303_v6 = vsub.f32 %v295_v53, %v301_v5 }
 0x1c1   :  { %v306_v7 = vmul.f32 1.442695, %v303_v6  ;;  %v1532_v8 = vpop.eup %1286 }
 0x1c3   :  { %1288 = vpow2.f32 %v306_v7 }
 0x1c9   :  { %v1534_v9 = vpop.eup %1288 }
 0x1ca   :  { %v314_v10 = vpack.c.bf16 %v1534_v9, %v1532_v8  ;;  %v713_v34 = vpop.f32.mrf.mxu1 }
 0x1cb   :  { %v718_v38 = vmul.f32 0.25, %v713_v34 }
 0x1cc   :  { %1158 = vmatmul.msk.bf16.vlgmr.msrb.gmra.mxu3 %vm271_vm0, %v314_v10 }
 0x1cd   :  { %498 = vmatpush.bf16.xpose.msrb.mxu3 %v489_v11  ;;  %v1577_v41 = vsel %vm266_vm1, %v718_v38, -1e+30 }
 0x1ce   :  { %v722_v44 = vsel %vm271_vm0, %v1577_v41, -inf }
 0x1d1   :  { %v411_v12 = vpop.permute.xlu0 %410 }
 0x1d2   :  { %1161 = vmatmul.msk.bf16.vlgmr.msrb.gmra.mxu2 %vm271_vm0, %v411_v12  ;;  %v715_v5 = vpop.f32.mrf.mxu1 }
 0x1d3   :  { %v719_v7 = vmul.f32 0.25, %v715_v5 }
 0x1d5   :  { %v1617_v10 = vsel %vm267_vm2, %v719_v7, -1e+30 }
 0x1d6   :  { %v725_v11 = vsel %vm271_vm0, %v1617_v10, -inf }
 0x1d9   :  { %v768_v16 = vpop.permute.xlu0 %767 }
 0x1da   :  { %v773_v17 = vsel %vm271_vm0, %v768_v16, 0 }
 0x1dc   :  { %1159 = vmatmul.msk.bf16.vlgmr.msra.gmra.mxu3 %vm271_vm0, %v338_v40 }
 0x1dd   :  { %640 = vmatpush.bf16.xpose.msra.mxu3 %v631_v14 }
 0x1ec   :  { %1163 = vmatmul.msk.bf16.vlgmr.msrb.gmra.mxu3 %vm271_vm0, %v482_v42 }
 0x1ed   :  { %782 = vmatpush.bf16.xpose.msrb.mxu3 %v773_v17 }
 0x1fc   :  { %1167 = vmatmul.msk.bf16.vlgmr.msra.gmra.mxu3 %vm271_vm0, %v624_v50 }
 0x20c   :  { %1171 = vmatmul.msk.bf16.vlgmr.msrb.gmra.mxu3 %vm271_vm0, %v766_v13 }
 0x21a   :  { %v582_v13 = vpop.xlane.xlu0 %581 }
 0x222   :  { %v585_v49 = vpop.xlane.xlu0 %584 }
 0x223   :  { %v587_v16 = vsub.f32 %v1528_v0, %v585_v49 }
 0x225   :  { %v590_v18 = vmul.f32 1.442695, %v587_v16 }
 0x227   :  { %1290 = vpow2.f32 %v590_v18 }
 0x24f   :  { %v1547_v20 = vpop.f32.mrf.mxu3 }
 0x255   :  { %v429_v21 = vpop.f32.mrf.mxu2 }
 0x256   :  { %v434_v22 = vmul.f32 0.25, %v429_v21 }
 0x257   :  { %v1549_v23 = vpop.f32.mrf.mxu3 }
 0x258   :  { %v1553_v24 = vsel %vm266_vm1, %v434_v22, -1e+30 }
 0x259   :  { %v438_v25 = vsel %vm271_vm0, %v1553_v24, -inf }
 0x25a   :  { %439 = vmax.xlane.f32.xlu2 %v438_v25  ;;  %v586_v25 = vsub.f32 %v1522_v58, %v582_v13 }
 0x25d   :  { %v431_v26 = vpop.f32.mrf.mxu2 }
 0x25e   :  { %v435_v27 = vmul.f32 0.25, %v431_v26 }
 0x25f   :  { %v357_v28 = vpop.f32.mrf.mxu3 }
 0x260   :  { %v1559_v29 = vsel %vm267_vm2, %v435_v27, -1e+30  ;;  %v362_v32 = vmul.f32 0.25, %v357_v28  ;;  %v1291_v27 = vpop.eup %1290  ;;  %v588_v28 = vmul.f32 1.442695, %v586_v25 }
 0x261   :  { %v441_v31 = vsel %vm271_vm0, %v1559_v29, -inf  ;;  %v595_v0 = vsel %vm271_vm0, %v1291_v27, 0.0 }
 0x262   :  { %442 = vmax.xlane.f32.xlu0 %v441_v31  ;;  %v1565_v33 = vsel %vm266_vm1, %v362_v32, -1e+30 }
 0x263   :  { %v366_v37 = vsel %vm271_vm0, %v1565_v33, -inf }
 0x267   :  { %v359_v35 = vpop.f32.mrf.mxu3 }
 0x268   :  { %v363_v36 = vmul.f32 0.25, %v359_v35 }
 0x26a   :  { %367 = vmax.xlane.f32.xlu0 %v366_v37  ;;  %v1571_v39 = vsel %vm267_vm2, %v363_v36, -1e+30 }
 0x26b   :  { %v369_v40 = vsel %vm271_vm0, %v1571_v39, -inf }
 0x26c   :  { %370 = vmax.xlane.f32.xlu1 %v369_v40 }
 0x26f   :  { %v500_v42 = vpop.f32.mrf.mxu3 }
 0x270   :  { %v505_v3 = vmul.f32 0.25, %v500_v42 }
 0x272   :  { %723 = vmax.xlane.f32.xlu0 %v722_v44  ;;  %v1611_v4 = vsel %vm266_vm1, %v505_v3, -1e+30 }
 0x273   :  { %v509_v6 = vsel %vm271_vm0, %v1611_v4, -inf }
 0x277   :  { %v502_v45 = vpop.f32.mrf.mxu3 }
 0x278   :  { %v506_v46 = vmul.f32 0.25, %v502_v45 }
 0x27a   :  { %v1583_v47 = vsel %vm267_vm2, %v506_v46, -1e+30 }
 0x27b   :  { %v512_v48 = vsel %vm271_vm0, %v1583_v47, -inf }
 0x27c   :  { %513 = vmax.xlane.f32.xlu0 %v512_v48 }
 0x27f   :  { %v642_v50 = vpop.f32.mrf.mxu3 }
 0x280   :  { %v647_v51 = vmul.f32 0.25, %v642_v50 }
 0x282   :  { %v1589_v52 = vsel %vm266_vm1, %v647_v51, -1e+30 }
 0x283   :  { %v651_v53 = vsel %vm271_vm0, %v1589_v52, -inf }
 0x284   :  { %652 = vmax.xlane.f32.xlu0 %v651_v53 }
 0x285   :  { %599 = vrot.lane.b32.xlu1 %v1484_v30, %s1388_s21 }
 0x287   :  { %v644_v54 = vpop.f32.mrf.mxu3 }
 0x288   :  { %v648_v55 = vmul.f32 0.25, %v644_v54 }
 0x28a   :  { %v1597_v56 = vsel %vm267_vm2, %v648_v55, -1e+30 }
 0x28b   :  { %v654_v57 = vsel %vm271_vm0, %v1597_v56, -inf }
 0x28c   :  { %655 = vmax.xlane.f32.xlu2 %v654_v57 }
 0x28f   :  { %v784_v59 = vpop.f32.mrf.mxu3 }
 0x290   :  { %v789_v12 = vmul.f32 0.25, %v784_v59 }
 0x292   :  { %v1625_v14 = vsel %vm266_vm1, %v789_v12, -1e+30 }
 0x293   :  { %v793_v15 = vsel %vm271_vm0, %v1625_v14, -inf }
 0x297   :  { %v786_v61 = vpop.f32.mrf.mxu3 }
 0x298   :  { %v790_v62 = vmul.f32 0.25, %v786_v61  ;;  %670 = vrot.lane.b32.xlu0 %v1484_v30, %s1389_s22  ;;  %v311_v61 = vsel %vm271_vm0, %v1534_v9, 0.0 }
 0x29a   :  { %v1605_v1 = vsel %vm267_vm2, %v790_v62, -1e+30 }
 0x29b   :  { %v796_v2 = vsel %vm271_vm0, %v1605_v1, -inf }
 0x29c   :  { %797 = vmax.xlane.f32.xlu2 %v796_v2 }
 0x2af   :  { %510 = vmax.xlane.f32.xlu1 %v509_v6 }
 0x2b4   :  { %741 = vrot.lane.b32.xlu2 %v1484_v30, %s1390_s23 }
 0x2b7   :  { %726 = vmax.xlane.f32.xlu1 %v725_v11 }
 0x2c2   :  { %794 = vmax.xlane.f32.xlu0 %v793_v15 }
 0x2cd   :  { %v440_v17 = vpop.xlane.xlu2 %439 }
 0x2ce   :  { %v444_v19 = vsub.f32 %v1553_v24, %v440_v17 }
 0x2d0   :  { %812 = vrot.lane.b32.xlu1 %v1484_v30, %s1391_s24  ;;  %v446_v21 = vmul.f32 1.442695, %v444_v19 }
 0x2d2   :  { %1292 = vpow2.f32 %v446_v21 }
 0x2d5   :  { %v443_v22 = vpop.xlane.xlu0 %442 }
 0x2d6   :  { %v445_v43 = vsub.f32 %v1559_v29, %v443_v22 }
 0x2d8   :  { %v448_v26 = vmul.f32 1.442695, %v445_v43  ;;  %v1293_v32 = vpop.eup %1292 }
 0x2d9   :  { %v450_v54 = vsel %vm271_vm0, %v1293_v32, 0.0 }
 0x2da   :  { %1294 = vpow2.f32 %v448_v26 }
 0x2db   :  { %1296 = vpow2.f32 %v588_v28 }
 0x2dd   :  { %596 = vadd.xlane.f32.xlu2 %v595_v0  ;;  %v368_v31 = vpop.xlane.xlu0 %367 }
 0x2de   :  { %v372_v30 = vsub.f32 %v1565_v33, %v368_v31 }
 0x2df   :  { %v371_v24 = vpop.xlane.xlu1 %370 }
 0x2e0   :  { %v1295_v34 = vpop.eup %1294  ;;  %v374_v35 = vmul.f32 1.442695, %v372_v30  ;;  %v373_v29 = vsub.f32 %v1571_v39, %v371_v24 }
 0x2e1   :  { %v456_v36 = vpack.c.bf16 %v1295_v34, %v1293_v32  ;;  %v453_v58 = vsel %vm271_vm0, %v1295_v34, 0.0  ;;  %v1297_v40 = vpop.eup %1296 }
 0x2e2   :  { %v376_v37 = vmul.f32 1.442695, %v373_v29  ;;  %454 = vadd.xlane.f32.xlu0 %v453_v58  ;;  %1298 = vpow2.f32 %v374_v35  ;;  %v592_v45 = vsel %vm271_vm0, %v1297_v40, 0.0 }
 0x2e3   :  { %1162 = vmatmul.msk.bf16.vlgmr.msra.gmra.mxu2 %vm271_vm0, %v456_v36 }
 0x2e4   :  { %1300 = vpow2.f32 %v376_v37 }
 0x2e5   :  { %v724_v38 = vpop.xlane.xlu0 %723 }
 0x2e6   :  { %v728_v33 = vsub.f32 %v1577_v41, %v724_v38  ;;  %v598_v41 = vpack.c.bf16 %v1291_v27, %v1297_v40 }
 0x2e8   :  { %v730_v42 = vmul.f32 1.442695, %v728_v33  ;;  %v1299_v44 = vpop.eup %1298 }
 0x2e9   :  { %v378_v55 = vsel %vm271_vm0, %v1299_v44, 0.0 }
 0x2ea   :  { %v1642_v46 = vpop.eup %1300  ;;  %1302 = vpow2.f32 %v730_v42  ;;  %593 = vadd.xlane.f32.xlu0 %v592_v45 }
 0x2eb   :  { %v384_v39 = vpack.c.bf16 %v1642_v46, %v1299_v44  ;;  %v381_v44 = vsel %vm271_vm0, %v1642_v46, 0.0 }
 0x2ed   :  { %1160 = vmatmul.msk.bf16.vlgmr.msrb.gmra.mxu0 %vm271_vm0, %v384_v39 }
 0x2ef   :  { %v514_v53 = vpop.xlane.xlu0 %513 }
 0x2f0   :  { %v1303_v48 = vpop.eup %1302  ;;  %v516_v15 = vsub.f32 %v1583_v47, %v514_v53 }
 0x2f1   :  { %v734_v50 = vsel %vm271_vm0, %v1303_v48, 0.0 }
 0x2f2   :  { %735 = vadd.xlane.f32.xlu2 %v734_v50  ;;  %v519_v49 = vmul.f32 1.442695, %v516_v15 }
 0x2f7   :  { %v600_v51 = vpop.permute.xlu1 %599  ;;  %v653_v62 = vpop.xlane.xlu0 %652 }
 0x2f8   :  { %612 = vmatpush.bf16.msrb.mxu2 %v600_v51  ;;  %v657_v26 = vsub.f32 %v1589_v52, %v653_v62  ;;  %v308_v52 = vsel %vm271_vm0, %v1532_v8, 0.0 }
 0x2fa   :  { %451 = vadd.xlane.f32.xlu1 %v450_v54  ;;  %379 = vadd.xlane.f32.xlu2 %v378_v55  ;;  %v659_v47 = vmul.f32 1.442695, %v657_v26 }
 0x2fb   :  { %1166 = vmatmul.msk.bf16.vlgmr.msrb.gmra.mxu2 %vm271_vm0, %v598_v41 }
 0x2ff   :  { %v656_v57 = vpop.xlane.xlu2 %655 }
 0x300   :  { %v658_v59 = vsub.f32 %v1597_v56, %v656_v57 }
 0x302   :  { %v661_v2 = vmul.f32 1.442695, %v658_v59  ;;  %312 = vadd.xlane.f32.xlu1 %v311_v61 }
 0x304   :  { %1304 = vpow2.f32 %v661_v2 }
 0x30a   :  { %v1305_v3 = vpop.eup %1304  ;;  %v671_v5 = vpop.permute.xlu0 %670 }
 0x30b   :  { %683 = vmatpush.bf16.msrb.mxu0 %v671_v5  ;;  %v666_v6 = vsel %vm271_vm0, %v1305_v3, 0.0 }
 0x30c   :  { %667 = vadd.xlane.f32.xlu1 %v666_v6 }
 0x30f   :  { %v798_v7 = vpop.xlane.xlu2 %797 }
 0x310   :  { %v800_v11 = vsub.f32 %v1605_v1, %v798_v7 }
 0x312   :  { %v803_v12 = vmul.f32 1.442695, %v800_v11 }
 0x314   :  { %1306 = vpow2.f32 %v803_v12 }
 0x315   :  { %1308 = vpow2.f32 %v519_v49 }
 0x317   :  { %v742_v13 = vpop.permute.xlu2 %741 }
 0x318   :  { %754 = vmatpush.bf16.msra.mxu2 %v742_v13 }
 0x31a   :  { %v1307_v56 = vpop.eup %1306 }
 0x31b   :  { %v808_v9 = vsel %vm271_vm0, %v1307_v56, 0.0  ;;  %v1309_v21 = vpop.eup %1308 }
 0x31c   :  { %809 = vadd.xlane.f32.xlu2 %v808_v9 }
 0x322   :  { %v511_v16 = vpop.xlane.xlu1 %510 }
 0x323   :  { %v515_v17 = vsub.f32 %v1611_v4, %v511_v16 }
 0x325   :  { %v517_v18 = vmul.f32 1.442695, %v515_v17 }
 0x327   :  { %1310 = vpow2.f32 %v517_v18 }
 0x32a   :  { %v727_v19 = vpop.xlane.xlu1 %726 }
 0x32b   :  { %v729_v1 = vsub.f32 %v1617_v10, %v727_v19 }
 0x32d   :  { %v1311_v22 = vpop.eup %1310  ;;  %v732_v43 = vmul.f32 1.442695, %v729_v1 }
 0x32e   :  { %v527_v25 = vpack.c.bf16 %v1309_v21, %v1311_v22  ;;  %v521_v45 = vsel %vm271_vm0, %v1311_v22, 0.0 }
 0x32f   :  { %1312 = vpow2.f32 %v732_v43 }
 0x330   :  { %1164 = vmatmul.msk.bf16.vlgmr.msra.gmra.mxu0 %vm271_vm0, %v527_v25  ;;  %1314 = vpow2.f32 %v659_v47 }
 0x335   :  { %v1313_v27 = vpop.eup %1312  ;;  %v795_v28 = vpop.xlane.xlu0 %794 }
 0x336   :  { %v740_v0 = vpack.c.bf16 %v1313_v27, %v1303_v48  ;;  %v799_v4 = vsub.f32 %v1625_v14, %v795_v28  ;;  %v737_v31 = vsel %vm271_vm0, %v1313_v27, 0.0  ;;  %v1315_v30 = vpop.eup %1314  ;;  %v524_v48 = vsel %vm271_vm0, %v1309_v21, 0.0 }
 0x337   :  { %738 = vadd.xlane.f32.xlu0 %v737_v31  ;;  %v669_v32 = vpack.c.bf16 %v1305_v3, %v1315_v30  ;;  %v663_v50 = vsel %vm271_vm0, %v1315_v30, 0.0 }
 0x338   :  { %v801_v10 = vmul.f32 1.442695, %v799_v4  ;;  %1170 = vmatmul.msk.bf16.vlgmr.msra.gmra.mxu2 %vm271_vm0, %v740_v0 }
 0x33a   :  { %1316 = vpow2.f32 %v801_v10 }
 0x33f   :  { %309 = vadd.xlane.f32.xlu0 %v308_v52 }
 0x340   :  { %v1317_v24 = vpop.eup %1316  ;;  %1168 = vmatmul.msk.bf16.vlgmr.msrb.gmra.mxu0 %vm271_vm0, %v669_v32 }
 0x341   :  { %v805_v34 = vsel %vm271_vm0, %v1317_v24, 0.0  ;;  %v811_v35 = vpack.c.bf16 %v1307_v56, %v1317_v24 }
 0x342   :  { %v813_v14 = vpop.permute.xlu1 %812  ;;  %806 = vadd.xlane.f32.xlu1 %v805_v34 }
 0x343   :  { %825 = vmatpush.bf16.msra.mxu0 %v813_v14 }
 0x350   :  { %1172 = vmatmul.msk.bf16.vlgmr.msra.gmra.mxu0 %vm271_vm0, %v811_v35  ;;  %v597_v53 = vpop.xlane.xlu2 %596 }
 0x355   :  { %v455_v36 = vpop.xlane.xlu0 %454 }
 0x356   :  { %1318 = vrcp.f32 %v455_v36 }
 0x35c   :  { %v1319_v38 = vpop.eup %1318 }
 0x35d   :  { %v594_v41 = vpop.xlane.xlu0 %593 }
 0x365   :  { %v736_v46 = vpop.xlane.xlu2 %735 }
 0x366   :  { %v472_v29 = vpop.f32.mrf.mxu2 }
 0x36a   :  { %v401_v13 = vpop.f32.mrf.mxu0 }
 0x36d   :  { %v452_v58 = vpop.xlane.xlu1 %451  ;;  %v380_v17 = vpop.xlane.xlu2 %379 }
 0x36e   :  { %1320 = vrcp.f32 %v452_v58  ;;  %v474_v37 = vpop.f32.mrf.mxu2 }
 0x36f   :  { %v480_v33 = vmul.f32 %v1319_v38, %v474_v37  ;;  %1322 = vrcp.f32 %v597_v53  ;;  %v1233_v53 = vld [vmem:[%s1735_s5 + $0x20] sm:$0xff] }
 0x370   :  { %1324 = vrcp.f32 %v594_v41 }
 0x372   :  { %v403_v56 = vpop.f32.mrf.mxu0 }
 0x374   :  { %v1321_v8 = vpop.eup %1320 }
 0x375   :  { %v479_v40 = vmul.f32 %v1321_v8, %v472_v29  ;;  %v1323_v57 = vpop.eup %1322  ;;  %v313_v21 = vpop.xlane.xlu1 %312 }
 0x376   :  { %v1325_v61 = vpop.eup %1324 }
 0x377   :  { %v1248_v42 = vpack.i.bf16 %v480_v33, %v479_v40 }
 0x379   :  { %1249 = vrot.lane.b32.xlu0 %v1248_v42, %s1390_s23 }
 0x37e   :  { %v614_v39 = vpop.f32.mrf.mxu2 }
 0x37f   :  { %v621_v62 = vmul.f32 %v1325_v61, %v614_v39  ;;  %v668_v28 = vpop.xlane.xlu1 %667  ;;  %v1235_v39 = vld [vmem:[%s1735_s5 + $0x30] sm:$0xff] }
 0x386   :  { %v616_v51 = vpop.f32.mrf.mxu2 }
 0x387   :  { %v622_v59 = vmul.f32 %v1323_v57, %v616_v51 }
 0x389   :  { %v1253_v2 = vpack.i.bf16 %v622_v59, %v621_v62 }
 0x38f   :  { %v810_v31 = vpop.xlane.xlu2 %809 }
 0x3a3   :  { %382 = vadd.xlane.f32.xlu0 %v381_v44 }
 0x3aa   :  { %v739_v55 = vpop.xlane.xlu0 %738 }
 0x3ab   :  { %522 = vadd.xlane.f32.xlu0 %v521_v45  ;;  %1326 = vrcp.f32 %v739_v55  ;;  %v1236_v45 = vld [vmem:[%s1735_s5 + $0x38] sm:$0xff] }
 0x3ac   :  { %1328 = vrcp.f32 %v736_v46  ;;  %981 = vmatpush.bf16.msrb.mxu1 %v1236_v45 }
 0x3ad   :  { %v543_v9 = vpop.f32.mrf.mxu0  ;;  %1330 = vrcp.f32 %v380_v17 }
 0x3b0   :  { %982 = vmatpush.bf16.msrb.mxu1 %v1235_v39 }
 0x3b1   :  { %v1327_v5 = vpop.eup %1326 }
 0x3b2   :  { %v1329_v7 = vpop.eup %1328  ;;  %v310_v15 = vpop.xlane.xlu0 %309 }
 0x3b3   :  { %525 = vadd.xlane.f32.xlu0 %v524_v48  ;;  %v1331_v1 = vpop.eup %1330  ;;  %v1234_v48 = vld [vmem:[%s1735_s5 + $0x28] sm:$0xff] }
 0x3b4   :  { %v408_v26 = vmul.f32 %v1331_v1, %v401_v13  ;;  %983 = vmatpush.bf16.msrb.mxu1 %v1234_v48 }
 0x3b5   :  { %v545_v49 = vpop.f32.mrf.mxu0  ;;  %v807_v30 = vpop.xlane.xlu1 %806 }
 0x3b8   :  { %984 = vmatpush.bf16.msrb.mxu1 %v1233_v53 }
 0x3bb   :  { %664 = vadd.xlane.f32.xlu0 %v663_v50  ;;  %v756_v54 = vpop.f32.mrf.mxu2 }
 0x3bc   :  { %v763_v11 = vmul.f32 %v1329_v7, %v756_v54  ;;  %v1229_v7 = vld [vmem:[%s1735_s5] sm:$0xff] }
 0x3bd   :  { %v685_v18 = vpop.f32.mrf.mxu0 }
 0x3c3   :  { %v758_v3 = vpop.f32.mrf.mxu2 }
 0x3c4   :  { %v764_v6 = vmul.f32 %v1327_v5, %v758_v3  ;;  %v1232_v3 = vld [vmem:[%s1735_s5 + $0x18] sm:$0xff] }
 0x3c5   :  { %v687_v43 = vpop.f32.mrf.mxu0  ;;  %985 = vmatpush.bf16.msrb.mxu1 %v1232_v3 }
 0x3c6   :  { %v1273_v12 = vpack.i.bf16 %v764_v6, %v763_v11  ;;  %v1230_v6 = vld [vmem:[%s1735_s5 + $0x8] sm:$0xff] }
 0x3cd   :  { %v827_v4 = vpop.f32.mrf.mxu0 }
 0x3cf   :  { %1254 = vrot.lane.b32.xlu0 %v1253_v2, %s1388_s21 }
 0x3d5   :  { %v829_v35 = vpop.f32.mrf.mxu0 }
 0x3d7   :  { %1274 = vrot.lane.b32.xlu0 %v1273_v12, %s1385_s19 }
 0x3eb   :  { %v1677_v16 = vpop.permute.xlu0 %1249 }
 0x3ec   :  { %v1252_v59 = vunpack.i.h.bf16 %v1677_v16  ;;  %v1251_v61 = vunpack.i.l.bf16 %v1677_v16 }
 0x416   :  { %v383_v19 = vpop.xlane.xlu0 %382 }
 0x417   :  { %1332 = vrcp.f32 %v383_v19 }
 0x41d   :  { %v1333_v22 = vpop.eup %1332 }
 0x41e   :  { %v523_v25 = vpop.xlane.xlu0 %522  ;;  %v409_v47 = vmul.f32 %v1333_v22, %v403_v56 }
 0x41f   :  { %1334 = vrcp.f32 %v523_v25 }
 0x420   :  { %v1258_v27 = vpack.i.bf16 %v409_v47, %v408_v26 }
 0x422   :  { %1259 = vrot.lane.b32.xlu2 %v1258_v27, %s1391_s24 }
 0x425   :  { %v1335_v10 = vpop.eup %1334 }
 0x426   :  { %v526_v0 = vpop.xlane.xlu0 %525  ;;  %v550_v24 = vmul.f32 %v1335_v10, %v543_v9 }
 0x427   :  { %1336 = vrcp.f32 %v526_v0 }
 0x428   :  { %1338 = vrcp.f32 %v668_v28 }
 0x429   :  { %1340 = vrcp.f32 %v810_v31 }
 0x42a   :  { %1342 = vrcp.f32 %v807_v30 }
 0x42d   :  { %v1337_v32 = vpop.eup %1336 }
 0x42e   :  { %v665_v52 = vpop.xlane.xlu0 %664  ;;  %v551_v34 = vmul.f32 %v1337_v32, %v545_v49  ;;  %v1339_v29 = vpop.eup %1338 }
 0x42f   :  { %1344 = vrcp.f32 %v665_v52  ;;  %v1341_v36 = vpop.eup %1340  ;;  %v693_v8 = vmul.f32 %v1339_v29, %v687_v43  ;;  %v1283_v52 = vld [vmem:[%s1736_s6] ss:$0 sm:$0xff] }
 0x430   :  { %v1263_v14 = vpack.i.bf16 %v551_v34, %v550_v24  ;;  %v1343_v58 = vpop.eup %1342  ;;  %v835_v37 = vmul.f32 %v1341_v36, %v829_v35  ;;  %1346 = vrcp.f32 %v313_v21 }
 0x431   :  { %v834_v40 = vmul.f32 %v1343_v58, %v827_v4  ;;  %1348 = vrcp.f32 %v310_v15  ;;  %v1392_v58 = vmov 128.0  }
 0x432   :  { %1264 = vrot.lane.b32.xlu1 %v1263_v14, %s1389_s22  ;;  %1350 = vrcp.f32 %v1392_v58 }
 0x433   :  { %v1278_v42 = vpack.i.bf16 %v835_v37, %v834_v40 }
 0x435   :  { %v1345_v38 = vpop.eup %1344 }
 0x436   :  { %v692_v33 = vmul.f32 %v1345_v38, %v685_v18  ;;  %v1347_v50 = vpop.eup %1346 }
 0x437   :  { %v1349_v51 = vpop.eup %1348  ;;  %v335_v41 = vmul.f32 %v1347_v50, %v1549_v23 }
 0x438   :  { %v1268_v44 = vpack.i.bf16 %v693_v8, %v692_v33  ;;  %v334_v55 = vmul.f32 %v1349_v51, %v1547_v20  ;;  %v1231_v20 = vld [vmem:[%s1735_s5 + $0x10] sm:$0xff]  ;;  %v1351_v37 = vpop.eup %1350 }
 0x439   :  { %986 = vmatpush.bf16.msrb.mxu1 %v1231_v20  ;;  %v1002_v38 = vmul.f32 128.0, %v1351_v37  ;;  %vm1006_vm9 = vweird.f32 %v1351_v37 }
 0x43a   :  { %1279 = vrot.lane.b32.xlu1 %v1278_v42, %s1386_s20  ;;  %1269 = vrot.lane.b32.xlu2 %v1268_v44, %s1387_s4 }
 0x43b   :  { %v1003_v8 = vsub.f32 1.0, %v1002_v38 }
 0x43d   :  { %987 = vmatpush.bf16.msrb.mxu1 %v1230_v6  ;;  %v1004_v40 = vmul.f32 %v1351_v37, %v1003_v8  ;;  %v1284_v6 = vld [vmem:[%s1737_s7] ss:$0 sm:$0xff] }
 0x43f   :  { %v1005_v33 = vadd.f32 %v1351_v37, %v1004_v40 }
 0x441   :  { %988 = vmatpush.bf16.msrb.mxu1 %v1229_v7  ;;  %v1255_v11 = vpop.permute.xlu0 %1254  ;;  %v1007_v42 = vsel %vm1006_vm9, %v1351_v37, %v1005_v33 }
 0x442   :  { %v1257_v9 = vunpack.i.h.bf16 %v1255_v11  ;;  %v1256_v15 = vunpack.i.l.bf16 %v1255_v11 }
 0x449   :  { %v1275_v1 = vpop.permute.xlu0 %1274 }
 0x44a   :  { %v1277_v26 = vunpack.i.h.bf16 %v1275_v1  ;;  %v1276_v47 = vunpack.i.l.bf16 %v1275_v1 }
 0x47c   :  { %v1260_v54 = vpop.permute.xlu2 %1259 }
 0x47d   :  { %v1262_v57 = vunpack.i.h.bf16 %v1260_v54  ;;  %v1261_v46 = vunpack.i.l.bf16 %v1260_v54 }
 0x47f   :  { %v893_v62 = vsel %vm271_vm0, %v335_v41, %v1262_v57  ;;  %v892_v2 = vsel %vm271_vm0, %v334_v55, %v1261_v46 }
 0x480   :  { %v895_v23 = vsel %vm894_vm3, %v892_v2, %v1251_v61  ;;  %v896_v5 = vsel %vm894_vm3, %v893_v62, %v1252_v59 }
 0x494   :  { %v1270_v49 = vpop.permute.xlu2 %1269 }
 0x495   :  { %v1272_v21 = vunpack.i.h.bf16 %v1270_v49  ;;  %v1271_v22 = vunpack.i.l.bf16 %v1270_v49 }
 0x4a4   :  { %v1265_v12 = vpop.permute.xlu1 %1264 }
 0x4a5   :  { %v1267_v13 = vunpack.i.h.bf16 %v1265_v12  ;;  %v1266_v56 = vunpack.i.l.bf16 %v1265_v12  ;;  %v1285_v12 = vld [vmem:[%s1738_s8] ss:$0 sm:$0xff] }
 0x4a7   :  { %v898_v16 = vsel %vm897_vm4, %v895_v23, %v1266_v56  ;;  %v899_v17 = vsel %vm897_vm4, %v896_v5, %v1267_v13 }
 0x4a8   :  { %v901_v18 = vsel %vm900_vm5, %v898_v16, %v1256_v15  ;;  %v902_v19 = vsel %vm900_vm5, %v899_v17, %v1257_v9 }
 0x4a9   :  { %v904_v43 = vsel %vm903_vm6, %v901_v18, %v1271_v22  ;;  %v905_v25 = vsel %vm903_vm6, %v902_v19, %v1272_v21 }
 0x4aa   :  { %v907_v4 = vsel %vm906_vm7, %v904_v43, %v1276_v47  ;;  %v908_v31 = vsel %vm906_vm7, %v905_v25, %v1277_v26 }
 0x4ac   :  { %v1280_v27 = vpop.permute.xlu1 %1279 }
 0x4ad   :  { %v1282_v28 = vunpack.i.h.bf16 %v1280_v27  ;;  %v1281_v0 = vunpack.i.l.bf16 %v1280_v27 }
 0x4af   :  { %v910_v10 = vsel %vm909_vm8, %v907_v4, %v1281_v0  ;;  %v911_v30 = vsel %vm909_vm8, %v908_v31, %v1282_v28 }
 0x4b0   :  { %v912_v32 = vpack.c.bf16 %v911_v30, %v910_v10 }
 0x4b2   :  { %989 = vmatmul.bf16.vlgmr.msrb.gmra.mxu1 %v912_v32 }
 0x52f   :  { %v990_v24 = vpop.f32.mrf.mxu1 }
 0x530   :  { %v991_v34 = vadd.f32 %v1283_v52, %v990_v24 }
 0x532   :  { %v995_v14 = vadd.f32 %v991_v34, %v1449_v60 }
 0x534   :  { %997 = vadd.xlane.f32.xlu2 %v995_v14 }
 0x537   :  { %v992_v35 = vpop.f32.mrf.mxu1 }
 0x538   :  { %v993_v29 = vadd.f32 %v1283_v52, %v992_v35 }
 0x53a   :  { %v996_v36 = vadd.f32 %v993_v29, %v1454_v63 }
 0x53c   :  { %999 = vadd.xlane.f32.xlu0 %v996_v36 }
 0x5a7   :  { %v998_v44 = vpop.xlane.xlu2 %997 }
 0x5a8   :  { %v1008_v45 = vmul.f32 %v1007_v42, %v998_v44 }
 0x5aa   :  { %v1010_v39 = vsub.f32 %v995_v14, %v1008_v45 }
 0x5ac   :  { %v1012_v48 = vmul.f32 %v1010_v39, %v1010_v39 }
 0x5ae   :  { %1014 = vadd.xlane.f32.xlu1 %v1012_v48 }
 0x5af   :  { %v1000_v60 = vpop.xlane.xlu0 %999 }
 0x5b0   :  { %v1009_v50 = vmul.f32 %v1007_v42, %v1000_v60 }
 0x5b2   :  { %v1011_v51 = vsub.f32 %v996_v36, %v1009_v50 }
 0x5b4   :  { %v1013_v53 = vmul.f32 %v1011_v51, %v1011_v51 }
 0x5b6   :  { %1016 = vadd.xlane.f32.xlu2 %v1013_v53 }
 0x621   :  { %v1015_v63 = vpop.xlane.xlu1 %1014 }
 0x622   :  { %v1018_v41 = vmul.f32 %v1015_v63, %v1007_v42 }
 0x624   :  { %v1020_v54 = vadd.f32 1e-05, %v1018_v41 }
 0x626   :  { %1352 = vrsqrt.f32 %v1020_v54  ;;  %vm1028_vm11 = vweird.f32 %v1020_v54 }
 0x629   :  { %v1017_v55 = vpop.xlane.xlu2 %1016 }
 0x62a   :  { %v1019_v57 = vmul.f32 %v1017_v55, %v1007_v42 }
 0x62c   :  { %v1353_v46 = vpop.eup %1352  ;;  %v1021_v59 = vadd.f32 1e-05, %v1019_v57 }
 0x62d   :  { %v1023_v61 = vmul.f32 %v1353_v46, %v1020_v54  ;;  %vm1029_vm10 = vweird.f32 %v1353_v46 }
 0x62e   :  { %1354 = vrsqrt.f32 %v1021_v59  ;;  %vm1030_vm12 = vmor %vm1028_vm11, %vm1029_vm10  ;;  %vm1038_vm14 = vweird.f32 %v1021_v59 }
 0x62f   :  { %v1024_v62 = vmul.f32 %v1353_v46, %v1023_v61 }
 0x631   :  { %v1025_v2 = vmul.f32 0.5, %v1024_v62 }
 0x633   :  { %v1026_v3 = vsub.f32 1.5, %v1025_v2 }
 0x634   :  { %v1355_v23 = vpop.eup %1354 }
 0x635   :  { %v1027_v5 = vmul.f32 %v1353_v46, %v1026_v3  ;;  %v1033_v20 = vmul.f32 %v1355_v23, %v1021_v59  ;;  %vm1039_vm13 = vweird.f32 %v1355_v23 }
 0x636   :  { %vm1040_vm15 = vmor %vm1038_vm14, %vm1039_vm13 }
 0x637   :  { %v1031_v7 = vsel %vm1030_vm12, %v1353_v46, %v1027_v5  ;;  %v1034_v11 = vmul.f32 %v1355_v23, %v1033_v20 }
 0x638   :  { %v1042_v13 = vmul.f32 %v1031_v7, %v1010_v39 }
 0x639   :  { %v1035_v56 = vmul.f32 0.5, %v1034_v11 }
 0x63a   :  { %v1047_v9 = vmul.f32 %v1284_v6, %v1042_v13 }
 0x63b   :  { %v1036_v15 = vsub.f32 1.5, %v1035_v56 }
 0x63c   :  { %v1052_v49 = vadd.f32 %v1285_v12, %v1047_v9 }
 0x63d   :  { %v1037_v16 = vmul.f32 %v1355_v23, %v1036_v15 }
 0x63e   :  { %1054 = vst [vmem:[%s1739_s9] sm:$0xff] %v1052_v49 }
 0x63f   :  { %v1041_v17 = vsel %vm1040_vm15, %v1355_v23, %v1037_v16 }
 0x640   :  { %v1043_v18 = vmul.f32 %v1041_v17, %v1011_v51 }
 0x642   :  { %v1048_v19 = vmul.f32 %v1284_v6, %v1043_v18 }
 0x644   :  { %v1053_v1 = vadd.f32 %v1285_v12, %v1048_v19 }
 0x646   :  { %1055 = vst [vmem:[%s1739_s9 + $0x8] sm:$0xff] %v1053_v1 }
 0x647   :  { %1060 = vsyncpa [#allocation3], 1 }

// kernel: generator_forward.24
= control target key start
LH: loop header
LB: loop body
LE: loop exit
PB: predicated region body
PF: predicated region fallthrough
CT: control target
= control target key end

     0   :  { %14 = vsyncpa [#allocation3], 0  ;;  %s1758_s0 = inlined_call_operand.vmem [shape: f32[16,128], index: 0, kind: input, shape index: {}, may-alias: {0,1}]   ;;  %s1759_s1 = inlined_call_operand.vmem [shape: f32[16,128], index: 1, kind: input, shape index: {}, may-alias: {0,1}]   ;;  %s1760_s2 = inlined_call_operand.vmem [shape: s32[16,16], index: 2, kind: input, shape index: {}]   ;;  %s1761_s3 = inlined_call_operand.hbm [shape: bf16[128,384], index: 3, kind: input, shape index: {}]   ;;  %s1762_s4 = inlined_call_operand.vmem [shape: f32[1,384], index: 4, kind: input, shape index: {}]   ;;  %s1763_s5 = inlined_call_operand.hbm [shape: bf16[128,128], index: 5, kind: input, shape index: {}]   ;;  %s1764_s6 = inlined_call_operand.vmem [shape: f32[1,128], index: 6, kind: input, shape index: {}]   ;;  %s1765_s7 = inlined_call_operand.vmem [shape: f32[1,128], index: 7, kind: input, shape index: {}]   ;;  %s1766_s8 = inlined_call_operand.vmem [shape: f32[1,128], index: 8, kind: input, shape index: {}]   ;;  %s1767_s9 = inlined_call_operand.vmem [shape: f32[16,128], index: 9, kind: output, shape index: {}]  }
   0x1   :  { %s26_s10 = sshll.u32 %s1761_s3, 4  ;;  %s27_s10 = int_to_ptr.hbm [resolvable:$true] %s26_s10 }
   0x2   :  { %15 = vsyncpa [#allocation5], 0  ;;  %s1427_s11 = smov [#allocation2]   ;;  %s41_s15 = sshll.u32 %s1763_s5, 4  ;;  %s42_s15 = int_to_ptr.hbm [resolvable:$true] %s41_s15 }
   0x3   :  { %s28_s12 = sshll.u32 %s1427_s11, 4  ;;  %s1428_s16 = smov 192   ;;  %s29_s12 = int_to_ptr.vmem [resolvable:$true] %s28_s12 }
   0x4   :  { %s1429_s17 = smov 12   ;;  %s1430_s18 = smov [#allocation4]  }
   0x5   :  { %34 = dma.hbm_to_vmem [thread:$0]  %s27_s10, 3072, %s29_s12, [#allocation3], %s1428_s16, %s1428_s16, %s1429_s17  }
   0x6   :  { %s43_s19 = sshll.u32 %s1430_s18, 4  ;;  %s1431_s20 = smov 64   ;;  %s44_s19 = int_to_ptr.vmem [resolvable:$true] %s43_s19 }
   0x7   :  { %s1432_s21 = smov 4  }
   0x8   :  { %49 = dma.hbm_to_vmem [thread:$0]  %s42_s15, 1024, %s44_s19, [#allocation5], %s1431_s20, %s1431_s20, %s1432_s21  }
   0x9   :  { %1423 = dma.done.wait [#allocation3], 3072  }
   0xa   :  { %1424 = vsyncadd [#allocation3], 4294964224 }
   0xb   :  { %1425 = dma.done.wait [#allocation5], 1024  }
   0xc   :  { %1426 = vsyncadd [#allocation5], 4294966272  ;;  %v1164_v0 = vld [vmem:[#allocation2 + $0xa8] sm:$0xf]  ;;  %v1244_v1 = vld [vmem:[#allocation2 + $0xb0] sm:$0xf0] }
   0xd   :  { %v1243_v2 = vld [vmem:[#allocation2 + $0xac] sm:$0xf]  ;;  %v1165_v3 = vor.u32 %v1244_v1, %v1164_v0  ;;  %v1166_v4 = vld [vmem:[#allocation2 + $0xb4] sm:$0xf0]  ;;  %v1152_v5 = vld [vmem:[#allocation2 + $0x90] sm:$0xf] }
   0xe   :  { %v1241_v6 = vld [vmem:[#allocation2 + $0x98] sm:$0xf0]  ;;  %v1169_v7 = vor.u32 %v1243_v2, %v1166_v4  ;;  %v1240_v8 = vld [vmem:[#allocation2 + $0x94] sm:$0xf]  ;;  %v1154_v9 = vld [vmem:[#allocation2 + $0x9c] sm:$0xf0] }
   0xf   :  { %238 = vmatpush.bf16.msra.mxu0 %v1165_v3  ;;  %v1153_v10 = vor.u32 %v1241_v6, %v1152_v5  ;;  %v1157_v11 = vor.u32 %v1240_v8, %v1154_v9  ;;  %v1140_v12 = vld [vmem:[#allocation2 + $0x78] sm:$0xf]  ;;  %v1238_v13 = vld [vmem:[#allocation2 + $0x80] sm:$0xf0]  ;;  %v1237_v14 = vld [vmem:[#allocation2 + $0x7c] sm:$0xf] }
  0x10   :  { %252 = vmatpush.bf16.msra.mxu1 %v1169_v7  ;;  %v1142_v15 = vld [vmem:[#allocation2 + $0x84] sm:$0xf0]  ;;  %v1141_v16 = vor.u32 %v1238_v13, %v1140_v12  ;;  %v1128_v18 = vld [vmem:[#allocation2 + $0x60] sm:$0xf]  ;;  %v1235_v19 = vld [vmem:[#allocation2 + $0x68] sm:$0xf0] }
  0x11   :  { %v1145_v17 = vor.u32 %v1237_v14, %v1142_v15  ;;  %v1234_v20 = vld [vmem:[#allocation2 + $0x64] sm:$0xf]  ;;  %v1130_v21 = vld [vmem:[#allocation2 + $0x6c] sm:$0xf0]  ;;  %v1129_v22 = vor.u32 %v1235_v19, %v1128_v18  ;;  %v1116_v23 = vld [vmem:[#allocation2 + $0x48] sm:$0xf] }
  0x12   :  { %v1172_v24 = vld [vmem:[#allocation2 + $0xb0] sm:$0xf]  ;;  %v1245_v25 = vld [vmem:[#allocation2 + $0xb8] sm:$0xf0]  ;;  %v1133_v26 = vor.u32 %v1234_v20, %v1130_v21  ;;  %v1232_v27 = vld [vmem:[#allocation2 + $0x50] sm:$0xf0] }
  0x13   :  { %239 = vmatpush.bf16.msra.mxu0 %v1153_v10  ;;  %v1173_v28 = vor.u32 %v1245_v25, %v1172_v24  ;;  %v1160_v29 = vld [vmem:[#allocation2 + $0x98] sm:$0xf]  ;;  %v1242_v30 = vld [vmem:[#allocation2 + $0xa0] sm:$0xf0]  ;;  %v1231_v31 = vld [vmem:[#allocation2 + $0x4c] sm:$0xf]  ;;  %v1117_v34 = vor.u32 %v1232_v27, %v1116_v23 }
  0x14   :  { %253 = vmatpush.bf16.msra.mxu1 %v1157_v11  ;;  %v1118_v32 = vld [vmem:[#allocation2 + $0x54] sm:$0xf0]  ;;  %v1161_v33 = vor.u32 %v1242_v30, %v1160_v29  ;;  %v1148_v35 = vld [vmem:[#allocation2 + $0x80] sm:$0xf]  ;;  %v1239_v36 = vld [vmem:[#allocation2 + $0x88] sm:$0xf0] }
  0x15   :  { %266 = vmatpush.bf16.msra.mxu2 %v1173_v28  ;;  %v1121_v37 = vor.u32 %v1231_v31, %v1118_v32  ;;  %v1104_v38 = vld [vmem:[#allocation2 + $0x30] sm:$0xf]  ;;  %v1229_v39 = vld [vmem:[#allocation2 + $0x38] sm:$0xf0]  ;;  %v1228_v40 = vld [vmem:[#allocation2 + $0x34] sm:$0xf]  ;;  %v1149_v42 = vor.u32 %v1239_v36, %v1148_v35 }
  0x16   :  { %v1106_v41 = vld [vmem:[#allocation2 + $0x3c] sm:$0xf0]  ;;  %v1105_v43 = vor.u32 %v1229_v39, %v1104_v38  ;;  %v1136_v44 = vld [vmem:[#allocation2 + $0x68] sm:$0xf]  ;;  %v1236_v45 = vld [vmem:[#allocation2 + $0x70] sm:$0xf0] }
  0x17   :  { %240 = vmatpush.bf16.msra.mxu0 %v1141_v16  ;;  %v1109_v46 = vor.u32 %v1228_v40, %v1106_v41  ;;  %v1092_v47 = vld [vmem:[#allocation2 + $0x18] sm:$0xf]  ;;  %v1226_v48 = vld [vmem:[#allocation2 + $0x20] sm:$0xf0]  ;;  %v1225_v49 = vld [vmem:[#allocation2 + $0x1c] sm:$0xf]  ;;  %v1137_v51 = vor.u32 %v1236_v45, %v1136_v44 }
  0x18   :  { %254 = vmatpush.bf16.msra.mxu1 %v1145_v17  ;;  %v1094_v50 = vld [vmem:[#allocation2 + $0x24] sm:$0xf0]  ;;  %v1093_v52 = vor.u32 %v1226_v48, %v1092_v47  ;;  %v1124_v53 = vld [vmem:[#allocation2 + $0x50] sm:$0xf]  ;;  %v1233_v54 = vld [vmem:[#allocation2 + $0x58] sm:$0xf0] }
  0x19   :  { %267 = vmatpush.bf16.msra.mxu2 %v1161_v33  ;;  %v1097_v55 = vor.u32 %v1225_v49, %v1094_v50  ;;  %v1080_v56 = vld [vmem:[#allocation2] sm:$0xf]  ;;  %v1223_v57 = vld [vmem:[#allocation2 + $0x8] sm:$0xf0]  ;;  %v1222_v58 = vld [vmem:[#allocation2 + $0x4] sm:$0xf]  ;;  %v1125_v61 = vor.u32 %v1233_v54, %v1124_v53 }
  0x1a   :  { %v1082_v59 = vld [vmem:[#allocation2 + $0xc] sm:$0xf0]  ;;  %v1501_v60 = vld [vmem:[%s1758_s0] sm:$0xff]  ;;  %v1081_v62 = vor.u32 %v1223_v57, %v1080_v56  ;;  %v1506_v63 = vld [vmem:[%s1758_s0 + $0x8] sm:$0xff]  ;;  %vm287_vm0 = vcmask 130048   ;;  %s1433_s25 = smov 96  }
  0x1b   :  { %241 = vmatpush.bf16.msra.mxu0 %v1129_v22  ;;  %v1112_v0 = vld [vmem:[#allocation2 + $0x38] sm:$0xf]  ;;  %v1230_v1 = vld [vmem:[#allocation2 + $0x40] sm:$0xf0]  ;;  %v1085_v2 = vor.u32 %v1222_v58, %v1082_v59  ;;  %v69_v3 = vpack.c.bf16 %v1506_v63, %v1501_v60  ;;  %v1100_v5 = vld [vmem:[#allocation2 + $0x20] sm:$0xf] }
  0x1c   :  { %255 = vmatpush.bf16.msra.mxu1 %v1133_v26  ;;  %v1113_v4 = vor.u32 %v1230_v1, %v1112_v0  ;;  %v1227_v6 = vld [vmem:[#allocation2 + $0x28] sm:$0xf0]  ;;  %v1088_v8 = vld [vmem:[#allocation2 + $0x8] sm:$0xf]  ;;  %v1224_v9 = vld [vmem:[#allocation2 + $0x10] sm:$0xf0] }
  0x1d   :  { %268 = vmatpush.bf16.msra.mxu2 %v1149_v42  ;;  %v1101_v7 = vor.u32 %v1227_v6, %v1100_v5  ;;  %v1089_v10 = vor.u32 %v1224_v9, %v1088_v8  ;;  %v102_v12 = vld [vmem:[%s1762_s4] sm:$0x7]  ;;  %s1434_s26 = smov 112   ;;  %s1435_s4 = smov 80   ;;  %v1562_v49 = vld [vmem:[%s1760_s2 + $0x8] sm:$0xff]  ;;  %vm910_vm3 = vcmask 261120  }
  0x1e   :  { %v105_v14 = vperm.slane %v102_v12, 1  ;;  %v104_v18 = vperm.slane %v102_v12, 0  ;;  %s1436_s1 = smov 48   ;;  %s1437_s27 = smov 32   ;;  %v106_v26 = vperm.slane %v102_v12, 2  ;;  %vm283_vm2 = vcmp.ne.s32.totalorder %v1562_v49, 0 }
  0x1f   :  { %242 = vmatpush.bf16.msra.mxu0 %v1117_v34  ;;  %s1438_s28 = smov 16   ;;  %vm913_vm4 = vcmask 392192   ;;  %vm916_vm5 = vcmask 523264   ;;  %vm919_vm6 = vcmask 654336   ;;  %vm922_vm7 = vcmask 785408  }
  0x20   :  { %256 = vmatpush.bf16.msra.mxu1 %v1121_v37  ;;  %vm925_vm8 = vcmask 916480  }
  0x21   :  { %269 = vmatpush.bf16.msra.mxu2 %v1137_v51 }
  0x23   :  { %243 = vmatpush.bf16.msra.mxu0 %v1105_v43  ;;  %v1553_v43 = vld [vmem:[%s1760_s2] sm:$0xff] }
  0x24   :  { %257 = vmatpush.bf16.msra.mxu1 %v1109_v46  ;;  %vm282_vm1 = vcmp.ne.s32.totalorder %v1553_v43, 0 }
  0x25   :  { %270 = vmatpush.bf16.msra.mxu2 %v1125_v61 }
  0x27   :  { %244 = vmatpush.bf16.msra.mxu0 %v1093_v52 }
  0x28   :  { %258 = vmatpush.bf16.msra.mxu1 %v1097_v55 }
  0x29   :  { %271 = vmatpush.bf16.msra.mxu2 %v1113_v4 }
  0x2b   :  { %245 = vmatpush.bf16.msra.mxu0 %v1081_v62 }
  0x2c   :  { %259 = vmatpush.bf16.msra.mxu1 %v1085_v2 }
  0x2d   :  { %272 = vmatpush.bf16.msra.mxu2 %v1101_v7 }
  0x2e   :  { %246 = vmatmul.bf16.vlgmr.msra.gmra.mxu0 %v69_v3 }
  0x2f   :  { %260 = vmatmul.bf16.vlgmr.msra.gmra.mxu1 %v69_v3 }
  0x31   :  { %273 = vmatpush.bf16.msra.mxu2 %v1089_v10 }
  0x34   :  { %274 = vmatmul.bf16.vlgmr.msra.gmra.mxu2 %v69_v3 }
  0xab   :  { %v247_v13 = vpop.f32.mrf.mxu0 }
  0xac   :  { %v261_v11 = vpop.f32.mrf.mxu1  ;;  %v248_v22 = vadd.f32 %v247_v13, %v104_v18 }
  0xad   :  { %v262_v16 = vadd.f32 %v261_v11, %v105_v14 }
  0xb3   :  { %v249_v20 = vpop.f32.mrf.mxu0 }
  0xb4   :  { %v263_v15 = vpop.f32.mrf.mxu1  ;;  %v250_v23 = vadd.f32 %v249_v20, %v104_v18 }
  0xb5   :  { %v264_v17 = vadd.f32 %v263_v15, %v105_v14 }
  0xb6   :  { %v284_v24 = vpack.c.bf16 %v250_v23, %v248_v22 }
  0xb7   :  { %v1513_v19 = vpack.c.bf16 %v264_v17, %v262_v16  ;;  %v275_v25 = vpop.f32.mrf.mxu2 }
  0xb8   :  { %v276_v27 = vadd.f32 %v275_v25, %v106_v26 }
  0xb9   :  { %428 = vrot.lane.b32.xlu2 %v1513_v19, %s1433_s25  ;;  %356 = vrot.lane.b32.xlu1 %v1513_v19, %s1434_s26  ;;  %v292_v21 = vsel %vm287_vm0, %v1513_v19, 0 }
  0xba   :  { %301 = vmatpush.bf16.xpose.msra.mxu3 %v292_v21 }
  0xbf   :  { %v277_v28 = vpop.f32.mrf.mxu2 }
  0xc0   :  { %v278_v29 = vadd.f32 %v277_v28, %v106_v26 }
  0xc1   :  { %499 = vrot.lane.b32.xlu2 %v1513_v19, %s1435_s4  ;;  %353 = vrot.lane.b32.xlu1 %v284_v24, %s1434_s26 }
  0xc2   :  { %1174 = vmatmul.msk.bf16.vlgmr.msra.gmra.mxu3 %vm287_vm0, %v284_v24  ;;  %v1536_v30 = vpack.c.bf16 %v278_v29, %v276_v27 }
  0xc4   :  { %341 = vmatpush.bf16.msrb.mxu3 %v1536_v30 }
  0xc9   :  { %570 = vrot.lane.b32.xlu2 %v1513_v19, %s1431_s20  ;;  %497 = vrot.lane.b32.xlu1 %v284_v24, %s1435_s4 }
  0xd1   :  { %568 = vrot.lane.b32.xlu2 %v284_v24, %s1431_s20  ;;  %641 = vrot.lane.b32.xlu1 %v1513_v19, %s1436_s1 }
  0xd9   :  { %712 = vrot.lane.b32.xlu2 %v1513_v19, %s1437_s27  ;;  %639 = vrot.lane.b32.xlu1 %v284_v24, %s1436_s1 }
  0xe1   :  { %781 = vrot.lane.b32.xlu2 %v284_v24, %s1438_s28  ;;  %710 = vrot.lane.b32.xlu1 %v284_v24, %s1437_s27 }
  0xe9   :  { %402 = vrot.lane.b32.xlu2 %v1536_v30, %s1434_s26  ;;  %473 = vrot.lane.b32.xlu1 %v1536_v30, %s1433_s25 }
  0xf1   :  { %544 = vrot.lane.b32.xlu2 %v1536_v30, %s1435_s4 }
 0x113   :  { %v429_v31 = vpop.permute.xlu2 %428 }
 0x114   :  { %v434_v32 = vsel %vm287_vm0, %v429_v31, 0 }
 0x115   :  { %443 = vmatpush.bf16.xpose.msrb.mxu2 %v434_v32 }
 0x11b   :  { %v500_v33 = vpop.permute.xlu2 %499 }
 0x11c   :  { %v505_v11 = vsel %vm287_vm0, %v500_v33, 0 }
 0x123   :  { %v571_v34 = vpop.permute.xlu2 %570 }
 0x124   :  { %v576_v35 = vsel %vm287_vm0, %v571_v34, 0 }
 0x125   :  { %585 = vmatpush.bf16.xpose.msrb.mxu1 %v576_v35 }
 0x12b   :  { %v357_v36 = vpop.permute.xlu1 %356  ;;  %v569_v37 = vpop.permute.xlu2 %568 }
 0x12c   :  { %v362_v38 = vsel %vm287_vm0, %v357_v36, 0  ;;  %1182 = vmatmul.msk.bf16.vlgmr.msrb.gmra.mxu1 %vm287_vm0, %v569_v37 }
 0x12d   :  { %371 = vmatpush.bf16.xpose.msra.mxu3 %v362_v38 }
 0x133   :  { %v713_v39 = vpop.permute.xlu2 %712  ;;  %v354_v40 = vpop.permute.xlu1 %353 }
 0x134   :  { %v718_v41 = vsel %vm287_vm0, %v713_v39, 0 }
 0x135   :  { %727 = vmatpush.bf16.xpose.msra.mxu1 %v718_v41 }
 0x13b   :  { %v498_v42 = vpop.permute.xlu1 %497  ;;  %v782_v13 = vpop.permute.xlu2 %781 }
 0x143   :  { %v642_v44 = vpop.permute.xlu1 %641  ;;  %v403_v15 = vpop.permute.xlu2 %402 }
 0x144   :  { %v647_v14 = vsel %vm287_vm0, %v642_v44, 0  ;;  %415 = vmatpush.bf16.msrb.mxu0 %v403_v15 }
 0x145   :  { %v303_v45 = vpop.f32.mrf.mxu3 }
 0x146   :  { %v308_v46 = vmul.f32 0.25, %v303_v45 }
 0x148   :  { %v310_v47 = vsel %vm282_vm1, %v308_v46, -1e+30 }
 0x149   :  { %v312_v48 = vsel %vm287_vm0, %v310_v47, -inf }
 0x14a   :  { %313 = vmax.xlane.f32.xlu0 %v312_v48 }
 0x14b   :  { %v640_v50 = vpop.permute.xlu1 %639  ;;  %v545_v18 = vpop.permute.xlu2 %544 }
 0x14c   :  { %557 = vmatpush.bf16.msra.mxu0 %v545_v18 }
 0x14d   :  { %v305_v51 = vpop.f32.mrf.mxu3 }
 0x14e   :  { %v309_v52 = vmul.f32 0.25, %v305_v51 }
 0x150   :  { %v311_v53 = vsel %vm283_vm2, %v309_v52, -1e+30 }
 0x151   :  { %v315_v54 = vsel %vm287_vm0, %v311_v53, -inf }
 0x152   :  { %316 = vmax.xlane.f32.xlu0 %v315_v54 }
 0x153   :  { %v711_v55 = vpop.permute.xlu1 %710 }
 0x154   :  { %1186 = vmatmul.msk.bf16.vlgmr.msra.gmra.mxu1 %vm287_vm0, %v711_v55 }
 0x166   :  { %426 = vrot.lane.b32.xlu0 %v284_v24, %s1433_s25 }
 0x16e   :  { %783 = vrot.lane.b32.xlu0 %v1513_v19, %s1438_s28  ;;  %v474_v19 = vpop.permute.xlu1 %473 }
 0x16f   :  { %486 = vmatpush.bf16.msra.mxu2 %v474_v19 }
 0x1a9   :  { %v587_v56 = vpop.f32.mrf.mxu1 }
 0x1aa   :  { %v592_v57 = vmul.f32 0.25, %v587_v56 }
 0x1ac   :  { %v1574_v58 = vsel %vm282_vm1, %v592_v57, -1e+30 }
 0x1ad   :  { %v596_v59 = vsel %vm287_vm0, %v1574_v58, -inf }
 0x1ae   :  { %597 = vmax.xlane.f32.xlu0 %v596_v59 }
 0x1b1   :  { %v589_v61 = vpop.f32.mrf.mxu1 }
 0x1b2   :  { %v593_v62 = vmul.f32 0.25, %v589_v61 }
 0x1b4   :  { %v1580_v0 = vsel %vm283_vm2, %v593_v62, -1e+30 }
 0x1b5   :  { %v599_v1 = vsel %vm287_vm0, %v1580_v0, -inf }
 0x1b6   :  { %600 = vmax.xlane.f32.xlu0 %v599_v1 }
 0x1bd   :  { %v314_v2 = vpop.xlane.xlu0 %313 }
 0x1be   :  { %v318_v3 = vsub.f32 %v310_v47, %v314_v2 }
 0x1c0   :  { %v320_v4 = vmul.f32 1.442695, %v318_v3 }
 0x1c2   :  { %1305 = vpow2.f32 %v320_v4 }
 0x1c5   :  { %v317_v5 = vpop.xlane.xlu0 %316 }
 0x1c6   :  { %v319_v6 = vsub.f32 %v311_v53, %v317_v5 }
 0x1c8   :  { %v322_v7 = vmul.f32 1.442695, %v319_v6  ;;  %v1584_v8 = vpop.eup %1305 }
 0x1ca   :  { %1307 = vpow2.f32 %v322_v7 }
 0x1d0   :  { %v1586_v9 = vpop.eup %1307 }
 0x1d1   :  { %v330_v10 = vpack.c.bf16 %v1586_v9, %v1584_v8  ;;  %v729_v34 = vpop.f32.mrf.mxu1 }
 0x1d2   :  { %v734_v38 = vmul.f32 0.25, %v729_v34 }
 0x1d3   :  { %1175 = vmatmul.msk.bf16.vlgmr.msrb.gmra.mxu3 %vm287_vm0, %v330_v10 }
 0x1d4   :  { %514 = vmatpush.bf16.xpose.msrb.mxu3 %v505_v11  ;;  %v1629_v41 = vsel %vm282_vm1, %v734_v38, -1e+30 }
 0x1d5   :  { %v738_v44 = vsel %vm287_vm0, %v1629_v41, -inf }
 0x1d8   :  { %v427_v12 = vpop.permute.xlu0 %426 }
 0x1d9   :  { %1178 = vmatmul.msk.bf16.vlgmr.msrb.gmra.mxu2 %vm287_vm0, %v427_v12  ;;  %v731_v5 = vpop.f32.mrf.mxu1 }
 0x1da   :  { %v735_v7 = vmul.f32 0.25, %v731_v5 }
 0x1dc   :  { %v1669_v10 = vsel %vm283_vm2, %v735_v7, -1e+30 }
 0x1dd   :  { %v741_v11 = vsel %vm287_vm0, %v1669_v10, -inf }
 0x1e0   :  { %v784_v16 = vpop.permute.xlu0 %783 }
 0x1e1   :  { %v789_v17 = vsel %vm287_vm0, %v784_v16, 0 }
 0x1e3   :  { %1176 = vmatmul.msk.bf16.vlgmr.msra.gmra.mxu3 %vm287_vm0, %v354_v40 }
 0x1e4   :  { %656 = vmatpush.bf16.xpose.msra.mxu3 %v647_v14 }
 0x1f3   :  { %1180 = vmatmul.msk.bf16.vlgmr.msrb.gmra.mxu3 %vm287_vm0, %v498_v42 }
 0x1f4   :  { %798 = vmatpush.bf16.xpose.msrb.mxu3 %v789_v17 }
 0x203   :  { %1184 = vmatmul.msk.bf16.vlgmr.msra.gmra.mxu3 %vm287_vm0, %v640_v50 }
 0x213   :  { %1188 = vmatmul.msk.bf16.vlgmr.msrb.gmra.mxu3 %vm287_vm0, %v782_v13 }
 0x221   :  { %v598_v13 = vpop.xlane.xlu0 %597 }
 0x229   :  { %v601_v49 = vpop.xlane.xlu0 %600 }
 0x22a   :  { %v603_v16 = vsub.f32 %v1580_v0, %v601_v49 }
 0x22c   :  { %v606_v18 = vmul.f32 1.442695, %v603_v16 }
 0x22e   :  { %1309 = vpow2.f32 %v606_v18 }
 0x256   :  { %v1599_v20 = vpop.f32.mrf.mxu3 }
 0x25c   :  { %v445_v21 = vpop.f32.mrf.mxu2 }
 0x25d   :  { %v450_v22 = vmul.f32 0.25, %v445_v21 }
 0x25e   :  { %v1601_v23 = vpop.f32.mrf.mxu3 }
 0x25f   :  { %v1605_v24 = vsel %vm282_vm1, %v450_v22, -1e+30 }
 0x260   :  { %v454_v25 = vsel %vm287_vm0, %v1605_v24, -inf }
 0x261   :  { %455 = vmax.xlane.f32.xlu2 %v454_v25  ;;  %v602_v25 = vsub.f32 %v1574_v58, %v598_v13 }
 0x264   :  { %v447_v26 = vpop.f32.mrf.mxu2 }
 0x265   :  { %v451_v27 = vmul.f32 0.25, %v447_v26 }
 0x266   :  { %v373_v28 = vpop.f32.mrf.mxu3 }
 0x267   :  { %v1611_v29 = vsel %vm283_vm2, %v451_v27, -1e+30  ;;  %v378_v32 = vmul.f32 0.25, %v373_v28  ;;  %v1310_v27 = vpop.eup %1309  ;;  %v604_v28 = vmul.f32 1.442695, %v602_v25 }
 0x268   :  { %v457_v31 = vsel %vm287_vm0, %v1611_v29, -inf  ;;  %v611_v0 = vsel %vm287_vm0, %v1310_v27, 0.0 }
 0x269   :  { %458 = vmax.xlane.f32.xlu0 %v457_v31  ;;  %v1617_v33 = vsel %vm282_vm1, %v378_v32, -1e+30 }
 0x26a   :  { %v382_v37 = vsel %vm287_vm0, %v1617_v33, -inf }
 0x26e   :  { %v375_v35 = vpop.f32.mrf.mxu3 }
 0x26f   :  { %v379_v36 = vmul.f32 0.25, %v375_v35 }
 0x271   :  { %383 = vmax.xlane.f32.xlu0 %v382_v37  ;;  %v1623_v39 = vsel %vm283_vm2, %v379_v36, -1e+30 }
 0x272   :  { %v385_v40 = vsel %vm287_vm0, %v1623_v39, -inf }
 0x273   :  { %386 = vmax.xlane.f32.xlu1 %v385_v40 }
 0x276   :  { %v516_v42 = vpop.f32.mrf.mxu3 }
 0x277   :  { %v521_v3 = vmul.f32 0.25, %v516_v42 }
 0x279   :  { %739 = vmax.xlane.f32.xlu0 %v738_v44  ;;  %v1663_v4 = vsel %vm282_vm1, %v521_v3, -1e+30 }
 0x27a   :  { %v525_v6 = vsel %vm287_vm0, %v1663_v4, -inf }
 0x27e   :  { %v518_v45 = vpop.f32.mrf.mxu3 }
 0x27f   :  { %v522_v46 = vmul.f32 0.25, %v518_v45 }
 0x281   :  { %v1635_v47 = vsel %vm283_vm2, %v522_v46, -1e+30 }
 0x282   :  { %v528_v48 = vsel %vm287_vm0, %v1635_v47, -inf }
 0x283   :  { %529 = vmax.xlane.f32.xlu0 %v528_v48 }
 0x286   :  { %v658_v50 = vpop.f32.mrf.mxu3 }
 0x287   :  { %v663_v51 = vmul.f32 0.25, %v658_v50 }
 0x289   :  { %v1641_v52 = vsel %vm282_vm1, %v663_v51, -1e+30 }
 0x28a   :  { %v667_v53 = vsel %vm287_vm0, %v1641_v52, -inf }
 0x28b   :  { %668 = vmax.xlane.f32.xlu0 %v667_v53 }
 0x28c   :  { %615 = vrot.lane.b32.xlu1 %v1536_v30, %s1431_s20 }
 0x28e   :  { %v660_v54 = vpop.f32.mrf.mxu3 }
 0x28f   :  { %v664_v55 = vmul.f32 0.25, %v660_v54 }
 0x291   :  { %v1649_v56 = vsel %vm283_vm2, %v664_v55, -1e+30 }
 0x292   :  { %v670_v57 = vsel %vm287_vm0, %v1649_v56, -inf }
 0x293   :  { %671 = vmax.xlane.f32.xlu2 %v670_v57 }
 0x296   :  { %v800_v59 = vpop.f32.mrf.mxu3 }
 0x297   :  { %v805_v12 = vmul.f32 0.25, %v800_v59 }
 0x299   :  { %v1677_v14 = vsel %vm282_vm1, %v805_v12, -1e+30 }
 0x29a   :  { %v809_v15 = vsel %vm287_vm0, %v1677_v14, -inf }
 0x29e   :  { %v802_v61 = vpop.f32.mrf.mxu3 }
 0x29f   :  { %v806_v62 = vmul.f32 0.25, %v802_v61  ;;  %686 = vrot.lane.b32.xlu0 %v1536_v30, %s1436_s1  ;;  %v327_v61 = vsel %vm287_vm0, %v1586_v9, 0.0 }
 0x2a1   :  { %v1657_v1 = vsel %vm283_vm2, %v806_v62, -1e+30 }
 0x2a2   :  { %v812_v2 = vsel %vm287_vm0, %v1657_v1, -inf }
 0x2a3   :  { %813 = vmax.xlane.f32.xlu2 %v812_v2 }
 0x2b6   :  { %526 = vmax.xlane.f32.xlu1 %v525_v6 }
 0x2bb   :  { %757 = vrot.lane.b32.xlu2 %v1536_v30, %s1437_s27 }
 0x2be   :  { %742 = vmax.xlane.f32.xlu1 %v741_v11 }
 0x2c9   :  { %810 = vmax.xlane.f32.xlu0 %v809_v15 }
 0x2d4   :  { %v456_v17 = vpop.xlane.xlu2 %455 }
 0x2d5   :  { %v460_v19 = vsub.f32 %v1605_v24, %v456_v17 }
 0x2d7   :  { %828 = vrot.lane.b32.xlu1 %v1536_v30, %s1438_s28  ;;  %v462_v21 = vmul.f32 1.442695, %v460_v19 }
 0x2d9   :  { %1311 = vpow2.f32 %v462_v21 }
 0x2dc   :  { %v459_v22 = vpop.xlane.xlu0 %458 }
 0x2dd   :  { %v461_v43 = vsub.f32 %v1611_v29, %v459_v22 }
 0x2df   :  { %v464_v26 = vmul.f32 1.442695, %v461_v43  ;;  %v1312_v32 = vpop.eup %1311 }
 0x2e0   :  { %v466_v54 = vsel %vm287_vm0, %v1312_v32, 0.0 }
 0x2e1   :  { %1313 = vpow2.f32 %v464_v26 }
 0x2e2   :  { %1315 = vpow2.f32 %v604_v28 }
 0x2e4   :  { %612 = vadd.xlane.f32.xlu2 %v611_v0  ;;  %v384_v31 = vpop.xlane.xlu0 %383 }
 0x2e5   :  { %v388_v30 = vsub.f32 %v1617_v33, %v384_v31 }
 0x2e6   :  { %v387_v24 = vpop.xlane.xlu1 %386 }
 0x2e7   :  { %v1314_v34 = vpop.eup %1313  ;;  %v390_v35 = vmul.f32 1.442695, %v388_v30  ;;  %v389_v29 = vsub.f32 %v1623_v39, %v387_v24 }
 0x2e8   :  { %v472_v36 = vpack.c.bf16 %v1314_v34, %v1312_v32  ;;  %v469_v58 = vsel %vm287_vm0, %v1314_v34, 0.0  ;;  %v1316_v40 = vpop.eup %1315 }
 0x2e9   :  { %v392_v37 = vmul.f32 1.442695, %v389_v29  ;;  %470 = vadd.xlane.f32.xlu0 %v469_v58  ;;  %1317 = vpow2.f32 %v390_v35  ;;  %v608_v45 = vsel %vm287_vm0, %v1316_v40, 0.0 }
 0x2ea   :  { %1179 = vmatmul.msk.bf16.vlgmr.msra.gmra.mxu2 %vm287_vm0, %v472_v36 }
 0x2eb   :  { %1319 = vpow2.f32 %v392_v37 }
 0x2ec   :  { %v740_v38 = vpop.xlane.xlu0 %739 }
 0x2ed   :  { %v744_v33 = vsub.f32 %v1629_v41, %v740_v38  ;;  %v614_v41 = vpack.c.bf16 %v1310_v27, %v1316_v40 }
 0x2ef   :  { %v746_v42 = vmul.f32 1.442695, %v744_v33  ;;  %v1318_v44 = vpop.eup %1317 }
 0x2f0   :  { %v394_v55 = vsel %vm287_vm0, %v1318_v44, 0.0 }
 0x2f1   :  { %v1694_v46 = vpop.eup %1319  ;;  %1321 = vpow2.f32 %v746_v42  ;;  %609 = vadd.xlane.f32.xlu0 %v608_v45 }
 0x2f2   :  { %v400_v39 = vpack.c.bf16 %v1694_v46, %v1318_v44  ;;  %v397_v44 = vsel %vm287_vm0, %v1694_v46, 0.0 }
 0x2f4   :  { %1177 = vmatmul.msk.bf16.vlgmr.msrb.gmra.mxu0 %vm287_vm0, %v400_v39 }
 0x2f6   :  { %v530_v53 = vpop.xlane.xlu0 %529 }
 0x2f7   :  { %v1322_v48 = vpop.eup %1321  ;;  %v532_v15 = vsub.f32 %v1635_v47, %v530_v53 }
 0x2f8   :  { %v750_v50 = vsel %vm287_vm0, %v1322_v48, 0.0 }
 0x2f9   :  { %751 = vadd.xlane.f32.xlu2 %v750_v50  ;;  %v535_v49 = vmul.f32 1.442695, %v532_v15 }
 0x2fe   :  { %v616_v51 = vpop.permute.xlu1 %615  ;;  %v669_v62 = vpop.xlane.xlu0 %668 }
 0x2ff   :  { %628 = vmatpush.bf16.msrb.mxu2 %v616_v51  ;;  %v673_v26 = vsub.f32 %v1641_v52, %v669_v62  ;;  %v324_v52 = vsel %vm287_vm0, %v1584_v8, 0.0 }
 0x301   :  { %467 = vadd.xlane.f32.xlu1 %v466_v54  ;;  %395 = vadd.xlane.f32.xlu2 %v394_v55  ;;  %v675_v47 = vmul.f32 1.442695, %v673_v26 }
 0x302   :  { %1183 = vmatmul.msk.bf16.vlgmr.msrb.gmra.mxu2 %vm287_vm0, %v614_v41 }
 0x306   :  { %v672_v57 = vpop.xlane.xlu2 %671 }
 0x307   :  { %v674_v59 = vsub.f32 %v1649_v56, %v672_v57 }
 0x309   :  { %v677_v2 = vmul.f32 1.442695, %v674_v59  ;;  %328 = vadd.xlane.f32.xlu1 %v327_v61 }
 0x30b   :  { %1323 = vpow2.f32 %v677_v2 }
 0x311   :  { %v1324_v3 = vpop.eup %1323  ;;  %v687_v5 = vpop.permute.xlu0 %686 }
 0x312   :  { %699 = vmatpush.bf16.msrb.mxu0 %v687_v5  ;;  %v682_v6 = vsel %vm287_vm0, %v1324_v3, 0.0 }
 0x313   :  { %683 = vadd.xlane.f32.xlu1 %v682_v6 }
 0x316   :  { %v814_v7 = vpop.xlane.xlu2 %813 }
 0x317   :  { %v816_v11 = vsub.f32 %v1657_v1, %v814_v7 }
 0x319   :  { %v819_v12 = vmul.f32 1.442695, %v816_v11 }
 0x31b   :  { %1325 = vpow2.f32 %v819_v12 }
 0x31c   :  { %1327 = vpow2.f32 %v535_v49 }
 0x31e   :  { %v758_v13 = vpop.permute.xlu2 %757 }
 0x31f   :  { %770 = vmatpush.bf16.msra.mxu2 %v758_v13 }
 0x321   :  { %v1326_v56 = vpop.eup %1325 }
 0x322   :  { %v824_v9 = vsel %vm287_vm0, %v1326_v56, 0.0  ;;  %v1328_v21 = vpop.eup %1327 }
 0x323   :  { %825 = vadd.xlane.f32.xlu2 %v824_v9 }
 0x329   :  { %v527_v16 = vpop.xlane.xlu1 %526 }
 0x32a   :  { %v531_v17 = vsub.f32 %v1663_v4, %v527_v16 }
 0x32c   :  { %v533_v18 = vmul.f32 1.442695, %v531_v17 }
 0x32e   :  { %1329 = vpow2.f32 %v533_v18 }
 0x331   :  { %v743_v19 = vpop.xlane.xlu1 %742 }
 0x332   :  { %v745_v1 = vsub.f32 %v1669_v10, %v743_v19 }
 0x334   :  { %v1330_v22 = vpop.eup %1329  ;;  %v748_v43 = vmul.f32 1.442695, %v745_v1 }
 0x335   :  { %v543_v25 = vpack.c.bf16 %v1328_v21, %v1330_v22  ;;  %v537_v45 = vsel %vm287_vm0, %v1330_v22, 0.0 }
 0x336   :  { %1331 = vpow2.f32 %v748_v43 }
 0x337   :  { %1181 = vmatmul.msk.bf16.vlgmr.msra.gmra.mxu0 %vm287_vm0, %v543_v25  ;;  %1333 = vpow2.f32 %v675_v47 }
 0x33c   :  { %v1332_v27 = vpop.eup %1331  ;;  %v811_v28 = vpop.xlane.xlu0 %810 }
 0x33d   :  { %v756_v0 = vpack.c.bf16 %v1332_v27, %v1322_v48  ;;  %v815_v4 = vsub.f32 %v1677_v14, %v811_v28  ;;  %v753_v31 = vsel %vm287_vm0, %v1332_v27, 0.0  ;;  %v1334_v30 = vpop.eup %1333  ;;  %v540_v48 = vsel %vm287_vm0, %v1328_v21, 0.0 }
 0x33e   :  { %754 = vadd.xlane.f32.xlu0 %v753_v31  ;;  %v685_v32 = vpack.c.bf16 %v1324_v3, %v1334_v30  ;;  %v679_v50 = vsel %vm287_vm0, %v1334_v30, 0.0 }
 0x33f   :  { %v817_v10 = vmul.f32 1.442695, %v815_v4  ;;  %1187 = vmatmul.msk.bf16.vlgmr.msra.gmra.mxu2 %vm287_vm0, %v756_v0 }
 0x341   :  { %1335 = vpow2.f32 %v817_v10 }
 0x346   :  { %325 = vadd.xlane.f32.xlu0 %v324_v52 }
 0x347   :  { %v1336_v24 = vpop.eup %1335  ;;  %1185 = vmatmul.msk.bf16.vlgmr.msrb.gmra.mxu0 %vm287_vm0, %v685_v32 }
 0x348   :  { %v821_v34 = vsel %vm287_vm0, %v1336_v24, 0.0  ;;  %v827_v35 = vpack.c.bf16 %v1326_v56, %v1336_v24 }
 0x349   :  { %v829_v14 = vpop.permute.xlu1 %828  ;;  %822 = vadd.xlane.f32.xlu1 %v821_v34 }
 0x34a   :  { %841 = vmatpush.bf16.msra.mxu0 %v829_v14 }
 0x357   :  { %1189 = vmatmul.msk.bf16.vlgmr.msra.gmra.mxu0 %vm287_vm0, %v827_v35  ;;  %v613_v53 = vpop.xlane.xlu2 %612 }
 0x35c   :  { %v471_v36 = vpop.xlane.xlu0 %470 }
 0x35d   :  { %1337 = vrcp.f32 %v471_v36 }
 0x363   :  { %v1338_v38 = vpop.eup %1337 }
 0x364   :  { %v610_v41 = vpop.xlane.xlu0 %609 }
 0x36c   :  { %v752_v46 = vpop.xlane.xlu2 %751 }
 0x36d   :  { %v488_v29 = vpop.f32.mrf.mxu2 }
 0x371   :  { %v417_v13 = vpop.f32.mrf.mxu0 }
 0x374   :  { %v468_v58 = vpop.xlane.xlu1 %467  ;;  %v396_v17 = vpop.xlane.xlu2 %395 }
 0x375   :  { %1339 = vrcp.f32 %v468_v58  ;;  %v490_v37 = vpop.f32.mrf.mxu2 }
 0x376   :  { %v496_v33 = vmul.f32 %v1338_v38, %v490_v37  ;;  %1341 = vrcp.f32 %v613_v53  ;;  %v1250_v53 = vld [vmem:[#allocation4 + $0x20] sm:$0xff] }
 0x377   :  { %1343 = vrcp.f32 %v610_v41 }
 0x379   :  { %v419_v56 = vpop.f32.mrf.mxu0 }
 0x37b   :  { %v1340_v8 = vpop.eup %1339 }
 0x37c   :  { %v495_v40 = vmul.f32 %v1340_v8, %v488_v29  ;;  %v1342_v57 = vpop.eup %1341  ;;  %v329_v21 = vpop.xlane.xlu1 %328 }
 0x37d   :  { %v1344_v61 = vpop.eup %1343 }
 0x37e   :  { %v1267_v42 = vpack.i.bf16 %v496_v33, %v495_v40 }
 0x380   :  { %1268 = vrot.lane.b32.xlu0 %v1267_v42, %s1437_s27 }
 0x385   :  { %v630_v39 = vpop.f32.mrf.mxu2 }
 0x386   :  { %v637_v62 = vmul.f32 %v1344_v61, %v630_v39  ;;  %v684_v28 = vpop.xlane.xlu1 %683  ;;  %v1252_v39 = vld [vmem:[#allocation4 + $0x30] sm:$0xff] }
 0x38d   :  { %v632_v51 = vpop.f32.mrf.mxu2 }
 0x38e   :  { %v638_v59 = vmul.f32 %v1342_v57, %v632_v51 }
 0x390   :  { %v1272_v2 = vpack.i.bf16 %v638_v59, %v637_v62 }
 0x396   :  { %v826_v31 = vpop.xlane.xlu2 %825 }
 0x3aa   :  { %398 = vadd.xlane.f32.xlu0 %v397_v44 }
 0x3b1   :  { %v755_v55 = vpop.xlane.xlu0 %754 }
 0x3b2   :  { %538 = vadd.xlane.f32.xlu0 %v537_v45  ;;  %1345 = vrcp.f32 %v755_v55  ;;  %v1253_v45 = vld [vmem:[#allocation4 + $0x38] sm:$0xff] }
 0x3b3   :  { %1347 = vrcp.f32 %v752_v46  ;;  %997 = vmatpush.bf16.msrb.mxu1 %v1253_v45 }
 0x3b4   :  { %v559_v9 = vpop.f32.mrf.mxu0  ;;  %1349 = vrcp.f32 %v396_v17 }
 0x3b7   :  { %998 = vmatpush.bf16.msrb.mxu1 %v1252_v39 }
 0x3b8   :  { %v1346_v5 = vpop.eup %1345 }
 0x3b9   :  { %v1348_v7 = vpop.eup %1347  ;;  %v326_v15 = vpop.xlane.xlu0 %325 }
 0x3ba   :  { %541 = vadd.xlane.f32.xlu0 %v540_v48  ;;  %v1350_v1 = vpop.eup %1349  ;;  %v1251_v48 = vld [vmem:[#allocation4 + $0x28] sm:$0xff] }
 0x3bb   :  { %v424_v26 = vmul.f32 %v1350_v1, %v417_v13  ;;  %999 = vmatpush.bf16.msrb.mxu1 %v1251_v48 }
 0x3bc   :  { %v561_v49 = vpop.f32.mrf.mxu0  ;;  %v823_v30 = vpop.xlane.xlu1 %822 }
 0x3bf   :  { %1000 = vmatpush.bf16.msrb.mxu1 %v1250_v53 }
 0x3c2   :  { %680 = vadd.xlane.f32.xlu0 %v679_v50  ;;  %v772_v54 = vpop.f32.mrf.mxu2 }
 0x3c3   :  { %v779_v11 = vmul.f32 %v1348_v7, %v772_v54  ;;  %v1247_v7 = vld [vmem:[#allocation4 + $0x8] sm:$0xff] }
 0x3c4   :  { %v701_v18 = vpop.f32.mrf.mxu0 }
 0x3ca   :  { %v774_v3 = vpop.f32.mrf.mxu2 }
 0x3cb   :  { %v780_v6 = vmul.f32 %v1346_v5, %v774_v3  ;;  %v1249_v3 = vld [vmem:[#allocation4 + $0x18] sm:$0xff] }
 0x3cc   :  { %v703_v43 = vpop.f32.mrf.mxu0  ;;  %1001 = vmatpush.bf16.msrb.mxu1 %v1249_v3 }
 0x3cd   :  { %v1292_v12 = vpack.i.bf16 %v780_v6, %v779_v11 }
 0x3d4   :  { %v843_v4 = vpop.f32.mrf.mxu0 }
 0x3d6   :  { %1273 = vrot.lane.b32.xlu0 %v1272_v2, %s1431_s20 }
 0x3dc   :  { %v845_v35 = vpop.f32.mrf.mxu0 }
 0x3de   :  { %1293 = vrot.lane.b32.xlu0 %v1292_v12, %s1433_s25 }
 0x3f2   :  { %v1729_v16 = vpop.permute.xlu0 %1268 }
 0x3f3   :  { %v1271_v59 = vunpack.i.h.bf16 %v1729_v16  ;;  %v1270_v61 = vunpack.i.l.bf16 %v1729_v16 }
 0x41d   :  { %v399_v19 = vpop.xlane.xlu0 %398 }
 0x41e   :  { %1351 = vrcp.f32 %v399_v19 }
 0x424   :  { %v1352_v22 = vpop.eup %1351 }
 0x425   :  { %v539_v25 = vpop.xlane.xlu0 %538  ;;  %v425_v47 = vmul.f32 %v1352_v22, %v419_v56 }
 0x426   :  { %1353 = vrcp.f32 %v539_v25 }
 0x427   :  { %v1277_v27 = vpack.i.bf16 %v425_v47, %v424_v26 }
 0x429   :  { %1278 = vrot.lane.b32.xlu2 %v1277_v27, %s1438_s28 }
 0x42c   :  { %v1354_v10 = vpop.eup %1353 }
 0x42d   :  { %v542_v0 = vpop.xlane.xlu0 %541  ;;  %v566_v24 = vmul.f32 %v1354_v10, %v559_v9 }
 0x42e   :  { %1355 = vrcp.f32 %v542_v0 }
 0x42f   :  { %1357 = vrcp.f32 %v684_v28 }
 0x430   :  { %1359 = vrcp.f32 %v826_v31 }
 0x431   :  { %1361 = vrcp.f32 %v823_v30 }
 0x434   :  { %v1356_v32 = vpop.eup %1355 }
 0x435   :  { %v681_v52 = vpop.xlane.xlu0 %680  ;;  %v567_v34 = vmul.f32 %v1356_v32, %v561_v49  ;;  %v1358_v29 = vpop.eup %1357 }
 0x436   :  { %1363 = vrcp.f32 %v681_v52  ;;  %v1360_v36 = vpop.eup %1359  ;;  %v709_v8 = vmul.f32 %v1358_v29, %v703_v43  ;;  %v1302_v52 = vld [vmem:[%s1764_s6] ss:$0 sm:$0xff] }
 0x437   :  { %v1282_v14 = vpack.i.bf16 %v567_v34, %v566_v24  ;;  %v1362_v58 = vpop.eup %1361  ;;  %v851_v37 = vmul.f32 %v1360_v36, %v845_v35  ;;  %1365 = vrcp.f32 %v329_v21 }
 0x438   :  { %v850_v40 = vmul.f32 %v1362_v58, %v843_v4  ;;  %1367 = vrcp.f32 %v326_v15  ;;  %v1439_v58 = vmov 128.0  }
 0x439   :  { %1283 = vrot.lane.b32.xlu1 %v1282_v14, %s1436_s1  ;;  %1369 = vrcp.f32 %v1439_v58 }
 0x43a   :  { %v1297_v42 = vpack.i.bf16 %v851_v37, %v850_v40 }
 0x43c   :  { %v1364_v38 = vpop.eup %1363 }
 0x43d   :  { %v708_v33 = vmul.f32 %v1364_v38, %v701_v18  ;;  %v1366_v50 = vpop.eup %1365 }
 0x43e   :  { %v1368_v51 = vpop.eup %1367  ;;  %v351_v41 = vmul.f32 %v1366_v50, %v1601_v23  ;;  %v1248_v23 = vld [vmem:[#allocation4 + $0x10] sm:$0xff] }
 0x43f   :  { %v1287_v44 = vpack.i.bf16 %v709_v8, %v708_v33  ;;  %v350_v55 = vmul.f32 %v1368_v51, %v1599_v20  ;;  %1002 = vmatpush.bf16.msrb.mxu1 %v1248_v23  ;;  %v1246_v20 = vld [vmem:[#allocation4] sm:$0xff]  ;;  %v1370_v37 = vpop.eup %1369 }
 0x440   :  { %v1018_v38 = vmul.f32 128.0, %v1370_v37  ;;  %vm1022_vm9 = vweird.f32 %v1370_v37 }
 0x441   :  { %1298 = vrot.lane.b32.xlu1 %v1297_v42, %s1434_s26  ;;  %1288 = vrot.lane.b32.xlu2 %v1287_v44, %s1435_s4 }
 0x442   :  { %v1019_v8 = vsub.f32 1.0, %v1018_v38 }
 0x443   :  { %1003 = vmatpush.bf16.msrb.mxu1 %v1247_v7  ;;  %v1303_v7 = vld [vmem:[%s1765_s7] ss:$0 sm:$0xff] }
 0x444   :  { %v1020_v40 = vmul.f32 %v1370_v37, %v1019_v8 }
 0x446   :  { %v1021_v33 = vadd.f32 %v1370_v37, %v1020_v40 }
 0x447   :  { %1004 = vmatpush.bf16.msrb.mxu1 %v1246_v20 }
 0x448   :  { %v1274_v11 = vpop.permute.xlu0 %1273  ;;  %v1023_v42 = vsel %vm1022_vm9, %v1370_v37, %v1021_v33 }
 0x449   :  { %v1276_v9 = vunpack.i.h.bf16 %v1274_v11  ;;  %v1275_v15 = vunpack.i.l.bf16 %v1274_v11 }
 0x450   :  { %v1294_v1 = vpop.permute.xlu0 %1293 }
 0x451   :  { %v1296_v26 = vunpack.i.h.bf16 %v1294_v1  ;;  %v1295_v47 = vunpack.i.l.bf16 %v1294_v1 }
 0x483   :  { %v1279_v54 = vpop.permute.xlu2 %1278 }
 0x484   :  { %v1281_v57 = vunpack.i.h.bf16 %v1279_v54  ;;  %v1280_v46 = vunpack.i.l.bf16 %v1279_v54 }
 0x486   :  { %v909_v62 = vsel %vm287_vm0, %v351_v41, %v1281_v57  ;;  %v908_v2 = vsel %vm287_vm0, %v350_v55, %v1280_v46 }
 0x487   :  { %v911_v5 = vsel %vm910_vm3, %v908_v2, %v1270_v61  ;;  %v912_v6 = vsel %vm910_vm3, %v909_v62, %v1271_v59 }
 0x49b   :  { %v1289_v49 = vpop.permute.xlu2 %1288 }
 0x49c   :  { %v1291_v21 = vunpack.i.h.bf16 %v1289_v49  ;;  %v1290_v22 = vunpack.i.l.bf16 %v1289_v49 }
 0x4ab   :  { %v1284_v12 = vpop.permute.xlu1 %1283 }
 0x4ac   :  { %v1286_v13 = vunpack.i.h.bf16 %v1284_v12  ;;  %v1285_v56 = vunpack.i.l.bf16 %v1284_v12  ;;  %v1304_v12 = vld [vmem:[%s1766_s8] ss:$0 sm:$0xff] }
 0x4ae   :  { %v914_v16 = vsel %vm913_vm4, %v911_v5, %v1285_v56  ;;  %v915_v17 = vsel %vm913_vm4, %v912_v6, %v1286_v13 }
 0x4af   :  { %v917_v18 = vsel %vm916_vm5, %v914_v16, %v1275_v15  ;;  %v918_v19 = vsel %vm916_vm5, %v915_v17, %v1276_v9 }
 0x4b0   :  { %v920_v43 = vsel %vm919_vm6, %v917_v18, %v1290_v22  ;;  %v921_v25 = vsel %vm919_vm6, %v918_v19, %v1291_v21 }
 0x4b1   :  { %v923_v4 = vsel %vm922_vm7, %v920_v43, %v1295_v47  ;;  %v924_v31 = vsel %vm922_vm7, %v921_v25, %v1296_v26 }
 0x4b3   :  { %v1299_v27 = vpop.permute.xlu1 %1298 }
 0x4b4   :  { %v1301_v28 = vunpack.i.h.bf16 %v1299_v27  ;;  %v1300_v0 = vunpack.i.l.bf16 %v1299_v27 }
 0x4b6   :  { %v926_v10 = vsel %vm925_vm8, %v923_v4, %v1300_v0  ;;  %v927_v30 = vsel %vm925_vm8, %v924_v31, %v1301_v28 }
 0x4b7   :  { %v928_v32 = vpack.c.bf16 %v927_v30, %v926_v10 }
 0x4b9   :  { %1005 = vmatmul.bf16.vlgmr.msrb.gmra.mxu1 %v928_v32 }
 0x536   :  { %v1006_v24 = vpop.f32.mrf.mxu1 }
 0x537   :  { %v1007_v34 = vadd.f32 %v1302_v52, %v1006_v24 }
 0x539   :  { %v1011_v14 = vadd.f32 %v1007_v34, %v1501_v60 }
 0x53b   :  { %1013 = vadd.xlane.f32.xlu2 %v1011_v14 }
 0x53e   :  { %v1008_v35 = vpop.f32.mrf.mxu1 }
 0x53f   :  { %v1009_v29 = vadd.f32 %v1302_v52, %v1008_v35 }
 0x541   :  { %v1012_v36 = vadd.f32 %v1009_v29, %v1506_v63 }
 0x543   :  { %1015 = vadd.xlane.f32.xlu0 %v1012_v36 }
 0x5ae   :  { %v1014_v44 = vpop.xlane.xlu2 %1013 }
 0x5af   :  { %v1024_v45 = vmul.f32 %v1023_v42, %v1014_v44 }
 0x5b1   :  { %v1026_v39 = vsub.f32 %v1011_v14, %v1024_v45 }
 0x5b3   :  { %v1028_v48 = vmul.f32 %v1026_v39, %v1026_v39 }
 0x5b5   :  { %1030 = vadd.xlane.f32.xlu1 %v1028_v48 }
 0x5b6   :  { %v1016_v60 = vpop.xlane.xlu0 %1015 }
 0x5b7   :  { %v1025_v50 = vmul.f32 %v1023_v42, %v1016_v60 }
 0x5b9   :  { %v1027_v51 = vsub.f32 %v1012_v36, %v1025_v50 }
 0x5bb   :  { %v1029_v53 = vmul.f32 %v1027_v51, %v1027_v51 }
 0x5bd   :  { %1032 = vadd.xlane.f32.xlu2 %v1029_v53 }
 0x628   :  { %v1031_v63 = vpop.xlane.xlu1 %1030 }
 0x629   :  { %v1034_v41 = vmul.f32 %v1031_v63, %v1023_v42 }
 0x62b   :  { %v1036_v54 = vadd.f32 1e-05, %v1034_v41 }
 0x62d   :  { %1371 = vrsqrt.f32 %v1036_v54  ;;  %vm1044_vm11 = vweird.f32 %v1036_v54 }
 0x630   :  { %v1033_v55 = vpop.xlane.xlu2 %1032 }
 0x631   :  { %v1035_v57 = vmul.f32 %v1033_v55, %v1023_v42 }
 0x633   :  { %v1372_v46 = vpop.eup %1371  ;;  %v1037_v59 = vadd.f32 1e-05, %v1035_v57 }
 0x634   :  { %v1039_v61 = vmul.f32 %v1372_v46, %v1036_v54  ;;  %vm1045_vm10 = vweird.f32 %v1372_v46 }
 0x635   :  { %1373 = vrsqrt.f32 %v1037_v59  ;;  %vm1046_vm12 = vmor %vm1044_vm11, %vm1045_vm10  ;;  %vm1054_vm14 = vweird.f32 %v1037_v59 }
 0x636   :  { %v1040_v62 = vmul.f32 %v1372_v46, %v1039_v61 }
 0x638   :  { %v1041_v2 = vmul.f32 0.5, %v1040_v62 }
 0x63a   :  { %v1042_v3 = vsub.f32 1.5, %v1041_v2 }
 0x63b   :  { %v1374_v5 = vpop.eup %1373 }
 0x63c   :  { %v1043_v6 = vmul.f32 %v1372_v46, %v1042_v3  ;;  %v1049_v23 = vmul.f32 %v1374_v5, %v1037_v59  ;;  %vm1055_vm13 = vweird.f32 %v1374_v5 }
 0x63d   :  { %vm1056_vm15 = vmor %vm1054_vm14, %vm1055_vm13 }
 0x63e   :  { %v1047_v20 = vsel %vm1046_vm12, %v1372_v46, %v1043_v6  ;;  %v1050_v11 = vmul.f32 %v1374_v5, %v1049_v23 }
 0x63f   :  { %v1058_v13 = vmul.f32 %v1047_v20, %v1026_v39 }
 0x640   :  { %v1051_v56 = vmul.f32 0.5, %v1050_v11 }
 0x641   :  { %v1063_v9 = vmul.f32 %v1303_v7, %v1058_v13 }
 0x642   :  { %v1052_v15 = vsub.f32 1.5, %v1051_v56 }
 0x643   :  { %v1068_v49 = vadd.f32 %v1304_v12, %v1063_v9 }
 0x644   :  { %v1053_v16 = vmul.f32 %v1374_v5, %v1052_v15 }
 0x645   :  { %1070 = vst [vmem:[%s1767_s9] sm:$0xff] %v1068_v49 }
 0x646   :  { %v1057_v17 = vsel %vm1056_vm15, %v1374_v5, %v1053_v16 }
 0x647   :  { %v1059_v18 = vmul.f32 %v1057_v17, %v1027_v51 }
 0x649   :  { %v1064_v19 = vmul.f32 %v1303_v7, %v1059_v18 }
 0x64b   :  { %v1069_v1 = vadd.f32 %v1304_v12, %v1064_v19 }
 0x64d   :  { %1071 = vst [vmem:[%s1767_s9 + $0x8] sm:$0xff] %v1069_v1 }
 0x64e   :  { %1076 = vsyncpa [#allocation3], 1 }
 0x64f   :  { %1077 = vsyncpa [#allocation5], 1 }

// kernel: generator_forward.27
= control target key start
LH: loop header
LB: loop body
LE: loop exit
PB: predicated region body
PF: predicated region fallthrough
CT: control target
= control target key end

     0   :  { %8 = vsyncpa [#allocation3], 0  ;;  %s822_s0 = inlined_call_operand.vmem [shape: f32[16,128], index: 0, kind: input, shape index: {}]   ;;  %s823_s1 = inlined_call_operand.hbm [shape: bf16[128,512], index: 1, kind: input, shape index: {}]   ;;  %s824_s2 = inlined_call_operand.vmem [shape: f32[1,512], index: 2, kind: input, shape index: {}]   ;;  %s825_s3 = inlined_call_operand.vmem [shape: f32[16,512], index: 3, kind: output, shape index: {}]  }
   0x1   :  { %10 = vsyncpa [#allocation3 + $0x1], 0  ;;  %s677_s12 = smov 0   ;;  %s679_s13 = smov 0  }
   0x2   :  { %s681_s14 = smov 0   ;;  %s683_s15 = smov 0  }
   0x3 LB: > { %s696_s16 = sadd.s32 4294967295, %s652_s15   ;;  %s699_s17 = sadd.s32 1, %s652_s15   ;;  %s652_s15 = sphi %s683_s15, %s833_s15   ;;  %s648_s14 = sphi %s681_s14, %s832_s14   ;;  %s644_s13 = sphi %s679_s13, %s831_s13   ;;  %s640_s12 = sphi %s677_s12, %s830_s12  }
   0x4   : > { %s41_s18 = ssub.s32 %s652_s15, %s699_s17  ;;  %s44_s19 = sadd.s32 1, %s648_s14 }
   0x5   : > { %p42_p0 = scmp.eq.s32.totalorder %s41_s18, 0  ;;  %p51_p1 = scmp.ne.s32.totalorder %s648_s14, %s644_s13 }
   0x6   : > { %p52_p2 = scmp.eq.s32.totalorder %s652_s15, 0  ;;  %p57_p3 = scmp.ne.s32.totalorder %s644_s13, %s640_s12 }
   0x7   : > { %s709_s20 = scalar_select %p42_p0, %s648_s14, %s44_s19  }
   0x8   : > { %p711_p4 = por %p52_p2, %p51_p1  ;;  %p58_p5 = scmp.eq.s32.totalorder %s696_s16, 0 }
   0x9   : > { %p107_p6 = scmp.eq.s32.totalorder %s696_s16, 1  ;;  %p552_p8 = scmp.lt.s32.totalorder %s652_s15, 2 }
   0xa   : > { %p717_p7 = por %p58_p5, %p57_p3  ;;  %s136_s24 = sand.u32 1, %s648_s14  }
   0xb   : > { %p722_p9 = por %p107_p6, %p51_p1  ;;  %s452_s25 = sshll.u32 %s136_s24, 7 }
   0xc   : > { %s528_s26 = sshll.u32 %s652_s15, 3  ;;  %s140_s30 = scalar_lea.vmem [#allocation2], %s452_s25 }
   0xd   : > { %s145_s29 = scalar_lea.hbm %s823_s1, %s528_s26  ;;  %s148_s4 = sshll.u32 %s140_s30, 4  ;;  %s149_s4 = int_to_ptr.vmem [resolvable:$true] %s148_s4 }
   0xe   : > { %s146_s5 = sshll.u32 %s145_s29, 4  ;;  %p733_p10 = pnand %p552_p8, %p711_p4  ;;  %s147_s5 = int_to_ptr.hbm [resolvable:$true] %s146_s5 }
   0xf   : > { %s137_s7 = scalar_lea.sflag [#allocation3], %s136_s24  ;;  %s588_s8 = sshra.s32 %s147_s5, 4  ;;  %s589_s8 = int_to_ptr.hbm [resolvable:$true] %s588_s8 }
  0x10   : > { %s590_s9 = scalar_lea.hbm %s589_s8, 128  ;;  %p592_p12 = pneg %p733_p10 }
  0x11   : > { %p591_p11 = scmp.ne.s32.totalorder %s589_s8, %s590_s9  ;;  %s595_s12 = scalar_lea.hbm %s823_s1, 256 }
  0x12   : > { %p596_p1 = scmp.lt.s32.totalorder %s589_s8, %s823_s1  ;;  %p597_p2 = scmp.lt.s32.totalorder %s595_s12, %s590_s9 }
  0x13   : > { %p593_p13 = pnand %p592_p12, %p591_p11 }
  0x14   : > { %p598_p3 = por %p597_p2, %p596_p1 }
  0x15   : > { %p594_p0 = pneg %p593_p13 }
  0x17   : > { %p599_p4 = pnand %p598_p3, %p594_p0 }
  0x19   : > { %602 = shalt.err (!%p599_p4)
}
  0x1a   : > { %s654_s21 = smov 256   ;;  %s655_s24 = smov 128  }
  0x1b   : > { %s656_s25 = smov 8   ;;  %p455_p5 = scmp.ge.s32.totalorder %s652_s15, 1 }
  0x1c   : > { %551 = dma.hbm_to_vmem [thread:$0]  (!%p733_p10), %s147_s5, 2048, %s149_s4, %s137_s7, %s654_s21, %s655_s24, %s656_s25  }
  0x1d   : > { %p164_p6 = scmp.lt.s32.totalorder %s652_s15, 3 }
  0x1f   : > { %p165_p8 = pnand %p455_p5, %p164_p6 }
  0x20   : > { %s750_s26 = sand.u32 (!%p165_p8), 1, %s644_s13  }
  0x21   : > { %168 = sbr.rel (%p165_p8) target bundleno = 219 (0xdb), region = 32  ;;  %s456_s27 = sshll.u32 (!%p165_p8), %s750_s26, 7 }
  0x22   : > { %s171_s28 = scalar_lea.sflag (!%p165_p8), [#allocation3], %s750_s26  ;;  %s754_s29 = scalar_lea.vmem (!%p165_p8), [#allocation2], %s456_s27 }
  0x26   : > { %635 = dma.done.wait (%p717_p7), %s171_s28, 2048  }
  0x27   : > { %637 = vsyncadd (%p717_p7), %s171_s28, 4294965248  ;;  %v517_v0 = vld [vmem:[%s754_s29 + $0x70] sm:$0xf]  ;;  %v544_v1 = vld [vmem:[%s754_s29 + $0x74] sm:$0xf0]  ;;  %s458_s5 = sshll.u32 %s696_s16, 1 }
  0x28   : > { %v543_v2 = vld [vmem:[%s754_s29 + $0x74] sm:$0xf]  ;;  %v518_v3 = vor.u32 %v544_v1, %v517_v0  ;;  %v519_v4 = vld [vmem:[%s754_s29 + $0x78] sm:$0xf0]  ;;  %v509_v5 = vld [vmem:[%s754_s29 + $0x60] sm:$0xf] }
  0x29   : > { %v542_v6 = vld [vmem:[%s754_s29 + $0x64] sm:$0xf0]  ;;  %v522_v7 = vor.u32 %v543_v2, %v519_v4  ;;  %v541_v8 = vld [vmem:[%s754_s29 + $0x64] sm:$0xf]  ;;  %v511_v9 = vld [vmem:[%s754_s29 + $0x68] sm:$0xf0] }
  0x2a   : > { %313 = vmatpush.bf16.msra.mxu0 %v518_v3  ;;  %v510_v10 = vor.u32 %v542_v6, %v509_v5  ;;  %v514_v11 = vor.u32 %v541_v8, %v511_v9  ;;  %v501_v12 = vld [vmem:[%s754_s29 + $0x50] sm:$0xf]  ;;  %v540_v13 = vld [vmem:[%s754_s29 + $0x54] sm:$0xf0]  ;;  %v539_v14 = vld [vmem:[%s754_s29 + $0x54] sm:$0xf] }
  0x2b   : > { %327 = vmatpush.bf16.msra.mxu1 %v522_v7  ;;  %v503_v15 = vld [vmem:[%s754_s29 + $0x58] sm:$0xf0]  ;;  %v502_v16 = vor.u32 %v540_v13, %v501_v12  ;;  %v493_v18 = vld [vmem:[%s754_s29 + $0x40] sm:$0xf]  ;;  %v538_v19 = vld [vmem:[%s754_s29 + $0x44] sm:$0xf0] }
  0x2c   : > { %v506_v17 = vor.u32 %v539_v14, %v503_v15  ;;  %v537_v20 = vld [vmem:[%s754_s29 + $0x44] sm:$0xf]  ;;  %v495_v21 = vld [vmem:[%s754_s29 + $0x48] sm:$0xf0]  ;;  %v494_v22 = vor.u32 %v538_v19, %v493_v18  ;;  %v485_v24 = vld [vmem:[%s754_s29 + $0x30] sm:$0xf] }
  0x2d   : > { %v498_v23 = vor.u32 %v537_v20, %v495_v21  ;;  %v536_v25 = vld [vmem:[%s754_s29 + $0x34] sm:$0xf0]  ;;  %v535_v26 = vld [vmem:[%s754_s29 + $0x34] sm:$0xf]  ;;  %v487_v27 = vld [vmem:[%s754_s29 + $0x38] sm:$0xf0] }
  0x2e   : > { %314 = vmatpush.bf16.msra.mxu0 %v510_v10  ;;  %v486_v28 = vor.u32 %v536_v25, %v485_v24  ;;  %v490_v29 = vor.u32 %v535_v26, %v487_v27  ;;  %v477_v30 = vld [vmem:[%s754_s29 + $0x20] sm:$0xf]  ;;  %v534_v31 = vld [vmem:[%s754_s29 + $0x24] sm:$0xf0]  ;;  %v533_v32 = vld [vmem:[%s754_s29 + $0x24] sm:$0xf] }
  0x2f   : > { %328 = vmatpush.bf16.msra.mxu1 %v514_v11  ;;  %v479_v33 = vld [vmem:[%s754_s29 + $0x28] sm:$0xf0]  ;;  %v478_v34 = vor.u32 %v534_v31, %v477_v30  ;;  %v469_v36 = vld [vmem:[%s754_s29 + $0x10] sm:$0xf]  ;;  %v532_v37 = vld [vmem:[%s754_s29 + $0x14] sm:$0xf0] }
  0x30   : > { %v482_v35 = vor.u32 %v533_v32, %v479_v33  ;;  %v531_v38 = vld [vmem:[%s754_s29 + $0x14] sm:$0xf]  ;;  %v471_v39 = vld [vmem:[%s754_s29 + $0x18] sm:$0xf0]  ;;  %v470_v40 = vor.u32 %v532_v37, %v469_v36  ;;  %v461_v42 = vld [vmem:[%s754_s29] sm:$0xf] }
  0x31   : > { %v474_v41 = vor.u32 %v531_v38, %v471_v39  ;;  %v530_v43 = vld [vmem:[%s754_s29 + $0x4] sm:$0xf0]  ;;  %v529_v44 = vld [vmem:[%s754_s29 + $0x4] sm:$0xf]  ;;  %v463_v45 = vld [vmem:[%s754_s29 + $0x8] sm:$0xf0] }
  0x32   : > { %315 = vmatpush.bf16.msra.mxu0 %v502_v16  ;;  %v462_v46 = vor.u32 %v530_v43, %v461_v42  ;;  %v208_v47 = vld [vmem:[%s822_s0] sm:$0xff]  ;;  %v209_v48 = vld [vmem:[%s822_s0 + $0x8] sm:$0xff]  ;;  %v466_v49 = vor.u32 %v529_v44, %v463_v45  ;;  %p203_p7 = scmp.lt.s32.totalorder %s458_s5, 3  ;;  %s457_s9 = sshll.u32 %s750_s26, 5 }
  0x33   : > { %329 = vmatpush.bf16.msra.mxu1 %v506_v17  ;;  %v210_v50 = vpack.c.bf16 %v209_v48, %v208_v47  ;;  %s200_s10 = scalar_lea.vmem [#allocation4], %s457_s9  ;;  %s545_s11 = sshll.u32 (%p722_p9), %s696_s16, 4 }
  0x34   : > { %s835_s5 = smov (!%p203_p7, %s458_s5), 3  ;;  %s354_s19 = scalar_lea.vmem (%p722_p9), %s825_s3, %s545_s11 }
  0x35   : > { %s205_s8 = scalar_lea.vmem %s824_s2, %s835_s5 }
  0x36   : > { %316 = vmatpush.bf16.msra.mxu0 %v494_v22  ;;  %v227_v51 = vld [vmem:[%s205_s8] sm:$0x3] }
  0x37   : > { %330 = vmatpush.bf16.msra.mxu1 %v498_v23  ;;  %v229_v52 = vperm.slane %v227_v51, 0  ;;  %v230_v53 = vperm.slane %v227_v51, 1 }
  0x3a   : > { %317 = vmatpush.bf16.msra.mxu0 %v486_v28 }
  0x3b   : > { %331 = vmatpush.bf16.msra.mxu1 %v490_v29 }
  0x3e   : > { %318 = vmatpush.bf16.msra.mxu0 %v478_v34 }
  0x3f   : > { %332 = vmatpush.bf16.msra.mxu1 %v482_v35 }
  0x42   : > { %319 = vmatpush.bf16.msra.mxu0 %v470_v40 }
  0x43   : > { %333 = vmatpush.bf16.msra.mxu1 %v474_v41 }
  0x46   : > { %320 = vmatpush.bf16.msra.mxu0 %v462_v46 }
  0x47   : > { %334 = vmatpush.bf16.msra.mxu1 %v466_v49 }
  0x49   : > { %321 = vmatmul.bf16.vlgmr.msra.gmra.mxu0 %v210_v50 }
  0x4a   : > { %335 = vmatmul.bf16.vlgmr.msra.gmra.mxu1 %v210_v50 }
  0xc6   : > { %v322_v54 = vpop.f32.mrf.mxu0 }
  0xc7   : > { %v323_v55 = vadd.f32 %v322_v54, %v229_v52  ;;  %v336_v56 = vpop.f32.mrf.mxu1 }
  0xc8   : > { %v337_v57 = vadd.f32 %v336_v56, %v230_v53 }
  0xc9   : > { %341 = vst [vmem:[%s200_s10] sm:$0xff] %v323_v55 }
  0xca   : > { %342 = vst [vmem:[%s200_s10 + $0x8] sm:$0xff] %v337_v57 }
  0xce   : > { %v324_v58 = vpop.f32.mrf.mxu0  ;;  %351 = sbr.rel (!%p722_p9) target bundleno = 219 (0xdb), region = 40 }
  0xcf   : > { %v325_v59 = vadd.f32 %v324_v58, %v229_v52  ;;  %v338_v60 = vpop.f32.mrf.mxu1 }
  0xd0   : > { %v339_v61 = vadd.f32 %v338_v60, %v230_v53  ;;  %v367_v62 = vld [vmem:[%s200_s10] sm:$0xff] (%p722_p9) }
  0xd1   : > { %343 = vst [vmem:[%s200_s10 + $0x10] sm:$0xff] %v325_v59  ;;  %v369_v63 = vld [vmem:[%s200_s10 + $0x8] sm:$0xff] (%p722_p9) }
  0xd2   : > { %344 = vst [vmem:[%s200_s10 + $0x18] sm:$0xff] %v339_v61 }
  0xd3   : > { %368 = vst [vmem:[%s354_s19] sm:$0xff] %v367_v62 }
  0xd4   : > { %370 = vst [vmem:[%s354_s19 + $0x8] sm:$0xff] %v369_v63 }
  0xd8   : > { %v371_v0 = vld [vmem:[%s200_s10 + $0x10] sm:$0xff] }
  0xd9   : > { %v373_v1 = vld [vmem:[%s200_s10 + $0x18] sm:$0xff]  ;;  %372 = vst [vmem:[%s354_s19 + $0x20] sm:$0xff] %v371_v0 }
  0xda   : > { %374 = vst [vmem:[%s354_s19 + $0x28] sm:$0xff] %v373_v1 }
  0xdb PF: > { %p13_p9 = scmp.ge.s32.totalorder %s699_s17, 4   ;;  %s830_s12 = smov %s644_s13 }
  0xdc   : > { %s831_s13 = smov %s648_s14  ;;  %s832_s14 = smov %s709_s20 }
  0xdd   : > { %s833_s15 = smov %s699_s17  ;;  %15 = sbr.rel (!%p13_p9) target bundleno = 3 (0x3), region = 98 }
  0xe2   :  { %390 = vsyncpa [#allocation3], 1 }
  0xe3   :  { %392 = vsyncpa [#allocation3 + $0x1], 1 }

// kernel: generator_forward.25
= control target key start
LH: loop header
LB: loop body
LE: loop exit
PB: predicated region body
PF: predicated region fallthrough
CT: control target
= control target key end

     0   :  { %14 = vsyncpa [#allocation3], 0  ;;  %s1773_s0 = inlined_call_operand.vmem [shape: f32[16,128], index: 0, kind: input, shape index: {}]   ;;  %s1774_s1 = inlined_call_operand.vmem [shape: f32[16,128], index: 1, kind: input, shape index: {}]   ;;  %s1775_s2 = inlined_call_operand.vmem [shape: s32[16,16], index: 2, kind: input, shape index: {}]   ;;  %s1776_s3 = inlined_call_operand.hbm [shape: bf16[128,384], index: 3, kind: input, shape index: {}]   ;;  %s1777_s4 = inlined_call_operand.vmem [shape: f32[1,384], index: 4, kind: input, shape index: {}]   ;;  %s1778_s5 = inlined_call_operand.hbm [shape: bf16[128,128], index: 5, kind: input, shape index: {}]   ;;  %s1779_s6 = inlined_call_operand.vmem [shape: f32[1,128], index: 6, kind: input, shape index: {}]   ;;  %s1780_s7 = inlined_call_operand.vmem [shape: f32[1,128], index: 7, kind: input, shape index: {}]   ;;  %s1781_s8 = inlined_call_operand.vmem [shape: f32[1,128], index: 8, kind: input, shape index: {}]   ;;  %s1782_s9 = inlined_call_operand.vmem [shape: f32[16,128], index: 9, kind: output, shape index: {}]  }
   0x1   :  { %s26_s11 = sshll.u32 %s1776_s3, 4  ;;  %s27_s11 = int_to_ptr.hbm [resolvable:$true] %s26_s11 }
   0x2   :  { %15 = vsyncpa [#allocation5], 0  ;;  %s1433_s12 = smov [#allocation2]   ;;  %s41_s16 = sshll.u32 %s1778_s5, 4  ;;  %s42_s16 = int_to_ptr.hbm [resolvable:$true] %s41_s16 }
   0x3   :  { %s28_s13 = sshll.u32 %s1433_s12, 4  ;;  %s1434_s17 = smov 192   ;;  %s29_s13 = int_to_ptr.vmem [resolvable:$true] %s28_s13 }
   0x4   :  { %s1435_s18 = smov 12   ;;  %s1436_s19 = smov [#allocation4]  }
   0x5   :  { %34 = dma.hbm_to_vmem [thread:$0]  %s27_s11, 3072, %s29_s13, [#allocation3], %s1434_s17, %s1434_s17, %s1435_s18  }
   0x6   :  { %s43_s20 = sshll.u32 %s1436_s19, 4  ;;  %s1437_s21 = smov 64   ;;  %s44_s20 = int_to_ptr.vmem [resolvable:$true] %s43_s20 }
   0x7   :  { %s1438_s22 = smov 4  }
   0x8   :  { %49 = dma.hbm_to_vmem [thread:$0]  %s42_s16, 1024, %s44_s20, [#allocation5], %s1437_s21, %s1437_s21, %s1438_s22  }
   0x9   :  { %1429 = dma.done.wait [#allocation3], 3072  }
   0xa   :  { %1430 = vsyncadd [#allocation3], 4294964224 }
   0xb   :  { %1431 = dma.done.wait [#allocation5], 1024  }
   0xc   :  { %1432 = vsyncadd [#allocation5], 4294966272  ;;  %v1113_v0 = vld [vmem:[#allocation2 + $0xa8] sm:$0xf]  ;;  %v1234_v1 = vld [vmem:[#allocation2 + $0xb0] sm:$0xf0] }
   0xd   :  { %v1173_v2 = vld [vmem:[#allocation2 + $0xac] sm:$0xf]  ;;  %v1114_v3 = vor.u32 %v1234_v1, %v1113_v0  ;;  %v1250_v4 = vld [vmem:[#allocation2 + $0xb4] sm:$0xf0]  ;;  %v1109_v5 = vld [vmem:[#allocation2 + $0x90] sm:$0xf] }
   0xe   :  { %v1233_v6 = vld [vmem:[#allocation2 + $0x98] sm:$0xf0]  ;;  %v1174_v7 = vor.u32 %v1250_v4, %v1173_v2  ;;  %v1165_v8 = vld [vmem:[#allocation2 + $0x94] sm:$0xf]  ;;  %v1248_v9 = vld [vmem:[#allocation2 + $0x9c] sm:$0xf0] }
   0xf   :  { %140 = vmatpush.bf16.msra.mxu0 %v1114_v3  ;;  %v1110_v10 = vor.u32 %v1233_v6, %v1109_v5  ;;  %v1166_v11 = vor.u32 %v1248_v9, %v1165_v8  ;;  %v1105_v12 = vld [vmem:[#allocation2 + $0x78] sm:$0xf]  ;;  %v1232_v13 = vld [vmem:[#allocation2 + $0x80] sm:$0xf0]  ;;  %v1157_v14 = vld [vmem:[#allocation2 + $0x7c] sm:$0xf] }
  0x10   :  { %257 = vmatpush.bf16.msra.mxu1 %v1174_v7  ;;  %v1246_v15 = vld [vmem:[#allocation2 + $0x84] sm:$0xf0]  ;;  %v1106_v16 = vor.u32 %v1232_v13, %v1105_v12  ;;  %v1101_v18 = vld [vmem:[#allocation2 + $0x60] sm:$0xf]  ;;  %v1231_v19 = vld [vmem:[#allocation2 + $0x68] sm:$0xf0] }
  0x11   :  { %v1158_v17 = vor.u32 %v1246_v15, %v1157_v14  ;;  %v1149_v20 = vld [vmem:[#allocation2 + $0x64] sm:$0xf]  ;;  %v1244_v21 = vld [vmem:[#allocation2 + $0x6c] sm:$0xf0]  ;;  %v1102_v22 = vor.u32 %v1231_v19, %v1101_v18  ;;  %v1097_v23 = vld [vmem:[#allocation2 + $0x48] sm:$0xf] }
  0x12   :  { %v1230_v24 = vld [vmem:[#allocation2 + $0x50] sm:$0xf0]  ;;  %v1150_v25 = vor.u32 %v1244_v21, %v1149_v20  ;;  %v1249_v26 = vld [vmem:[#allocation2 + $0xb0] sm:$0xf]  ;;  %v1175_v27 = vld [vmem:[#allocation2 + $0xb8] sm:$0xf0] }
  0x13   :  { %141 = vmatpush.bf16.msra.mxu0 %v1110_v10  ;;  %v1247_v28 = vld [vmem:[#allocation2 + $0x98] sm:$0xf]  ;;  %v1141_v29 = vld [vmem:[#allocation2 + $0x4c] sm:$0xf]  ;;  %v1178_v31 = vor.u32 %v1249_v26, %v1175_v27  ;;  %v1167_v32 = vld [vmem:[#allocation2 + $0xa0] sm:$0xf0]  ;;  %v1098_v33 = vor.u32 %v1230_v24, %v1097_v23 }
  0x14   :  { %258 = vmatpush.bf16.msra.mxu1 %v1166_v11  ;;  %v1242_v30 = vld [vmem:[#allocation2 + $0x54] sm:$0xf0]  ;;  %v1093_v34 = vld [vmem:[#allocation2 + $0x30] sm:$0xf]  ;;  %v1170_v35 = vor.u32 %v1247_v28, %v1167_v32  ;;  %v1229_v37 = vld [vmem:[#allocation2 + $0x38] sm:$0xf0] }
  0x15   :  { %271 = vmatpush.bf16.msra.mxu2 %v1178_v31  ;;  %v1142_v36 = vor.u32 %v1242_v30, %v1141_v29  ;;  %v1245_v38 = vld [vmem:[#allocation2 + $0x80] sm:$0xf]  ;;  %v1159_v39 = vld [vmem:[#allocation2 + $0x88] sm:$0xf0]  ;;  %v1133_v40 = vld [vmem:[#allocation2 + $0x34] sm:$0xf]  ;;  %v1094_v42 = vor.u32 %v1229_v37, %v1093_v34 }
  0x16   :  { %v1240_v41 = vld [vmem:[#allocation2 + $0x3c] sm:$0xf0]  ;;  %v1089_v43 = vld [vmem:[#allocation2 + $0x18] sm:$0xf]  ;;  %v1162_v44 = vor.u32 %v1245_v38, %v1159_v39  ;;  %v1228_v46 = vld [vmem:[#allocation2 + $0x20] sm:$0xf0] }
  0x17   :  { %142 = vmatpush.bf16.msra.mxu0 %v1106_v16  ;;  %v1134_v45 = vor.u32 %v1240_v41, %v1133_v40  ;;  %v1243_v47 = vld [vmem:[#allocation2 + $0x68] sm:$0xf]  ;;  %v1151_v48 = vld [vmem:[#allocation2 + $0x70] sm:$0xf0]  ;;  %v1125_v49 = vld [vmem:[#allocation2 + $0x1c] sm:$0xf]  ;;  %v1090_v51 = vor.u32 %v1228_v46, %v1089_v43 }
  0x18   :  { %259 = vmatpush.bf16.msra.mxu1 %v1158_v17  ;;  %v1238_v50 = vld [vmem:[#allocation2 + $0x24] sm:$0xf0]  ;;  %v1085_v52 = vld [vmem:[#allocation2] sm:$0xf]  ;;  %v1154_v53 = vor.u32 %v1243_v47, %v1151_v48  ;;  %v1227_v55 = vld [vmem:[#allocation2 + $0x8] sm:$0xf0] }
  0x19   :  { %272 = vmatpush.bf16.msra.mxu2 %v1170_v35  ;;  %v1126_v54 = vor.u32 %v1238_v50, %v1125_v49  ;;  %v1241_v56 = vld [vmem:[#allocation2 + $0x50] sm:$0xf]  ;;  %v1143_v57 = vld [vmem:[#allocation2 + $0x58] sm:$0xf0]  ;;  %v1117_v58 = vld [vmem:[#allocation2 + $0x4] sm:$0xf]  ;;  %v1086_v60 = vor.u32 %v1227_v55, %v1085_v52 }
  0x1a   :  { %v1236_v59 = vld [vmem:[#allocation2 + $0xc] sm:$0xf0]  ;;  %v1507_v61 = vld [vmem:[%s1773_s0] sm:$0xff]  ;;  %v1512_v62 = vld [vmem:[%s1773_s0 + $0x8] sm:$0xff]  ;;  %v1146_v0 = vor.u32 %v1241_v56, %v1143_v57  ;;  %vm292_vm0 = vcmask 130048   ;;  %s1439_s10 = smov 96  }
  0x1b   :  { %143 = vmatpush.bf16.msra.mxu0 %v1102_v22  ;;  %v69_v63 = vld [vmem:[%s1774_s1] sm:$0xff]  ;;  %v1118_v1 = vor.u32 %v1236_v59, %v1117_v58  ;;  %v70_v2 = vld [vmem:[%s1774_s1 + $0x8] sm:$0xff]  ;;  %v1239_v3 = vld [vmem:[#allocation2 + $0x38] sm:$0xf]  ;;  %v71_v5 = vpack.c.bf16 %v1512_v62, %v1507_v61  ;;  %s1440_s11 = smov 112   ;;  %s1441_s12 = smov 80  }
  0x1c   :  { %260 = vmatpush.bf16.msra.mxu1 %v1150_v25  ;;  %v1135_v4 = vld [vmem:[#allocation2 + $0x40] sm:$0xf0]  ;;  %v154_v6 = vpack.c.bf16 %v70_v2, %v69_v63  ;;  %v1237_v8 = vld [vmem:[#allocation2 + $0x20] sm:$0xf]  ;;  %v1127_v9 = vld [vmem:[#allocation2 + $0x28] sm:$0xf0] }
  0x1d   :  { %273 = vmatpush.bf16.msra.mxu2 %v1162_v44  ;;  %v1138_v7 = vor.u32 %v1239_v3, %v1135_v4  ;;  %v1130_v10 = vor.u32 %v1237_v8, %v1127_v9  ;;  %v1235_v11 = vld [vmem:[#allocation2 + $0x8] sm:$0xf]  ;;  %v1119_v12 = vld [vmem:[#allocation2 + $0x10] sm:$0xf0]  ;;  %v171_v16 = vld [vmem:[%s1777_s4 + $0x1] sm:$0x3] }
  0x1e   :  { %v1122_v13 = vor.u32 %v1235_v11, %v1119_v12  ;;  %v173_v17 = vperm.slane %v171_v16, 0  ;;  %v1307_v21 = vld [vmem:[%s1777_s4] ss:$0 sm:$0xff]  ;;  %s1442_s4 = smov 48   ;;  %s1443_s13 = smov 32   ;;  %v174_v29 = vperm.slane %v171_v16, 1 }
  0x1f   :  { %144 = vmatpush.bf16.msra.mxu0 %v1098_v33  ;;  %s1444_s14 = smov 16   ;;  %v1568_v46 = vld [vmem:[%s1775_s2] sm:$0xff]  ;;  %v1577_v52 = vld [vmem:[%s1775_s2 + $0x8] sm:$0xff]  ;;  %vm915_vm3 = vcmask 261120   ;;  %vm918_vm4 = vcmask 392192   ;;  %vm921_vm5 = vcmask 523264  }
  0x20   :  { %261 = vmatpush.bf16.msra.mxu1 %v1142_v36  ;;  %vm287_vm1 = vcmp.ne.s32.totalorder %v1568_v46, 0  ;;  %vm288_vm2 = vcmp.ne.s32.totalorder %v1577_v52, 0  ;;  %vm924_vm6 = vcmask 654336   ;;  %vm927_vm7 = vcmask 785408  }
  0x21   :  { %274 = vmatpush.bf16.msra.mxu2 %v1154_v53  ;;  %vm930_vm8 = vcmask 916480  }
  0x23   :  { %145 = vmatpush.bf16.msra.mxu0 %v1094_v42 }
  0x24   :  { %262 = vmatpush.bf16.msra.mxu1 %v1134_v45 }
  0x25   :  { %275 = vmatpush.bf16.msra.mxu2 %v1146_v0 }
  0x27   :  { %146 = vmatpush.bf16.msra.mxu0 %v1090_v51 }
  0x28   :  { %263 = vmatpush.bf16.msra.mxu1 %v1126_v54 }
  0x29   :  { %276 = vmatpush.bf16.msra.mxu2 %v1138_v7 }
  0x2b   :  { %147 = vmatpush.bf16.msra.mxu0 %v1086_v60 }
  0x2c   :  { %264 = vmatpush.bf16.msra.mxu1 %v1118_v1 }
  0x2d   :  { %277 = vmatpush.bf16.msra.mxu2 %v1130_v10 }
  0x2e   :  { %148 = vmatmul.bf16.vlgmr.msra.gmra.mxu0 %v71_v5 }
  0x2f   :  { %265 = vmatmul.bf16.vlgmr.msra.gmra.mxu1 %v154_v6 }
  0x31   :  { %278 = vmatpush.bf16.msra.mxu2 %v1122_v13 }
  0x34   :  { %279 = vmatmul.bf16.vlgmr.msra.gmra.mxu2 %v154_v6 }
  0xab   :  { %v149_v15 = vpop.f32.mrf.mxu0 }
  0xac   :  { %v266_v14 = vpop.f32.mrf.mxu1  ;;  %v150_v25 = vadd.f32 %v1307_v21, %v149_v15 }
  0xad   :  { %v267_v19 = vadd.f32 %v266_v14, %v173_v17 }
  0xb3   :  { %v151_v23 = vpop.f32.mrf.mxu0 }
  0xb4   :  { %v268_v18 = vpop.f32.mrf.mxu1  ;;  %v152_v26 = vadd.f32 %v1307_v21, %v151_v23 }
  0xb5   :  { %v269_v20 = vadd.f32 %v268_v18, %v173_v17 }
  0xb6   :  { %v289_v27 = vpack.c.bf16 %v152_v26, %v150_v25 }
  0xb7   :  { %v1528_v22 = vpack.c.bf16 %v269_v20, %v267_v19  ;;  %v280_v28 = vpop.f32.mrf.mxu2 }
  0xb8   :  { %v281_v30 = vadd.f32 %v280_v28, %v174_v29 }
  0xb9   :  { %433 = vrot.lane.b32.xlu2 %v1528_v22, %s1439_s10  ;;  %361 = vrot.lane.b32.xlu1 %v1528_v22, %s1440_s11  ;;  %v297_v24 = vsel %vm292_vm0, %v1528_v22, 0 }
  0xba   :  { %306 = vmatpush.bf16.xpose.msra.mxu3 %v297_v24 }
  0xbf   :  { %v282_v31 = vpop.f32.mrf.mxu2 }
  0xc0   :  { %v283_v32 = vadd.f32 %v282_v31, %v174_v29 }
  0xc1   :  { %504 = vrot.lane.b32.xlu2 %v1528_v22, %s1441_s12  ;;  %358 = vrot.lane.b32.xlu1 %v289_v27, %s1440_s11 }
  0xc2   :  { %1179 = vmatmul.msk.bf16.vlgmr.msra.gmra.mxu3 %vm292_vm0, %v289_v27  ;;  %v1551_v33 = vpack.c.bf16 %v283_v32, %v281_v30 }
  0xc4   :  { %346 = vmatpush.bf16.msrb.mxu3 %v1551_v33 }
  0xc9   :  { %575 = vrot.lane.b32.xlu2 %v1528_v22, %s1437_s21  ;;  %502 = vrot.lane.b32.xlu1 %v289_v27, %s1441_s12 }
  0xd1   :  { %573 = vrot.lane.b32.xlu2 %v289_v27, %s1437_s21  ;;  %646 = vrot.lane.b32.xlu1 %v1528_v22, %s1442_s4 }
  0xd9   :  { %717 = vrot.lane.b32.xlu2 %v1528_v22, %s1443_s13  ;;  %644 = vrot.lane.b32.xlu1 %v289_v27, %s1442_s4 }
  0xe1   :  { %786 = vrot.lane.b32.xlu2 %v289_v27, %s1444_s14  ;;  %715 = vrot.lane.b32.xlu1 %v289_v27, %s1443_s13 }
  0xe9   :  { %407 = vrot.lane.b32.xlu2 %v1551_v33, %s1440_s11  ;;  %478 = vrot.lane.b32.xlu1 %v1551_v33, %s1439_s10 }
  0xf1   :  { %549 = vrot.lane.b32.xlu2 %v1551_v33, %s1441_s12 }
 0x113   :  { %v434_v34 = vpop.permute.xlu2 %433 }
 0x114   :  { %v439_v35 = vsel %vm292_vm0, %v434_v34, 0 }
 0x115   :  { %448 = vmatpush.bf16.xpose.msrb.mxu2 %v439_v35 }
 0x11b   :  { %v505_v36 = vpop.permute.xlu2 %504 }
 0x11c   :  { %v510_v14 = vsel %vm292_vm0, %v505_v36, 0 }
 0x123   :  { %v576_v37 = vpop.permute.xlu2 %575 }
 0x124   :  { %v581_v38 = vsel %vm292_vm0, %v576_v37, 0 }
 0x125   :  { %590 = vmatpush.bf16.xpose.msrb.mxu1 %v581_v38 }
 0x12b   :  { %v362_v39 = vpop.permute.xlu1 %361  ;;  %v574_v40 = vpop.permute.xlu2 %573 }
 0x12c   :  { %v367_v41 = vsel %vm292_vm0, %v362_v39, 0  ;;  %1187 = vmatmul.msk.bf16.vlgmr.msrb.gmra.mxu1 %vm292_vm0, %v574_v40 }
 0x12d   :  { %376 = vmatpush.bf16.xpose.msra.mxu3 %v367_v41 }
 0x133   :  { %v718_v42 = vpop.permute.xlu2 %717  ;;  %v359_v43 = vpop.permute.xlu1 %358 }
 0x134   :  { %v723_v44 = vsel %vm292_vm0, %v718_v42, 0 }
 0x135   :  { %732 = vmatpush.bf16.xpose.msra.mxu1 %v723_v44 }
 0x13b   :  { %v503_v45 = vpop.permute.xlu1 %502  ;;  %v787_v16 = vpop.permute.xlu2 %786 }
 0x143   :  { %v647_v47 = vpop.permute.xlu1 %646  ;;  %v408_v18 = vpop.permute.xlu2 %407 }
 0x144   :  { %v652_v17 = vsel %vm292_vm0, %v647_v47, 0  ;;  %420 = vmatpush.bf16.msrb.mxu0 %v408_v18 }
 0x145   :  { %v308_v48 = vpop.f32.mrf.mxu3 }
 0x146   :  { %v313_v49 = vmul.f32 0.25, %v308_v48 }
 0x148   :  { %v315_v50 = vsel %vm287_vm1, %v313_v49, -1e+30 }
 0x149   :  { %v317_v51 = vsel %vm292_vm0, %v315_v50, -inf }
 0x14a   :  { %318 = vmax.xlane.f32.xlu0 %v317_v51 }
 0x14b   :  { %v645_v53 = vpop.permute.xlu1 %644  ;;  %v550_v21 = vpop.permute.xlu2 %549 }
 0x14c   :  { %562 = vmatpush.bf16.msra.mxu0 %v550_v21 }
 0x14d   :  { %v310_v54 = vpop.f32.mrf.mxu3 }
 0x14e   :  { %v314_v55 = vmul.f32 0.25, %v310_v54 }
 0x150   :  { %v316_v56 = vsel %vm288_vm2, %v314_v55, -1e+30 }
 0x151   :  { %v320_v57 = vsel %vm292_vm0, %v316_v56, -inf }
 0x152   :  { %321 = vmax.xlane.f32.xlu0 %v320_v57 }
 0x153   :  { %v716_v58 = vpop.permute.xlu1 %715 }
 0x154   :  { %1191 = vmatmul.msk.bf16.vlgmr.msra.gmra.mxu1 %vm292_vm0, %v716_v58 }
 0x166   :  { %431 = vrot.lane.b32.xlu0 %v289_v27, %s1439_s10 }
 0x16e   :  { %788 = vrot.lane.b32.xlu0 %v1528_v22, %s1444_s14  ;;  %v479_v22 = vpop.permute.xlu1 %478 }
 0x16f   :  { %491 = vmatpush.bf16.msra.mxu2 %v479_v22 }
 0x1a9   :  { %v592_v59 = vpop.f32.mrf.mxu1 }
 0x1aa   :  { %v597_v60 = vmul.f32 0.25, %v592_v59 }
 0x1ac   :  { %v1589_v63 = vsel %vm287_vm1, %v597_v60, -1e+30 }
 0x1ad   :  { %v601_v0 = vsel %vm292_vm0, %v1589_v63, -inf }
 0x1ae   :  { %602 = vmax.xlane.f32.xlu0 %v601_v0 }
 0x1b1   :  { %v594_v1 = vpop.f32.mrf.mxu1 }
 0x1b2   :  { %v598_v2 = vmul.f32 0.25, %v594_v1 }
 0x1b4   :  { %v1595_v3 = vsel %vm288_vm2, %v598_v2, -1e+30 }
 0x1b5   :  { %v604_v4 = vsel %vm292_vm0, %v1595_v3, -inf }
 0x1b6   :  { %605 = vmax.xlane.f32.xlu0 %v604_v4 }
 0x1bd   :  { %v319_v5 = vpop.xlane.xlu0 %318 }
 0x1be   :  { %v323_v6 = vsub.f32 %v315_v50, %v319_v5 }
 0x1c0   :  { %v325_v7 = vmul.f32 1.442695, %v323_v6 }
 0x1c2   :  { %1311 = vpow2.f32 %v325_v7 }
 0x1c5   :  { %v322_v8 = vpop.xlane.xlu0 %321 }
 0x1c6   :  { %v324_v9 = vsub.f32 %v316_v56, %v322_v8 }
 0x1c8   :  { %v327_v10 = vmul.f32 1.442695, %v324_v9  ;;  %v1599_v11 = vpop.eup %1311 }
 0x1ca   :  { %1313 = vpow2.f32 %v327_v10 }
 0x1d0   :  { %v1601_v12 = vpop.eup %1313 }
 0x1d1   :  { %v335_v13 = vpack.c.bf16 %v1601_v12, %v1599_v11  ;;  %v734_v37 = vpop.f32.mrf.mxu1 }
 0x1d2   :  { %v739_v41 = vmul.f32 0.25, %v734_v37 }
 0x1d3   :  { %1180 = vmatmul.msk.bf16.vlgmr.msrb.gmra.mxu3 %vm292_vm0, %v335_v13 }
 0x1d4   :  { %519 = vmatpush.bf16.xpose.msrb.mxu3 %v510_v14  ;;  %v1644_v44 = vsel %vm287_vm1, %v739_v41, -1e+30 }
 0x1d5   :  { %v743_v47 = vsel %vm292_vm0, %v1644_v44, -inf }
 0x1d8   :  { %v432_v15 = vpop.permute.xlu0 %431 }
 0x1d9   :  { %1183 = vmatmul.msk.bf16.vlgmr.msrb.gmra.mxu2 %vm292_vm0, %v432_v15  ;;  %v736_v8 = vpop.f32.mrf.mxu1 }
 0x1da   :  { %v740_v10 = vmul.f32 0.25, %v736_v8 }
 0x1dc   :  { %v1684_v13 = vsel %vm288_vm2, %v740_v10, -1e+30 }
 0x1dd   :  { %v746_v14 = vsel %vm292_vm0, %v1684_v13, -inf }
 0x1e0   :  { %v789_v19 = vpop.permute.xlu0 %788 }
 0x1e1   :  { %v794_v20 = vsel %vm292_vm0, %v789_v19, 0 }
 0x1e3   :  { %1181 = vmatmul.msk.bf16.vlgmr.msra.gmra.mxu3 %vm292_vm0, %v359_v43 }
 0x1e4   :  { %661 = vmatpush.bf16.xpose.msra.mxu3 %v652_v17 }
 0x1f3   :  { %1185 = vmatmul.msk.bf16.vlgmr.msrb.gmra.mxu3 %vm292_vm0, %v503_v45 }
 0x1f4   :  { %803 = vmatpush.bf16.xpose.msrb.mxu3 %v794_v20 }
 0x203   :  { %1189 = vmatmul.msk.bf16.vlgmr.msra.gmra.mxu3 %vm292_vm0, %v645_v53 }
 0x213   :  { %1193 = vmatmul.msk.bf16.vlgmr.msrb.gmra.mxu3 %vm292_vm0, %v787_v16 }
 0x221   :  { %v603_v16 = vpop.xlane.xlu0 %602 }
 0x229   :  { %v606_v52 = vpop.xlane.xlu0 %605 }
 0x22a   :  { %v608_v19 = vsub.f32 %v1595_v3, %v606_v52 }
 0x22c   :  { %v611_v21 = vmul.f32 1.442695, %v608_v19 }
 0x22e   :  { %1315 = vpow2.f32 %v611_v21 }
 0x256   :  { %v1614_v23 = vpop.f32.mrf.mxu3 }
 0x25c   :  { %v450_v24 = vpop.f32.mrf.mxu2 }
 0x25d   :  { %v455_v25 = vmul.f32 0.25, %v450_v24 }
 0x25e   :  { %v1616_v26 = vpop.f32.mrf.mxu3 }
 0x25f   :  { %v1620_v27 = vsel %vm287_vm1, %v455_v25, -1e+30 }
 0x260   :  { %v459_v28 = vsel %vm292_vm0, %v1620_v27, -inf }
 0x261   :  { %460 = vmax.xlane.f32.xlu2 %v459_v28  ;;  %v607_v28 = vsub.f32 %v1589_v63, %v603_v16 }
 0x264   :  { %v452_v29 = vpop.f32.mrf.mxu2 }
 0x265   :  { %v456_v30 = vmul.f32 0.25, %v452_v29 }
 0x266   :  { %v378_v31 = vpop.f32.mrf.mxu3 }
 0x267   :  { %v1626_v32 = vsel %vm288_vm2, %v456_v30, -1e+30  ;;  %v383_v35 = vmul.f32 0.25, %v378_v31  ;;  %v1316_v30 = vpop.eup %1315  ;;  %v609_v31 = vmul.f32 1.442695, %v607_v28 }
 0x268   :  { %v462_v34 = vsel %vm292_vm0, %v1626_v32, -inf  ;;  %v616_v3 = vsel %vm292_vm0, %v1316_v30, 0.0 }
 0x269   :  { %463 = vmax.xlane.f32.xlu0 %v462_v34  ;;  %v1632_v36 = vsel %vm287_vm1, %v383_v35, -1e+30 }
 0x26a   :  { %v387_v40 = vsel %vm292_vm0, %v1632_v36, -inf }
 0x26e   :  { %v380_v38 = vpop.f32.mrf.mxu3 }
 0x26f   :  { %v384_v39 = vmul.f32 0.25, %v380_v38 }
 0x271   :  { %388 = vmax.xlane.f32.xlu0 %v387_v40  ;;  %v1638_v42 = vsel %vm288_vm2, %v384_v39, -1e+30 }
 0x272   :  { %v390_v43 = vsel %vm292_vm0, %v1638_v42, -inf }
 0x273   :  { %391 = vmax.xlane.f32.xlu1 %v390_v43 }
 0x276   :  { %v521_v45 = vpop.f32.mrf.mxu3 }
 0x277   :  { %v526_v6 = vmul.f32 0.25, %v521_v45 }
 0x279   :  { %744 = vmax.xlane.f32.xlu0 %v743_v47  ;;  %v1678_v7 = vsel %vm287_vm1, %v526_v6, -1e+30 }
 0x27a   :  { %v530_v9 = vsel %vm292_vm0, %v1678_v7, -inf }
 0x27e   :  { %v523_v48 = vpop.f32.mrf.mxu3 }
 0x27f   :  { %v527_v49 = vmul.f32 0.25, %v523_v48 }
 0x281   :  { %v1650_v50 = vsel %vm288_vm2, %v527_v49, -1e+30 }
 0x282   :  { %v533_v51 = vsel %vm292_vm0, %v1650_v50, -inf }
 0x283   :  { %534 = vmax.xlane.f32.xlu0 %v533_v51 }
 0x286   :  { %v663_v53 = vpop.f32.mrf.mxu3 }
 0x287   :  { %v668_v54 = vmul.f32 0.25, %v663_v53 }
 0x289   :  { %v1656_v55 = vsel %vm287_vm1, %v668_v54, -1e+30 }
 0x28a   :  { %v672_v56 = vsel %vm292_vm0, %v1656_v55, -inf }
 0x28b   :  { %673 = vmax.xlane.f32.xlu0 %v672_v56 }
 0x28c   :  { %620 = vrot.lane.b32.xlu1 %v1551_v33, %s1437_s21 }
 0x28e   :  { %v665_v57 = vpop.f32.mrf.mxu3 }
 0x28f   :  { %v669_v58 = vmul.f32 0.25, %v665_v57 }
 0x291   :  { %v1664_v59 = vsel %vm288_vm2, %v669_v58, -1e+30 }
 0x292   :  { %v675_v60 = vsel %vm292_vm0, %v1664_v59, -inf }
 0x293   :  { %676 = vmax.xlane.f32.xlu2 %v675_v60 }
 0x296   :  { %v805_v0 = vpop.f32.mrf.mxu3 }
 0x297   :  { %v810_v15 = vmul.f32 0.25, %v805_v0 }
 0x299   :  { %v1692_v17 = vsel %vm287_vm1, %v810_v15, -1e+30 }
 0x29a   :  { %v814_v18 = vsel %vm292_vm0, %v1692_v17, -inf }
 0x29e   :  { %v807_v1 = vpop.f32.mrf.mxu3 }
 0x29f   :  { %v811_v2 = vmul.f32 0.25, %v807_v1  ;;  %691 = vrot.lane.b32.xlu0 %v1551_v33, %s1442_s4  ;;  %v332_v1 = vsel %vm292_vm0, %v1601_v12, 0.0 }
 0x2a1   :  { %v1672_v4 = vsel %vm288_vm2, %v811_v2, -1e+30 }
 0x2a2   :  { %v817_v5 = vsel %vm292_vm0, %v1672_v4, -inf }
 0x2a3   :  { %818 = vmax.xlane.f32.xlu2 %v817_v5 }
 0x2b6   :  { %531 = vmax.xlane.f32.xlu1 %v530_v9 }
 0x2bb   :  { %762 = vrot.lane.b32.xlu2 %v1551_v33, %s1443_s13 }
 0x2be   :  { %747 = vmax.xlane.f32.xlu1 %v746_v14 }
 0x2c9   :  { %815 = vmax.xlane.f32.xlu0 %v814_v18 }
 0x2d4   :  { %v461_v20 = vpop.xlane.xlu2 %460 }
 0x2d5   :  { %v465_v22 = vsub.f32 %v1620_v27, %v461_v20 }
 0x2d7   :  { %833 = vrot.lane.b32.xlu1 %v1551_v33, %s1444_s14  ;;  %v467_v24 = vmul.f32 1.442695, %v465_v22 }
 0x2d9   :  { %1317 = vpow2.f32 %v467_v24 }
 0x2dc   :  { %v464_v25 = vpop.xlane.xlu0 %463 }
 0x2dd   :  { %v466_v46 = vsub.f32 %v1626_v32, %v464_v25 }
 0x2df   :  { %v469_v29 = vmul.f32 1.442695, %v466_v46  ;;  %v1318_v35 = vpop.eup %1317 }
 0x2e0   :  { %v471_v57 = vsel %vm292_vm0, %v1318_v35, 0.0 }
 0x2e1   :  { %1319 = vpow2.f32 %v469_v29 }
 0x2e2   :  { %1321 = vpow2.f32 %v609_v31 }
 0x2e4   :  { %617 = vadd.xlane.f32.xlu2 %v616_v3  ;;  %v389_v34 = vpop.xlane.xlu0 %388 }
 0x2e5   :  { %v393_v33 = vsub.f32 %v1632_v36, %v389_v34 }
 0x2e6   :  { %v392_v27 = vpop.xlane.xlu1 %391 }
 0x2e7   :  { %v1320_v37 = vpop.eup %1319  ;;  %v395_v38 = vmul.f32 1.442695, %v393_v33  ;;  %v394_v32 = vsub.f32 %v1638_v42, %v392_v27 }
 0x2e8   :  { %v477_v39 = vpack.c.bf16 %v1320_v37, %v1318_v35  ;;  %v474_v63 = vsel %vm292_vm0, %v1320_v37, 0.0  ;;  %v1322_v43 = vpop.eup %1321 }
 0x2e9   :  { %v397_v40 = vmul.f32 1.442695, %v394_v32  ;;  %475 = vadd.xlane.f32.xlu0 %v474_v63  ;;  %1323 = vpow2.f32 %v395_v38  ;;  %v613_v48 = vsel %vm292_vm0, %v1322_v43, 0.0 }
 0x2ea   :  { %1184 = vmatmul.msk.bf16.vlgmr.msra.gmra.mxu2 %vm292_vm0, %v477_v39 }
 0x2eb   :  { %1325 = vpow2.f32 %v397_v40 }
 0x2ec   :  { %v745_v41 = vpop.xlane.xlu0 %744 }
 0x2ed   :  { %v749_v36 = vsub.f32 %v1644_v44, %v745_v41  ;;  %v619_v44 = vpack.c.bf16 %v1316_v30, %v1322_v43 }
 0x2ef   :  { %v751_v45 = vmul.f32 1.442695, %v749_v36  ;;  %v1324_v47 = vpop.eup %1323 }
 0x2f0   :  { %v399_v58 = vsel %vm292_vm0, %v1324_v47, 0.0 }
 0x2f1   :  { %v1709_v49 = vpop.eup %1325  ;;  %1327 = vpow2.f32 %v751_v45  ;;  %614 = vadd.xlane.f32.xlu0 %v613_v48 }
 0x2f2   :  { %v405_v42 = vpack.c.bf16 %v1709_v49, %v1324_v47  ;;  %v402_v47 = vsel %vm292_vm0, %v1709_v49, 0.0 }
 0x2f4   :  { %1182 = vmatmul.msk.bf16.vlgmr.msrb.gmra.mxu0 %vm292_vm0, %v405_v42 }
 0x2f6   :  { %v535_v56 = vpop.xlane.xlu0 %534 }
 0x2f7   :  { %v1328_v51 = vpop.eup %1327  ;;  %v537_v18 = vsub.f32 %v1650_v50, %v535_v56 }
 0x2f8   :  { %v755_v53 = vsel %vm292_vm0, %v1328_v51, 0.0 }
 0x2f9   :  { %756 = vadd.xlane.f32.xlu2 %v755_v53  ;;  %v540_v52 = vmul.f32 1.442695, %v537_v18 }
 0x2fe   :  { %v621_v54 = vpop.permute.xlu1 %620  ;;  %v674_v2 = vpop.xlane.xlu0 %673 }
 0x2ff   :  { %633 = vmatpush.bf16.msrb.mxu2 %v621_v54  ;;  %v678_v29 = vsub.f32 %v1656_v55, %v674_v2  ;;  %v329_v55 = vsel %vm292_vm0, %v1599_v11, 0.0 }
 0x301   :  { %472 = vadd.xlane.f32.xlu1 %v471_v57  ;;  %400 = vadd.xlane.f32.xlu2 %v399_v58  ;;  %v680_v50 = vmul.f32 1.442695, %v678_v29 }
 0x302   :  { %1188 = vmatmul.msk.bf16.vlgmr.msrb.gmra.mxu2 %vm292_vm0, %v619_v44 }
 0x306   :  { %v677_v60 = vpop.xlane.xlu2 %676 }
 0x307   :  { %v679_v0 = vsub.f32 %v1664_v59, %v677_v60 }
 0x309   :  { %v682_v5 = vmul.f32 1.442695, %v679_v0  ;;  %333 = vadd.xlane.f32.xlu1 %v332_v1 }
 0x30b   :  { %1329 = vpow2.f32 %v682_v5 }
 0x311   :  { %v1330_v6 = vpop.eup %1329  ;;  %v692_v8 = vpop.permute.xlu0 %691 }
 0x312   :  { %704 = vmatpush.bf16.msrb.mxu0 %v692_v8  ;;  %v687_v9 = vsel %vm292_vm0, %v1330_v6, 0.0 }
 0x313   :  { %688 = vadd.xlane.f32.xlu1 %v687_v9 }
 0x316   :  { %v819_v10 = vpop.xlane.xlu2 %818 }
 0x317   :  { %v821_v14 = vsub.f32 %v1672_v4, %v819_v10 }
 0x319   :  { %v824_v15 = vmul.f32 1.442695, %v821_v14 }
 0x31b   :  { %1331 = vpow2.f32 %v824_v15 }
 0x31c   :  { %1333 = vpow2.f32 %v540_v52 }
 0x31e   :  { %v763_v16 = vpop.permute.xlu2 %762 }
 0x31f   :  { %775 = vmatpush.bf16.msra.mxu2 %v763_v16 }
 0x321   :  { %v1332_v59 = vpop.eup %1331 }
 0x322   :  { %v829_v12 = vsel %vm292_vm0, %v1332_v59, 0.0  ;;  %v1334_v24 = vpop.eup %1333 }
 0x323   :  { %830 = vadd.xlane.f32.xlu2 %v829_v12 }
 0x329   :  { %v532_v19 = vpop.xlane.xlu1 %531 }
 0x32a   :  { %v536_v20 = vsub.f32 %v1678_v7, %v532_v19 }
 0x32c   :  { %v538_v21 = vmul.f32 1.442695, %v536_v20 }
 0x32e   :  { %1335 = vpow2.f32 %v538_v21 }
 0x331   :  { %v748_v22 = vpop.xlane.xlu1 %747 }
 0x332   :  { %v750_v4 = vsub.f32 %v1684_v13, %v748_v22 }
 0x334   :  { %v1336_v25 = vpop.eup %1335  ;;  %v753_v46 = vmul.f32 1.442695, %v750_v4 }
 0x335   :  { %v548_v28 = vpack.c.bf16 %v1334_v24, %v1336_v25  ;;  %v542_v48 = vsel %vm292_vm0, %v1336_v25, 0.0 }
 0x336   :  { %1337 = vpow2.f32 %v753_v46 }
 0x337   :  { %1186 = vmatmul.msk.bf16.vlgmr.msra.gmra.mxu0 %vm292_vm0, %v548_v28  ;;  %1339 = vpow2.f32 %v680_v50 }
 0x33c   :  { %v1338_v30 = vpop.eup %1337  ;;  %v816_v31 = vpop.xlane.xlu0 %815 }
 0x33d   :  { %v761_v3 = vpack.c.bf16 %v1338_v30, %v1328_v51  ;;  %v820_v7 = vsub.f32 %v1692_v17, %v816_v31  ;;  %v758_v34 = vsel %vm292_vm0, %v1338_v30, 0.0  ;;  %v1340_v33 = vpop.eup %1339  ;;  %v545_v51 = vsel %vm292_vm0, %v1334_v24, 0.0 }
 0x33e   :  { %759 = vadd.xlane.f32.xlu0 %v758_v34  ;;  %v690_v35 = vpack.c.bf16 %v1330_v6, %v1340_v33  ;;  %v684_v53 = vsel %vm292_vm0, %v1340_v33, 0.0 }
 0x33f   :  { %v822_v13 = vmul.f32 1.442695, %v820_v7  ;;  %1192 = vmatmul.msk.bf16.vlgmr.msra.gmra.mxu2 %vm292_vm0, %v761_v3 }
 0x341   :  { %1341 = vpow2.f32 %v822_v13 }
 0x346   :  { %330 = vadd.xlane.f32.xlu0 %v329_v55 }
 0x347   :  { %v1342_v27 = vpop.eup %1341  ;;  %1190 = vmatmul.msk.bf16.vlgmr.msrb.gmra.mxu0 %vm292_vm0, %v690_v35 }
 0x348   :  { %v826_v37 = vsel %vm292_vm0, %v1342_v27, 0.0  ;;  %v832_v38 = vpack.c.bf16 %v1332_v59, %v1342_v27 }
 0x349   :  { %v834_v17 = vpop.permute.xlu1 %833  ;;  %827 = vadd.xlane.f32.xlu1 %v826_v37 }
 0x34a   :  { %846 = vmatpush.bf16.msra.mxu0 %v834_v17 }
 0x357   :  { %1194 = vmatmul.msk.bf16.vlgmr.msra.gmra.mxu0 %vm292_vm0, %v832_v38  ;;  %v618_v56 = vpop.xlane.xlu2 %617 }
 0x35c   :  { %v476_v39 = vpop.xlane.xlu0 %475 }
 0x35d   :  { %1343 = vrcp.f32 %v476_v39 }
 0x363   :  { %v1344_v41 = vpop.eup %1343 }
 0x364   :  { %v615_v44 = vpop.xlane.xlu0 %614 }
 0x36c   :  { %v757_v49 = vpop.xlane.xlu2 %756 }
 0x36d   :  { %v493_v32 = vpop.f32.mrf.mxu2 }
 0x371   :  { %v422_v16 = vpop.f32.mrf.mxu0 }
 0x374   :  { %v473_v63 = vpop.xlane.xlu1 %472  ;;  %v401_v20 = vpop.xlane.xlu2 %400 }
 0x375   :  { %1345 = vrcp.f32 %v473_v63  ;;  %v495_v40 = vpop.f32.mrf.mxu2 }
 0x376   :  { %v501_v36 = vmul.f32 %v1344_v41, %v495_v40  ;;  %1347 = vrcp.f32 %v618_v56  ;;  %v1255_v56 = vld [vmem:[#allocation4 + $0x20] sm:$0xff] }
 0x377   :  { %1349 = vrcp.f32 %v615_v44 }
 0x379   :  { %v424_v59 = vpop.f32.mrf.mxu0 }
 0x37b   :  { %v1346_v11 = vpop.eup %1345 }
 0x37c   :  { %v500_v43 = vmul.f32 %v1346_v11, %v493_v32  ;;  %v1348_v60 = vpop.eup %1347  ;;  %v334_v24 = vpop.xlane.xlu1 %333 }
 0x37d   :  { %v1350_v1 = vpop.eup %1349 }
 0x37e   :  { %v1272_v45 = vpack.i.bf16 %v501_v36, %v500_v43 }
 0x380   :  { %1273 = vrot.lane.b32.xlu0 %v1272_v45, %s1443_s13 }
 0x385   :  { %v635_v42 = vpop.f32.mrf.mxu2 }
 0x386   :  { %v642_v2 = vmul.f32 %v1350_v1, %v635_v42  ;;  %v689_v31 = vpop.xlane.xlu1 %688  ;;  %v1257_v42 = vld [vmem:[#allocation4 + $0x30] sm:$0xff] }
 0x38d   :  { %v637_v54 = vpop.f32.mrf.mxu2 }
 0x38e   :  { %v643_v0 = vmul.f32 %v1348_v60, %v637_v54 }
 0x390   :  { %v1277_v5 = vpack.i.bf16 %v643_v0, %v642_v2 }
 0x396   :  { %v831_v34 = vpop.xlane.xlu2 %830 }
 0x3aa   :  { %403 = vadd.xlane.f32.xlu0 %v402_v47 }
 0x3b1   :  { %v760_v58 = vpop.xlane.xlu0 %759 }
 0x3b2   :  { %543 = vadd.xlane.f32.xlu0 %v542_v48  ;;  %1351 = vrcp.f32 %v760_v58  ;;  %v1258_v48 = vld [vmem:[#allocation4 + $0x38] sm:$0xff] }
 0x3b3   :  { %1353 = vrcp.f32 %v757_v49  ;;  %1002 = vmatpush.bf16.msrb.mxu1 %v1258_v48 }
 0x3b4   :  { %v564_v12 = vpop.f32.mrf.mxu0  ;;  %1355 = vrcp.f32 %v401_v20 }
 0x3b7   :  { %1003 = vmatpush.bf16.msrb.mxu1 %v1257_v42 }
 0x3b8   :  { %v1352_v8 = vpop.eup %1351 }
 0x3b9   :  { %v1354_v10 = vpop.eup %1353  ;;  %v331_v18 = vpop.xlane.xlu0 %330 }
 0x3ba   :  { %546 = vadd.xlane.f32.xlu0 %v545_v51  ;;  %v1356_v4 = vpop.eup %1355  ;;  %v1256_v51 = vld [vmem:[#allocation4 + $0x28] sm:$0xff] }
 0x3bb   :  { %v429_v29 = vmul.f32 %v1356_v4, %v422_v16  ;;  %1004 = vmatpush.bf16.msrb.mxu1 %v1256_v51 }
 0x3bc   :  { %v566_v52 = vpop.f32.mrf.mxu0  ;;  %v828_v33 = vpop.xlane.xlu1 %827 }
 0x3bf   :  { %1005 = vmatpush.bf16.msrb.mxu1 %v1255_v56 }
 0x3c2   :  { %685 = vadd.xlane.f32.xlu0 %v684_v53  ;;  %v777_v57 = vpop.f32.mrf.mxu2 }
 0x3c3   :  { %v784_v14 = vmul.f32 %v1354_v10, %v777_v57  ;;  %v1252_v10 = vld [vmem:[#allocation4 + $0x8] sm:$0xff] }
 0x3c4   :  { %v706_v21 = vpop.f32.mrf.mxu0 }
 0x3ca   :  { %v779_v6 = vpop.f32.mrf.mxu2 }
 0x3cb   :  { %v785_v9 = vmul.f32 %v1352_v8, %v779_v6  ;;  %v1254_v6 = vld [vmem:[#allocation4 + $0x18] sm:$0xff] }
 0x3cc   :  { %v708_v46 = vpop.f32.mrf.mxu0  ;;  %1006 = vmatpush.bf16.msrb.mxu1 %v1254_v6 }
 0x3cd   :  { %v1297_v15 = vpack.i.bf16 %v785_v9, %v784_v14 }
 0x3d4   :  { %v848_v7 = vpop.f32.mrf.mxu0 }
 0x3d6   :  { %1278 = vrot.lane.b32.xlu0 %v1277_v5, %s1437_s21 }
 0x3dc   :  { %v850_v38 = vpop.f32.mrf.mxu0 }
 0x3de   :  { %1298 = vrot.lane.b32.xlu0 %v1297_v15, %s1439_s10 }
 0x3f2   :  { %v1744_v19 = vpop.permute.xlu0 %1273 }
 0x3f3   :  { %v1276_v0 = vunpack.i.h.bf16 %v1744_v19  ;;  %v1275_v1 = vunpack.i.l.bf16 %v1744_v19 }
 0x41d   :  { %v404_v22 = vpop.xlane.xlu0 %403 }
 0x41e   :  { %1357 = vrcp.f32 %v404_v22 }
 0x424   :  { %v1358_v25 = vpop.eup %1357 }
 0x425   :  { %v544_v28 = vpop.xlane.xlu0 %543  ;;  %v430_v50 = vmul.f32 %v1358_v25, %v424_v59 }
 0x426   :  { %1359 = vrcp.f32 %v544_v28 }
 0x427   :  { %v1282_v30 = vpack.i.bf16 %v430_v50, %v429_v29 }
 0x429   :  { %1283 = vrot.lane.b32.xlu2 %v1282_v30, %s1444_s14 }
 0x42c   :  { %v1360_v13 = vpop.eup %1359 }
 0x42d   :  { %v547_v3 = vpop.xlane.xlu0 %546  ;;  %v571_v27 = vmul.f32 %v1360_v13, %v564_v12 }
 0x42e   :  { %1361 = vrcp.f32 %v547_v3 }
 0x42f   :  { %1363 = vrcp.f32 %v689_v31 }
 0x430   :  { %1365 = vrcp.f32 %v831_v34 }
 0x431   :  { %1367 = vrcp.f32 %v828_v33 }
 0x434   :  { %v1362_v35 = vpop.eup %1361 }
 0x435   :  { %v686_v55 = vpop.xlane.xlu0 %685  ;;  %v572_v37 = vmul.f32 %v1362_v35, %v566_v52  ;;  %v1364_v32 = vpop.eup %1363 }
 0x436   :  { %1369 = vrcp.f32 %v686_v55  ;;  %v1366_v39 = vpop.eup %1365  ;;  %v714_v11 = vmul.f32 %v1364_v32, %v708_v46  ;;  %v1308_v55 = vld [vmem:[%s1779_s6] ss:$0 sm:$0xff] }
 0x437   :  { %v1287_v17 = vpack.i.bf16 %v572_v37, %v571_v27  ;;  %v1368_v63 = vpop.eup %1367  ;;  %v856_v40 = vmul.f32 %v1366_v39, %v850_v38  ;;  %1371 = vrcp.f32 %v334_v24 }
 0x438   :  { %v855_v43 = vmul.f32 %v1368_v63, %v848_v7  ;;  %1373 = vrcp.f32 %v331_v18  ;;  %v1445_v63 = vmov 128.0  }
 0x439   :  { %1288 = vrot.lane.b32.xlu1 %v1287_v17, %s1442_s4  ;;  %1375 = vrcp.f32 %v1445_v63 }
 0x43a   :  { %v1302_v45 = vpack.i.bf16 %v856_v40, %v855_v43 }
 0x43c   :  { %v1370_v41 = vpop.eup %1369 }
 0x43d   :  { %v713_v36 = vmul.f32 %v1370_v41, %v706_v21  ;;  %v1372_v53 = vpop.eup %1371 }
 0x43e   :  { %v1374_v54 = vpop.eup %1373  ;;  %v356_v44 = vmul.f32 %v1372_v53, %v1616_v26  ;;  %v1253_v26 = vld [vmem:[#allocation4 + $0x10] sm:$0xff] }
 0x43f   :  { %v1292_v47 = vpack.i.bf16 %v714_v11, %v713_v36  ;;  %v355_v58 = vmul.f32 %v1374_v54, %v1614_v23  ;;  %1007 = vmatpush.bf16.msrb.mxu1 %v1253_v26  ;;  %v1251_v23 = vld [vmem:[#allocation4] sm:$0xff]  ;;  %v1376_v40 = vpop.eup %1375 }
 0x440   :  { %v1023_v41 = vmul.f32 128.0, %v1376_v40  ;;  %vm1027_vm9 = vweird.f32 %v1376_v40 }
 0x441   :  { %1303 = vrot.lane.b32.xlu1 %v1302_v45, %s1440_s11  ;;  %1293 = vrot.lane.b32.xlu2 %v1292_v47, %s1441_s12 }
 0x442   :  { %v1024_v11 = vsub.f32 1.0, %v1023_v41 }
 0x443   :  { %1008 = vmatpush.bf16.msrb.mxu1 %v1252_v10  ;;  %v1309_v10 = vld [vmem:[%s1780_s7] ss:$0 sm:$0xff] }
 0x444   :  { %v1025_v43 = vmul.f32 %v1376_v40, %v1024_v11 }
 0x446   :  { %v1026_v36 = vadd.f32 %v1376_v40, %v1025_v43 }
 0x447   :  { %1009 = vmatpush.bf16.msrb.mxu1 %v1251_v23 }
 0x448   :  { %v1279_v14 = vpop.permute.xlu0 %1278  ;;  %v1028_v45 = vsel %vm1027_vm9, %v1376_v40, %v1026_v36 }
 0x449   :  { %v1281_v12 = vunpack.i.h.bf16 %v1279_v14  ;;  %v1280_v18 = vunpack.i.l.bf16 %v1279_v14 }
 0x450   :  { %v1299_v4 = vpop.permute.xlu0 %1298 }
 0x451   :  { %v1301_v29 = vunpack.i.h.bf16 %v1299_v4  ;;  %v1300_v50 = vunpack.i.l.bf16 %v1299_v4 }
 0x483   :  { %v1284_v57 = vpop.permute.xlu2 %1283 }
 0x484   :  { %v1286_v60 = vunpack.i.h.bf16 %v1284_v57  ;;  %v1285_v49 = vunpack.i.l.bf16 %v1284_v57 }
 0x486   :  { %v914_v2 = vsel %vm292_vm0, %v356_v44, %v1286_v60  ;;  %v913_v5 = vsel %vm292_vm0, %v355_v58, %v1285_v49 }
 0x487   :  { %v916_v8 = vsel %vm915_vm3, %v913_v5, %v1275_v1  ;;  %v917_v9 = vsel %vm915_vm3, %v914_v2, %v1276_v0 }
 0x49b   :  { %v1294_v52 = vpop.permute.xlu2 %1293 }
 0x49c   :  { %v1296_v24 = vunpack.i.h.bf16 %v1294_v52  ;;  %v1295_v25 = vunpack.i.l.bf16 %v1294_v52 }
 0x4ab   :  { %v1289_v15 = vpop.permute.xlu1 %1288 }
 0x4ac   :  { %v1291_v16 = vunpack.i.h.bf16 %v1289_v15  ;;  %v1290_v59 = vunpack.i.l.bf16 %v1289_v15  ;;  %v1310_v15 = vld [vmem:[%s1781_s8] ss:$0 sm:$0xff] }
 0x4ae   :  { %v919_v19 = vsel %vm918_vm4, %v916_v8, %v1290_v59  ;;  %v920_v20 = vsel %vm918_vm4, %v917_v9, %v1291_v16 }
 0x4af   :  { %v922_v21 = vsel %vm921_vm5, %v919_v19, %v1280_v18  ;;  %v923_v22 = vsel %vm921_vm5, %v920_v20, %v1281_v12 }
 0x4b0   :  { %v925_v46 = vsel %vm924_vm6, %v922_v21, %v1295_v25  ;;  %v926_v28 = vsel %vm924_vm6, %v923_v22, %v1296_v24 }
 0x4b1   :  { %v928_v7 = vsel %vm927_vm7, %v925_v46, %v1300_v50  ;;  %v929_v34 = vsel %vm927_vm7, %v926_v28, %v1301_v29 }
 0x4b3   :  { %v1304_v30 = vpop.permute.xlu1 %1303 }
 0x4b4   :  { %v1306_v31 = vunpack.i.h.bf16 %v1304_v30  ;;  %v1305_v3 = vunpack.i.l.bf16 %v1304_v30 }
 0x4b6   :  { %v931_v13 = vsel %vm930_vm8, %v928_v7, %v1305_v3  ;;  %v932_v33 = vsel %vm930_vm8, %v929_v34, %v1306_v31 }
 0x4b7   :  { %v933_v35 = vpack.c.bf16 %v932_v33, %v931_v13 }
 0x4b9   :  { %1010 = vmatmul.bf16.vlgmr.msrb.gmra.mxu1 %v933_v35 }
 0x536   :  { %v1011_v27 = vpop.f32.mrf.mxu1 }
 0x537   :  { %v1012_v37 = vadd.f32 %v1308_v55, %v1011_v27 }
 0x539   :  { %v1016_v17 = vadd.f32 %v1012_v37, %v1507_v61 }
 0x53b   :  { %1018 = vadd.xlane.f32.xlu2 %v1016_v17 }
 0x53e   :  { %v1013_v38 = vpop.f32.mrf.mxu1 }
 0x53f   :  { %v1014_v32 = vadd.f32 %v1308_v55, %v1013_v38 }
 0x541   :  { %v1017_v39 = vadd.f32 %v1014_v32, %v1512_v62 }
 0x543   :  { %1020 = vadd.xlane.f32.xlu0 %v1017_v39 }
 0x5ae   :  { %v1019_v47 = vpop.xlane.xlu2 %1018 }
 0x5af   :  { %v1029_v48 = vmul.f32 %v1028_v45, %v1019_v47 }
 0x5b1   :  { %v1031_v42 = vsub.f32 %v1016_v17, %v1029_v48 }
 0x5b3   :  { %v1033_v51 = vmul.f32 %v1031_v42, %v1031_v42 }
 0x5b5   :  { %1035 = vadd.xlane.f32.xlu1 %v1033_v51 }
 0x5b6   :  { %v1021_v61 = vpop.xlane.xlu0 %1020 }
 0x5b7   :  { %v1030_v53 = vmul.f32 %v1028_v45, %v1021_v61 }
 0x5b9   :  { %v1032_v54 = vsub.f32 %v1017_v39, %v1030_v53 }
 0x5bb   :  { %v1034_v56 = vmul.f32 %v1032_v54, %v1032_v54 }
 0x5bd   :  { %1037 = vadd.xlane.f32.xlu2 %v1034_v56 }
 0x628   :  { %v1036_v62 = vpop.xlane.xlu1 %1035 }
 0x629   :  { %v1039_v44 = vmul.f32 %v1036_v62, %v1028_v45 }
 0x62b   :  { %v1041_v57 = vadd.f32 1e-05, %v1039_v44 }
 0x62d   :  { %1377 = vrsqrt.f32 %v1041_v57  ;;  %vm1049_vm11 = vweird.f32 %v1041_v57 }
 0x630   :  { %v1038_v58 = vpop.xlane.xlu2 %1037 }
 0x631   :  { %v1040_v60 = vmul.f32 %v1038_v58, %v1028_v45 }
 0x633   :  { %v1378_v49 = vpop.eup %1377  ;;  %v1042_v0 = vadd.f32 1e-05, %v1040_v60 }
 0x634   :  { %v1044_v1 = vmul.f32 %v1378_v49, %v1041_v57  ;;  %vm1050_vm10 = vweird.f32 %v1378_v49 }
 0x635   :  { %1379 = vrsqrt.f32 %v1042_v0  ;;  %vm1051_vm12 = vmor %vm1049_vm11, %vm1050_vm10  ;;  %vm1059_vm14 = vweird.f32 %v1042_v0 }
 0x636   :  { %v1045_v2 = vmul.f32 %v1378_v49, %v1044_v1 }
 0x638   :  { %v1046_v5 = vmul.f32 0.5, %v1045_v2 }
 0x63a   :  { %v1047_v6 = vsub.f32 1.5, %v1046_v5 }
 0x63b   :  { %v1380_v8 = vpop.eup %1379 }
 0x63c   :  { %v1048_v9 = vmul.f32 %v1378_v49, %v1047_v6  ;;  %v1054_v26 = vmul.f32 %v1380_v8, %v1042_v0  ;;  %vm1060_vm13 = vweird.f32 %v1380_v8 }
 0x63d   :  { %vm1061_vm15 = vmor %vm1059_vm14, %vm1060_vm13 }
 0x63e   :  { %v1052_v23 = vsel %vm1051_vm12, %v1378_v49, %v1048_v9  ;;  %v1055_v14 = vmul.f32 %v1380_v8, %v1054_v26 }
 0x63f   :  { %v1063_v16 = vmul.f32 %v1052_v23, %v1031_v42 }
 0x640   :  { %v1056_v59 = vmul.f32 0.5, %v1055_v14 }
 0x641   :  { %v1068_v12 = vmul.f32 %v1309_v10, %v1063_v16 }
 0x642   :  { %v1057_v18 = vsub.f32 1.5, %v1056_v59 }
 0x643   :  { %v1073_v52 = vadd.f32 %v1310_v15, %v1068_v12 }
 0x644   :  { %v1058_v19 = vmul.f32 %v1380_v8, %v1057_v18 }
 0x645   :  { %1075 = vst [vmem:[%s1782_s9] sm:$0xff] %v1073_v52 }
 0x646   :  { %v1062_v20 = vsel %vm1061_vm15, %v1380_v8, %v1058_v19 }
 0x647   :  { %v1064_v21 = vmul.f32 %v1062_v20, %v1032_v54 }
 0x649   :  { %v1069_v22 = vmul.f32 %v1309_v10, %v1064_v21 }
 0x64b   :  { %v1074_v4 = vadd.f32 %v1310_v15, %v1069_v22 }
 0x64d   :  { %1076 = vst [vmem:[%s1782_s9 + $0x8] sm:$0xff] %v1074_v4 }
 0x64e   :  { %1081 = vsyncpa [#allocation3], 1 }
 0x64f   :  { %1082 = vsyncpa [#allocation5], 1 }

// kernel: generator_forward.26
= control target key start
LH: loop header
LB: loop body
LE: loop exit
PB: predicated region body
PF: predicated region fallthrough
CT: control target
= control target key end

     0   :  { %12 = vsyncpa [#allocation3], 0  ;;  %s1189_s0 = inlined_call_operand.vmem [shape: f32[16,128], index: 0, kind: input, shape index: {}]   ;;  %s1190_s1 = inlined_call_operand.hbm [shape: bf16[128,512], index: 1, kind: input, shape index: {}]   ;;  %s1191_s2 = inlined_call_operand.vmem [shape: f32[1,512], index: 2, kind: input, shape index: {}]   ;;  %s1192_s3 = inlined_call_operand.hbm [shape: bf16[512,128], index: 3, kind: input, shape index: {}]   ;;  %s1193_s4 = inlined_call_operand.vmem [shape: f32[1,128], index: 4, kind: input, shape index: {}]   ;;  %s1194_s5 = inlined_call_operand.vmem [shape: f32[1,128], index: 5, kind: input, shape index: {}]   ;;  %s1195_s6 = inlined_call_operand.vmem [shape: f32[1,128], index: 6, kind: input, shape index: {}]   ;;  %s1196_s7 = inlined_call_operand.vmem [shape: f32[16,128], index: 7, kind: output, shape index: {}]  }
   0x1   :  { %s20_s26 = sshll.u32 %s1190_s1, 4  ;;  %s21_s26 = int_to_ptr.hbm [resolvable:$true] %s20_s26 }
   0x2   :  { %13 = vsyncpa [#allocation5], 0  ;;  %s1104_s27 = smov [#allocation2]   ;;  %s35_s8 = sshll.u32 %s1192_s3, 4  ;;  %s36_s8 = int_to_ptr.hbm [resolvable:$true] %s35_s8 }
   0x3   :  { %s22_s28 = sshll.u32 %s1104_s27, 4  ;;  %s1105_s9 = smov 256   ;;  %s23_s28 = int_to_ptr.vmem [resolvable:$true] %s22_s28 }
   0x4   :  { %s1106_s10 = smov 16   ;;  %s1107_s11 = smov [#allocation4]  }
   0x5   :  { %28 = dma.hbm_to_vmem [thread:$0]  %s21_s26, 4096, %s23_s28, [#allocation3], %s1105_s9, %s1105_s9, %s1106_s10  }
   0x6   :  { %s37_s12 = sshll.u32 %s1107_s11, 4  ;;  %s1108_s13 = smov 64   ;;  %s38_s12 = int_to_ptr.vmem [resolvable:$true] %s37_s12 }
   0x7   :  { %s1109_s14 = smov 4  }
   0x8   :  { %43 = dma.hbm_to_vmem [thread:$0]  %s36_s8, 4096, %s38_s12, [#allocation5], %s1108_s13, %s1108_s13, %s1109_s14  }
   0x9   :  { %1100 = dma.done.wait [#allocation3], 4096  }
   0xa   :  { %1101 = vsyncadd [#allocation3], 4294963200 }
   0xb   :  { %1102 = dma.done.wait [#allocation5], 4096  }
   0xc   :  { %1103 = vsyncadd [#allocation5], 4294963200  ;;  %v830_v0 = vld [vmem:[#allocation2 + $0xe0] sm:$0xf]  ;;  %v1002_v1 = vld [vmem:[#allocation2 + $0xec] sm:$0xf0] }
   0xd   :  { %v1000_v2 = vld [vmem:[#allocation2 + $0xe4] sm:$0xf]  ;;  %v831_v3 = vor.u32 %v1002_v1, %v830_v0  ;;  %v832_v4 = vld [vmem:[#allocation2 + $0xf0] sm:$0xf0]  ;;  %v838_v5 = vld [vmem:[#allocation2 + $0xe8] sm:$0xf] }
   0xe   :  { %v1003_v6 = vld [vmem:[#allocation2 + $0xf4] sm:$0xf0]  ;;  %v835_v7 = vor.u32 %v1000_v2, %v832_v4  ;;  %v1001_v9 = vld [vmem:[#allocation2 + $0xec] sm:$0xf]  ;;  %v840_v10 = vld [vmem:[#allocation2 + $0xf8] sm:$0xf0] }
   0xf   :  { %v839_v8 = vor.u32 %v1003_v6, %v838_v5  ;;  %v814_v11 = vld [vmem:[#allocation2 + $0xc0] sm:$0xf]  ;;  %265 = vmatpush.bf16.msra.mxu0 %v831_v3  ;;  %v843_v12 = vor.u32 %v1001_v9, %v840_v10  ;;  %v998_v13 = vld [vmem:[#allocation2 + $0xcc] sm:$0xf0]  ;;  %v996_v14 = vld [vmem:[#allocation2 + $0xc4] sm:$0xf] }
  0x10   :  { %v816_v15 = vld [vmem:[#allocation2 + $0xd0] sm:$0xf0]  ;;  %279 = vmatpush.bf16.msra.mxu1 %v835_v7  ;;  %v815_v16 = vor.u32 %v998_v13, %v814_v11  ;;  %v822_v18 = vld [vmem:[#allocation2 + $0xc8] sm:$0xf]  ;;  %v999_v19 = vld [vmem:[#allocation2 + $0xd4] sm:$0xf0] }
  0x11   :  { %293 = vmatpush.bf16.msra.mxu2 %v839_v8  ;;  %v819_v17 = vor.u32 %v996_v14, %v816_v15  ;;  %v997_v20 = vld [vmem:[#allocation2 + $0xcc] sm:$0xf]  ;;  %307 = vmatpush.bf16.msra.mxu3 %v843_v12  ;;  %v823_v21 = vor.u32 %v999_v19, %v822_v18  ;;  %v824_v22 = vld [vmem:[#allocation2 + $0xd8] sm:$0xf0]  ;;  %v798_v23 = vld [vmem:[#allocation2 + $0xa0] sm:$0xf] }
  0x12   :  { %v994_v24 = vld [vmem:[#allocation2 + $0xac] sm:$0xf0]  ;;  %v827_v25 = vor.u32 %v997_v20, %v824_v22  ;;  %v992_v26 = vld [vmem:[#allocation2 + $0xa4] sm:$0xf]  ;;  %v800_v27 = vld [vmem:[#allocation2 + $0xb0] sm:$0xf0] }
  0x13   :  { %v806_v28 = vld [vmem:[#allocation2 + $0xa8] sm:$0xf]  ;;  %266 = vmatpush.bf16.msra.mxu0 %v815_v16  ;;  %v799_v29 = vor.u32 %v994_v24, %v798_v23  ;;  %v995_v30 = vld [vmem:[#allocation2 + $0xb4] sm:$0xf0]  ;;  %v993_v31 = vld [vmem:[#allocation2 + $0xac] sm:$0xf]  ;;  %v803_v33 = vor.u32 %v992_v26, %v800_v27 }
  0x14   :  { %v808_v32 = vld [vmem:[#allocation2 + $0xb8] sm:$0xf0]  ;;  %280 = vmatpush.bf16.msra.mxu1 %v819_v17  ;;  %v807_v34 = vor.u32 %v995_v30, %v806_v28  ;;  %v782_v35 = vld [vmem:[#allocation2 + $0x80] sm:$0xf]  ;;  %v990_v36 = vld [vmem:[#allocation2 + $0x8c] sm:$0xf0] }
  0x15   :  { %294 = vmatpush.bf16.msra.mxu2 %v823_v21  ;;  %v988_v37 = vld [vmem:[#allocation2 + $0x84] sm:$0xf]  ;;  %308 = vmatpush.bf16.msra.mxu3 %v827_v25  ;;  %v811_v38 = vor.u32 %v993_v31, %v808_v32  ;;  %v784_v39 = vld [vmem:[#allocation2 + $0x90] sm:$0xf0]  ;;  %v790_v40 = vld [vmem:[#allocation2 + $0x88] sm:$0xf]  ;;  %v783_v44 = vor.u32 %v990_v36, %v782_v35 }
  0x16   :  { %v991_v41 = vld [vmem:[#allocation2 + $0x94] sm:$0xf0]  ;;  %v989_v42 = vld [vmem:[#allocation2 + $0x8c] sm:$0xf]  ;;  %v792_v43 = vld [vmem:[#allocation2 + $0x98] sm:$0xf0]  ;;  %v787_v45 = vor.u32 %v988_v37, %v784_v39 }
  0x17   :  { %267 = vmatpush.bf16.msra.mxu0 %v799_v29  ;;  %v791_v46 = vor.u32 %v991_v41, %v790_v40  ;;  %v766_v47 = vld [vmem:[#allocation2 + $0x60] sm:$0xf]  ;;  %v986_v48 = vld [vmem:[#allocation2 + $0x6c] sm:$0xf0]  ;;  %v984_v49 = vld [vmem:[#allocation2 + $0x64] sm:$0xf]  ;;  %v795_v50 = vor.u32 %v989_v42, %v792_v43 }
  0x18   :  { %281 = vmatpush.bf16.msra.mxu1 %v803_v33  ;;  %v768_v51 = vld [vmem:[#allocation2 + $0x70] sm:$0xf0]  ;;  %v774_v52 = vld [vmem:[#allocation2 + $0x68] sm:$0xf]  ;;  %v987_v53 = vld [vmem:[#allocation2 + $0x74] sm:$0xf0]  ;;  %v767_v56 = vor.u32 %v986_v48, %v766_v47 }
  0x19   :  { %295 = vmatpush.bf16.msra.mxu2 %v807_v34  ;;  %309 = vmatpush.bf16.msra.mxu3 %v811_v38  ;;  %v985_v54 = vld [vmem:[#allocation2 + $0x6c] sm:$0xf]  ;;  %v776_v55 = vld [vmem:[#allocation2 + $0x78] sm:$0xf0]  ;;  %v771_v57 = vor.u32 %v984_v49, %v768_v51  ;;  %v775_v58 = vor.u32 %v987_v53, %v774_v52  ;;  %v750_v59 = vld [vmem:[#allocation2 + $0x40] sm:$0xf] }
  0x1a   :  { %v982_v60 = vld [vmem:[#allocation2 + $0x4c] sm:$0xf0]  ;;  %v980_v61 = vld [vmem:[#allocation2 + $0x44] sm:$0xf]  ;;  %v779_v62 = vor.u32 %v985_v54, %v776_v55  ;;  %v752_v63 = vld [vmem:[#allocation2 + $0x50] sm:$0xf0] }
  0x1b   :  { %268 = vmatpush.bf16.msra.mxu0 %v783_v44  ;;  %v758_v0 = vld [vmem:[#allocation2 + $0x48] sm:$0xf]  ;;  %v983_v1 = vld [vmem:[#allocation2 + $0x54] sm:$0xf0]  ;;  %v981_v2 = vld [vmem:[#allocation2 + $0x4c] sm:$0xf]  ;;  %v751_v4 = vor.u32 %v982_v60, %v750_v59  ;;  %v755_v5 = vor.u32 %v980_v61, %v752_v63 }
  0x1c   :  { %282 = vmatpush.bf16.msra.mxu1 %v787_v45  ;;  %v760_v3 = vld [vmem:[#allocation2 + $0x58] sm:$0xf0]  ;;  %v759_v6 = vor.u32 %v983_v1, %v758_v0  ;;  %v734_v7 = vld [vmem:[#allocation2 + $0x20] sm:$0xf]  ;;  %v978_v8 = vld [vmem:[#allocation2 + $0x2c] sm:$0xf0] }
  0x1d   :  { %296 = vmatpush.bf16.msra.mxu2 %v791_v46  ;;  %310 = vmatpush.bf16.msra.mxu3 %v795_v50  ;;  %v976_v9 = vld [vmem:[#allocation2 + $0x24] sm:$0xf]  ;;  %v763_v10 = vor.u32 %v981_v2, %v760_v3  ;;  %v736_v11 = vld [vmem:[#allocation2 + $0x30] sm:$0xf0]  ;;  %v742_v12 = vld [vmem:[#allocation2 + $0x28] sm:$0xf]  ;;  %v735_v16 = vor.u32 %v978_v8, %v734_v7 }
  0x1e   :  { %v979_v13 = vld [vmem:[#allocation2 + $0x34] sm:$0xf0]  ;;  %v977_v14 = vld [vmem:[#allocation2 + $0x2c] sm:$0xf]  ;;  %v744_v15 = vld [vmem:[#allocation2 + $0x38] sm:$0xf0]  ;;  %v739_v17 = vor.u32 %v976_v9, %v736_v11 }
  0x1f   :  { %269 = vmatpush.bf16.msra.mxu0 %v767_v56  ;;  %v743_v18 = vor.u32 %v979_v13, %v742_v12  ;;  %v718_v19 = vld [vmem:[#allocation2] sm:$0xf]  ;;  %v974_v20 = vld [vmem:[#allocation2 + $0xc] sm:$0xf0]  ;;  %v972_v21 = vld [vmem:[#allocation2 + $0x4] sm:$0xf]  ;;  %v747_v22 = vor.u32 %v977_v14, %v744_v15 }
  0x20   :  { %283 = vmatpush.bf16.msra.mxu1 %v771_v57  ;;  %v720_v23 = vld [vmem:[#allocation2 + $0x10] sm:$0xf0]  ;;  %v726_v24 = vld [vmem:[#allocation2 + $0x8] sm:$0xf]  ;;  %v975_v25 = vld [vmem:[#allocation2 + $0x14] sm:$0xf0]  ;;  %v719_v29 = vor.u32 %v974_v20, %v718_v19 }
  0x21   :  { %297 = vmatpush.bf16.msra.mxu2 %v775_v58  ;;  %311 = vmatpush.bf16.msra.mxu3 %v779_v62  ;;  %v973_v26 = vld [vmem:[#allocation2 + $0xc] sm:$0xf]  ;;  %v728_v27 = vld [vmem:[#allocation2 + $0x18] sm:$0xf0]  ;;  %v1160_v28 = vld [vmem:[%s1189_s0] sm:$0xff]  ;;  %v723_v31 = vor.u32 %v972_v21, %v720_v23  ;;  %v727_v32 = vor.u32 %v975_v25, %v726_v24 }
  0x22   :  { %v1165_v30 = vld [vmem:[%s1189_s0 + $0x8] sm:$0xff]  ;;  %v731_v33 = vor.u32 %v973_v26, %v728_v27  ;;  %v1011_v34 = vld [vmem:[#allocation4 + $0x38] sm:$0xff]  ;;  %v1010_v38 = vld [vmem:[#allocation4 + $0x30] sm:$0xff] }
  0x23   :  { %270 = vmatpush.bf16.msra.mxu0 %v751_v4  ;;  %v62_v35 = vpack.c.bf16 %v1165_v30, %v1160_v28  ;;  %v1019_v36 = vld [vmem:[#allocation4 + $0x78] sm:$0xff]  ;;  %v1018_v40 = vld [vmem:[#allocation4 + $0x70] sm:$0xff]  ;;  %v1009_v42 = vld [vmem:[#allocation4 + $0x28] sm:$0xff] }
  0x24   :  { %284 = vmatpush.bf16.msra.mxu1 %v755_v5  ;;  %v1027_v37 = vld [vmem:[#allocation4 + $0xb8] sm:$0xff]  ;;  %v1026_v41 = vld [vmem:[#allocation4 + $0xb0] sm:$0xff]  ;;  %v1017_v44 = vld [vmem:[#allocation4 + $0x68] sm:$0xff] }
  0x25   :  { %298 = vmatpush.bf16.msra.mxu2 %v759_v6  ;;  %312 = vmatpush.bf16.msra.mxu3 %v763_v10  ;;  %v1035_v39 = vld [vmem:[#allocation4 + $0xf8] sm:$0xff]  ;;  %v1034_v43 = vld [vmem:[#allocation4 + $0xf0] sm:$0xff]  ;;  %v1025_v45 = vld [vmem:[#allocation4 + $0xa8] sm:$0xff] }
  0x26   :  { %v1008_v46 = vld [vmem:[#allocation4 + $0x20] sm:$0xff]  ;;  %v1033_v47 = vld [vmem:[#allocation4 + $0xe8] sm:$0xff]  ;;  %v1007_v49 = vld [vmem:[#allocation4 + $0x18] sm:$0xff] }
  0x27   :  { %271 = vmatpush.bf16.msra.mxu0 %v735_v16  ;;  %v1016_v48 = vld [vmem:[#allocation4 + $0x60] sm:$0xff]  ;;  %v1015_v50 = vld [vmem:[#allocation4 + $0x58] sm:$0xff]  ;;  %v1006_v53 = vld [vmem:[#allocation4 + $0x10] sm:$0xff] }
  0x28   :  { %285 = vmatpush.bf16.msra.mxu1 %v739_v17  ;;  %v1024_v51 = vld [vmem:[#allocation4 + $0xa0] sm:$0xff]  ;;  %v1014_v54 = vld [vmem:[#allocation4 + $0x50] sm:$0xff]  ;;  %v1023_v55 = vld [vmem:[#allocation4 + $0x98] sm:$0xff] }
  0x29   :  { %299 = vmatpush.bf16.msra.mxu2 %v743_v18  ;;  %313 = vmatpush.bf16.msra.mxu3 %v747_v22  ;;  %v1032_v52 = vld [vmem:[#allocation4 + $0xe0] sm:$0xff]  ;;  %v1031_v56 = vld [vmem:[#allocation4 + $0xd8] sm:$0xff]  ;;  %v1005_v57 = vld [vmem:[#allocation4 + $0x8] sm:$0xff] }
  0x2a   :  { %v1013_v58 = vld [vmem:[#allocation4 + $0x48] sm:$0xff]  ;;  %v1022_v59 = vld [vmem:[#allocation4 + $0x90] sm:$0xff]  ;;  %v1004_v61 = vld [vmem:[#allocation4] sm:$0xff] }
  0x2b   :  { %272 = vmatpush.bf16.msra.mxu0 %v719_v29  ;;  %v1030_v60 = vld [vmem:[#allocation4 + $0xd0] sm:$0xff]  ;;  %v1012_v62 = vld [vmem:[#allocation4 + $0x40] sm:$0xff]  ;;  %v1021_v63 = vld [vmem:[#allocation4 + $0x88] sm:$0xff] }
  0x2c   :  { %286 = vmatpush.bf16.msra.mxu1 %v723_v31  ;;  %v1029_v0 = vld [vmem:[#allocation4 + $0xc8] sm:$0xff]  ;;  %v1020_v1 = vld [vmem:[#allocation4 + $0x80] sm:$0xff] }
  0x2d   :  { %300 = vmatpush.bf16.msra.mxu2 %v727_v32  ;;  %314 = vmatpush.bf16.msra.mxu3 %v731_v33  ;;  %v1028_v2 = vld [vmem:[#allocation4 + $0xc0] sm:$0xff] }
  0x2e   :  { %273 = vmatmul.bf16.vlgmr.msra.gmra.mxu0 %v62_v35  ;;  %v95_v3 = vld [vmem:[%s1191_s2] sm:$0xf] }
  0x2f   :  { %593 = vmatpush.bf16.msrb.mxu0 %v1011_v34  ;;  %287 = vmatmul.bf16.vlgmr.msra.gmra.mxu1 %v62_v35  ;;  %v97_v5 = vperm.slane %v95_v3, 0  ;;  %v98_v7 = vperm.slane %v95_v3, 1  ;;  %v99_v17 = vperm.slane %v95_v3, 2  ;;  %v100_v19 = vperm.slane %v95_v3, 3 }
  0x30   :  { %607 = vmatpush.bf16.msrb.mxu1 %v1019_v36  ;;  %301 = vmatmul.bf16.vlgmr.msra.gmra.mxu2 %v62_v35 }
  0x31   :  { %315 = vmatmul.bf16.vlgmr.msra.gmra.mxu3 %v62_v35  ;;  %621 = vmatpush.bf16.msrb.mxu2 %v1027_v37 }
  0x32   :  { %635 = vmatpush.bf16.msrb.mxu3 %v1035_v39  ;;  %v1043_v39 = vld [vmem:[%s1193_s4] ss:$0 sm:$0xff] }
  0x33   :  { %594 = vmatpush.bf16.msrb.mxu0 %v1010_v38 }
  0x34   :  { %608 = vmatpush.bf16.msrb.mxu1 %v1018_v40 }
  0x35   :  { %622 = vmatpush.bf16.msrb.mxu2 %v1026_v41 }
  0x36   :  { %636 = vmatpush.bf16.msrb.mxu3 %v1034_v43 }
  0x37   :  { %595 = vmatpush.bf16.msrb.mxu0 %v1009_v42 }
  0x38   :  { %609 = vmatpush.bf16.msrb.mxu1 %v1017_v44 }
  0x39   :  { %623 = vmatpush.bf16.msrb.mxu2 %v1025_v45 }
  0x3a   :  { %637 = vmatpush.bf16.msrb.mxu3 %v1033_v47 }
  0x3b   :  { %596 = vmatpush.bf16.msrb.mxu0 %v1008_v46 }
  0x3c   :  { %610 = vmatpush.bf16.msrb.mxu1 %v1016_v48 }
  0x3d   :  { %624 = vmatpush.bf16.msrb.mxu2 %v1024_v51 }
  0x3e   :  { %638 = vmatpush.bf16.msrb.mxu3 %v1032_v52 }
  0x3f   :  { %597 = vmatpush.bf16.msrb.mxu0 %v1007_v49 }
  0x40   :  { %611 = vmatpush.bf16.msrb.mxu1 %v1015_v50 }
  0x41   :  { %625 = vmatpush.bf16.msrb.mxu2 %v1023_v55 }
  0x42   :  { %639 = vmatpush.bf16.msrb.mxu3 %v1031_v56 }
  0x43   :  { %598 = vmatpush.bf16.msrb.mxu0 %v1006_v53 }
  0x44   :  { %612 = vmatpush.bf16.msrb.mxu1 %v1014_v54 }
  0x45   :  { %626 = vmatpush.bf16.msrb.mxu2 %v1022_v59 }
  0x46   :  { %640 = vmatpush.bf16.msrb.mxu3 %v1030_v60 }
  0x47   :  { %599 = vmatpush.bf16.msrb.mxu0 %v1005_v57  ;;  %v1110_v57 = vmov 128.0  }
  0x48   :  { %613 = vmatpush.bf16.msrb.mxu1 %v1013_v58  ;;  %1046 = vrcp.f32 %v1110_v57 }
  0x49   :  { %627 = vmatpush.bf16.msrb.mxu2 %v1021_v63 }
  0x4a   :  { %641 = vmatpush.bf16.msrb.mxu3 %v1029_v0 }
  0x4b   :  { %600 = vmatpush.bf16.msrb.mxu0 %v1004_v61 }
  0x4c   :  { %614 = vmatpush.bf16.msrb.mxu1 %v1012_v62 }
  0x4d   :  { %628 = vmatpush.bf16.msrb.mxu2 %v1020_v1 }
  0x4e   :  { %642 = vmatpush.bf16.msrb.mxu3 %v1028_v2  ;;  %v1047_v58 = vpop.eup %1046 }
  0x4f   :  { %v656_v59 = vmul.f32 128.0, %v1047_v58  ;;  %vm660_vm0 = vweird.f32 %v1047_v58 }
  0x51   :  { %v657_v60 = vsub.f32 1.0, %v656_v59 }
  0x53   :  { %v658_v61 = vmul.f32 %v1047_v58, %v657_v60 }
  0x55   :  { %v659_v62 = vadd.f32 %v1047_v58, %v658_v61 }
  0x57   :  { %v661_v63 = vsel %vm660_vm0, %v1047_v58, %v659_v62 }
  0xab   :  { %v274_v4 = vpop.f32.mrf.mxu0 }
  0xac   :  { %v288_v6 = vpop.f32.mrf.mxu1  ;;  %v275_v8 = vadd.f32 %v274_v4, %v97_v5 }
  0xad   :  { %v289_v9 = vadd.f32 %v288_v6, %v98_v7 }
  0xae   :  { %v321_v13 = vmax.f32 %v275_v8, 0.0 }
  0xaf   :  { %v322_v16 = vmax.f32 %v289_v9, 0.0 }
  0xb3   :  { %v302_v10 = vpop.f32.mrf.mxu2  ;;  %v276_v12 = vpop.f32.mrf.mxu0 }
  0xb4   :  { %v316_v11 = vpop.f32.mrf.mxu3  ;;  %v277_v14 = vadd.f32 %v276_v12, %v97_v5  ;;  %v290_v15 = vpop.f32.mrf.mxu1  ;;  %v303_v23 = vadd.f32 %v302_v10, %v99_v17 }
  0xb5   :  { %v291_v18 = vadd.f32 %v290_v15, %v98_v7  ;;  %v317_v25 = vadd.f32 %v316_v11, %v100_v19 }
  0xb6   :  { %v325_v20 = vmax.f32 %v277_v14, 0.0  ;;  %v323_v32 = vmax.f32 %v303_v23, 0.0  ;;  %v1045_v23 = vld [vmem:[%s1195_s6] ss:$0 sm:$0xff] }
  0xb7   :  { %v326_v21 = vmax.f32 %v291_v18, 0.0  ;;  %v324_v34 = vmax.f32 %v317_v25, 0.0 }
  0xb8   :  { %v329_v22 = vpack.c.bf16 %v325_v20, %v321_v13  ;;  %v1044_v20 = vld [vmem:[%s1194_s5] ss:$0 sm:$0xff] }
  0xb9   :  { %v330_v24 = vpack.c.bf16 %v326_v21, %v322_v16 }
  0xba   :  { %601 = vmatmul.bf16.vlgmr.msrb.gmra.mxu0 %v329_v22 }
  0xbb   :  { %v304_v26 = vpop.f32.mrf.mxu2  ;;  %615 = vmatmul.bf16.vlgmr.msrb.gmra.mxu1 %v330_v24 }
  0xbc   :  { %v305_v27 = vadd.f32 %v304_v26, %v99_v17  ;;  %v318_v29 = vpop.f32.mrf.mxu3 }
  0xbd   :  { %v319_v31 = vadd.f32 %v318_v29, %v100_v19 }
  0xbe   :  { %v327_v33 = vmax.f32 %v305_v27, 0.0 }
  0xbf   :  { %v328_v35 = vmax.f32 %v319_v31, 0.0 }
  0xc0   :  { %v331_v36 = vpack.c.bf16 %v327_v33, %v323_v32 }
  0xc1   :  { %v332_v37 = vpack.c.bf16 %v328_v35, %v324_v34 }
  0xc2   :  { %629 = vmatmul.bf16.vlgmr.msrb.gmra.mxu2 %v331_v36 }
  0xc3   :  { %643 = vmatmul.bf16.vlgmr.msrb.gmra.mxu3 %v332_v37 }
 0x137   :  { %v602_v38 = vpop.f32.mrf.mxu0 }
 0x138   :  { %v603_v40 = vadd.f32 %v1043_v39, %v602_v38  ;;  %v616_v41 = vpop.f32.mrf.mxu1 }
 0x13a   :  { %v617_v42 = vadd.f32 %v616_v41, %v603_v40 }
 0x13f   :  { %v604_v43 = vpop.f32.mrf.mxu0 }
 0x140   :  { %v605_v47 = vadd.f32 %v1043_v39, %v604_v43  ;;  %v618_v50 = vpop.f32.mrf.mxu1 }
 0x142   :  { %v619_v51 = vadd.f32 %v618_v50, %v605_v47 }
 0x145   :  { %v630_v44 = vpop.f32.mrf.mxu2 }
 0x146   :  { %v631_v45 = vadd.f32 %v630_v44, %v617_v42  ;;  %v644_v46 = vpop.f32.mrf.mxu3 }
 0x148   :  { %v645_v48 = vadd.f32 %v644_v46, %v631_v45 }
 0x14a   :  { %v649_v49 = vadd.f32 %v645_v48, %v1160_v28 }
 0x14c   :  { %651 = vadd.xlane.f32.xlu0 %v649_v49 }
 0x14d   :  { %v632_v52 = vpop.f32.mrf.mxu2 }
 0x14e   :  { %v633_v53 = vadd.f32 %v632_v52, %v619_v51  ;;  %v646_v54 = vpop.f32.mrf.mxu3 }
 0x150   :  { %v647_v55 = vadd.f32 %v646_v54, %v633_v53 }
 0x152   :  { %v650_v56 = vadd.f32 %v647_v55, %v1165_v30 }
 0x154   :  { %653 = vadd.xlane.f32.xlu0 %v650_v56 }
 0x1bf   :  { %v652_v28 = vpop.xlane.xlu0 %651 }
 0x1c0   :  { %v662_v0 = vmul.f32 %v661_v63, %v652_v28 }
 0x1c2   :  { %v664_v1 = vsub.f32 %v649_v49, %v662_v0 }
 0x1c4   :  { %v666_v2 = vmul.f32 %v664_v1, %v664_v1 }
 0x1c6   :  { %668 = vadd.xlane.f32.xlu1 %v666_v2 }
 0x1c7   :  { %v654_v3 = vpop.xlane.xlu0 %653 }
 0x1c8   :  { %v663_v4 = vmul.f32 %v661_v63, %v654_v3 }
 0x1ca   :  { %v665_v5 = vsub.f32 %v650_v56, %v663_v4 }
 0x1cc   :  { %v667_v6 = vmul.f32 %v665_v5, %v665_v5 }
 0x1ce   :  { %670 = vadd.xlane.f32.xlu1 %v667_v6 }
 0x239   :  { %v669_v30 = vpop.xlane.xlu1 %668 }
 0x23a   :  { %v672_v7 = vmul.f32 %v669_v30, %v661_v63 }
 0x23c   :  { %v674_v8 = vadd.f32 1e-05, %v672_v7 }
 0x23e   :  { %1048 = vrsqrt.f32 %v674_v8  ;;  %vm682_vm2 = vweird.f32 %v674_v8 }
 0x241   :  { %v671_v9 = vpop.xlane.xlu1 %670 }
 0x242   :  { %v673_v10 = vmul.f32 %v671_v9, %v661_v63 }
 0x244   :  { %v1049_v11 = vpop.eup %1048  ;;  %v675_v12 = vadd.f32 1e-05, %v673_v10 }
 0x245   :  { %v677_v13 = vmul.f32 %v1049_v11, %v674_v8  ;;  %vm683_vm1 = vweird.f32 %v1049_v11 }
 0x246   :  { %1050 = vrsqrt.f32 %v675_v12  ;;  %vm684_vm3 = vmor %vm682_vm2, %vm683_vm1  ;;  %vm692_vm5 = vweird.f32 %v675_v12 }
 0x247   :  { %v678_v14 = vmul.f32 %v1049_v11, %v677_v13 }
 0x249   :  { %v679_v15 = vmul.f32 0.5, %v678_v14 }
 0x24b   :  { %v680_v16 = vsub.f32 1.5, %v679_v15 }
 0x24c   :  { %v1051_v17 = vpop.eup %1050 }
 0x24d   :  { %v681_v18 = vmul.f32 %v1049_v11, %v680_v16  ;;  %v687_v19 = vmul.f32 %v1051_v17, %v675_v12  ;;  %vm693_vm4 = vweird.f32 %v1051_v17 }
 0x24e   :  { %vm694_vm6 = vmor %vm692_vm5, %vm693_vm4 }
 0x24f   :  { %v685_v21 = vsel %vm684_vm3, %v1049_v11, %v681_v18  ;;  %v688_v22 = vmul.f32 %v1051_v17, %v687_v19 }
 0x250   :  { %v696_v24 = vmul.f32 %v685_v21, %v664_v1 }
 0x251   :  { %v689_v25 = vmul.f32 0.5, %v688_v22 }
 0x252   :  { %v701_v26 = vmul.f32 %v1044_v20, %v696_v24 }
 0x253   :  { %v690_v27 = vsub.f32 1.5, %v689_v25 }
 0x254   :  { %v706_v29 = vadd.f32 %v1045_v23, %v701_v26 }
 0x255   :  { %v691_v31 = vmul.f32 %v1051_v17, %v690_v27 }
 0x256   :  { %708 = vst [vmem:[%s1196_s7] sm:$0xff] %v706_v29 }
 0x257   :  { %v695_v32 = vsel %vm694_vm6, %v1051_v17, %v691_v31 }
 0x258   :  { %v697_v33 = vmul.f32 %v695_v32, %v665_v5 }
 0x25a   :  { %v702_v34 = vmul.f32 %v1044_v20, %v697_v33 }
 0x25c   :  { %v707_v35 = vadd.f32 %v1045_v23, %v702_v34 }
 0x25e   :  { %709 = vst [vmem:[%s1196_s7 + $0x8] sm:$0xff] %v707_v35 }
 0x25f   :  { %714 = vsyncpa [#allocation3], 1 }
 0x260   :  { %715 = vsyncpa [#allocation5], 1 }

</bundles_post_ra>
